<compile_context>
chip_gen: v5e
topology: v5e:2x2
jax: 0.10.0
libtpu: 0.0.40
codegen_flags: <defaults>
</compile_context>

<pallas_src>
import functools

import jax
import jax.numpy as jnp
from jax.experimental import pallas as pl
from jax.experimental.pallas import tpu as pltpu

BN_EPS = 1e-3          # timm tf_efficientnet BN eps
STEM_CH = 16
HEAD_CH = 1280
VMEM_LIMIT = 48 * 1024 * 1024   # above 32 MiB default, below v7x 64 MiB physical

STAGES = [
    # (block_type, repeats, kernel, stride, expand, out_ch, se_ratio)
    ('cn', 1, 3, 1, 1, 16, 0.0),
    ('er', 1, 3, 2, 4, 24, 0.0),
    ('ir', 1, 3, 2, 4, 32, 0.25),
    ('ir', 1, 3, 1, 6, 48, 0.25),
]


def _round_up(x, m):
    return (x + m - 1) // m * m


# ----------------------------------------------------------------------------- kernels
def _apply_act(x, act):
    if act == 'silu':
        return x * jax.nn.sigmoid(x)
    if act == 'sigmoid':
        return jax.nn.sigmoid(x)
    return x


def _mm_kernel(a_ref, b_ref, bias_ref, o_ref, acc_ref, *, act):
    """Tiled matmul, K-axis accumulation, fused bias + activation epilogue."""
    @pl.when(pl.program_id(2) == 0)
    def _():
        acc_ref[...] = jnp.zeros_like(acc_ref)

    acc_ref[...] += jnp.dot(a_ref[...], b_ref[...],
                            preferred_element_type=jnp.float32)

    @pl.when(pl.program_id(2) == pl.num_programs(2) - 1)
    def _():
        y = _apply_act(acc_ref[...] + bias_ref[...], act)
        o_ref[...] = y.astype(o_ref.dtype)


def _mm_res_kernel(a_ref, b_ref, bias_ref, res_ref, o_ref, acc_ref, *, act):
    """Same as _mm_kernel but fuses the residual (shortcut) add into the epilogue."""
    @pl.when(pl.program_id(2) == 0)
    def _():
        acc_ref[...] = jnp.zeros_like(acc_ref)

    acc_ref[...] += jnp.dot(a_ref[...], b_ref[...],
                            preferred_element_type=jnp.float32)

    @pl.when(pl.program_id(2) == pl.num_programs(2) - 1)
    def _():
        y = _apply_act(acc_ref[...] + bias_ref[...], act)
        y = y + res_ref[...].astype(jnp.float32)
        o_ref[...] = y.astype(o_ref.dtype)


def _dw_kernel(p_ref, w_ref, bias_ref, o_ref, *, kk):
    """Depthwise conv tile: k*k tap multiply-accumulate, BN bias (scale pre-folded), SiLU."""
    acc = jnp.zeros(o_ref.shape, jnp.float32)
    for t in range(kk):
        acc = acc + p_ref[t].astype(jnp.float32) * w_ref[t].astype(jnp.float32)
    acc = acc + bias_ref[...]
    o_ref[...] = (acc * jax.nn.sigmoid(acc)).astype(o_ref.dtype)     # SiLU


def _pool_kernel(x_ref, o_ref, *, inv_hw):
    """Spatial mean, tiled over HW with an output accumulator."""
    @pl.when(pl.program_id(0) == 0)
    def _():
        o_ref[...] = jnp.zeros_like(o_ref)
    o_ref[...] += jnp.sum(x_ref[...].astype(jnp.float32), axis=1) * inv_hw


def _se_apply_kernel(x_ref, g_ref, o_ref):
    o_ref[...] = (x_ref[...].astype(jnp.float32) * g_ref[...]).astype(o_ref.dtype)


# ----------------------------------------------------------------------------- wrappers
def pallas_matmul(a, b, bias, act='none', residual=None, out_dtype=jnp.float32):
    """act((a @ b) + bias) [+ residual].  a:(M,K) b:(K,N) bias:(N,).
    BN scale must already be folded into b's columns."""
    M, K = a.shape
    K2, N = b.shape
    assert K == K2

    tm = min(256, _round_up(M, 8))
    tk = min(512, _round_up(K, 128))
    tn = min(256, _round_up(N, 128))
    Mp, Kp, Np = _round_up(M, tm), _round_up(K, tk), _round_up(N, tn)

    a_p = jnp.pad(a.astype(jnp.bfloat16), ((0, Mp - M), (0, Kp - K)))
    b_p = jnp.pad(b.astype(jnp.bfloat16), ((0, Kp - K), (0, Np - N)))
    bias_p = jnp.pad(bias.astype(jnp.float32), (0, Np - N)).reshape(1, Np)

    grid = (Mp // tm, Np // tn, Kp // tk)
    in_specs = [pl.BlockSpec((tm, tk), lambda i, j, k: (i, k)),
                pl.BlockSpec((tk, tn), lambda i, j, k: (k, j)),
                pl.BlockSpec((1, tn), lambda i, j, k: (0, j))]
    operands = [a_p, b_p, bias_p]

    if residual is not None:
        r_p = jnp.pad(residual.astype(jnp.bfloat16), ((0, Mp - M), (0, Np - N)))
        in_specs.append(pl.BlockSpec((tm, tn), lambda i, j, k: (i, j)))
        operands.append(r_p)
        kernel = functools.partial(_mm_res_kernel, act=act)
    else:
        kernel = functools.partial(_mm_kernel, act=act)

    flops = int(2 * Mp * Kp * Np)
    transcend = int(Mp * Np) if act != 'none' else 0
    bytes_accessed = int((Mp * Kp + Kp * Np) * 2 + Mp * Np * jnp.dtype(out_dtype).itemsize)

    out = pl.pallas_call(
        kernel,
        grid_spec=pltpu.PrefetchScalarGridSpec(
            num_scalar_prefetch=0,
            grid=grid,
            in_specs=in_specs,
            out_specs=pl.BlockSpec((tm, tn), lambda i, j, k: (i, j)),
            scratch_shapes=[pltpu.VMEM((tm, tn), jnp.float32)]),
        out_shape=jax.ShapeDtypeStruct((Mp, Np), out_dtype),
        compiler_params=pltpu.CompilerParams(
            dimension_semantics=("parallel", "parallel", "arbitrary"),
            vmem_limit_bytes=VMEM_LIMIT),
        cost_estimate=pl.CostEstimate(flops=flops, transcendentals=transcend,
                                      bytes_accessed=bytes_accessed),
    )(*operands)
    return out[:M, :N]


def pallas_depthwise(patches_kmc, w_kkc, bias, out_dtype=jnp.bfloat16):
    """Depthwise conv (already im2col'd) fused with BN bias + SiLU, tiled over rows.
    patches_kmc:(KK,M,C)  w_kkc:(KK,C) (BN scale pre-folded) -> (M,C)"""
    KK, M, C = patches_kmc.shape
    tm = min(512, _round_up(M, 8))
    Mp, Cp = _round_up(M, tm), _round_up(C, 128)

    p_p = jnp.pad(patches_kmc.astype(jnp.bfloat16), ((0, 0), (0, Mp - M), (0, Cp - C)))
    w_p = jnp.pad(w_kkc.astype(jnp.float32), ((0, 0), (0, Cp - C))).reshape(KK, 1, Cp)
    b_p = jnp.pad(bias.astype(jnp.float32), (0, Cp - C)).reshape(1, Cp)

    out = pl.pallas_call(
        functools.partial(_dw_kernel, kk=KK),
        grid_spec=pltpu.PrefetchScalarGridSpec(
            num_scalar_prefetch=0,
            grid=(Mp // tm,),
            in_specs=[pl.BlockSpec((KK, tm, Cp), lambda i: (0, i, 0)),
                      pl.BlockSpec((KK, 1, Cp), lambda i: (0, 0, 0)),
                      pl.BlockSpec((1, Cp), lambda i: (0, 0))],
            out_specs=pl.BlockSpec((tm, Cp), lambda i: (i, 0))),
        out_shape=jax.ShapeDtypeStruct((Mp, Cp), out_dtype),
        compiler_params=pltpu.CompilerParams(
            dimension_semantics=("parallel",),
            vmem_limit_bytes=VMEM_LIMIT),
    )(p_p, w_p, b_p)
    return out[:M, :C]


def pallas_avgpool(x3):
    """x3:(N,HW,C) -> (N,C) spatial mean, tiled/accumulated over HW."""
    N, HW, C = x3.shape
    thw = min(512, _round_up(HW, 8))
    HWp, Cp = _round_up(HW, thw), _round_up(C, 128)
    x_p = jnp.pad(x3, ((0, 0), (0, HWp - HW), (0, Cp - C)))
    out = pl.pallas_call(
        functools.partial(_pool_kernel, inv_hw=1.0 / HW),
        grid_spec=pltpu.PrefetchScalarGridSpec(
            num_scalar_prefetch=0,
            grid=(HWp // thw,),
            in_specs=[pl.BlockSpec((N, thw, Cp), lambda i: (0, i, 0))],
            out_specs=pl.BlockSpec((N, Cp), lambda i: (0, 0))),
        out_shape=jax.ShapeDtypeStruct((N, Cp), jnp.float32),
        compiler_params=pltpu.CompilerParams(
            dimension_semantics=("arbitrary",),
            vmem_limit_bytes=VMEM_LIMIT),
    )(x_p)
    return out[:, :C]


def pallas_se_apply(x3, gate, out_dtype=jnp.bfloat16):
    """x3:(N,HW,C) * gate:(N,C), broadcast over HW, tiled over HW."""
    N, HW, C = x3.shape
    thw = min(512, _round_up(HW, 8))
    HWp, Cp = _round_up(HW, thw), _round_up(C, 128)
    x_p = jnp.pad(x3.astype(jnp.bfloat16), ((0, 0), (0, HWp - HW), (0, Cp - C)))
    g_p = jnp.pad(gate.astype(jnp.float32), ((0, 0), (0, Cp - C))).reshape(N, 1, Cp)
    out = pl.pallas_call(
        _se_apply_kernel,
        grid_spec=pltpu.PrefetchScalarGridSpec(
            num_scalar_prefetch=0,
            grid=(HWp // thw,),
            in_specs=[pl.BlockSpec((N, thw, Cp), lambda i: (0, i, 0)),
                      pl.BlockSpec((N, 1, Cp), lambda i: (0, 0, 0))],
            out_specs=pl.BlockSpec((N, thw, Cp), lambda i: (0, i, 0))),
        out_shape=jax.ShapeDtypeStruct((N, HWp, Cp), out_dtype),
        compiler_params=pltpu.CompilerParams(
            dimension_semantics=("parallel",),
            vmem_limit_bytes=VMEM_LIMIT),
    )(x_p, g_p)
    return out[:, :HW, :C]


# ----------------------------------------------------------------------------- conv glue
def _tf_same_pad(size, k, s):
    out = -(-size // s)
    pad = max((out - 1) * s + k - size, 0)
    return pad // 2, pad - pad // 2


def _extract_patches(x, k, s):
    """x:(N,H,W,C) -> patches (N,Ho,Wo,k*k,C) with TF-SAME padding."""
    N, H, W, C = x.shape
    ph = _tf_same_pad(H, k, s)
    pw = _tf_same_pad(W, k, s)
    Ho = -(-H // s)
    Wo = -(-W // s)
    xp = jnp.pad(x, ((0, 0), ph, pw, (0, 0)))
    cols = []
    for di in range(k):
        for dj in range(k):
            cols.append(xp[:, di:di + (Ho - 1) * s + 1:s,
                            dj:dj + (Wo - 1) * s + 1:s, :])
    patches = jnp.stack(cols, axis=3)
    return patches, (N, Ho, Wo)


def _fold_bn(bn):
    scale = bn['gamma'] * jax.lax.rsqrt(bn['var'] + BN_EPS)
    bias = bn['beta'] - bn['mean'] * scale
    return scale, bias


def conv_bn_act(x, w_hwio, bn, k, s, act, residual=None, out_dtype=jnp.bfloat16):
    cin = x.shape[-1]
    cout = w_hwio.shape[-1]
    patches, (N, Ho, Wo) = _extract_patches(x.astype(jnp.bfloat16), k, s)
    a = patches.reshape(N * Ho * Wo, k * k * cin)
    scale, bias = _fold_bn(bn)
    b = (w_hwio * scale).reshape(k * k * cin, cout)          # fold BN scale into weights
    res2 = None if residual is None else residual.reshape(N * Ho * Wo, cout)
    y = pallas_matmul(a, b, bias, act, residual=res2, out_dtype=out_dtype)
    return y.reshape(N, Ho, Wo, cout)


def dwconv_bn_act(x, w_kkc, bn, k, s):
    C = x.shape[-1]
    patches, (N, Ho, Wo) = _extract_patches(x.astype(jnp.bfloat16), k, s)
    p = patches.reshape(N * Ho * Wo, k * k, C).transpose(1, 0, 2)
    scale, bias = _fold_bn(bn)
    w_folded = w_kkc.reshape(k * k, C) * scale               # fold BN scale into weights
    y = pallas_depthwise(p, w_folded, bias)
    return y.reshape(N, Ho, Wo, C)


# ----------------------------------------------------------------------------- blocks
def conv_bn_act_block(x, p, k, stride):          # timm 'cn' (ConvBnAct, skip)
    res = x if (stride == 1 and x.shape[-1] == p['w'].shape[-1]) else None
    return conv_bn_act(x, p['w'], p['bn'], k, stride, 'silu', residual=res)


def edge_residual_block(x, p, k, stride):        # timm 'er' (FusedMBConv)
    shortcut = x
    h = conv_bn_act(x, p['w_exp'], p['bn1'], k, stride, 'silu')
    res = shortcut if (stride == 1 and shortcut.shape[-1] == p['w_pwl'].shape[-1]) else None
    h = conv_bn_act(h, p['w_pwl'], p['bn2'], 1, 1, 'none', residual=res)
    return h


def inverted_residual_block(x, p, k, stride):    # timm 'ir' (MBConv + SE)
    shortcut = x
    h = conv_bn_act(x, p['w_pw'], p['bn1'], 1, 1, 'silu')
    h = dwconv_bn_act(h, p['w_dw'], p['bn2'], k, stride)
    # squeeze-excite
    N, Ho, Wo, Cmid = h.shape
    h3 = h.reshape(N, Ho * Wo, Cmid)
    pooled = pallas_avgpool(h3)                                        # (N, Cmid) f32
    g = pallas_matmul(pooled, p['se_w1'], p['se_b1'], 'silu', out_dtype=jnp.float32)
    g = pallas_matmul(g, p['se_w2'], p['se_b2'], 'sigmoid', out_dtype=jnp.float32)
    h = pallas_se_apply(h3, g).reshape(N, Ho, Wo, Cmid)
    res = shortcut if (stride == 1 and shortcut.shape[-1] == p['w_pwl'].shape[-1]) else None
    h = conv_bn_act(h, p['w_pwl'], p['bn3'], 1, 1, 'none', residual=res)
    return h


# ----------------------------------------------------------------------------- params
class KeyGen:
    def __init__(self, key):
        self._key = key

    def __call__(self):
        self._key, sub = jax.random.split(self._key)
        return sub


def init_conv(kg, k, cin, cout):
    return jax.random.normal(kg(), (k, k, cin, cout), jnp.float32) / jnp.sqrt(1.0 * k * k * cin)


def init_dw(kg, k, c):
    return jax.random.normal(kg(), (k, k, c), jnp.float32) / float(k)


def init_bn(kg, c):
    return dict(gamma=1.0 + 0.1 * jax.random.normal(kg(), (c,), jnp.float32),
                beta=0.1 * jax.random.normal(kg(), (c,), jnp.float32),
                mean=0.1 * jax.random.normal(kg(), (c,), jnp.float32),
                var=1.0 + 0.1 * jnp.abs(jax.random.normal(kg(), (c,), jnp.float32)))


def init_lin_w(kg, cin, cout):
    return jax.random.normal(kg(), (cin, cout), jnp.float32) / jnp.sqrt(1.0 * cin)


def init_lin_b(kg, c):
    return 0.01 * jax.random.normal(kg(), (c,), jnp.float32)


def build_model(key):
    kg = KeyGen(key)
    params = {'stem_w': init_conv(kg, 3, 3, STEM_CH), 'stem_bn': init_bn(kg, STEM_CH)}
    cfgs = []
    blocks = []
    cin = STEM_CH
    for (btype, rep, k, s, e, cout, se) in STAGES:
        for r in range(rep):
            stride = s if r == 0 else 1
            if btype == 'cn':
                bp = dict(w=init_conv(kg, k, cin, cout), bn=init_bn(kg, cout))
            elif btype == 'er':
                mid = cin * e
                bp = dict(w_exp=init_conv(kg, k, cin, mid), bn1=init_bn(kg, mid),
                          w_pwl=init_conv(kg, 1, mid, cout), bn2=init_bn(kg, cout))
            else:
                mid = cin * e
                rd = max(1, int(cin * se))
                bp = dict(w_pw=init_conv(kg, 1, cin, mid), bn1=init_bn(kg, mid),
                          w_dw=init_dw(kg, k, mid), bn2=init_bn(kg, mid),
                          se_w1=init_lin_w(kg, mid, rd), se_b1=init_lin_b(kg, rd),
                          se_w2=init_lin_w(kg, rd, mid), se_b2=init_lin_b(kg, mid),
                          w_pwl=init_conv(kg, 1, mid, cout), bn3=init_bn(kg, cout))
            cfgs.append((btype, k, stride))
            blocks.append(bp)
            cin = cout
    params['blocks'] = blocks
    params['head_w'] = init_conv(kg, 1, cin, HEAD_CH)
    params['head_bn'] = init_bn(kg, HEAD_CH)
    params['fc1_w'] = init_lin_w(kg, HEAD_CH, 512)
    params['fc1_b'] = init_lin_b(kg, 512)
    params['fc2_w'] = init_lin_w(kg, 512, 1)
    params['fc2_b'] = init_lin_b(kg, 1)
    return tuple(cfgs), params


# ----------------------------------------------------------------------------- forward
def eff_v2_forward(block_cfgs, params, x_nchw):
    x = jnp.transpose(x_nchw.astype(jnp.float32), (0, 2, 3, 1))        # NCHW -> NHWC
    # stem: conv 3x3 s2 + BN + SiLU
    x = conv_bn_act(x, params['stem_w'], params['stem_bn'], 3, 2, 'silu')
    # stages
    for (btype, k, stride), bp in zip(block_cfgs, params['blocks']):
        if btype == 'cn':
            x = conv_bn_act_block(x, bp, k, stride)
        elif btype == 'er':
            x = edge_residual_block(x, bp, k, stride)
        else:
            x = inverted_residual_block(x, bp, k, stride)
    # head conv 1x1 -> 1280 + BN + SiLU
    x = conv_bn_act(x, params['head_w'], params['head_bn'], 1, 1, 'silu')
    N, H, W, C = x.shape
    pooled = pallas_avgpool(x.reshape(N, H * W, C))                    # (N, 1280) f32
    # classifier: Linear(1280,512) -> Dropout(eval: identity) -> Linear(512,1) -> sigmoid
    h = pallas_matmul(pooled, params['fc1_w'], params['fc1_b'], 'none',
                      out_dtype=jnp.float32)
    out = pallas_matmul(h, params['fc2_w'], params['fc2_b'], 'sigmoid',
                        out_dtype=jnp.float32)
    return out                                                          # (N, 1)


# ----------------------------------------------------------------------------- main
if __name__ == "__main__":
    root = jax.random.PRNGKey(0)
    pkey, xkey = jax.random.split(root)
    block_cfgs, params = build_model(pkey)

    x = jax.random.normal(xkey, (2, 3, 32, 32), jnp.float32)            # NCHW like PyTorch

    fwd = jax.jit(lambda p, xx: eff_v2_forward(block_cfgs, p, xx))
    out = jax.block_until_ready(fwd(params, x))

    assert out.shape == (2, 1), out.shape
    assert bool(jnp.all(jnp.isfinite(out)))
    assert bool(jnp.all((out >= 0.0) & (out <= 1.0)))
    print("KERNEL_OK")
</pallas_src>

<mosaic_0001>
module attributes {stable_mosaic.version = 11 : i64} {
  func.func @_mm_kernel(%arg0: i32, %arg1: i32, %arg2: i32, %arg3: memref<256x128xbf16, #tpu.memory_space<vmem>>, %arg4: memref<128x128xbf16, #tpu.memory_space<vmem>>, %arg5: memref<1x128xf32, #tpu.memory_space<vmem>>, %arg6: memref<256x128xbf16, #tpu.memory_space<vmem>>, %arg7: memref<256x128xf32, #tpu.memory_space<vmem>>) attributes {dimension_semantics = [#tpu.dimension_semantics<parallel>, #tpu.dimension_semantics<parallel>, #tpu.dimension_semantics<arbitrary>], iteration_bounds = array<i64: 2, 1, 1>, scalar_prefetch = 0 : i64, scratch_operands = 1 : i64, tpu.core_type = #tpu.core_type<tc>, window_params = [{transform_indices = @transform_0, window_bounds = array<i64: 256, 128>}, {transform_indices = @transform_1, window_bounds = array<i64: 128, 128>}, {transform_indices = @transform_2, window_bounds = array<i64: 1, 128>}, {transform_indices = @transform_3, window_bounds = array<i64: 256, 128>}]} {
    %c0_i32 = arith.constant 0 : i32
    %0 = arith.cmpi eq, %arg2, %c0_i32 : i32
    %1 = arith.extui %0 : i1 to i32
    %c0_i32_0 = arith.constant 0 : i32
    %2 = arith.cmpi ne, %1, %c0_i32_0 : i32
    scf.if %2 {
      %cst_10 = arith.constant 0.000000e+00 : f32
      %12 = vector.broadcast %cst_10 : f32 to vector<256x128xf32>
      %c0_11 = arith.constant 0 : index
      %c0_12 = arith.constant 0 : index
      %13 = vector.load %arg7[%c0_11, %c0_12] : memref<256x128xf32, #tpu.memory_space<vmem>>, vector<256x128xf32>
      tpu.vector_store %arg7[%c0_11, %c0_12], %12 {strides = array<i32>} : memref<256x128xf32, #tpu.memory_space<vmem>>, vector<256x128xf32>,
    } else {
    }
    %c0 = arith.constant 0 : index
    %c0_1 = arith.constant 0 : index
    %3 = vector.load %arg7[%c0, %c0_1] : memref<256x128xf32, #tpu.memory_space<vmem>>, vector<256x128xf32>
    %c0_2 = arith.constant 0 : index
    %c0_3 = arith.constant 0 : index
    %4 = vector.load %arg3[%c0_2, %c0_3] : memref<256x128xbf16, #tpu.memory_space<vmem>>, vector<256x128xbf16>
    %c0_4 = arith.constant 0 : index
    %c0_5 = arith.constant 0 : index
    %5 = vector.load %arg4[%c0_4, %c0_5] : memref<128x128xbf16, #tpu.memory_space<vmem>>, vector<128x128xbf16>
    %cst = arith.constant dense<0.000000e+00> : vector<256x128xf32>
    %6 = tpu.matmul %4, %5, %cst {dimension_numbers = #tpu.dot_dimension_numbers<[1], [0], [0], [1], [0, 0, 1, 1], [], []>} : vector<256x128xbf16>, vector<128x128xbf16>, vector<256x128xf32> -> vector<256x128xf32>
    %7 = arith.addf %3, %6 : vector<256x128xf32>
    %c0_6 = arith.constant 0 : index
    %c0_7 = arith.constant 0 : index
    %8 = vector.load %arg7[%c0_6, %c0_7] : memref<256x128xf32, #tpu.memory_space<vmem>>, vector<256x128xf32>
    tpu.vector_store %arg7[%c0_6, %c0_7], %7 {strides = array<i32>} : memref<256x128xf32, #tpu.memory_space<vmem>>, vector<256x128xf32>,
    %c0_i32_8 = arith.constant 0 : i32
    %9 = arith.cmpi eq, %arg2, %c0_i32_8 : i32
    %10 = arith.extui %9 : i1 to i32
    %c0_i32_9 = arith.constant 0 : i32
    %11 = arith.cmpi ne, %10, %c0_i32_9 : i32
    scf.if %11 {
      %c0_10 = arith.constant 0 : index
      %c0_11 = arith.constant 0 : index
      %12 = vector.load %arg7[%c0_10, %c0_11] : memref<256x128xf32, #tpu.memory_space<vmem>>, vector<256x128xf32>
      %c0_12 = arith.constant 0 : index
      %c0_13 = arith.constant 0 : index
      %13 = vector.load %arg5[%c0_12, %c0_13] : memref<1x128xf32, #tpu.memory_space<vmem>>, vector<1x128xf32>
      %14 = vector.broadcast %13 : vector<1x128xf32> to vector<256x128xf32>
      %15 = arith.addf %12, %14 : vector<256x128xf32>
      %16 = arith.negf %15 : vector<256x128xf32>
      %17 = math.exp %16 : vector<256x128xf32>
      %cst_14 = arith.constant 1.000000e+00 : f32
      %18 = vector.broadcast %cst_14 : f32 to vector<256x128xf32>
      %19 = arith.addf %18, %17 : vector<256x128xf32>
      %20 = arith.divf %18, %19 : vector<256x128xf32>
      %21 = arith.mulf %15, %20 : vector<256x128xf32>
      %22 = arith.truncf %21 : vector<256x128xf32> to vector<256x128xbf16>
      %c0_15 = arith.constant 0 : index
      %c0_16 = arith.constant 0 : index
      %23 = vector.load %arg6[%c0_15, %c0_16] : memref<256x128xbf16, #tpu.memory_space<vmem>>, vector<256x128xbf16>
      tpu.vector_store %arg6[%c0_15, %c0_16], %22 {strides = array<i32>} : memref<256x128xbf16, #tpu.memory_space<vmem>>, vector<256x128xbf16>,
    } else {
    }
    return
  }
  func.func @transform_0(%arg0: i32, %arg1: i32, %arg2: i32) -> (i32, i32) {
    %c0_i32 = arith.constant 0 : i32
    return %arg0, %arg2 : i32, i32
  }
  func.func @transform_1(%arg0: i32, %arg1: i32, %arg2: i32) -> (i32, i32) {
    %c0_i32 = arith.constant 0 : i32
    return %arg2, %arg1 : i32, i32
  }
  func.func @transform_2(%arg0: i32, %arg1: i32, %arg2: i32) -> (i32, i32) {
    %c0_i32 = arith.constant 0 : i32
    %c0_i32_0 = arith.constant 0 : i32
    return %c0_i32, %arg1 : i32, i32
  }
  func.func @transform_3(%arg0: i32, %arg1: i32, %arg2: i32) -> (i32, i32) {
    %c0_i32 = arith.constant 0 : i32
    return %arg0, %arg1 : i32, i32
  }
}

module attributes {stable_mosaic.version = 11 : i64} {
  func.func @_mm_res_kernel(%arg0: i32, %arg1: i32, %arg2: i32, %arg3: memref<256x256xbf16, #tpu.memory_space<vmem>>, %arg4: memref<256x128xbf16, #tpu.memory_space<vmem>>, %arg5: memref<1x128xf32, #tpu.memory_space<vmem>>, %arg6: memref<256x128xbf16, #tpu.memory_space<vmem>>, %arg7: memref<256x128xbf16, #tpu.memory_space<vmem>>, %arg8: memref<256x128xf32, #tpu.memory_space<vmem>>) attributes {dimension_semantics = [#tpu.dimension_semantics<parallel>, #tpu.dimension_semantics<parallel>, #tpu.dimension_semantics<arbitrary>], iteration_bounds = array<i64: 2, 1, 1>, scalar_prefetch = 0 : i64, scratch_operands = 1 : i64, tpu.core_type = #tpu.core_type<tc>, window_params = [{transform_indices = @transform_0, window_bounds = array<i64: 256, 256>}, {transform_indices = @transform_1, window_bounds = array<i64: 256, 128>}, {transform_indices = @transform_2, window_bounds = array<i64: 1, 128>}, {transform_indices = @transform_3, window_bounds = array<i64: 256, 128>}, {transform_indices = @transform_4, window_bounds = array<i64: 256, 128>}]} {
    %c0_i32 = arith.constant 0 : i32
    %0 = arith.cmpi eq, %arg2, %c0_i32 : i32
    %1 = arith.extui %0 : i1 to i32
    %c0_i32_0 = arith.constant 0 : i32
    %2 = arith.cmpi ne, %1, %c0_i32_0 : i32
    scf.if %2 {
      %cst_10 = arith.constant 0.000000e+00 : f32
      %12 = vector.broadcast %cst_10 : f32 to vector<256x128xf32>
      %c0_11 = arith.constant 0 : index
      %c0_12 = arith.constant 0 : index
      %13 = vector.load %arg8[%c0_11, %c0_12] : memref<256x128xf32, #tpu.memory_space<vmem>>, vector<256x128xf32>
      tpu.vector_store %arg8[%c0_11, %c0_12], %12 {strides = array<i32>} : memref<256x128xf32, #tpu.memory_space<vmem>>, vector<256x128xf32>,
    } else {
    }
    %c0 = arith.constant 0 : index
    %c0_1 = arith.constant 0 : index
    %3 = vector.load %arg8[%c0, %c0_1] : memref<256x128xf32, #tpu.memory_space<vmem>>, vector<256x128xf32>
    %c0_2 = arith.constant 0 : index
    %c0_3 = arith.constant 0 : index
    %4 = vector.load %arg3[%c0_2, %c0_3] : memref<256x256xbf16, #tpu.memory_space<vmem>>, vector<256x256xbf16>
    %c0_4 = arith.constant 0 : index
    %c0_5 = arith.constant 0 : index
    %5 = vector.load %arg4[%c0_4, %c0_5] : memref<256x128xbf16, #tpu.memory_space<vmem>>, vector<256x128xbf16>
    %cst = arith.constant dense<0.000000e+00> : vector<256x128xf32>
    %6 = tpu.matmul %4, %5, %cst {dimension_numbers = #tpu.dot_dimension_numbers<[1], [0], [0], [1], [0, 0, 1, 1], [], []>} : vector<256x256xbf16>, vector<256x128xbf16>, vector<256x128xf32> -> vector<256x128xf32>
    %7 = arith.addf %3, %6 : vector<256x128xf32>
    %c0_6 = arith.constant 0 : index
    %c0_7 = arith.constant 0 : index
    %8 = vector.load %arg8[%c0_6, %c0_7] : memref<256x128xf32, #tpu.memory_space<vmem>>, vector<256x128xf32>
    tpu.vector_store %arg8[%c0_6, %c0_7], %7 {strides = array<i32>} : memref<256x128xf32, #tpu.memory_space<vmem>>, vector<256x128xf32>,
    %c0_i32_8 = arith.constant 0 : i32
    %9 = arith.cmpi eq, %arg2, %c0_i32_8 : i32
    %10 = arith.extui %9 : i1 to i32
    %c0_i32_9 = arith.constant 0 : i32
    %11 = arith.cmpi ne, %10, %c0_i32_9 : i32
    scf.if %11 {
      %c0_10 = arith.constant 0 : index
      %c0_11 = arith.constant 0 : index
      %12 = vector.load %arg8[%c0_10, %c0_11] : memref<256x128xf32, #tpu.memory_space<vmem>>, vector<256x128xf32>
      %c0_12 = arith.constant 0 : index
      %c0_13 = arith.constant 0 : index
      %13 = vector.load %arg5[%c0_12, %c0_13] : memref<1x128xf32, #tpu.memory_space<vmem>>, vector<1x128xf32>
      %14 = vector.broadcast %13 : vector<1x128xf32> to vector<256x128xf32>
      %15 = arith.addf %12, %14 : vector<256x128xf32>
      %16 = arith.negf %15 : vector<256x128xf32>
      %17 = math.exp %16 : vector<256x128xf32>
      %cst_14 = arith.constant 1.000000e+00 : f32
      %18 = vector.broadcast %cst_14 : f32 to vector<256x128xf32>
      %19 = arith.addf %18, %17 : vector<256x128xf32>
      %20 = arith.divf %18, %19 : vector<256x128xf32>
      %21 = arith.mulf %15, %20 : vector<256x128xf32>
      %c0_15 = arith.constant 0 : index
      %c0_16 = arith.constant 0 : index
      %22 = vector.load %arg6[%c0_15, %c0_16] : memref<256x128xbf16, #tpu.memory_space<vmem>>, vector<256x128xbf16>
      %23 = arith.extf %22 : vector<256x128xbf16> to vector<256x128xf32>
      %24 = arith.addf %21, %23 : vector<256x128xf32>
      %25 = arith.truncf %24 : vector<256x128xf32> to vector<256x128xbf16>
      %c0_17 = arith.constant 0 : index
      %c0_18 = arith.constant 0 : index
      %26 = vector.load %arg7[%c0_17, %c0_18] : memref<256x128xbf16, #tpu.memory_space<vmem>>, vector<256x128xbf16>
      tpu.vector_store %arg7[%c0_17, %c0_18], %25 {strides = array<i32>} : memref<256x128xbf16, #tpu.memory_space<vmem>>, vector<256x128xbf16>,
    } else {
    }
    return
  }
  func.func @transform_0(%arg0: i32, %arg1: i32, %arg2: i32) -> (i32, i32) {
    %c0_i32 = arith.constant 0 : i32
    return %arg0, %arg2 : i32, i32
  }
  func.func @transform_1(%arg0: i32, %arg1: i32, %arg2: i32) -> (i32, i32) {
    %c0_i32 = arith.constant 0 : i32
    return %arg2, %arg1 : i32, i32
  }
  func.func @transform_2(%arg0: i32, %arg1: i32, %arg2: i32) -> (i32, i32) {
    %c0_i32 = arith.constant 0 : i32
    %c0_i32_0 = arith.constant 0 : i32
    return %c0_i32, %arg1 : i32, i32
  }
  func.func @transform_3(%arg0: i32, %arg1: i32, %arg2: i32) -> (i32, i32) {
    %c0_i32 = arith.constant 0 : i32
    return %arg0, %arg1 : i32, i32
  }
  func.func @transform_4(%arg0: i32, %arg1: i32, %arg2: i32) -> (i32, i32) {
    %c0_i32 = arith.constant 0 : i32
    return %arg0, %arg1 : i32, i32
  }
}

module attributes {stable_mosaic.version = 11 : i64} {
  func.func @_mm_kernel(%arg0: i32, %arg1: i32, %arg2: i32, %arg3: memref<128x256xbf16, #tpu.memory_space<vmem>>, %arg4: memref<256x128xbf16, #tpu.memory_space<vmem>>, %arg5: memref<1x128xf32, #tpu.memory_space<vmem>>, %arg6: memref<128x128xbf16, #tpu.memory_space<vmem>>, %arg7: memref<128x128xf32, #tpu.memory_space<vmem>>) attributes {dimension_semantics = [#tpu.dimension_semantics<parallel>, #tpu.dimension_semantics<parallel>, #tpu.dimension_semantics<arbitrary>], iteration_bounds = array<i64: 1, 1, 1>, scalar_prefetch = 0 : i64, scratch_operands = 1 : i64, tpu.core_type = #tpu.core_type<tc>, window_params = [{transform_indices = @transform_0, window_bounds = array<i64: 128, 256>}, {transform_indices = @transform_1, window_bounds = array<i64: 256, 128>}, {transform_indices = @transform_2, window_bounds = array<i64: 1, 128>}, {transform_indices = @transform_3, window_bounds = array<i64: 128, 128>}]} {
    %c0_i32 = arith.constant 0 : i32
    %0 = arith.cmpi eq, %arg2, %c0_i32 : i32
    %1 = arith.extui %0 : i1 to i32
    %c0_i32_0 = arith.constant 0 : i32
    %2 = arith.cmpi ne, %1, %c0_i32_0 : i32
    scf.if %2 {
      %cst_10 = arith.constant 0.000000e+00 : f32
      %12 = vector.broadcast %cst_10 : f32 to vector<128x128xf32>
      %c0_11 = arith.constant 0 : index
      %c0_12 = arith.constant 0 : index
      %13 = vector.load %arg7[%c0_11, %c0_12] : memref<128x128xf32, #tpu.memory_space<vmem>>, vector<128x128xf32>
      tpu.vector_store %arg7[%c0_11, %c0_12], %12 {strides = array<i32>} : memref<128x128xf32, #tpu.memory_space<vmem>>, vector<128x128xf32>,
    } else {
    }
    %c0 = arith.constant 0 : index
    %c0_1 = arith.constant 0 : index
    %3 = vector.load %arg7[%c0, %c0_1] : memref<128x128xf32, #tpu.memory_space<vmem>>, vector<128x128xf32>
    %c0_2 = arith.constant 0 : index
    %c0_3 = arith.constant 0 : index
    %4 = vector.load %arg3[%c0_2, %c0_3] : memref<128x256xbf16, #tpu.memory_space<vmem>>, vector<128x256xbf16>
    %c0_4 = arith.constant 0 : index
    %c0_5 = arith.constant 0 : index
    %5 = vector.load %arg4[%c0_4, %c0_5] : memref<256x128xbf16, #tpu.memory_space<vmem>>, vector<256x128xbf16>
    %cst = arith.constant dense<0.000000e+00> : vector<128x128xf32>
    %6 = tpu.matmul %4, %5, %cst {dimension_numbers = #tpu.dot_dimension_numbers<[1], [0], [0], [1], [0, 0, 1, 1], [], []>} : vector<128x256xbf16>, vector<256x128xbf16>, vector<128x128xf32> -> vector<128x128xf32>
    %7 = arith.addf %3, %6 : vector<128x128xf32>
    %c0_6 = arith.constant 0 : index
    %c0_7 = arith.constant 0 : index
    %8 = vector.load %arg7[%c0_6, %c0_7] : memref<128x128xf32, #tpu.memory_space<vmem>>, vector<128x128xf32>
    tpu.vector_store %arg7[%c0_6, %c0_7], %7 {strides = array<i32>} : memref<128x128xf32, #tpu.memory_space<vmem>>, vector<128x128xf32>,
    %c0_i32_8 = arith.constant 0 : i32
    %9 = arith.cmpi eq, %arg2, %c0_i32_8 : i32
    %10 = arith.extui %9 : i1 to i32
    %c0_i32_9 = arith.constant 0 : i32
    %11 = arith.cmpi ne, %10, %c0_i32_9 : i32
    scf.if %11 {
      %c0_10 = arith.constant 0 : index
      %c0_11 = arith.constant 0 : index
      %12 = vector.load %arg7[%c0_10, %c0_11] : memref<128x128xf32, #tpu.memory_space<vmem>>, vector<128x128xf32>
      %c0_12 = arith.constant 0 : index
      %c0_13 = arith.constant 0 : index
      %13 = vector.load %arg5[%c0_12, %c0_13] : memref<1x128xf32, #tpu.memory_space<vmem>>, vector<1x128xf32>
      %14 = vector.broadcast %13 : vector<1x128xf32> to vector<128x128xf32>
      %15 = arith.addf %12, %14 : vector<128x128xf32>
      %16 = arith.negf %15 : vector<128x128xf32>
      %17 = math.exp %16 : vector<128x128xf32>
      %cst_14 = arith.constant 1.000000e+00 : f32
      %18 = vector.broadcast %cst_14 : f32 to vector<128x128xf32>
      %19 = arith.addf %18, %17 : vector<128x128xf32>
      %20 = arith.divf %18, %19 : vector<128x128xf32>
      %21 = arith.mulf %15, %20 : vector<128x128xf32>
      %22 = arith.truncf %21 : vector<128x128xf32> to vector<128x128xbf16>
      %c0_15 = arith.constant 0 : index
      %c0_16 = arith.constant 0 : index
      %23 = vector.load %arg6[%c0_15, %c0_16] : memref<128x128xbf16, #tpu.memory_space<vmem>>, vector<128x128xbf16>
      tpu.vector_store %arg6[%c0_15, %c0_16], %22 {strides = array<i32>} : memref<128x128xbf16, #tpu.memory_space<vmem>>, vector<128x128xbf16>,
    } else {
    }
    return
  }
  func.func @transform_0(%arg0: i32, %arg1: i32, %arg2: i32) -> (i32, i32) {
    %c0_i32 = arith.constant 0 : i32
    return %arg0, %arg2 : i32, i32
  }
  func.func @transform_1(%arg0: i32, %arg1: i32, %arg2: i32) -> (i32, i32) {
    %c0_i32 = arith.constant 0 : i32
    return %arg2, %arg1 : i32, i32
  }
  func.func @transform_2(%arg0: i32, %arg1: i32, %arg2: i32) -> (i32, i32) {
    %c0_i32 = arith.constant 0 : i32
    %c0_i32_0 = arith.constant 0 : i32
    return %c0_i32, %arg1 : i32, i32
  }
  func.func @transform_3(%arg0: i32, %arg1: i32, %arg2: i32) -> (i32, i32) {
    %c0_i32 = arith.constant 0 : i32
    return %arg0, %arg1 : i32, i32
  }
}

module attributes {stable_mosaic.version = 11 : i64} {
  func.func @_mm_kernel(%arg0: i32, %arg1: i32, %arg2: i32, %arg3: memref<128x128xbf16, #tpu.memory_space<vmem>>, %arg4: memref<128x128xbf16, #tpu.memory_space<vmem>>, %arg5: memref<1x128xf32, #tpu.memory_space<vmem>>, %arg6: memref<128x128xbf16, #tpu.memory_space<vmem>>, %arg7: memref<128x128xf32, #tpu.memory_space<vmem>>) attributes {dimension_semantics = [#tpu.dimension_semantics<parallel>, #tpu.dimension_semantics<parallel>, #tpu.dimension_semantics<arbitrary>], iteration_bounds = array<i64: 1, 1, 1>, scalar_prefetch = 0 : i64, scratch_operands = 1 : i64, tpu.core_type = #tpu.core_type<tc>, window_params = [{transform_indices = @transform_0, window_bounds = array<i64: 128, 128>}, {transform_indices = @transform_1, window_bounds = array<i64: 128, 128>}, {transform_indices = @transform_2, window_bounds = array<i64: 1, 128>}, {transform_indices = @transform_3, window_bounds = array<i64: 128, 128>}]} {
    %c0_i32 = arith.constant 0 : i32
    %0 = arith.cmpi eq, %arg2, %c0_i32 : i32
    %1 = arith.extui %0 : i1 to i32
    %c0_i32_0 = arith.constant 0 : i32
    %2 = arith.cmpi ne, %1, %c0_i32_0 : i32
    scf.if %2 {
      %cst_10 = arith.constant 0.000000e+00 : f32
      %12 = vector.broadcast %cst_10 : f32 to vector<128x128xf32>
      %c0_11 = arith.constant 0 : index
      %c0_12 = arith.constant 0 : index
      %13 = vector.load %arg7[%c0_11, %c0_12] : memref<128x128xf32, #tpu.memory_space<vmem>>, vector<128x128xf32>
      tpu.vector_store %arg7[%c0_11, %c0_12], %12 {strides = array<i32>} : memref<128x128xf32, #tpu.memory_space<vmem>>, vector<128x128xf32>,
    } else {
    }
    %c0 = arith.constant 0 : index
    %c0_1 = arith.constant 0 : index
    %3 = vector.load %arg7[%c0, %c0_1] : memref<128x128xf32, #tpu.memory_space<vmem>>, vector<128x128xf32>
    %c0_2 = arith.constant 0 : index
    %c0_3 = arith.constant 0 : index
    %4 = vector.load %arg3[%c0_2, %c0_3] : memref<128x128xbf16, #tpu.memory_space<vmem>>, vector<128x128xbf16>
    %c0_4 = arith.constant 0 : index
    %c0_5 = arith.constant 0 : index
    %5 = vector.load %arg4[%c0_4, %c0_5] : memref<128x128xbf16, #tpu.memory_space<vmem>>, vector<128x128xbf16>
    %cst = arith.constant dense<0.000000e+00> : vector<128x128xf32>
    %6 = tpu.matmul %4, %5, %cst {dimension_numbers = #tpu.dot_dimension_numbers<[1], [0], [0], [1], [0, 0, 1, 1], [], []>} : vector<128x128xbf16>, vector<128x128xbf16>, vector<128x128xf32> -> vector<128x128xf32>
    %7 = arith.addf %3, %6 : vector<128x128xf32>
    %c0_6 = arith.constant 0 : index
    %c0_7 = arith.constant 0 : index
    %8 = vector.load %arg7[%c0_6, %c0_7] : memref<128x128xf32, #tpu.memory_space<vmem>>, vector<128x128xf32>
    tpu.vector_store %arg7[%c0_6, %c0_7], %7 {strides = array<i32>} : memref<128x128xf32, #tpu.memory_space<vmem>>, vector<128x128xf32>,
    %c0_i32_8 = arith.constant 0 : i32
    %9 = arith.cmpi eq, %arg2, %c0_i32_8 : i32
    %10 = arith.extui %9 : i1 to i32
    %c0_i32_9 = arith.constant 0 : i32
    %11 = arith.cmpi ne, %10, %c0_i32_9 : i32
    scf.if %11 {
      %c0_10 = arith.constant 0 : index
      %c0_11 = arith.constant 0 : index
      %12 = vector.load %arg7[%c0_10, %c0_11] : memref<128x128xf32, #tpu.memory_space<vmem>>, vector<128x128xf32>
      %c0_12 = arith.constant 0 : index
      %c0_13 = arith.constant 0 : index
      %13 = vector.load %arg5[%c0_12, %c0_13] : memref<1x128xf32, #tpu.memory_space<vmem>>, vector<1x128xf32>
      %14 = vector.broadcast %13 : vector<1x128xf32> to vector<128x128xf32>
      %15 = arith.addf %12, %14 : vector<128x128xf32>
      %16 = arith.truncf %15 : vector<128x128xf32> to vector<128x128xbf16>
      %c0_14 = arith.constant 0 : index
      %c0_15 = arith.constant 0 : index
      %17 = vector.load %arg6[%c0_14, %c0_15] : memref<128x128xbf16, #tpu.memory_space<vmem>>, vector<128x128xbf16>
      tpu.vector_store %arg6[%c0_14, %c0_15], %16 {strides = array<i32>} : memref<128x128xbf16, #tpu.memory_space<vmem>>, vector<128x128xbf16>,
    } else {
    }
    return
  }
  func.func @transform_0(%arg0: i32, %arg1: i32, %arg2: i32) -> (i32, i32) {
    %c0_i32 = arith.constant 0 : i32
    return %arg0, %arg2 : i32, i32
  }
  func.func @transform_1(%arg0: i32, %arg1: i32, %arg2: i32) -> (i32, i32) {
    %c0_i32 = arith.constant 0 : i32
    return %arg2, %arg1 : i32, i32
  }
  func.func @transform_2(%arg0: i32, %arg1: i32, %arg2: i32) -> (i32, i32) {
    %c0_i32 = arith.constant 0 : i32
    %c0_i32_0 = arith.constant 0 : i32
    return %c0_i32, %arg1 : i32, i32
  }
  func.func @transform_3(%arg0: i32, %arg1: i32, %arg2: i32) -> (i32, i32) {
    %c0_i32 = arith.constant 0 : i32
    return %arg0, %arg1 : i32, i32
  }
}

module attributes {stable_mosaic.version = 11 : i64} {
  func.func @_mm_kernel(%arg0: i32, %arg1: i32, %arg2: i32, %arg3: memref<128x128xbf16, #tpu.memory_space<vmem>>, %arg4: memref<128x128xbf16, #tpu.memory_space<vmem>>, %arg5: memref<1x128xf32, #tpu.memory_space<vmem>>, %arg6: memref<128x128xbf16, #tpu.memory_space<vmem>>, %arg7: memref<128x128xf32, #tpu.memory_space<vmem>>) attributes {dimension_semantics = [#tpu.dimension_semantics<parallel>, #tpu.dimension_semantics<parallel>, #tpu.dimension_semantics<arbitrary>], iteration_bounds = array<i64: 1, 1, 1>, scalar_prefetch = 0 : i64, scratch_operands = 1 : i64, tpu.core_type = #tpu.core_type<tc>, window_params = [{transform_indices = @transform_0, window_bounds = array<i64: 128, 128>}, {transform_indices = @transform_1, window_bounds = array<i64: 128, 128>}, {transform_indices = @transform_2, window_bounds = array<i64: 1, 128>}, {transform_indices = @transform_3, window_bounds = array<i64: 128, 128>}]} {
    %c0_i32 = arith.constant 0 : i32
    %0 = arith.cmpi eq, %arg2, %c0_i32 : i32
    %1 = arith.extui %0 : i1 to i32
    %c0_i32_0 = arith.constant 0 : i32
    %2 = arith.cmpi ne, %1, %c0_i32_0 : i32
    scf.if %2 {
      %cst_10 = arith.constant 0.000000e+00 : f32
      %12 = vector.broadcast %cst_10 : f32 to vector<128x128xf32>
      %c0_11 = arith.constant 0 : index
      %c0_12 = arith.constant 0 : index
      %13 = vector.load %arg7[%c0_11, %c0_12] : memref<128x128xf32, #tpu.memory_space<vmem>>, vector<128x128xf32>
      tpu.vector_store %arg7[%c0_11, %c0_12], %12 {strides = array<i32>} : memref<128x128xf32, #tpu.memory_space<vmem>>, vector<128x128xf32>,
    } else {
    }
    %c0 = arith.constant 0 : index
    %c0_1 = arith.constant 0 : index
    %3 = vector.load %arg7[%c0, %c0_1] : memref<128x128xf32, #tpu.memory_space<vmem>>, vector<128x128xf32>
    %c0_2 = arith.constant 0 : index
    %c0_3 = arith.constant 0 : index
    %4 = vector.load %arg3[%c0_2, %c0_3] : memref<128x128xbf16, #tpu.memory_space<vmem>>, vector<128x128xbf16>
    %c0_4 = arith.constant 0 : index
    %c0_5 = arith.constant 0 : index
    %5 = vector.load %arg4[%c0_4, %c0_5] : memref<128x128xbf16, #tpu.memory_space<vmem>>, vector<128x128xbf16>
    %cst = arith.constant dense<0.000000e+00> : vector<128x128xf32>
    %6 = tpu.matmul %4, %5, %cst {dimension_numbers = #tpu.dot_dimension_numbers<[1], [0], [0], [1], [0, 0, 1, 1], [], []>} : vector<128x128xbf16>, vector<128x128xbf16>, vector<128x128xf32> -> vector<128x128xf32>
    %7 = arith.addf %3, %6 : vector<128x128xf32>
    %c0_6 = arith.constant 0 : index
    %c0_7 = arith.constant 0 : index
    %8 = vector.load %arg7[%c0_6, %c0_7] : memref<128x128xf32, #tpu.memory_space<vmem>>, vector<128x128xf32>
    tpu.vector_store %arg7[%c0_6, %c0_7], %7 {strides = array<i32>} : memref<128x128xf32, #tpu.memory_space<vmem>>, vector<128x128xf32>,
    %c0_i32_8 = arith.constant 0 : i32
    %9 = arith.cmpi eq, %arg2, %c0_i32_8 : i32
    %10 = arith.extui %9 : i1 to i32
    %c0_i32_9 = arith.constant 0 : i32
    %11 = arith.cmpi ne, %10, %c0_i32_9 : i32
    scf.if %11 {
      %c0_10 = arith.constant 0 : index
      %c0_11 = arith.constant 0 : index
      %12 = vector.load %arg7[%c0_10, %c0_11] : memref<128x128xf32, #tpu.memory_space<vmem>>, vector<128x128xf32>
      %c0_12 = arith.constant 0 : index
      %c0_13 = arith.constant 0 : index
      %13 = vector.load %arg5[%c0_12, %c0_13] : memref<1x128xf32, #tpu.memory_space<vmem>>, vector<1x128xf32>
      %14 = vector.broadcast %13 : vector<1x128xf32> to vector<128x128xf32>
      %15 = arith.addf %12, %14 : vector<128x128xf32>
      %16 = arith.negf %15 : vector<128x128xf32>
      %17 = math.exp %16 : vector<128x128xf32>
      %cst_14 = arith.constant 1.000000e+00 : f32
      %18 = vector.broadcast %cst_14 : f32 to vector<128x128xf32>
      %19 = arith.addf %18, %17 : vector<128x128xf32>
      %20 = arith.divf %18, %19 : vector<128x128xf32>
      %21 = arith.mulf %15, %20 : vector<128x128xf32>
      %22 = arith.truncf %21 : vector<128x128xf32> to vector<128x128xbf16>
      %c0_15 = arith.constant 0 : index
      %c0_16 = arith.constant 0 : index
      %23 = vector.load %arg6[%c0_15, %c0_16] : memref<128x128xbf16, #tpu.memory_space<vmem>>, vector<128x128xbf16>
      tpu.vector_store %arg6[%c0_15, %c0_16], %22 {strides = array<i32>} : memref<128x128xbf16, #tpu.memory_space<vmem>>, vector<128x128xbf16>,
    } else {
    }
    return
  }
  func.func @transform_0(%arg0: i32, %arg1: i32, %arg2: i32) -> (i32, i32) {
    %c0_i32 = arith.constant 0 : i32
    return %arg0, %arg2 : i32, i32
  }
  func.func @transform_1(%arg0: i32, %arg1: i32, %arg2: i32) -> (i32, i32) {
    %c0_i32 = arith.constant 0 : i32
    return %arg2, %arg1 : i32, i32
  }
  func.func @transform_2(%arg0: i32, %arg1: i32, %arg2: i32) -> (i32, i32) {
    %c0_i32 = arith.constant 0 : i32
    %c0_i32_0 = arith.constant 0 : i32
    return %c0_i32, %arg1 : i32, i32
  }
  func.func @transform_3(%arg0: i32, %arg1: i32, %arg2: i32) -> (i32, i32) {
    %c0_i32 = arith.constant 0 : i32
    return %arg0, %arg1 : i32, i32
  }
}

module attributes {stable_mosaic.version = 11 : i64} {
  func.func @_dw_kernel(%arg0: i32, %arg1: memref<9x32x128xbf16, #tpu.memory_space<vmem>>, %arg2: memref<9x1x128xf32, #tpu.memory_space<vmem>>, %arg3: memref<1x128xf32, #tpu.memory_space<vmem>>, %arg4: memref<32x128xbf16, #tpu.memory_space<vmem>>) attributes {dimension_semantics = [#tpu.dimension_semantics<parallel>], iteration_bounds = array<i64: 1>, scalar_prefetch = 0 : i64, scratch_operands = 0 : i64, tpu.core_type = #tpu.core_type<tc>, window_params = [{transform_indices = @transform_0, window_bounds = array<i64: 9, 32, 128>}, {pipeline_mode = #tpu.pipeline_mode<synchronous>, transform_indices = @transform_1, window_bounds = array<i64: 9, 1, 128>}, {pipeline_mode = #tpu.pipeline_mode<synchronous>, transform_indices = @transform_2, window_bounds = array<i64: 1, 128>}, {transform_indices = @transform_3, window_bounds = array<i64: 32, 128>}]} {
    %cst = arith.constant 0.000000e+00 : f32
    %0 = vector.broadcast %cst : f32 to vector<32x128xf32>
    %c0 = arith.constant 0 : index
    %c0_0 = arith.constant 0 : index
    %c0_1 = arith.constant 0 : index
    %1 = vector.load %arg1[%c0, %c0_0, %c0_1] : memref<9x32x128xbf16, #tpu.memory_space<vmem>>, vector<1x32x128xbf16>
    %2 = vector.shape_cast %1 : vector<1x32x128xbf16> to vector<32x128xbf16>
    %3 = arith.extf %2 : vector<32x128xbf16> to vector<32x128xf32>
    %c0_2 = arith.constant 0 : index
    %c0_3 = arith.constant 0 : index
    %c0_4 = arith.constant 0 : index
    %4 = vector.load %arg2[%c0_2, %c0_3, %c0_4] : memref<9x1x128xf32, #tpu.memory_space<vmem>>, vector<1x1x128xf32>
    %5 = vector.shape_cast %4 : vector<1x1x128xf32> to vector<1x128xf32>
    %6 = vector.broadcast %5 : vector<1x128xf32> to vector<32x128xf32>
    %7 = arith.mulf %3, %6 : vector<32x128xf32>
    %8 = arith.addf %0, %7 : vector<32x128xf32>
    %c1 = arith.constant 1 : index
    %c0_5 = arith.constant 0 : index
    %c0_6 = arith.constant 0 : index
    %9 = vector.load %arg1[%c1, %c0_5, %c0_6] : memref<9x32x128xbf16, #tpu.memory_space<vmem>>, vector<1x32x128xbf16>
    %10 = vector.shape_cast %9 : vector<1x32x128xbf16> to vector<32x128xbf16>
    %11 = arith.extf %10 : vector<32x128xbf16> to vector<32x128xf32>
    %c1_7 = arith.constant 1 : index
    %c0_8 = arith.constant 0 : index
    %c0_9 = arith.constant 0 : index
    %12 = vector.load %arg2[%c1_7, %c0_8, %c0_9] : memref<9x1x128xf32, #tpu.memory_space<vmem>>, vector<1x1x128xf32>
    %13 = vector.shape_cast %12 : vector<1x1x128xf32> to vector<1x128xf32>
    %14 = vector.broadcast %13 : vector<1x128xf32> to vector<32x128xf32>
    %15 = arith.mulf %11, %14 : vector<32x128xf32>
    %16 = arith.addf %8, %15 : vector<32x128xf32>
    %c2 = arith.constant 2 : index
    %c0_10 = arith.constant 0 : index
    %c0_11 = arith.constant 0 : index
    %17 = vector.load %arg1[%c2, %c0_10, %c0_11] : memref<9x32x128xbf16, #tpu.memory_space<vmem>>, vector<1x32x128xbf16>
    %18 = vector.shape_cast %17 : vector<1x32x128xbf16> to vector<32x128xbf16>
    %19 = arith.extf %18 : vector<32x128xbf16> to vector<32x128xf32>
    %c2_12 = arith.constant 2 : index
    %c0_13 = arith.constant 0 : index
    %c0_14 = arith.constant 0 : index
    %20 = vector.load %arg2[%c2_12, %c0_13, %c0_14] : memref<9x1x128xf32, #tpu.memory_space<vmem>>, vector<1x1x128xf32>
    %21 = vector.shape_cast %20 : vector<1x1x128xf32> to vector<1x128xf32>
    %22 = vector.broadcast %21 : vector<1x128xf32> to vector<32x128xf32>
    %23 = arith.mulf %19, %22 : vector<32x128xf32>
    %24 = arith.addf %16, %23 : vector<32x128xf32>
    %c3 = arith.constant 3 : index
    %c0_15 = arith.constant 0 : index
    %c0_16 = arith.constant 0 : index
    %25 = vector.load %arg1[%c3, %c0_15, %c0_16] : memref<9x32x128xbf16, #tpu.memory_space<vmem>>, vector<1x32x128xbf16>
    %26 = vector.shape_cast %25 : vector<1x32x128xbf16> to vector<32x128xbf16>
    %27 = arith.extf %26 : vector<32x128xbf16> to vector<32x128xf32>
    %c3_17 = arith.constant 3 : index
    %c0_18 = arith.constant 0 : index
    %c0_19 = arith.constant 0 : index
    %28 = vector.load %arg2[%c3_17, %c0_18, %c0_19] : memref<9x1x128xf32, #tpu.memory_space<vmem>>, vector<1x1x128xf32>
    %29 = vector.shape_cast %28 : vector<1x1x128xf32> to vector<1x128xf32>
    %30 = vector.broadcast %29 : vector<1x128xf32> to vector<32x128xf32>
    %31 = arith.mulf %27, %30 : vector<32x128xf32>
    %32 = arith.addf %24, %31 : vector<32x128xf32>
    %c4 = arith.constant 4 : index
    %c0_20 = arith.constant 0 : index
    %c0_21 = arith.constant 0 : index
    %33 = vector.load %arg1[%c4, %c0_20, %c0_21] : memref<9x32x128xbf16, #tpu.memory_space<vmem>>, vector<1x32x128xbf16>
    %34 = vector.shape_cast %33 : vector<1x32x128xbf16> to vector<32x128xbf16>
    %35 = arith.extf %34 : vector<32x128xbf16> to vector<32x128xf32>
    %c4_22 = arith.constant 4 : index
    %c0_23 = arith.constant 0 : index
    %c0_24 = arith.constant 0 : index
    %36 = vector.load %arg2[%c4_22, %c0_23, %c0_24] : memref<9x1x128xf32, #tpu.memory_space<vmem>>, vector<1x1x128xf32>
    %37 = vector.shape_cast %36 : vector<1x1x128xf32> to vector<1x128xf32>
    %38 = vector.broadcast %37 : vector<1x128xf32> to vector<32x128xf32>
    %39 = arith.mulf %35, %38 : vector<32x128xf32>
    %40 = arith.addf %32, %39 : vector<32x128xf32>
    %c5 = arith.constant 5 : index
    %c0_25 = arith.constant 0 : index
    %c0_26 = arith.constant 0 : index
    %41 = vector.load %arg1[%c5, %c0_25, %c0_26] : memref<9x32x128xbf16, #tpu.memory_space<vmem>>, vector<1x32x128xbf16>
    %42 = vector.shape_cast %41 : vector<1x32x128xbf16> to vector<32x128xbf16>
    %43 = arith.extf %42 : vector<32x128xbf16> to vector<32x128xf32>
    %c5_27 = arith.constant 5 : index
    %c0_28 = arith.constant 0 : index
    %c0_29 = arith.constant 0 : index
    %44 = vector.load %arg2[%c5_27, %c0_28, %c0_29] : memref<9x1x128xf32, #tpu.memory_space<vmem>>, vector<1x1x128xf32>
    %45 = vector.shape_cast %44 : vector<1x1x128xf32> to vector<1x128xf32>
    %46 = vector.broadcast %45 : vector<1x128xf32> to vector<32x128xf32>
    %47 = arith.mulf %43, %46 : vector<32x128xf32>
    %48 = arith.addf %40, %47 : vector<32x128xf32>
    %c6 = arith.constant 6 : index
    %c0_30 = arith.constant 0 : index
    %c0_31 = arith.constant 0 : index
    %49 = vector.load %arg1[%c6, %c0_30, %c0_31] : memref<9x32x128xbf16, #tpu.memory_space<vmem>>, vector<1x32x128xbf16>
    %50 = vector.shape_cast %49 : vector<1x32x128xbf16> to vector<32x128xbf16>
    %51 = arith.extf %50 : vector<32x128xbf16> to vector<32x128xf32>
    %c6_32 = arith.constant 6 : index
    %c0_33 = arith.constant 0 : index
    %c0_34 = arith.constant 0 : index
    %52 = vector.load %arg2[%c6_32, %c0_33, %c0_34] : memref<9x1x128xf32, #tpu.memory_space<vmem>>, vector<1x1x128xf32>
    %53 = vector.shape_cast %52 : vector<1x1x128xf32> to vector<1x128xf32>
    %54 = vector.broadcast %53 : vector<1x128xf32> to vector<32x128xf32>
    %55 = arith.mulf %51, %54 : vector<32x128xf32>
    %56 = arith.addf %48, %55 : vector<32x128xf32>
    %c7 = arith.constant 7 : index
    %c0_35 = arith.constant 0 : index
    %c0_36 = arith.constant 0 : index
    %57 = vector.load %arg1[%c7, %c0_35, %c0_36] : memref<9x32x128xbf16, #tpu.memory_space<vmem>>, vector<1x32x128xbf16>
    %58 = vector.shape_cast %57 : vector<1x32x128xbf16> to vector<32x128xbf16>
    %59 = arith.extf %58 : vector<32x128xbf16> to vector<32x128xf32>
    %c7_37 = arith.constant 7 : index
    %c0_38 = arith.constant 0 : index
    %c0_39 = arith.constant 0 : index
    %60 = vector.load %arg2[%c7_37, %c0_38, %c0_39] : memref<9x1x128xf32, #tpu.memory_space<vmem>>, vector<1x1x128xf32>
    %61 = vector.shape_cast %60 : vector<1x1x128xf32> to vector<1x128xf32>
    %62 = vector.broadcast %61 : vector<1x128xf32> to vector<32x128xf32>
    %63 = arith.mulf %59, %62 : vector<32x128xf32>
    %64 = arith.addf %56, %63 : vector<32x128xf32>
    %c8 = arith.constant 8 : index
    %c0_40 = arith.constant 0 : index
    %c0_41 = arith.constant 0 : index
    %65 = vector.load %arg1[%c8, %c0_40, %c0_41] : memref<9x32x128xbf16, #tpu.memory_space<vmem>>, vector<1x32x128xbf16>
    %66 = vector.shape_cast %65 : vector<1x32x128xbf16> to vector<32x128xbf16>
    %67 = arith.extf %66 : vector<32x128xbf16> to vector<32x128xf32>
    %c8_42 = arith.constant 8 : index
    %c0_43 = arith.constant 0 : index
    %c0_44 = arith.constant 0 : index
    %68 = vector.load %arg2[%c8_42, %c0_43, %c0_44] : memref<9x1x128xf32, #tpu.memory_space<vmem>>, vector<1x1x128xf32>
    %69 = vector.shape_cast %68 : vector<1x1x128xf32> to vector<1x128xf32>
    %70 = vector.broadcast %69 : vector<1x128xf32> to vector<32x128xf32>
    %71 = arith.mulf %67, %70 : vector<32x128xf32>
    %72 = arith.addf %64, %71 : vector<32x128xf32>
    %c0_45 = arith.constant 0 : index
    %c0_46 = arith.constant 0 : index
    %73 = vector.load %arg3[%c0_45, %c0_46] : memref<1x128xf32, #tpu.memory_space<vmem>>, vector<1x128xf32>
    %74 = vector.broadcast %73 : vector<1x128xf32> to vector<32x128xf32>
    %75 = arith.addf %72, %74 : vector<32x128xf32>
    %76 = arith.negf %75 : vector<32x128xf32>
    %77 = math.exp %76 : vector<32x128xf32>
    %cst_47 = arith.constant 1.000000e+00 : f32
    %78 = vector.broadcast %cst_47 : f32 to vector<32x128xf32>
    %79 = arith.addf %78, %77 : vector<32x128xf32>
    %80 = arith.divf %78, %79 : vector<32x128xf32>
    %81 = arith.mulf %75, %80 : vector<32x128xf32>
    %82 = arith.truncf %81 : vector<32x128xf32> to vector<32x128xbf16>
    %c0_48 = arith.constant 0 : index
    %c0_49 = arith.constant 0 : index
    %83 = vector.load %arg4[%c0_48, %c0_49] : memref<32x128xbf16, #tpu.memory_space<vmem>>, vector<32x128xbf16>
    tpu.vector_store %arg4[%c0_48, %c0_49], %82 {strides = array<i32>} : memref<32x128xbf16, #tpu.memory_space<vmem>>, vector<32x128xbf16>,
    return
  }
  func.func @transform_0(%arg0: i32) -> (i32, i32, i32) {
    %c0_i32 = arith.constant 0 : i32
    %c0_i32_0 = arith.constant 0 : i32
    %c0_i32_1 = arith.constant 0 : i32
    return %c0_i32, %arg0, %c0_i32_0 : i32, i32, i32
  }
  func.func @transform_1(%arg0: i32) -> (i32, i32, i32) {
    %c0_i32 = arith.constant 0 : i32
    %c0_i32_0 = arith.constant 0 : i32
    %c0_i32_1 = arith.constant 0 : i32
    %c0_i32_2 = arith.constant 0 : i32
    return %c0_i32, %c0_i32_0, %c0_i32_1 : i32, i32, i32
  }
  func.func @transform_2(%arg0: i32) -> (i32, i32) {
    %c0_i32 = arith.constant 0 : i32
    %c0_i32_0 = arith.constant 0 : i32
    %c0_i32_1 = arith.constant 0 : i32
    return %c0_i32, %c0_i32_0 : i32, i32
  }
  func.func @transform_3(%arg0: i32) -> (i32, i32) {
    %c0_i32 = arith.constant 0 : i32
    %c0_i32_0 = arith.constant 0 : i32
    return %arg0, %c0_i32 : i32, i32
  }
}

module attributes {stable_mosaic.version = 11 : i64} {
  func.func @_pool_kernel(%arg0: i32, %arg1: memref<2x16x128xbf16, #tpu.memory_space<vmem>>, %arg2: memref<2x128xf32, #tpu.memory_space<vmem>>) attributes {dimension_semantics = [#tpu.dimension_semantics<arbitrary>], iteration_bounds = array<i64: 1>, scalar_prefetch = 0 : i64, scratch_operands = 0 : i64, tpu.core_type = #tpu.core_type<tc>, window_params = [{transform_indices = @transform_0, window_bounds = array<i64: 2, 16, 128>}, {pipeline_mode = #tpu.pipeline_mode<synchronous>, transform_indices = @transform_1, window_bounds = array<i64: 2, 128>}]} {
    %c0_i32 = arith.constant 0 : i32
    %0 = arith.cmpi eq, %arg0, %c0_i32 : i32
    %1 = arith.extui %0 : i1 to i32
    %c0_i32_0 = arith.constant 0 : i32
    %2 = arith.cmpi ne, %1, %c0_i32_0 : i32
    scf.if %2 {
      %cst_8 = arith.constant 0.000000e+00 : f32
      %11 = vector.broadcast %cst_8 : f32 to vector<2x128xf32>
      %c0_9 = arith.constant 0 : index
      %c0_10 = arith.constant 0 : index
      %12 = vector.load %arg2[%c0_9, %c0_10] : memref<2x128xf32, #tpu.memory_space<vmem>>, vector<2x128xf32>
      tpu.vector_store %arg2[%c0_9, %c0_10], %11 {strides = array<i32>} : memref<2x128xf32, #tpu.memory_space<vmem>>, vector<2x128xf32>,
    } else {
    }
    %c0 = arith.constant 0 : index
    %c0_1 = arith.constant 0 : index
    %3 = vector.load %arg2[%c0, %c0_1] : memref<2x128xf32, #tpu.memory_space<vmem>>, vector<2x128xf32>
    %c0_2 = arith.constant 0 : index
    %c0_3 = arith.constant 0 : index
    %c0_4 = arith.constant 0 : index
    %4 = vector.load %arg1[%c0_2, %c0_3, %c0_4] : memref<2x16x128xbf16, #tpu.memory_space<vmem>>, vector<2x16x128xbf16>
    %5 = arith.extf %4 : vector<2x16x128xbf16> to vector<2x16x128xf32>
    %cst = arith.constant dense<0.000000e+00> : vector<2x128xf32>
    %6 = vector.multi_reduction <add>, %5, %cst [1] : vector<2x16x128xf32> to vector<2x128xf32>
    %cst_5 = arith.constant 6.250000e-02 : f32
    %7 = vector.broadcast %cst_5 : f32 to vector<2x128xf32>
    %8 = arith.mulf %6, %7 : vector<2x128xf32>
    %9 = arith.addf %3, %8 : vector<2x128xf32>
    %c0_6 = arith.constant 0 : index
    %c0_7 = arith.constant 0 : index
    %10 = vector.load %arg2[%c0_6, %c0_7] : memref<2x128xf32, #tpu.memory_space<vmem>>, vector<2x128xf32>
    tpu.vector_store %arg2[%c0_6, %c0_7], %9 {strides = array<i32>} : memref<2x128xf32, #tpu.memory_space<vmem>>, vector<2x128xf32>,
    return
  }
  func.func @transform_0(%arg0: i32) -> (i32, i32, i32) {
    %c0_i32 = arith.constant 0 : i32
    %c0_i32_0 = arith.constant 0 : i32
    %c0_i32_1 = arith.constant 0 : i32
    return %c0_i32, %arg0, %c0_i32_0 : i32, i32, i32
  }
  func.func @transform_1(%arg0: i32) -> (i32, i32) {
    %c0_i32 = arith.constant 0 : i32
    %c0_i32_0 = arith.constant 0 : i32
    %c0_i32_1 = arith.constant 0 : i32
    return %c0_i32, %c0_i32_0 : i32, i32
  }
}

module attributes {stable_mosaic.version = 11 : i64} {
  func.func @_mm_kernel(%arg0: i32, %arg1: i32, %arg2: i32, %arg3: memref<8x128xbf16, #tpu.memory_space<vmem>>, %arg4: memref<128x128xbf16, #tpu.memory_space<vmem>>, %arg5: memref<1x128xf32, #tpu.memory_space<vmem>>, %arg6: memref<8x128xf32, #tpu.memory_space<vmem>>, %arg7: memref<8x128xf32, #tpu.memory_space<vmem>>) attributes {dimension_semantics = [#tpu.dimension_semantics<parallel>, #tpu.dimension_semantics<parallel>, #tpu.dimension_semantics<arbitrary>], iteration_bounds = array<i64: 1, 1, 1>, scalar_prefetch = 0 : i64, scratch_operands = 1 : i64, tpu.core_type = #tpu.core_type<tc>, window_params = [{transform_indices = @transform_0, window_bounds = array<i64: 8, 128>}, {transform_indices = @transform_1, window_bounds = array<i64: 128, 128>}, {transform_indices = @transform_2, window_bounds = array<i64: 1, 128>}, {transform_indices = @transform_3, window_bounds = array<i64: 8, 128>}]} {
    %c0_i32 = arith.constant 0 : i32
    %0 = arith.cmpi eq, %arg2, %c0_i32 : i32
    %1 = arith.extui %0 : i1 to i32
    %c0_i32_0 = arith.constant 0 : i32
    %2 = arith.cmpi ne, %1, %c0_i32_0 : i32
    scf.if %2 {
      %cst_10 = arith.constant 0.000000e+00 : f32
      %12 = vector.broadcast %cst_10 : f32 to vector<8x128xf32>
      %c0_11 = arith.constant 0 : index
      %c0_12 = arith.constant 0 : index
      %13 = vector.load %arg7[%c0_11, %c0_12] : memref<8x128xf32, #tpu.memory_space<vmem>>, vector<8x128xf32>
      tpu.vector_store %arg7[%c0_11, %c0_12], %12 {strides = array<i32>} : memref<8x128xf32, #tpu.memory_space<vmem>>, vector<8x128xf32>,
    } else {
    }
    %c0 = arith.constant 0 : index
    %c0_1 = arith.constant 0 : index
    %3 = vector.load %arg7[%c0, %c0_1] : memref<8x128xf32, #tpu.memory_space<vmem>>, vector<8x128xf32>
    %c0_2 = arith.constant 0 : index
    %c0_3 = arith.constant 0 : index
    %4 = vector.load %arg3[%c0_2, %c0_3] : memref<8x128xbf16, #tpu.memory_space<vmem>>, vector<8x128xbf16>
    %c0_4 = arith.constant 0 : index
    %c0_5 = arith.constant 0 : index
    %5 = vector.load %arg4[%c0_4, %c0_5] : memref<128x128xbf16, #tpu.memory_space<vmem>>, vector<128x128xbf16>
    %cst = arith.constant dense<0.000000e+00> : vector<8x128xf32>
    %6 = tpu.matmul %4, %5, %cst {dimension_numbers = #tpu.dot_dimension_numbers<[1], [0], [0], [1], [0, 0, 1, 1], [], []>} : vector<8x128xbf16>, vector<128x128xbf16>, vector<8x128xf32> -> vector<8x128xf32>
    %7 = arith.addf %3, %6 : vector<8x128xf32>
    %c0_6 = arith.constant 0 : index
    %c0_7 = arith.constant 0 : index
    %8 = vector.load %arg7[%c0_6, %c0_7] : memref<8x128xf32, #tpu.memory_space<vmem>>, vector<8x128xf32>
    tpu.vector_store %arg7[%c0_6, %c0_7], %7 {strides = array<i32>} : memref<8x128xf32, #tpu.memory_space<vmem>>, vector<8x128xf32>,
    %c0_i32_8 = arith.constant 0 : i32
    %9 = arith.cmpi eq, %arg2, %c0_i32_8 : i32
    %10 = arith.extui %9 : i1 to i32
    %c0_i32_9 = arith.constant 0 : i32
    %11 = arith.cmpi ne, %10, %c0_i32_9 : i32
    scf.if %11 {
      %c0_10 = arith.constant 0 : index
      %c0_11 = arith.constant 0 : index
      %12 = vector.load %arg7[%c0_10, %c0_11] : memref<8x128xf32, #tpu.memory_space<vmem>>, vector<8x128xf32>
      %c0_12 = arith.constant 0 : index
      %c0_13 = arith.constant 0 : index
      %13 = vector.load %arg5[%c0_12, %c0_13] : memref<1x128xf32, #tpu.memory_space<vmem>>, vector<1x128xf32>
      %14 = vector.broadcast %13 : vector<1x128xf32> to vector<8x128xf32>
      %15 = arith.addf %12, %14 : vector<8x128xf32>
      %16 = arith.negf %15 : vector<8x128xf32>
      %17 = math.exp %16 : vector<8x128xf32>
      %cst_14 = arith.constant 1.000000e+00 : f32
      %18 = vector.broadcast %cst_14 : f32 to vector<8x128xf32>
      %19 = arith.addf %18, %17 : vector<8x128xf32>
      %20 = arith.divf %18, %19 : vector<8x128xf32>
      %21 = arith.mulf %15, %20 : vector<8x128xf32>
      %c0_15 = arith.constant 0 : index
      %c0_16 = arith.constant 0 : index
      %22 = vector.load %arg6[%c0_15, %c0_16] : memref<8x128xf32, #tpu.memory_space<vmem>>, vector<8x128xf32>
      tpu.vector_store %arg6[%c0_15, %c0_16], %21 {strides = array<i32>} : memref<8x128xf32, #tpu.memory_space<vmem>>, vector<8x128xf32>,
    } else {
    }
    return
  }
  func.func @transform_0(%arg0: i32, %arg1: i32, %arg2: i32) -> (i32, i32) {
    %c0_i32 = arith.constant 0 : i32
    return %arg0, %arg2 : i32, i32
  }
  func.func @transform_1(%arg0: i32, %arg1: i32, %arg2: i32) -> (i32, i32) {
    %c0_i32 = arith.constant 0 : i32
    return %arg2, %arg1 : i32, i32
  }
  func.func @transform_2(%arg0: i32, %arg1: i32, %arg2: i32) -> (i32, i32) {
    %c0_i32 = arith.constant 0 : i32
    %c0_i32_0 = arith.constant 0 : i32
    return %c0_i32, %arg1 : i32, i32
  }
  func.func @transform_3(%arg0: i32, %arg1: i32, %arg2: i32) -> (i32, i32) {
    %c0_i32 = arith.constant 0 : i32
    return %arg0, %arg1 : i32, i32
  }
}

module attributes {stable_mosaic.version = 11 : i64} {
  func.func @_mm_kernel(%arg0: i32, %arg1: i32, %arg2: i32, %arg3: memref<8x128xbf16, #tpu.memory_space<vmem>>, %arg4: memref<128x128xbf16, #tpu.memory_space<vmem>>, %arg5: memref<1x128xf32, #tpu.memory_space<vmem>>, %arg6: memref<8x128xf32, #tpu.memory_space<vmem>>, %arg7: memref<8x128xf32, #tpu.memory_space<vmem>>) attributes {dimension_semantics = [#tpu.dimension_semantics<parallel>, #tpu.dimension_semantics<parallel>, #tpu.dimension_semantics<arbitrary>], iteration_bounds = array<i64: 1, 1, 1>, scalar_prefetch = 0 : i64, scratch_operands = 1 : i64, tpu.core_type = #tpu.core_type<tc>, window_params = [{transform_indices = @transform_0, window_bounds = array<i64: 8, 128>}, {transform_indices = @transform_1, window_bounds = array<i64: 128, 128>}, {transform_indices = @transform_2, window_bounds = array<i64: 1, 128>}, {transform_indices = @transform_3, window_bounds = array<i64: 8, 128>}]} {
    %c0_i32 = arith.constant 0 : i32
    %0 = arith.cmpi eq, %arg2, %c0_i32 : i32
    %1 = arith.extui %0 : i1 to i32
    %c0_i32_0 = arith.constant 0 : i32
    %2 = arith.cmpi ne, %1, %c0_i32_0 : i32
    scf.if %2 {
      %cst_10 = arith.constant 0.000000e+00 : f32
      %12 = vector.broadcast %cst_10 : f32 to vector<8x128xf32>
      %c0_11 = arith.constant 0 : index
      %c0_12 = arith.constant 0 : index
      %13 = vector.load %arg7[%c0_11, %c0_12] : memref<8x128xf32, #tpu.memory_space<vmem>>, vector<8x128xf32>
      tpu.vector_store %arg7[%c0_11, %c0_12], %12 {strides = array<i32>} : memref<8x128xf32, #tpu.memory_space<vmem>>, vector<8x128xf32>,
    } else {
    }
    %c0 = arith.constant 0 : index
    %c0_1 = arith.constant 0 : index
    %3 = vector.load %arg7[%c0, %c0_1] : memref<8x128xf32, #tpu.memory_space<vmem>>, vector<8x128xf32>
    %c0_2 = arith.constant 0 : index
    %c0_3 = arith.constant 0 : index
    %4 = vector.load %arg3[%c0_2, %c0_3] : memref<8x128xbf16, #tpu.memory_space<vmem>>, vector<8x128xbf16>
    %c0_4 = arith.constant 0 : index
    %c0_5 = arith.constant 0 : index
    %5 = vector.load %arg4[%c0_4, %c0_5] : memref<128x128xbf16, #tpu.memory_space<vmem>>, vector<128x128xbf16>
    %cst = arith.constant dense<0.000000e+00> : vector<8x128xf32>
    %6 = tpu.matmul %4, %5, %cst {dimension_numbers = #tpu.dot_dimension_numbers<[1], [0], [0], [1], [0, 0, 1, 1], [], []>} : vector<8x128xbf16>, vector<128x128xbf16>, vector<8x128xf32> -> vector<8x128xf32>
    %7 = arith.addf %3, %6 : vector<8x128xf32>
    %c0_6 = arith.constant 0 : index
    %c0_7 = arith.constant 0 : index
    %8 = vector.load %arg7[%c0_6, %c0_7] : memref<8x128xf32, #tpu.memory_space<vmem>>, vector<8x128xf32>
    tpu.vector_store %arg7[%c0_6, %c0_7], %7 {strides = array<i32>} : memref<8x128xf32, #tpu.memory_space<vmem>>, vector<8x128xf32>,
    %c0_i32_8 = arith.constant 0 : i32
    %9 = arith.cmpi eq, %arg2, %c0_i32_8 : i32
    %10 = arith.extui %9 : i1 to i32
    %c0_i32_9 = arith.constant 0 : i32
    %11 = arith.cmpi ne, %10, %c0_i32_9 : i32
    scf.if %11 {
      %c0_10 = arith.constant 0 : index
      %c0_11 = arith.constant 0 : index
      %12 = vector.load %arg7[%c0_10, %c0_11] : memref<8x128xf32, #tpu.memory_space<vmem>>, vector<8x128xf32>
      %c0_12 = arith.constant 0 : index
      %c0_13 = arith.constant 0 : index
      %13 = vector.load %arg5[%c0_12, %c0_13] : memref<1x128xf32, #tpu.memory_space<vmem>>, vector<1x128xf32>
      %14 = vector.broadcast %13 : vector<1x128xf32> to vector<8x128xf32>
      %15 = arith.addf %12, %14 : vector<8x128xf32>
      %16 = arith.negf %15 : vector<8x128xf32>
      %17 = math.exp %16 : vector<8x128xf32>
      %cst_14 = arith.constant 1.000000e+00 : f32
      %18 = vector.broadcast %cst_14 : f32 to vector<8x128xf32>
      %19 = arith.addf %18, %17 : vector<8x128xf32>
      %20 = arith.divf %18, %19 : vector<8x128xf32>
      %c0_15 = arith.constant 0 : index
      %c0_16 = arith.constant 0 : index
      %21 = vector.load %arg6[%c0_15, %c0_16] : memref<8x128xf32, #tpu.memory_space<vmem>>, vector<8x128xf32>
      tpu.vector_store %arg6[%c0_15, %c0_16], %20 {strides = array<i32>} : memref<8x128xf32, #tpu.memory_space<vmem>>, vector<8x128xf32>,
    } else {
    }
    return
  }
  func.func @transform_0(%arg0: i32, %arg1: i32, %arg2: i32) -> (i32, i32) {
    %c0_i32 = arith.constant 0 : i32
    return %arg0, %arg2 : i32, i32
  }
  func.func @transform_1(%arg0: i32, %arg1: i32, %arg2: i32) -> (i32, i32) {
    %c0_i32 = arith.constant 0 : i32
    return %arg2, %arg1 : i32, i32
  }
  func.func @transform_2(%arg0: i32, %arg1: i32, %arg2: i32) -> (i32, i32) {
    %c0_i32 = arith.constant 0 : i32
    %c0_i32_0 = arith.constant 0 : i32
    return %c0_i32, %arg1 : i32, i32
  }
  func.func @transform_3(%arg0: i32, %arg1: i32, %arg2: i32) -> (i32, i32) {
    %c0_i32 = arith.constant 0 : i32
    return %arg0, %arg1 : i32, i32
  }
}

module attributes {stable_mosaic.version = 11 : i64} {
  func.func @_se_apply_kernel(%arg0: i32, %arg1: memref<2x16x128xbf16, #tpu.memory_space<vmem>>, %arg2: memref<2x1x128xf32, #tpu.memory_space<vmem>>, %arg3: memref<2x16x128xbf16, #tpu.memory_space<vmem>>) attributes {dimension_semantics = [#tpu.dimension_semantics<parallel>], iteration_bounds = array<i64: 1>, scalar_prefetch = 0 : i64, scratch_operands = 0 : i64, tpu.core_type = #tpu.core_type<tc>, window_params = [{transform_indices = @transform_0, window_bounds = array<i64: 2, 16, 128>}, {pipeline_mode = #tpu.pipeline_mode<synchronous>, transform_indices = @transform_1, window_bounds = array<i64: 2, 1, 128>}, {transform_indices = @transform_2, window_bounds = array<i64: 2, 16, 128>}]} {
    %c0 = arith.constant 0 : index
    %c0_0 = arith.constant 0 : index
    %c0_1 = arith.constant 0 : index
    %0 = vector.load %arg1[%c0, %c0_0, %c0_1] : memref<2x16x128xbf16, #tpu.memory_space<vmem>>, vector<2x16x128xbf16>
    %1 = arith.extf %0 : vector<2x16x128xbf16> to vector<2x16x128xf32>
    %c0_2 = arith.constant 0 : index
    %c0_3 = arith.constant 0 : index
    %c0_4 = arith.constant 0 : index
    %2 = vector.load %arg2[%c0_2, %c0_3, %c0_4] : memref<2x1x128xf32, #tpu.memory_space<vmem>>, vector<2x1x128xf32>
    %3 = vector.broadcast %2 : vector<2x1x128xf32> to vector<2x16x128xf32>
    %4 = arith.mulf %1, %3 : vector<2x16x128xf32>
    %5 = arith.truncf %4 : vector<2x16x128xf32> to vector<2x16x128xbf16>
    %c0_5 = arith.constant 0 : index
    %c0_6 = arith.constant 0 : index
    %c0_7 = arith.constant 0 : index
    %6 = vector.load %arg3[%c0_5, %c0_6, %c0_7] : memref<2x16x128xbf16, #tpu.memory_space<vmem>>, vector<2x16x128xbf16>
    tpu.vector_store %arg3[%c0_5, %c0_6, %c0_7], %5 {strides = array<i32>} : memref<2x16x128xbf16, #tpu.memory_space<vmem>>, vector<2x16x128xbf16>,
    return
  }
  func.func @transform_0(%arg0: i32) -> (i32, i32, i32) {
    %c0_i32 = arith.constant 0 : i32
    %c0_i32_0 = arith.constant 0 : i32
    %c0_i32_1 = arith.constant 0 : i32
    return %c0_i32, %arg0, %c0_i32_0 : i32, i32, i32
  }
  func.func @transform_1(%arg0: i32) -> (i32, i32, i32) {
    %c0_i32 = arith.constant 0 : i32
    %c0_i32_0 = arith.constant 0 : i32
    %c0_i32_1 = arith.constant 0 : i32
    %c0_i32_2 = arith.constant 0 : i32
    return %c0_i32, %c0_i32_0, %c0_i32_1 : i32, i32, i32
  }
  func.func @transform_2(%arg0: i32) -> (i32, i32, i32) {
    %c0_i32 = arith.constant 0 : i32
    %c0_i32_0 = arith.constant 0 : i32
    %c0_i32_1 = arith.constant 0 : i32
    return %c0_i32, %arg0, %c0_i32_0 : i32, i32, i32
  }
}

module attributes {stable_mosaic.version = 11 : i64} {
  func.func @_mm_kernel(%arg0: i32, %arg1: i32, %arg2: i32, %arg3: memref<32x128xbf16, #tpu.memory_space<vmem>>, %arg4: memref<128x128xbf16, #tpu.memory_space<vmem>>, %arg5: memref<1x128xf32, #tpu.memory_space<vmem>>, %arg6: memref<32x128xbf16, #tpu.memory_space<vmem>>, %arg7: memref<32x128xf32, #tpu.memory_space<vmem>>) attributes {dimension_semantics = [#tpu.dimension_semantics<parallel>, #tpu.dimension_semantics<parallel>, #tpu.dimension_semantics<arbitrary>], iteration_bounds = array<i64: 1, 1, 1>, scalar_prefetch = 0 : i64, scratch_operands = 1 : i64, tpu.core_type = #tpu.core_type<tc>, window_params = [{transform_indices = @transform_0, window_bounds = array<i64: 32, 128>}, {transform_indices = @transform_1, window_bounds = array<i64: 128, 128>}, {transform_indices = @transform_2, window_bounds = array<i64: 1, 128>}, {transform_indices = @transform_3, window_bounds = array<i64: 32, 128>}]} {
    %c0_i32 = arith.constant 0 : i32
    %0 = arith.cmpi eq, %arg2, %c0_i32 : i32
    %1 = arith.extui %0 : i1 to i32
    %c0_i32_0 = arith.constant 0 : i32
    %2 = arith.cmpi ne, %1, %c0_i32_0 : i32
    scf.if %2 {
      %cst_10 = arith.constant 0.000000e+00 : f32
      %12 = vector.broadcast %cst_10 : f32 to vector<32x128xf32>
      %c0_11 = arith.constant 0 : index
      %c0_12 = arith.constant 0 : index
      %13 = vector.load %arg7[%c0_11, %c0_12] : memref<32x128xf32, #tpu.memory_space<vmem>>, vector<32x128xf32>
      tpu.vector_store %arg7[%c0_11, %c0_12], %12 {strides = array<i32>} : memref<32x128xf32, #tpu.memory_space<vmem>>, vector<32x128xf32>,
    } else {
    }
    %c0 = arith.constant 0 : index
    %c0_1 = arith.constant 0 : index
    %3 = vector.load %arg7[%c0, %c0_1] : memref<32x128xf32, #tpu.memory_space<vmem>>, vector<32x128xf32>
    %c0_2 = arith.constant 0 : index
    %c0_3 = arith.constant 0 : index
    %4 = vector.load %arg3[%c0_2, %c0_3] : memref<32x128xbf16, #tpu.memory_space<vmem>>, vector<32x128xbf16>
    %c0_4 = arith.constant 0 : index
    %c0_5 = arith.constant 0 : index
    %5 = vector.load %arg4[%c0_4, %c0_5] : memref<128x128xbf16, #tpu.memory_space<vmem>>, vector<128x128xbf16>
    %cst = arith.constant dense<0.000000e+00> : vector<32x128xf32>
    %6 = tpu.matmul %4, %5, %cst {dimension_numbers = #tpu.dot_dimension_numbers<[1], [0], [0], [1], [0, 0, 1, 1], [], []>} : vector<32x128xbf16>, vector<128x128xbf16>, vector<32x128xf32> -> vector<32x128xf32>
    %7 = arith.addf %3, %6 : vector<32x128xf32>
    %c0_6 = arith.constant 0 : index
    %c0_7 = arith.constant 0 : index
    %8 = vector.load %arg7[%c0_6, %c0_7] : memref<32x128xf32, #tpu.memory_space<vmem>>, vector<32x128xf32>
    tpu.vector_store %arg7[%c0_6, %c0_7], %7 {strides = array<i32>} : memref<32x128xf32, #tpu.memory_space<vmem>>, vector<32x128xf32>,
    %c0_i32_8 = arith.constant 0 : i32
    %9 = arith.cmpi eq, %arg2, %c0_i32_8 : i32
    %10 = arith.extui %9 : i1 to i32
    %c0_i32_9 = arith.constant 0 : i32
    %11 = arith.cmpi ne, %10, %c0_i32_9 : i32
    scf.if %11 {
      %c0_10 = arith.constant 0 : index
      %c0_11 = arith.constant 0 : index
      %12 = vector.load %arg7[%c0_10, %c0_11] : memref<32x128xf32, #tpu.memory_space<vmem>>, vector<32x128xf32>
      %c0_12 = arith.constant 0 : index
      %c0_13 = arith.constant 0 : index
      %13 = vector.load %arg5[%c0_12, %c0_13] : memref<1x128xf32, #tpu.memory_space<vmem>>, vector<1x128xf32>
      %14 = vector.broadcast %13 : vector<1x128xf32> to vector<32x128xf32>
      %15 = arith.addf %12, %14 : vector<32x128xf32>
      %16 = arith.truncf %15 : vector<32x128xf32> to vector<32x128xbf16>
      %c0_14 = arith.constant 0 : index
      %c0_15 = arith.constant 0 : index
      %17 = vector.load %arg6[%c0_14, %c0_15] : memref<32x128xbf16, #tpu.memory_space<vmem>>, vector<32x128xbf16>
      tpu.vector_store %arg6[%c0_14, %c0_15], %16 {strides = array<i32>} : memref<32x128xbf16, #tpu.memory_space<vmem>>, vector<32x128xbf16>,
    } else {
    }
    return
  }
  func.func @transform_0(%arg0: i32, %arg1: i32, %arg2: i32) -> (i32, i32) {
    %c0_i32 = arith.constant 0 : i32
    return %arg0, %arg2 : i32, i32
  }
  func.func @transform_1(%arg0: i32, %arg1: i32, %arg2: i32) -> (i32, i32) {
    %c0_i32 = arith.constant 0 : i32
    return %arg2, %arg1 : i32, i32
  }
  func.func @transform_2(%arg0: i32, %arg1: i32, %arg2: i32) -> (i32, i32) {
    %c0_i32 = arith.constant 0 : i32
    %c0_i32_0 = arith.constant 0 : i32
    return %c0_i32, %arg1 : i32, i32
  }
  func.func @transform_3(%arg0: i32, %arg1: i32, %arg2: i32) -> (i32, i32) {
    %c0_i32 = arith.constant 0 : i32
    return %arg0, %arg1 : i32, i32
  }
}

module attributes {stable_mosaic.version = 11 : i64} {
  func.func @_mm_kernel(%arg0: i32, %arg1: i32, %arg2: i32, %arg3: memref<32x128xbf16, #tpu.memory_space<vmem>>, %arg4: memref<128x256xbf16, #tpu.memory_space<vmem>>, %arg5: memref<1x256xf32, #tpu.memory_space<vmem>>, %arg6: memref<32x256xbf16, #tpu.memory_space<vmem>>, %arg7: memref<32x256xf32, #tpu.memory_space<vmem>>) attributes {dimension_semantics = [#tpu.dimension_semantics<parallel>, #tpu.dimension_semantics<parallel>, #tpu.dimension_semantics<arbitrary>], iteration_bounds = array<i64: 1, 1, 1>, scalar_prefetch = 0 : i64, scratch_operands = 1 : i64, tpu.core_type = #tpu.core_type<tc>, window_params = [{transform_indices = @transform_0, window_bounds = array<i64: 32, 128>}, {transform_indices = @transform_1, window_bounds = array<i64: 128, 256>}, {transform_indices = @transform_2, window_bounds = array<i64: 1, 256>}, {transform_indices = @transform_3, window_bounds = array<i64: 32, 256>}]} {
    %c0_i32 = arith.constant 0 : i32
    %0 = arith.cmpi eq, %arg2, %c0_i32 : i32
    %1 = arith.extui %0 : i1 to i32
    %c0_i32_0 = arith.constant 0 : i32
    %2 = arith.cmpi ne, %1, %c0_i32_0 : i32
    scf.if %2 {
      %cst_10 = arith.constant 0.000000e+00 : f32
      %12 = vector.broadcast %cst_10 : f32 to vector<32x256xf32>
      %c0_11 = arith.constant 0 : index
      %c0_12 = arith.constant 0 : index
      %13 = vector.load %arg7[%c0_11, %c0_12] : memref<32x256xf32, #tpu.memory_space<vmem>>, vector<32x256xf32>
      tpu.vector_store %arg7[%c0_11, %c0_12], %12 {strides = array<i32>} : memref<32x256xf32, #tpu.memory_space<vmem>>, vector<32x256xf32>,
    } else {
    }
    %c0 = arith.constant 0 : index
    %c0_1 = arith.constant 0 : index
    %3 = vector.load %arg7[%c0, %c0_1] : memref<32x256xf32, #tpu.memory_space<vmem>>, vector<32x256xf32>
    %c0_2 = arith.constant 0 : index
    %c0_3 = arith.constant 0 : index
    %4 = vector.load %arg3[%c0_2, %c0_3] : memref<32x128xbf16, #tpu.memory_space<vmem>>, vector<32x128xbf16>
    %c0_4 = arith.constant 0 : index
    %c0_5 = arith.constant 0 : index
    %5 = vector.load %arg4[%c0_4, %c0_5] : memref<128x256xbf16, #tpu.memory_space<vmem>>, vector<128x256xbf16>
    %cst = arith.constant dense<0.000000e+00> : vector<32x256xf32>
    %6 = tpu.matmul %4, %5, %cst {dimension_numbers = #tpu.dot_dimension_numbers<[1], [0], [0], [1], [0, 0, 1, 1], [], []>} : vector<32x128xbf16>, vector<128x256xbf16>, vector<32x256xf32> -> vector<32x256xf32>
    %7 = arith.addf %3, %6 : vector<32x256xf32>
    %c0_6 = arith.constant 0 : index
    %c0_7 = arith.constant 0 : index
    %8 = vector.load %arg7[%c0_6, %c0_7] : memref<32x256xf32, #tpu.memory_space<vmem>>, vector<32x256xf32>
    tpu.vector_store %arg7[%c0_6, %c0_7], %7 {strides = array<i32>} : memref<32x256xf32, #tpu.memory_space<vmem>>, vector<32x256xf32>,
    %c0_i32_8 = arith.constant 0 : i32
    %9 = arith.cmpi eq, %arg2, %c0_i32_8 : i32
    %10 = arith.extui %9 : i1 to i32
    %c0_i32_9 = arith.constant 0 : i32
    %11 = arith.cmpi ne, %10, %c0_i32_9 : i32
    scf.if %11 {
      %c0_10 = arith.constant 0 : index
      %c0_11 = arith.constant 0 : index
      %12 = vector.load %arg7[%c0_10, %c0_11] : memref<32x256xf32, #tpu.memory_space<vmem>>, vector<32x256xf32>
      %c0_12 = arith.constant 0 : index
      %c0_13 = arith.constant 0 : index
      %13 = vector.load %arg5[%c0_12, %c0_13] : memref<1x256xf32, #tpu.memory_space<vmem>>, vector<1x256xf32>
      %14 = vector.broadcast %13 : vector<1x256xf32> to vector<32x256xf32>
      %15 = arith.addf %12, %14 : vector<32x256xf32>
      %16 = arith.negf %15 : vector<32x256xf32>
      %17 = math.exp %16 : vector<32x256xf32>
      %cst_14 = arith.constant 1.000000e+00 : f32
      %18 = vector.broadcast %cst_14 : f32 to vector<32x256xf32>
      %19 = arith.addf %18, %17 : vector<32x256xf32>
      %20 = arith.divf %18, %19 : vector<32x256xf32>
      %21 = arith.mulf %15, %20 : vector<32x256xf32>
      %22 = arith.truncf %21 : vector<32x256xf32> to vector<32x256xbf16>
      %c0_15 = arith.constant 0 : index
      %c0_16 = arith.constant 0 : index
      %23 = vector.load %arg6[%c0_15, %c0_16] : memref<32x256xbf16, #tpu.memory_space<vmem>>, vector<32x256xbf16>
      tpu.vector_store %arg6[%c0_15, %c0_16], %22 {strides = array<i32>} : memref<32x256xbf16, #tpu.memory_space<vmem>>, vector<32x256xbf16>,
    } else {
    }
    return
  }
  func.func @transform_0(%arg0: i32, %arg1: i32, %arg2: i32) -> (i32, i32) {
    %c0_i32 = arith.constant 0 : i32
    return %arg0, %arg2 : i32, i32
  }
  func.func @transform_1(%arg0: i32, %arg1: i32, %arg2: i32) -> (i32, i32) {
    %c0_i32 = arith.constant 0 : i32
    return %arg2, %arg1 : i32, i32
  }
  func.func @transform_2(%arg0: i32, %arg1: i32, %arg2: i32) -> (i32, i32) {
    %c0_i32 = arith.constant 0 : i32
    %c0_i32_0 = arith.constant 0 : i32
    return %c0_i32, %arg1 : i32, i32
  }
  func.func @transform_3(%arg0: i32, %arg1: i32, %arg2: i32) -> (i32, i32) {
    %c0_i32 = arith.constant 0 : i32
    return %arg0, %arg1 : i32, i32
  }
}

module attributes {stable_mosaic.version = 11 : i64} {
  func.func @_dw_kernel(%arg0: i32, %arg1: memref<9x32x256xbf16, #tpu.memory_space<vmem>>, %arg2: memref<9x1x256xf32, #tpu.memory_space<vmem>>, %arg3: memref<1x256xf32, #tpu.memory_space<vmem>>, %arg4: memref<32x256xbf16, #tpu.memory_space<vmem>>) attributes {dimension_semantics = [#tpu.dimension_semantics<parallel>], iteration_bounds = array<i64: 1>, scalar_prefetch = 0 : i64, scratch_operands = 0 : i64, tpu.core_type = #tpu.core_type<tc>, window_params = [{transform_indices = @transform_0, window_bounds = array<i64: 9, 32, 256>}, {pipeline_mode = #tpu.pipeline_mode<synchronous>, transform_indices = @transform_1, window_bounds = array<i64: 9, 1, 256>}, {pipeline_mode = #tpu.pipeline_mode<synchronous>, transform_indices = @transform_2, window_bounds = array<i64: 1, 256>}, {transform_indices = @transform_3, window_bounds = array<i64: 32, 256>}]} {
    %cst = arith.constant 0.000000e+00 : f32
    %0 = vector.broadcast %cst : f32 to vector<32x256xf32>
    %c0 = arith.constant 0 : index
    %c0_0 = arith.constant 0 : index
    %c0_1 = arith.constant 0 : index
    %1 = vector.load %arg1[%c0, %c0_0, %c0_1] : memref<9x32x256xbf16, #tpu.memory_space<vmem>>, vector<1x32x256xbf16>
    %2 = vector.shape_cast %1 : vector<1x32x256xbf16> to vector<32x256xbf16>
    %3 = arith.extf %2 : vector<32x256xbf16> to vector<32x256xf32>
    %c0_2 = arith.constant 0 : index
    %c0_3 = arith.constant 0 : index
    %c0_4 = arith.constant 0 : index
    %4 = vector.load %arg2[%c0_2, %c0_3, %c0_4] : memref<9x1x256xf32, #tpu.memory_space<vmem>>, vector<1x1x256xf32>
    %5 = vector.shape_cast %4 : vector<1x1x256xf32> to vector<1x256xf32>
    %6 = vector.broadcast %5 : vector<1x256xf32> to vector<32x256xf32>
    %7 = arith.mulf %3, %6 : vector<32x256xf32>
    %8 = arith.addf %0, %7 : vector<32x256xf32>
    %c1 = arith.constant 1 : index
    %c0_5 = arith.constant 0 : index
    %c0_6 = arith.constant 0 : index
    %9 = vector.load %arg1[%c1, %c0_5, %c0_6] : memref<9x32x256xbf16, #tpu.memory_space<vmem>>, vector<1x32x256xbf16>
    %10 = vector.shape_cast %9 : vector<1x32x256xbf16> to vector<32x256xbf16>
    %11 = arith.extf %10 : vector<32x256xbf16> to vector<32x256xf32>
    %c1_7 = arith.constant 1 : index
    %c0_8 = arith.constant 0 : index
    %c0_9 = arith.constant 0 : index
    %12 = vector.load %arg2[%c1_7, %c0_8, %c0_9] : memref<9x1x256xf32, #tpu.memory_space<vmem>>, vector<1x1x256xf32>
    %13 = vector.shape_cast %12 : vector<1x1x256xf32> to vector<1x256xf32>
    %14 = vector.broadcast %13 : vector<1x256xf32> to vector<32x256xf32>
    %15 = arith.mulf %11, %14 : vector<32x256xf32>
    %16 = arith.addf %8, %15 : vector<32x256xf32>
    %c2 = arith.constant 2 : index
    %c0_10 = arith.constant 0 : index
    %c0_11 = arith.constant 0 : index
    %17 = vector.load %arg1[%c2, %c0_10, %c0_11] : memref<9x32x256xbf16, #tpu.memory_space<vmem>>, vector<1x32x256xbf16>
    %18 = vector.shape_cast %17 : vector<1x32x256xbf16> to vector<32x256xbf16>
    %19 = arith.extf %18 : vector<32x256xbf16> to vector<32x256xf32>
    %c2_12 = arith.constant 2 : index
    %c0_13 = arith.constant 0 : index
    %c0_14 = arith.constant 0 : index
    %20 = vector.load %arg2[%c2_12, %c0_13, %c0_14] : memref<9x1x256xf32, #tpu.memory_space<vmem>>, vector<1x1x256xf32>
    %21 = vector.shape_cast %20 : vector<1x1x256xf32> to vector<1x256xf32>
    %22 = vector.broadcast %21 : vector<1x256xf32> to vector<32x256xf32>
    %23 = arith.mulf %19, %22 : vector<32x256xf32>
    %24 = arith.addf %16, %23 : vector<32x256xf32>
    %c3 = arith.constant 3 : index
    %c0_15 = arith.constant 0 : index
    %c0_16 = arith.constant 0 : index
    %25 = vector.load %arg1[%c3, %c0_15, %c0_16] : memref<9x32x256xbf16, #tpu.memory_space<vmem>>, vector<1x32x256xbf16>
    %26 = vector.shape_cast %25 : vector<1x32x256xbf16> to vector<32x256xbf16>
    %27 = arith.extf %26 : vector<32x256xbf16> to vector<32x256xf32>
    %c3_17 = arith.constant 3 : index
    %c0_18 = arith.constant 0 : index
    %c0_19 = arith.constant 0 : index
    %28 = vector.load %arg2[%c3_17, %c0_18, %c0_19] : memref<9x1x256xf32, #tpu.memory_space<vmem>>, vector<1x1x256xf32>
    %29 = vector.shape_cast %28 : vector<1x1x256xf32> to vector<1x256xf32>
    %30 = vector.broadcast %29 : vector<1x256xf32> to vector<32x256xf32>
    %31 = arith.mulf %27, %30 : vector<32x256xf32>
    %32 = arith.addf %24, %31 : vector<32x256xf32>
    %c4 = arith.constant 4 : index
    %c0_20 = arith.constant 0 : index
    %c0_21 = arith.constant 0 : index
    %33 = vector.load %arg1[%c4, %c0_20, %c0_21] : memref<9x32x256xbf16, #tpu.memory_space<vmem>>, vector<1x32x256xbf16>
    %34 = vector.shape_cast %33 : vector<1x32x256xbf16> to vector<32x256xbf16>
    %35 = arith.extf %34 : vector<32x256xbf16> to vector<32x256xf32>
    %c4_22 = arith.constant 4 : index
    %c0_23 = arith.constant 0 : index
    %c0_24 = arith.constant 0 : index
    %36 = vector.load %arg2[%c4_22, %c0_23, %c0_24] : memref<9x1x256xf32, #tpu.memory_space<vmem>>, vector<1x1x256xf32>
    %37 = vector.shape_cast %36 : vector<1x1x256xf32> to vector<1x256xf32>
    %38 = vector.broadcast %37 : vector<1x256xf32> to vector<32x256xf32>
    %39 = arith.mulf %35, %38 : vector<32x256xf32>
    %40 = arith.addf %32, %39 : vector<32x256xf32>
    %c5 = arith.constant 5 : index
    %c0_25 = arith.constant 0 : index
    %c0_26 = arith.constant 0 : index
    %41 = vector.load %arg1[%c5, %c0_25, %c0_26] : memref<9x32x256xbf16, #tpu.memory_space<vmem>>, vector<1x32x256xbf16>
    %42 = vector.shape_cast %41 : vector<1x32x256xbf16> to vector<32x256xbf16>
    %43 = arith.extf %42 : vector<32x256xbf16> to vector<32x256xf32>
    %c5_27 = arith.constant 5 : index
    %c0_28 = arith.constant 0 : index
    %c0_29 = arith.constant 0 : index
    %44 = vector.load %arg2[%c5_27, %c0_28, %c0_29] : memref<9x1x256xf32, #tpu.memory_space<vmem>>, vector<1x1x256xf32>
    %45 = vector.shape_cast %44 : vector<1x1x256xf32> to vector<1x256xf32>
    %46 = vector.broadcast %45 : vector<1x256xf32> to vector<32x256xf32>
    %47 = arith.mulf %43, %46 : vector<32x256xf32>
    %48 = arith.addf %40, %47 : vector<32x256xf32>
    %c6 = arith.constant 6 : index
    %c0_30 = arith.constant 0 : index
    %c0_31 = arith.constant 0 : index
    %49 = vector.load %arg1[%c6, %c0_30, %c0_31] : memref<9x32x256xbf16, #tpu.memory_space<vmem>>, vector<1x32x256xbf16>
    %50 = vector.shape_cast %49 : vector<1x32x256xbf16> to vector<32x256xbf16>
    %51 = arith.extf %50 : vector<32x256xbf16> to vector<32x256xf32>
    %c6_32 = arith.constant 6 : index
    %c0_33 = arith.constant 0 : index
    %c0_34 = arith.constant 0 : index
    %52 = vector.load %arg2[%c6_32, %c0_33, %c0_34] : memref<9x1x256xf32, #tpu.memory_space<vmem>>, vector<1x1x256xf32>
    %53 = vector.shape_cast %52 : vector<1x1x256xf32> to vector<1x256xf32>
    %54 = vector.broadcast %53 : vector<1x256xf32> to vector<32x256xf32>
    %55 = arith.mulf %51, %54 : vector<32x256xf32>
    %56 = arith.addf %48, %55 : vector<32x256xf32>
    %c7 = arith.constant 7 : index
    %c0_35 = arith.constant 0 : index
    %c0_36 = arith.constant 0 : index
    %57 = vector.load %arg1[%c7, %c0_35, %c0_36] : memref<9x32x256xbf16, #tpu.memory_space<vmem>>, vector<1x32x256xbf16>
    %58 = vector.shape_cast %57 : vector<1x32x256xbf16> to vector<32x256xbf16>
    %59 = arith.extf %58 : vector<32x256xbf16> to vector<32x256xf32>
    %c7_37 = arith.constant 7 : index
    %c0_38 = arith.constant 0 : index
    %c0_39 = arith.constant 0 : index
    %60 = vector.load %arg2[%c7_37, %c0_38, %c0_39] : memref<9x1x256xf32, #tpu.memory_space<vmem>>, vector<1x1x256xf32>
    %61 = vector.shape_cast %60 : vector<1x1x256xf32> to vector<1x256xf32>
    %62 = vector.broadcast %61 : vector<1x256xf32> to vector<32x256xf32>
    %63 = arith.mulf %59, %62 : vector<32x256xf32>
    %64 = arith.addf %56, %63 : vector<32x256xf32>
    %c8 = arith.constant 8 : index
    %c0_40 = arith.constant 0 : index
    %c0_41 = arith.constant 0 : index
    %65 = vector.load %arg1[%c8, %c0_40, %c0_41] : memref<9x32x256xbf16, #tpu.memory_space<vmem>>, vector<1x32x256xbf16>
    %66 = vector.shape_cast %65 : vector<1x32x256xbf16> to vector<32x256xbf16>
    %67 = arith.extf %66 : vector<32x256xbf16> to vector<32x256xf32>
    %c8_42 = arith.constant 8 : index
    %c0_43 = arith.constant 0 : index
    %c0_44 = arith.constant 0 : index
    %68 = vector.load %arg2[%c8_42, %c0_43, %c0_44] : memref<9x1x256xf32, #tpu.memory_space<vmem>>, vector<1x1x256xf32>
    %69 = vector.shape_cast %68 : vector<1x1x256xf32> to vector<1x256xf32>
    %70 = vector.broadcast %69 : vector<1x256xf32> to vector<32x256xf32>
    %71 = arith.mulf %67, %70 : vector<32x256xf32>
    %72 = arith.addf %64, %71 : vector<32x256xf32>
    %c0_45 = arith.constant 0 : index
    %c0_46 = arith.constant 0 : index
    %73 = vector.load %arg3[%c0_45, %c0_46] : memref<1x256xf32, #tpu.memory_space<vmem>>, vector<1x256xf32>
    %74 = vector.broadcast %73 : vector<1x256xf32> to vector<32x256xf32>
    %75 = arith.addf %72, %74 : vector<32x256xf32>
    %76 = arith.negf %75 : vector<32x256xf32>
    %77 = math.exp %76 : vector<32x256xf32>
    %cst_47 = arith.constant 1.000000e+00 : f32
    %78 = vector.broadcast %cst_47 : f32 to vector<32x256xf32>
    %79 = arith.addf %78, %77 : vector<32x256xf32>
    %80 = arith.divf %78, %79 : vector<32x256xf32>
    %81 = arith.mulf %75, %80 : vector<32x256xf32>
    %82 = arith.truncf %81 : vector<32x256xf32> to vector<32x256xbf16>
    %c0_48 = arith.constant 0 : index
    %c0_49 = arith.constant 0 : index
    %83 = vector.load %arg4[%c0_48, %c0_49] : memref<32x256xbf16, #tpu.memory_space<vmem>>, vector<32x256xbf16>
    tpu.vector_store %arg4[%c0_48, %c0_49], %82 {strides = array<i32>} : memref<32x256xbf16, #tpu.memory_space<vmem>>, vector<32x256xbf16>,
    return
  }
  func.func @transform_0(%arg0: i32) -> (i32, i32, i32) {
    %c0_i32 = arith.constant 0 : i32
    %c0_i32_0 = arith.constant 0 : i32
    %c0_i32_1 = arith.constant 0 : i32
    return %c0_i32, %arg0, %c0_i32_0 : i32, i32, i32
  }
  func.func @transform_1(%arg0: i32) -> (i32, i32, i32) {
    %c0_i32 = arith.constant 0 : i32
    %c0_i32_0 = arith.constant 0 : i32
    %c0_i32_1 = arith.constant 0 : i32
    %c0_i32_2 = arith.constant 0 : i32
    return %c0_i32, %c0_i32_0, %c0_i32_1 : i32, i32, i32
  }
  func.func @transform_2(%arg0: i32) -> (i32, i32) {
    %c0_i32 = arith.constant 0 : i32
    %c0_i32_0 = arith.constant 0 : i32
    %c0_i32_1 = arith.constant 0 : i32
    return %c0_i32, %c0_i32_0 : i32, i32
  }
  func.func @transform_3(%arg0: i32) -> (i32, i32) {
    %c0_i32 = arith.constant 0 : i32
    %c0_i32_0 = arith.constant 0 : i32
    return %arg0, %c0_i32 : i32, i32
  }
}

module attributes {stable_mosaic.version = 11 : i64} {
  func.func @_pool_kernel(%arg0: i32, %arg1: memref<2x16x256xbf16, #tpu.memory_space<vmem>>, %arg2: memref<2x256xf32, #tpu.memory_space<vmem>>) attributes {dimension_semantics = [#tpu.dimension_semantics<arbitrary>], iteration_bounds = array<i64: 1>, scalar_prefetch = 0 : i64, scratch_operands = 0 : i64, tpu.core_type = #tpu.core_type<tc>, window_params = [{transform_indices = @transform_0, window_bounds = array<i64: 2, 16, 256>}, {pipeline_mode = #tpu.pipeline_mode<synchronous>, transform_indices = @transform_1, window_bounds = array<i64: 2, 256>}]} {
    %c0_i32 = arith.constant 0 : i32
    %0 = arith.cmpi eq, %arg0, %c0_i32 : i32
    %1 = arith.extui %0 : i1 to i32
    %c0_i32_0 = arith.constant 0 : i32
    %2 = arith.cmpi ne, %1, %c0_i32_0 : i32
    scf.if %2 {
      %cst_8 = arith.constant 0.000000e+00 : f32
      %11 = vector.broadcast %cst_8 : f32 to vector<2x256xf32>
      %c0_9 = arith.constant 0 : index
      %c0_10 = arith.constant 0 : index
      %12 = vector.load %arg2[%c0_9, %c0_10] : memref<2x256xf32, #tpu.memory_space<vmem>>, vector<2x256xf32>
      tpu.vector_store %arg2[%c0_9, %c0_10], %11 {strides = array<i32>} : memref<2x256xf32, #tpu.memory_space<vmem>>, vector<2x256xf32>,
    } else {
    }
    %c0 = arith.constant 0 : index
    %c0_1 = arith.constant 0 : index
    %3 = vector.load %arg2[%c0, %c0_1] : memref<2x256xf32, #tpu.memory_space<vmem>>, vector<2x256xf32>
    %c0_2 = arith.constant 0 : index
    %c0_3 = arith.constant 0 : index
    %c0_4 = arith.constant 0 : index
    %4 = vector.load %arg1[%c0_2, %c0_3, %c0_4] : memref<2x16x256xbf16, #tpu.memory_space<vmem>>, vector<2x16x256xbf16>
    %5 = arith.extf %4 : vector<2x16x256xbf16> to vector<2x16x256xf32>
    %cst = arith.constant dense<0.000000e+00> : vector<2x256xf32>
    %6 = vector.multi_reduction <add>, %5, %cst [1] : vector<2x16x256xf32> to vector<2x256xf32>
    %cst_5 = arith.constant 6.250000e-02 : f32
    %7 = vector.broadcast %cst_5 : f32 to vector<2x256xf32>
    %8 = arith.mulf %6, %7 : vector<2x256xf32>
    %9 = arith.addf %3, %8 : vector<2x256xf32>
    %c0_6 = arith.constant 0 : index
    %c0_7 = arith.constant 0 : index
    %10 = vector.load %arg2[%c0_6, %c0_7] : memref<2x256xf32, #tpu.memory_space<vmem>>, vector<2x256xf32>
    tpu.vector_store %arg2[%c0_6, %c0_7], %9 {strides = array<i32>} : memref<2x256xf32, #tpu.memory_space<vmem>>, vector<2x256xf32>,
    return
  }
  func.func @transform_0(%arg0: i32) -> (i32, i32, i32) {
    %c0_i32 = arith.constant 0 : i32
    %c0_i32_0 = arith.constant 0 : i32
    %c0_i32_1 = arith.constant 0 : i32
    return %c0_i32, %arg0, %c0_i32_0 : i32, i32, i32
  }
  func.func @transform_1(%arg0: i32) -> (i32, i32) {
    %c0_i32 = arith.constant 0 : i32
    %c0_i32_0 = arith.constant 0 : i32
    %c0_i32_1 = arith.constant 0 : i32
    return %c0_i32, %c0_i32_0 : i32, i32
  }
}

module attributes {stable_mosaic.version = 11 : i64} {
  func.func @_mm_kernel(%arg0: i32, %arg1: i32, %arg2: i32, %arg3: memref<8x256xbf16, #tpu.memory_space<vmem>>, %arg4: memref<256x128xbf16, #tpu.memory_space<vmem>>, %arg5: memref<1x128xf32, #tpu.memory_space<vmem>>, %arg6: memref<8x128xf32, #tpu.memory_space<vmem>>, %arg7: memref<8x128xf32, #tpu.memory_space<vmem>>) attributes {dimension_semantics = [#tpu.dimension_semantics<parallel>, #tpu.dimension_semantics<parallel>, #tpu.dimension_semantics<arbitrary>], iteration_bounds = array<i64: 1, 1, 1>, scalar_prefetch = 0 : i64, scratch_operands = 1 : i64, tpu.core_type = #tpu.core_type<tc>, window_params = [{transform_indices = @transform_0, window_bounds = array<i64: 8, 256>}, {transform_indices = @transform_1, window_bounds = array<i64: 256, 128>}, {transform_indices = @transform_2, window_bounds = array<i64: 1, 128>}, {transform_indices = @transform_3, window_bounds = array<i64: 8, 128>}]} {
    %c0_i32 = arith.constant 0 : i32
    %0 = arith.cmpi eq, %arg2, %c0_i32 : i32
    %1 = arith.extui %0 : i1 to i32
    %c0_i32_0 = arith.constant 0 : i32
    %2 = arith.cmpi ne, %1, %c0_i32_0 : i32
    scf.if %2 {
      %cst_10 = arith.constant 0.000000e+00 : f32
      %12 = vector.broadcast %cst_10 : f32 to vector<8x128xf32>
      %c0_11 = arith.constant 0 : index
      %c0_12 = arith.constant 0 : index
      %13 = vector.load %arg7[%c0_11, %c0_12] : memref<8x128xf32, #tpu.memory_space<vmem>>, vector<8x128xf32>
      tpu.vector_store %arg7[%c0_11, %c0_12], %12 {strides = array<i32>} : memref<8x128xf32, #tpu.memory_space<vmem>>, vector<8x128xf32>,
    } else {
    }
    %c0 = arith.constant 0 : index
    %c0_1 = arith.constant 0 : index
    %3 = vector.load %arg7[%c0, %c0_1] : memref<8x128xf32, #tpu.memory_space<vmem>>, vector<8x128xf32>
    %c0_2 = arith.constant 0 : index
    %c0_3 = arith.constant 0 : index
    %4 = vector.load %arg3[%c0_2, %c0_3] : memref<8x256xbf16, #tpu.memory_space<vmem>>, vector<8x256xbf16>
    %c0_4 = arith.constant 0 : index
    %c0_5 = arith.constant 0 : index
    %5 = vector.load %arg4[%c0_4, %c0_5] : memref<256x128xbf16, #tpu.memory_space<vmem>>, vector<256x128xbf16>
    %cst = arith.constant dense<0.000000e+00> : vector<8x128xf32>
    %6 = tpu.matmul %4, %5, %cst {dimension_numbers = #tpu.dot_dimension_numbers<[1], [0], [0], [1], [0, 0, 1, 1], [], []>} : vector<8x256xbf16>, vector<256x128xbf16>, vector<8x128xf32> -> vector<8x128xf32>
    %7 = arith.addf %3, %6 : vector<8x128xf32>
    %c0_6 = arith.constant 0 : index
    %c0_7 = arith.constant 0 : index
    %8 = vector.load %arg7[%c0_6, %c0_7] : memref<8x128xf32, #tpu.memory_space<vmem>>, vector<8x128xf32>
    tpu.vector_store %arg7[%c0_6, %c0_7], %7 {strides = array<i32>} : memref<8x128xf32, #tpu.memory_space<vmem>>, vector<8x128xf32>,
    %c0_i32_8 = arith.constant 0 : i32
    %9 = arith.cmpi eq, %arg2, %c0_i32_8 : i32
    %10 = arith.extui %9 : i1 to i32
    %c0_i32_9 = arith.constant 0 : i32
    %11 = arith.cmpi ne, %10, %c0_i32_9 : i32
    scf.if %11 {
      %c0_10 = arith.constant 0 : index
      %c0_11 = arith.constant 0 : index
      %12 = vector.load %arg7[%c0_10, %c0_11] : memref<8x128xf32, #tpu.memory_space<vmem>>, vector<8x128xf32>
      %c0_12 = arith.constant 0 : index
      %c0_13 = arith.constant 0 : index
      %13 = vector.load %arg5[%c0_12, %c0_13] : memref<1x128xf32, #tpu.memory_space<vmem>>, vector<1x128xf32>
      %14 = vector.broadcast %13 : vector<1x128xf32> to vector<8x128xf32>
      %15 = arith.addf %12, %14 : vector<8x128xf32>
      %16 = arith.negf %15 : vector<8x128xf32>
      %17 = math.exp %16 : vector<8x128xf32>
      %cst_14 = arith.constant 1.000000e+00 : f32
      %18 = vector.broadcast %cst_14 : f32 to vector<8x128xf32>
      %19 = arith.addf %18, %17 : vector<8x128xf32>
      %20 = arith.divf %18, %19 : vector<8x128xf32>
      %21 = arith.mulf %15, %20 : vector<8x128xf32>
      %c0_15 = arith.constant 0 : index
      %c0_16 = arith.constant 0 : index
      %22 = vector.load %arg6[%c0_15, %c0_16] : memref<8x128xf32, #tpu.memory_space<vmem>>, vector<8x128xf32>
      tpu.vector_store %arg6[%c0_15, %c0_16], %21 {strides = array<i32>} : memref<8x128xf32, #tpu.memory_space<vmem>>, vector<8x128xf32>,
    } else {
    }
    return
  }
  func.func @transform_0(%arg0: i32, %arg1: i32, %arg2: i32) -> (i32, i32) {
    %c0_i32 = arith.constant 0 : i32
    return %arg0, %arg2 : i32, i32
  }
  func.func @transform_1(%arg0: i32, %arg1: i32, %arg2: i32) -> (i32, i32) {
    %c0_i32 = arith.constant 0 : i32
    return %arg2, %arg1 : i32, i32
  }
  func.func @transform_2(%arg0: i32, %arg1: i32, %arg2: i32) -> (i32, i32) {
    %c0_i32 = arith.constant 0 : i32
    %c0_i32_0 = arith.constant 0 : i32
    return %c0_i32, %arg1 : i32, i32
  }
  func.func @transform_3(%arg0: i32, %arg1: i32, %arg2: i32) -> (i32, i32) {
    %c0_i32 = arith.constant 0 : i32
    return %arg0, %arg1 : i32, i32
  }
}

module attributes {stable_mosaic.version = 11 : i64} {
  func.func @_mm_kernel(%arg0: i32, %arg1: i32, %arg2: i32, %arg3: memref<8x128xbf16, #tpu.memory_space<vmem>>, %arg4: memref<128x256xbf16, #tpu.memory_space<vmem>>, %arg5: memref<1x256xf32, #tpu.memory_space<vmem>>, %arg6: memref<8x256xf32, #tpu.memory_space<vmem>>, %arg7: memref<8x256xf32, #tpu.memory_space<vmem>>) attributes {dimension_semantics = [#tpu.dimension_semantics<parallel>, #tpu.dimension_semantics<parallel>, #tpu.dimension_semantics<arbitrary>], iteration_bounds = array<i64: 1, 1, 1>, scalar_prefetch = 0 : i64, scratch_operands = 1 : i64, tpu.core_type = #tpu.core_type<tc>, window_params = [{transform_indices = @transform_0, window_bounds = array<i64: 8, 128>}, {transform_indices = @transform_1, window_bounds = array<i64: 128, 256>}, {transform_indices = @transform_2, window_bounds = array<i64: 1, 256>}, {transform_indices = @transform_3, window_bounds = array<i64: 8, 256>}]} {
    %c0_i32 = arith.constant 0 : i32
    %0 = arith.cmpi eq, %arg2, %c0_i32 : i32
    %1 = arith.extui %0 : i1 to i32
    %c0_i32_0 = arith.constant 0 : i32
    %2 = arith.cmpi ne, %1, %c0_i32_0 : i32
    scf.if %2 {
      %cst_10 = arith.constant 0.000000e+00 : f32
      %12 = vector.broadcast %cst_10 : f32 to vector<8x256xf32>
      %c0_11 = arith.constant 0 : index
      %c0_12 = arith.constant 0 : index
      %13 = vector.load %arg7[%c0_11, %c0_12] : memref<8x256xf32, #tpu.memory_space<vmem>>, vector<8x256xf32>
      tpu.vector_store %arg7[%c0_11, %c0_12], %12 {strides = array<i32>} : memref<8x256xf32, #tpu.memory_space<vmem>>, vector<8x256xf32>,
    } else {
    }
    %c0 = arith.constant 0 : index
    %c0_1 = arith.constant 0 : index
    %3 = vector.load %arg7[%c0, %c0_1] : memref<8x256xf32, #tpu.memory_space<vmem>>, vector<8x256xf32>
    %c0_2 = arith.constant 0 : index
    %c0_3 = arith.constant 0 : index
    %4 = vector.load %arg3[%c0_2, %c0_3] : memref<8x128xbf16, #tpu.memory_space<vmem>>, vector<8x128xbf16>
    %c0_4 = arith.constant 0 : index
    %c0_5 = arith.constant 0 : index
    %5 = vector.load %arg4[%c0_4, %c0_5] : memref<128x256xbf16, #tpu.memory_space<vmem>>, vector<128x256xbf16>
    %cst = arith.constant dense<0.000000e+00> : vector<8x256xf32>
    %6 = tpu.matmul %4, %5, %cst {dimension_numbers = #tpu.dot_dimension_numbers<[1], [0], [0], [1], [0, 0, 1, 1], [], []>} : vector<8x128xbf16>, vector<128x256xbf16>, vector<8x256xf32> -> vector<8x256xf32>
    %7 = arith.addf %3, %6 : vector<8x256xf32>
    %c0_6 = arith.constant 0 : index
    %c0_7 = arith.constant 0 : index
    %8 = vector.load %arg7[%c0_6, %c0_7] : memref<8x256xf32, #tpu.memory_space<vmem>>, vector<8x256xf32>
    tpu.vector_store %arg7[%c0_6, %c0_7], %7 {strides = array<i32>} : memref<8x256xf32, #tpu.memory_space<vmem>>, vector<8x256xf32>,
    %c0_i32_8 = arith.constant 0 : i32
    %9 = arith.cmpi eq, %arg2, %c0_i32_8 : i32
    %10 = arith.extui %9 : i1 to i32
    %c0_i32_9 = arith.constant 0 : i32
    %11 = arith.cmpi ne, %10, %c0_i32_9 : i32
    scf.if %11 {
      %c0_10 = arith.constant 0 : index
      %c0_11 = arith.constant 0 : index
      %12 = vector.load %arg7[%c0_10, %c0_11] : memref<8x256xf32, #tpu.memory_space<vmem>>, vector<8x256xf32>
      %c0_12 = arith.constant 0 : index
      %c0_13 = arith.constant 0 : index
      %13 = vector.load %arg5[%c0_12, %c0_13] : memref<1x256xf32, #tpu.memory_space<vmem>>, vector<1x256xf32>
      %14 = vector.broadcast %13 : vector<1x256xf32> to vector<8x256xf32>
      %15 = arith.addf %12, %14 : vector<8x256xf32>
      %16 = arith.negf %15 : vector<8x256xf32>
      %17 = math.exp %16 : vector<8x256xf32>
      %cst_14 = arith.constant 1.000000e+00 : f32
      %18 = vector.broadcast %cst_14 : f32 to vector<8x256xf32>
      %19 = arith.addf %18, %17 : vector<8x256xf32>
      %20 = arith.divf %18, %19 : vector<8x256xf32>
      %c0_15 = arith.constant 0 : index
      %c0_16 = arith.constant 0 : index
      %21 = vector.load %arg6[%c0_15, %c0_16] : memref<8x256xf32, #tpu.memory_space<vmem>>, vector<8x256xf32>
      tpu.vector_store %arg6[%c0_15, %c0_16], %20 {strides = array<i32>} : memref<8x256xf32, #tpu.memory_space<vmem>>, vector<8x256xf32>,
    } else {
    }
    return
  }
  func.func @transform_0(%arg0: i32, %arg1: i32, %arg2: i32) -> (i32, i32) {
    %c0_i32 = arith.constant 0 : i32
    return %arg0, %arg2 : i32, i32
  }
  func.func @transform_1(%arg0: i32, %arg1: i32, %arg2: i32) -> (i32, i32) {
    %c0_i32 = arith.constant 0 : i32
    return %arg2, %arg1 : i32, i32
  }
  func.func @transform_2(%arg0: i32, %arg1: i32, %arg2: i32) -> (i32, i32) {
    %c0_i32 = arith.constant 0 : i32
    %c0_i32_0 = arith.constant 0 : i32
    return %c0_i32, %arg1 : i32, i32
  }
  func.func @transform_3(%arg0: i32, %arg1: i32, %arg2: i32) -> (i32, i32) {
    %c0_i32 = arith.constant 0 : i32
    return %arg0, %arg1 : i32, i32
  }
}

module attributes {stable_mosaic.version = 11 : i64} {
  func.func @_se_apply_kernel(%arg0: i32, %arg1: memref<2x16x256xbf16, #tpu.memory_space<vmem>>, %arg2: memref<2x1x256xf32, #tpu.memory_space<vmem>>, %arg3: memref<2x16x256xbf16, #tpu.memory_space<vmem>>) attributes {dimension_semantics = [#tpu.dimension_semantics<parallel>], iteration_bounds = array<i64: 1>, scalar_prefetch = 0 : i64, scratch_operands = 0 : i64, tpu.core_type = #tpu.core_type<tc>, window_params = [{transform_indices = @transform_0, window_bounds = array<i64: 2, 16, 256>}, {pipeline_mode = #tpu.pipeline_mode<synchronous>, transform_indices = @transform_1, window_bounds = array<i64: 2, 1, 256>}, {transform_indices = @transform_2, window_bounds = array<i64: 2, 16, 256>}]} {
    %c0 = arith.constant 0 : index
    %c0_0 = arith.constant 0 : index
    %c0_1 = arith.constant 0 : index
    %0 = vector.load %arg1[%c0, %c0_0, %c0_1] : memref<2x16x256xbf16, #tpu.memory_space<vmem>>, vector<2x16x256xbf16>
    %1 = arith.extf %0 : vector<2x16x256xbf16> to vector<2x16x256xf32>
    %c0_2 = arith.constant 0 : index
    %c0_3 = arith.constant 0 : index
    %c0_4 = arith.constant 0 : index
    %2 = vector.load %arg2[%c0_2, %c0_3, %c0_4] : memref<2x1x256xf32, #tpu.memory_space<vmem>>, vector<2x1x256xf32>
    %3 = vector.broadcast %2 : vector<2x1x256xf32> to vector<2x16x256xf32>
    %4 = arith.mulf %1, %3 : vector<2x16x256xf32>
    %5 = arith.truncf %4 : vector<2x16x256xf32> to vector<2x16x256xbf16>
    %c0_5 = arith.constant 0 : index
    %c0_6 = arith.constant 0 : index
    %c0_7 = arith.constant 0 : index
    %6 = vector.load %arg3[%c0_5, %c0_6, %c0_7] : memref<2x16x256xbf16, #tpu.memory_space<vmem>>, vector<2x16x256xbf16>
    tpu.vector_store %arg3[%c0_5, %c0_6, %c0_7], %5 {strides = array<i32>} : memref<2x16x256xbf16, #tpu.memory_space<vmem>>, vector<2x16x256xbf16>,
    return
  }
  func.func @transform_0(%arg0: i32) -> (i32, i32, i32) {
    %c0_i32 = arith.constant 0 : i32
    %c0_i32_0 = arith.constant 0 : i32
    %c0_i32_1 = arith.constant 0 : i32
    return %c0_i32, %arg0, %c0_i32_0 : i32, i32, i32
  }
  func.func @transform_1(%arg0: i32) -> (i32, i32, i32) {
    %c0_i32 = arith.constant 0 : i32
    %c0_i32_0 = arith.constant 0 : i32
    %c0_i32_1 = arith.constant 0 : i32
    %c0_i32_2 = arith.constant 0 : i32
    return %c0_i32, %c0_i32_0, %c0_i32_1 : i32, i32, i32
  }
  func.func @transform_2(%arg0: i32) -> (i32, i32, i32) {
    %c0_i32 = arith.constant 0 : i32
    %c0_i32_0 = arith.constant 0 : i32
    %c0_i32_1 = arith.constant 0 : i32
    return %c0_i32, %arg0, %c0_i32_0 : i32, i32, i32
  }
}

module attributes {stable_mosaic.version = 11 : i64} {
  func.func @_mm_kernel(%arg0: i32, %arg1: i32, %arg2: i32, %arg3: memref<32x256xbf16, #tpu.memory_space<vmem>>, %arg4: memref<256x128xbf16, #tpu.memory_space<vmem>>, %arg5: memref<1x128xf32, #tpu.memory_space<vmem>>, %arg6: memref<32x128xbf16, #tpu.memory_space<vmem>>, %arg7: memref<32x128xf32, #tpu.memory_space<vmem>>) attributes {dimension_semantics = [#tpu.dimension_semantics<parallel>, #tpu.dimension_semantics<parallel>, #tpu.dimension_semantics<arbitrary>], iteration_bounds = array<i64: 1, 1, 1>, scalar_prefetch = 0 : i64, scratch_operands = 1 : i64, tpu.core_type = #tpu.core_type<tc>, window_params = [{transform_indices = @transform_0, window_bounds = array<i64: 32, 256>}, {transform_indices = @transform_1, window_bounds = array<i64: 256, 128>}, {transform_indices = @transform_2, window_bounds = array<i64: 1, 128>}, {transform_indices = @transform_3, window_bounds = array<i64: 32, 128>}]} {
    %c0_i32 = arith.constant 0 : i32
    %0 = arith.cmpi eq, %arg2, %c0_i32 : i32
    %1 = arith.extui %0 : i1 to i32
    %c0_i32_0 = arith.constant 0 : i32
    %2 = arith.cmpi ne, %1, %c0_i32_0 : i32
    scf.if %2 {
      %cst_10 = arith.constant 0.000000e+00 : f32
      %12 = vector.broadcast %cst_10 : f32 to vector<32x128xf32>
      %c0_11 = arith.constant 0 : index
      %c0_12 = arith.constant 0 : index
      %13 = vector.load %arg7[%c0_11, %c0_12] : memref<32x128xf32, #tpu.memory_space<vmem>>, vector<32x128xf32>
      tpu.vector_store %arg7[%c0_11, %c0_12], %12 {strides = array<i32>} : memref<32x128xf32, #tpu.memory_space<vmem>>, vector<32x128xf32>,
    } else {
    }
    %c0 = arith.constant 0 : index
    %c0_1 = arith.constant 0 : index
    %3 = vector.load %arg7[%c0, %c0_1] : memref<32x128xf32, #tpu.memory_space<vmem>>, vector<32x128xf32>
    %c0_2 = arith.constant 0 : index
    %c0_3 = arith.constant 0 : index
    %4 = vector.load %arg3[%c0_2, %c0_3] : memref<32x256xbf16, #tpu.memory_space<vmem>>, vector<32x256xbf16>
    %c0_4 = arith.constant 0 : index
    %c0_5 = arith.constant 0 : index
    %5 = vector.load %arg4[%c0_4, %c0_5] : memref<256x128xbf16, #tpu.memory_space<vmem>>, vector<256x128xbf16>
    %cst = arith.constant dense<0.000000e+00> : vector<32x128xf32>
    %6 = tpu.matmul %4, %5, %cst {dimension_numbers = #tpu.dot_dimension_numbers<[1], [0], [0], [1], [0, 0, 1, 1], [], []>} : vector<32x256xbf16>, vector<256x128xbf16>, vector<32x128xf32> -> vector<32x128xf32>
    %7 = arith.addf %3, %6 : vector<32x128xf32>
    %c0_6 = arith.constant 0 : index
    %c0_7 = arith.constant 0 : index
    %8 = vector.load %arg7[%c0_6, %c0_7] : memref<32x128xf32, #tpu.memory_space<vmem>>, vector<32x128xf32>
    tpu.vector_store %arg7[%c0_6, %c0_7], %7 {strides = array<i32>} : memref<32x128xf32, #tpu.memory_space<vmem>>, vector<32x128xf32>,
    %c0_i32_8 = arith.constant 0 : i32
    %9 = arith.cmpi eq, %arg2, %c0_i32_8 : i32
    %10 = arith.extui %9 : i1 to i32
    %c0_i32_9 = arith.constant 0 : i32
    %11 = arith.cmpi ne, %10, %c0_i32_9 : i32
    scf.if %11 {
      %c0_10 = arith.constant 0 : index
      %c0_11 = arith.constant 0 : index
      %12 = vector.load %arg7[%c0_10, %c0_11] : memref<32x128xf32, #tpu.memory_space<vmem>>, vector<32x128xf32>
      %c0_12 = arith.constant 0 : index
      %c0_13 = arith.constant 0 : index
      %13 = vector.load %arg5[%c0_12, %c0_13] : memref<1x128xf32, #tpu.memory_space<vmem>>, vector<1x128xf32>
      %14 = vector.broadcast %13 : vector<1x128xf32> to vector<32x128xf32>
      %15 = arith.addf %12, %14 : vector<32x128xf32>
      %16 = arith.truncf %15 : vector<32x128xf32> to vector<32x128xbf16>
      %c0_14 = arith.constant 0 : index
      %c0_15 = arith.constant 0 : index
      %17 = vector.load %arg6[%c0_14, %c0_15] : memref<32x128xbf16, #tpu.memory_space<vmem>>, vector<32x128xbf16>
      tpu.vector_store %arg6[%c0_14, %c0_15], %16 {strides = array<i32>} : memref<32x128xbf16, #tpu.memory_space<vmem>>, vector<32x128xbf16>,
    } else {
    }
    return
  }
  func.func @transform_0(%arg0: i32, %arg1: i32, %arg2: i32) -> (i32, i32) {
    %c0_i32 = arith.constant 0 : i32
    return %arg0, %arg2 : i32, i32
  }
  func.func @transform_1(%arg0: i32, %arg1: i32, %arg2: i32) -> (i32, i32) {
    %c0_i32 = arith.constant 0 : i32
    return %arg2, %arg1 : i32, i32
  }
  func.func @transform_2(%arg0: i32, %arg1: i32, %arg2: i32) -> (i32, i32) {
    %c0_i32 = arith.constant 0 : i32
    %c0_i32_0 = arith.constant 0 : i32
    return %c0_i32, %arg1 : i32, i32
  }
  func.func @transform_3(%arg0: i32, %arg1: i32, %arg2: i32) -> (i32, i32) {
    %c0_i32 = arith.constant 0 : i32
    return %arg0, %arg1 : i32, i32
  }
}

module attributes {stable_mosaic.version = 11 : i64} {
  func.func @_mm_kernel(%arg0: i32, %arg1: i32, %arg2: i32, %arg3: memref<32x128xbf16, #tpu.memory_space<vmem>>, %arg4: memref<128x256xbf16, #tpu.memory_space<vmem>>, %arg5: memref<1x256xf32, #tpu.memory_space<vmem>>, %arg6: memref<32x256xbf16, #tpu.memory_space<vmem>>, %arg7: memref<32x256xf32, #tpu.memory_space<vmem>>) attributes {dimension_semantics = [#tpu.dimension_semantics<parallel>, #tpu.dimension_semantics<parallel>, #tpu.dimension_semantics<arbitrary>], iteration_bounds = array<i64: 1, 5, 1>, scalar_prefetch = 0 : i64, scratch_operands = 1 : i64, tpu.core_type = #tpu.core_type<tc>, window_params = [{transform_indices = @transform_0, window_bounds = array<i64: 32, 128>}, {transform_indices = @transform_1, window_bounds = array<i64: 128, 256>}, {transform_indices = @transform_2, window_bounds = array<i64: 1, 256>}, {transform_indices = @transform_3, window_bounds = array<i64: 32, 256>}]} {
    %c0_i32 = arith.constant 0 : i32
    %0 = arith.cmpi eq, %arg2, %c0_i32 : i32
    %1 = arith.extui %0 : i1 to i32
    %c0_i32_0 = arith.constant 0 : i32
    %2 = arith.cmpi ne, %1, %c0_i32_0 : i32
    scf.if %2 {
      %cst_10 = arith.constant 0.000000e+00 : f32
      %12 = vector.broadcast %cst_10 : f32 to vector<32x256xf32>
      %c0_11 = arith.constant 0 : index
      %c0_12 = arith.constant 0 : index
      %13 = vector.load %arg7[%c0_11, %c0_12] : memref<32x256xf32, #tpu.memory_space<vmem>>, vector<32x256xf32>
      tpu.vector_store %arg7[%c0_11, %c0_12], %12 {strides = array<i32>} : memref<32x256xf32, #tpu.memory_space<vmem>>, vector<32x256xf32>,
    } else {
    }
    %c0 = arith.constant 0 : index
    %c0_1 = arith.constant 0 : index
    %3 = vector.load %arg7[%c0, %c0_1] : memref<32x256xf32, #tpu.memory_space<vmem>>, vector<32x256xf32>
    %c0_2 = arith.constant 0 : index
    %c0_3 = arith.constant 0 : index
    %4 = vector.load %arg3[%c0_2, %c0_3] : memref<32x128xbf16, #tpu.memory_space<vmem>>, vector<32x128xbf16>
    %c0_4 = arith.constant 0 : index
    %c0_5 = arith.constant 0 : index
    %5 = vector.load %arg4[%c0_4, %c0_5] : memref<128x256xbf16, #tpu.memory_space<vmem>>, vector<128x256xbf16>
    %cst = arith.constant dense<0.000000e+00> : vector<32x256xf32>
    %6 = tpu.matmul %4, %5, %cst {dimension_numbers = #tpu.dot_dimension_numbers<[1], [0], [0], [1], [0, 0, 1, 1], [], []>} : vector<32x128xbf16>, vector<128x256xbf16>, vector<32x256xf32> -> vector<32x256xf32>
    %7 = arith.addf %3, %6 : vector<32x256xf32>
    %c0_6 = arith.constant 0 : index
    %c0_7 = arith.constant 0 : index
    %8 = vector.load %arg7[%c0_6, %c0_7] : memref<32x256xf32, #tpu.memory_space<vmem>>, vector<32x256xf32>
    tpu.vector_store %arg7[%c0_6, %c0_7], %7 {strides = array<i32>} : memref<32x256xf32, #tpu.memory_space<vmem>>, vector<32x256xf32>,
    %c0_i32_8 = arith.constant 0 : i32
    %9 = arith.cmpi eq, %arg2, %c0_i32_8 : i32
    %10 = arith.extui %9 : i1 to i32
    %c0_i32_9 = arith.constant 0 : i32
    %11 = arith.cmpi ne, %10, %c0_i32_9 : i32
    scf.if %11 {
      %c0_10 = arith.constant 0 : index
      %c0_11 = arith.constant 0 : index
      %12 = vector.load %arg7[%c0_10, %c0_11] : memref<32x256xf32, #tpu.memory_space<vmem>>, vector<32x256xf32>
      %c0_12 = arith.constant 0 : index
      %c0_13 = arith.constant 0 : index
      %13 = vector.load %arg5[%c0_12, %c0_13] : memref<1x256xf32, #tpu.memory_space<vmem>>, vector<1x256xf32>
      %14 = vector.broadcast %13 : vector<1x256xf32> to vector<32x256xf32>
      %15 = arith.addf %12, %14 : vector<32x256xf32>
      %16 = arith.negf %15 : vector<32x256xf32>
      %17 = math.exp %16 : vector<32x256xf32>
      %cst_14 = arith.constant 1.000000e+00 : f32
      %18 = vector.broadcast %cst_14 : f32 to vector<32x256xf32>
      %19 = arith.addf %18, %17 : vector<32x256xf32>
      %20 = arith.divf %18, %19 : vector<32x256xf32>
      %21 = arith.mulf %15, %20 : vector<32x256xf32>
      %22 = arith.truncf %21 : vector<32x256xf32> to vector<32x256xbf16>
      %c0_15 = arith.constant 0 : index
      %c0_16 = arith.constant 0 : index
      %23 = vector.load %arg6[%c0_15, %c0_16] : memref<32x256xbf16, #tpu.memory_space<vmem>>, vector<32x256xbf16>
      tpu.vector_store %arg6[%c0_15, %c0_16], %22 {strides = array<i32>} : memref<32x256xbf16, #tpu.memory_space<vmem>>, vector<32x256xbf16>,
    } else {
    }
    return
  }
  func.func @transform_0(%arg0: i32, %arg1: i32, %arg2: i32) -> (i32, i32) {
    %c0_i32 = arith.constant 0 : i32
    return %arg0, %arg2 : i32, i32
  }
  func.func @transform_1(%arg0: i32, %arg1: i32, %arg2: i32) -> (i32, i32) {
    %c0_i32 = arith.constant 0 : i32
    return %arg2, %arg1 : i32, i32
  }
  func.func @transform_2(%arg0: i32, %arg1: i32, %arg2: i32) -> (i32, i32) {
    %c0_i32 = arith.constant 0 : i32
    %c0_i32_0 = arith.constant 0 : i32
    return %c0_i32, %arg1 : i32, i32
  }
  func.func @transform_3(%arg0: i32, %arg1: i32, %arg2: i32) -> (i32, i32) {
    %c0_i32 = arith.constant 0 : i32
    return %arg0, %arg1 : i32, i32
  }
}

module attributes {stable_mosaic.version = 11 : i64} {
  func.func @_pool_kernel(%arg0: i32, %arg1: memref<2x16x1280xbf16, #tpu.memory_space<vmem>>, %arg2: memref<2x1280xf32, #tpu.memory_space<vmem>>) attributes {dimension_semantics = [#tpu.dimension_semantics<arbitrary>], iteration_bounds = array<i64: 1>, scalar_prefetch = 0 : i64, scratch_operands = 0 : i64, tpu.core_type = #tpu.core_type<tc>, window_params = [{transform_indices = @transform_0, window_bounds = array<i64: 2, 16, 1280>}, {pipeline_mode = #tpu.pipeline_mode<synchronous>, transform_indices = @transform_1, window_bounds = array<i64: 2, 1280>}]} {
    %c0_i32 = arith.constant 0 : i32
    %0 = arith.cmpi eq, %arg0, %c0_i32 : i32
    %1 = arith.extui %0 : i1 to i32
    %c0_i32_0 = arith.constant 0 : i32
    %2 = arith.cmpi ne, %1, %c0_i32_0 : i32
    scf.if %2 {
      %cst_8 = arith.constant 0.000000e+00 : f32
      %11 = vector.broadcast %cst_8 : f32 to vector<2x1280xf32>
      %c0_9 = arith.constant 0 : index
      %c0_10 = arith.constant 0 : index
      %12 = vector.load %arg2[%c0_9, %c0_10] : memref<2x1280xf32, #tpu.memory_space<vmem>>, vector<2x1280xf32>
      tpu.vector_store %arg2[%c0_9, %c0_10], %11 {strides = array<i32>} : memref<2x1280xf32, #tpu.memory_space<vmem>>, vector<2x1280xf32>,
    } else {
    }
    %c0 = arith.constant 0 : index
    %c0_1 = arith.constant 0 : index
    %3 = vector.load %arg2[%c0, %c0_1] : memref<2x1280xf32, #tpu.memory_space<vmem>>, vector<2x1280xf32>
    %c0_2 = arith.constant 0 : index
    %c0_3 = arith.constant 0 : index
    %c0_4 = arith.constant 0 : index
    %4 = vector.load %arg1[%c0_2, %c0_3, %c0_4] : memref<2x16x1280xbf16, #tpu.memory_space<vmem>>, vector<2x16x1280xbf16>
    %5 = arith.extf %4 : vector<2x16x1280xbf16> to vector<2x16x1280xf32>
    %cst = arith.constant dense<0.000000e+00> : vector<2x1280xf32>
    %6 = vector.multi_reduction <add>, %5, %cst [1] : vector<2x16x1280xf32> to vector<2x1280xf32>
    %cst_5 = arith.constant 6.250000e-02 : f32
    %7 = vector.broadcast %cst_5 : f32 to vector<2x1280xf32>
    %8 = arith.mulf %6, %7 : vector<2x1280xf32>
    %9 = arith.addf %3, %8 : vector<2x1280xf32>
    %c0_6 = arith.constant 0 : index
    %c0_7 = arith.constant 0 : index
    %10 = vector.load %arg2[%c0_6, %c0_7] : memref<2x1280xf32, #tpu.memory_space<vmem>>, vector<2x1280xf32>
    tpu.vector_store %arg2[%c0_6, %c0_7], %9 {strides = array<i32>} : memref<2x1280xf32, #tpu.memory_space<vmem>>, vector<2x1280xf32>,
    return
  }
  func.func @transform_0(%arg0: i32) -> (i32, i32, i32) {
    %c0_i32 = arith.constant 0 : i32
    %c0_i32_0 = arith.constant 0 : i32
    %c0_i32_1 = arith.constant 0 : i32
    return %c0_i32, %arg0, %c0_i32_0 : i32, i32, i32
  }
  func.func @transform_1(%arg0: i32) -> (i32, i32) {
    %c0_i32 = arith.constant 0 : i32
    %c0_i32_0 = arith.constant 0 : i32
    %c0_i32_1 = arith.constant 0 : i32
    return %c0_i32, %c0_i32_0 : i32, i32
  }
}

module attributes {stable_mosaic.version = 11 : i64} {
  func.func @_mm_kernel(%arg0: i32, %arg1: i32, %arg2: i32, %arg3: memref<8x512xbf16, #tpu.memory_space<vmem>>, %arg4: memref<512x256xbf16, #tpu.memory_space<vmem>>, %arg5: memref<1x256xf32, #tpu.memory_space<vmem>>, %arg6: memref<8x256xf32, #tpu.memory_space<vmem>>, %arg7: memref<8x256xf32, #tpu.memory_space<vmem>>) attributes {dimension_semantics = [#tpu.dimension_semantics<parallel>, #tpu.dimension_semantics<parallel>, #tpu.dimension_semantics<arbitrary>], iteration_bounds = array<i64: 1, 2, 3>, scalar_prefetch = 0 : i64, scratch_operands = 1 : i64, tpu.core_type = #tpu.core_type<tc>, window_params = [{transform_indices = @transform_0, window_bounds = array<i64: 8, 512>}, {transform_indices = @transform_1, window_bounds = array<i64: 512, 256>}, {transform_indices = @transform_2, window_bounds = array<i64: 1, 256>}, {transform_indices = @transform_3, window_bounds = array<i64: 8, 256>}]} {
    %c0_i32 = arith.constant 0 : i32
    %0 = arith.cmpi eq, %arg2, %c0_i32 : i32
    %1 = arith.extui %0 : i1 to i32
    %c0_i32_0 = arith.constant 0 : i32
    %2 = arith.cmpi ne, %1, %c0_i32_0 : i32
    scf.if %2 {
      %cst_9 = arith.constant 0.000000e+00 : f32
      %12 = vector.broadcast %cst_9 : f32 to vector<8x256xf32>
      %c0_10 = arith.constant 0 : index
      %c0_11 = arith.constant 0 : index
      %13 = vector.load %arg7[%c0_10, %c0_11] : memref<8x256xf32, #tpu.memory_space<vmem>>, vector<8x256xf32>
      tpu.vector_store %arg7[%c0_10, %c0_11], %12 {strides = array<i32>} : memref<8x256xf32, #tpu.memory_space<vmem>>, vector<8x256xf32>,
    } else {
    }
    %c0 = arith.constant 0 : index
    %c0_1 = arith.constant 0 : index
    %3 = vector.load %arg7[%c0, %c0_1] : memref<8x256xf32, #tpu.memory_space<vmem>>, vector<8x256xf32>
    %c0_2 = arith.constant 0 : index
    %c0_3 = arith.constant 0 : index
    %4 = vector.load %arg3[%c0_2, %c0_3] : memref<8x512xbf16, #tpu.memory_space<vmem>>, vector<8x512xbf16>
    %c0_4 = arith.constant 0 : index
    %c0_5 = arith.constant 0 : index
    %5 = vector.load %arg4[%c0_4, %c0_5] : memref<512x256xbf16, #tpu.memory_space<vmem>>, vector<512x256xbf16>
    %cst = arith.constant dense<0.000000e+00> : vector<8x256xf32>
    %6 = tpu.matmul %4, %5, %cst {dimension_numbers = #tpu.dot_dimension_numbers<[1], [0], [0], [1], [0, 0, 1, 1], [], []>} : vector<8x512xbf16>, vector<512x256xbf16>, vector<8x256xf32> -> vector<8x256xf32>
    %7 = arith.addf %3, %6 : vector<8x256xf32>
    %c0_6 = arith.constant 0 : index
    %c0_7 = arith.constant 0 : index
    %8 = vector.load %arg7[%c0_6, %c0_7] : memref<8x256xf32, #tpu.memory_space<vmem>>, vector<8x256xf32>
    tpu.vector_store %arg7[%c0_6, %c0_7], %7 {strides = array<i32>} : memref<8x256xf32, #tpu.memory_space<vmem>>, vector<8x256xf32>,
    %c2_i32 = arith.constant 2 : i32
    %9 = arith.cmpi eq, %arg2, %c2_i32 : i32
    %10 = arith.extui %9 : i1 to i32
    %c0_i32_8 = arith.constant 0 : i32
    %11 = arith.cmpi ne, %10, %c0_i32_8 : i32
    scf.if %11 {
      %c0_9 = arith.constant 0 : index
      %c0_10 = arith.constant 0 : index
      %12 = vector.load %arg7[%c0_9, %c0_10] : memref<8x256xf32, #tpu.memory_space<vmem>>, vector<8x256xf32>
      %c0_11 = arith.constant 0 : index
      %c0_12 = arith.constant 0 : index
      %13 = vector.load %arg5[%c0_11, %c0_12] : memref<1x256xf32, #tpu.memory_space<vmem>>, vector<1x256xf32>
      %14 = vector.broadcast %13 : vector<1x256xf32> to vector<8x256xf32>
      %15 = arith.addf %12, %14 : vector<8x256xf32>
      %c0_13 = arith.constant 0 : index
      %c0_14 = arith.constant 0 : index
      %16 = vector.load %arg6[%c0_13, %c0_14] : memref<8x256xf32, #tpu.memory_space<vmem>>, vector<8x256xf32>
      tpu.vector_store %arg6[%c0_13, %c0_14], %15 {strides = array<i32>} : memref<8x256xf32, #tpu.memory_space<vmem>>, vector<8x256xf32>,
    } else {
    }
    return
  }
  func.func @transform_0(%arg0: i32, %arg1: i32, %arg2: i32) -> (i32, i32) {
    %c0_i32 = arith.constant 0 : i32
    return %arg0, %arg2 : i32, i32
  }
  func.func @transform_1(%arg0: i32, %arg1: i32, %arg2: i32) -> (i32, i32) {
    %c0_i32 = arith.constant 0 : i32
    return %arg2, %arg1 : i32, i32
  }
  func.func @transform_2(%arg0: i32, %arg1: i32, %arg2: i32) -> (i32, i32) {
    %c0_i32 = arith.constant 0 : i32
    %c0_i32_0 = arith.constant 0 : i32
    return %c0_i32, %arg1 : i32, i32
  }
  func.func @transform_3(%arg0: i32, %arg1: i32, %arg2: i32) -> (i32, i32) {
    %c0_i32 = arith.constant 0 : i32
    return %arg0, %arg1 : i32, i32
  }
}

module attributes {stable_mosaic.version = 11 : i64} {
  func.func @_mm_kernel(%arg0: i32, %arg1: i32, %arg2: i32, %arg3: memref<8x512xbf16, #tpu.memory_space<vmem>>, %arg4: memref<512x128xbf16, #tpu.memory_space<vmem>>, %arg5: memref<1x128xf32, #tpu.memory_space<vmem>>, %arg6: memref<8x128xf32, #tpu.memory_space<vmem>>, %arg7: memref<8x128xf32, #tpu.memory_space<vmem>>) attributes {dimension_semantics = [#tpu.dimension_semantics<parallel>, #tpu.dimension_semantics<parallel>, #tpu.dimension_semantics<arbitrary>], iteration_bounds = array<i64: 1, 1, 1>, scalar_prefetch = 0 : i64, scratch_operands = 1 : i64, tpu.core_type = #tpu.core_type<tc>, window_params = [{transform_indices = @transform_0, window_bounds = array<i64: 8, 512>}, {transform_indices = @transform_1, window_bounds = array<i64: 512, 128>}, {transform_indices = @transform_2, window_bounds = array<i64: 1, 128>}, {transform_indices = @transform_3, window_bounds = array<i64: 8, 128>}]} {
    %c0_i32 = arith.constant 0 : i32
    %0 = arith.cmpi eq, %arg2, %c0_i32 : i32
    %1 = arith.extui %0 : i1 to i32
    %c0_i32_0 = arith.constant 0 : i32
    %2 = arith.cmpi ne, %1, %c0_i32_0 : i32
    scf.if %2 {
      %cst_10 = arith.constant 0.000000e+00 : f32
      %12 = vector.broadcast %cst_10 : f32 to vector<8x128xf32>
      %c0_11 = arith.constant 0 : index
      %c0_12 = arith.constant 0 : index
      %13 = vector.load %arg7[%c0_11, %c0_12] : memref<8x128xf32, #tpu.memory_space<vmem>>, vector<8x128xf32>
      tpu.vector_store %arg7[%c0_11, %c0_12], %12 {strides = array<i32>} : memref<8x128xf32, #tpu.memory_space<vmem>>, vector<8x128xf32>,
    } else {
    }
    %c0 = arith.constant 0 : index
    %c0_1 = arith.constant 0 : index
    %3 = vector.load %arg7[%c0, %c0_1] : memref<8x128xf32, #tpu.memory_space<vmem>>, vector<8x128xf32>
    %c0_2 = arith.constant 0 : index
    %c0_3 = arith.constant 0 : index
    %4 = vector.load %arg3[%c0_2, %c0_3] : memref<8x512xbf16, #tpu.memory_space<vmem>>, vector<8x512xbf16>
    %c0_4 = arith.constant 0 : index
    %c0_5 = arith.constant 0 : index
    %5 = vector.load %arg4[%c0_4, %c0_5] : memref<512x128xbf16, #tpu.memory_space<vmem>>, vector<512x128xbf16>
    %cst = arith.constant dense<0.000000e+00> : vector<8x128xf32>
    %6 = tpu.matmul %4, %5, %cst {dimension_numbers = #tpu.dot_dimension_numbers<[1], [0], [0], [1], [0, 0, 1, 1], [], []>} : vector<8x512xbf16>, vector<512x128xbf16>, vector<8x128xf32> -> vector<8x128xf32>
    %7 = arith.addf %3, %6 : vector<8x128xf32>
    %c0_6 = arith.constant 0 : index
    %c0_7 = arith.constant 0 : index
    %8 = vector.load %arg7[%c0_6, %c0_7] : memref<8x128xf32, #tpu.memory_space<vmem>>, vector<8x128xf32>
    tpu.vector_store %arg7[%c0_6, %c0_7], %7 {strides = array<i32>} : memref<8x128xf32, #tpu.memory_space<vmem>>, vector<8x128xf32>,
    %c0_i32_8 = arith.constant 0 : i32
    %9 = arith.cmpi eq, %arg2, %c0_i32_8 : i32
    %10 = arith.extui %9 : i1 to i32
    %c0_i32_9 = arith.constant 0 : i32
    %11 = arith.cmpi ne, %10, %c0_i32_9 : i32
    scf.if %11 {
      %c0_10 = arith.constant 0 : index
      %c0_11 = arith.constant 0 : index
      %12 = vector.load %arg7[%c0_10, %c0_11] : memref<8x128xf32, #tpu.memory_space<vmem>>, vector<8x128xf32>
      %c0_12 = arith.constant 0 : index
      %c0_13 = arith.constant 0 : index
      %13 = vector.load %arg5[%c0_12, %c0_13] : memref<1x128xf32, #tpu.memory_space<vmem>>, vector<1x128xf32>
      %14 = vector.broadcast %13 : vector<1x128xf32> to vector<8x128xf32>
      %15 = arith.addf %12, %14 : vector<8x128xf32>
      %16 = arith.negf %15 : vector<8x128xf32>
      %17 = math.exp %16 : vector<8x128xf32>
      %cst_14 = arith.constant 1.000000e+00 : f32
      %18 = vector.broadcast %cst_14 : f32 to vector<8x128xf32>
      %19 = arith.addf %18, %17 : vector<8x128xf32>
      %20 = arith.divf %18, %19 : vector<8x128xf32>
      %c0_15 = arith.constant 0 : index
      %c0_16 = arith.constant 0 : index
      %21 = vector.load %arg6[%c0_15, %c0_16] : memref<8x128xf32, #tpu.memory_space<vmem>>, vector<8x128xf32>
      tpu.vector_store %arg6[%c0_15, %c0_16], %20 {strides = array<i32>} : memref<8x128xf32, #tpu.memory_space<vmem>>, vector<8x128xf32>,
    } else {
    }
    return
  }
  func.func @transform_0(%arg0: i32, %arg1: i32, %arg2: i32) -> (i32, i32) {
    %c0_i32 = arith.constant 0 : i32
    return %arg0, %arg2 : i32, i32
  }
  func.func @transform_1(%arg0: i32, %arg1: i32, %arg2: i32) -> (i32, i32) {
    %c0_i32 = arith.constant 0 : i32
    return %arg2, %arg1 : i32, i32
  }
  func.func @transform_2(%arg0: i32, %arg1: i32, %arg2: i32) -> (i32, i32) {
    %c0_i32 = arith.constant 0 : i32
    %c0_i32_0 = arith.constant 0 : i32
    return %c0_i32, %arg1 : i32, i32
  }
  func.func @transform_3(%arg0: i32, %arg1: i32, %arg2: i32) -> (i32, i32) {
    %c0_i32 = arith.constant 0 : i32
    return %arg0, %arg1 : i32, i32
  }
}

</mosaic_0001>

<bundles_post_ra>
// kernel: _lambda_.22
= control target key start
LH: loop header
LB: loop body
LE: loop exit
PB: predicated region body
PF: predicated region fallthrough
CT: control target
= control target key end

     0   :  { %s2040_s12 = smov 0   ;;  %s2042_s13 = smov 0   ;;  %s2946_s0 = inlined_call_operand.vmem [shape: bf16[512,128], index: 0, kind: input, shape index: {}]   ;;  %s2947_s1 = inlined_call_operand.vmem [shape: bf16[128,128], index: 1, kind: input, shape index: {}]   ;;  %s2948_s2 = inlined_call_operand.vmem [shape: f32[1,128], index: 2, kind: input, shape index: {}]   ;;  %s2949_s3 = inlined_call_operand.vmem [shape: bf16[512,128], index: 3, kind: output, shape index: {}]  }
   0x1   :  { %s2044_s14 = smov 0  }
   0x2 LB: > { %s32_s15 = sadd.s32 1, %s2014_s13  ;;  %p1564_p0 = scmp.ge.s32.totalorder %s2018_s14, 1  ;;  %s2018_s14 = sphi %s2044_s14, %s13_s14   ;;  %s2014_s13 = sphi %s2042_s13, %s3023_s13   ;;  %s2010_s12 = sphi %s2040_s12, %s3022_s12  }
   0x3   : > { %p34_p1 = scmp.ge.s32.totalorder %s32_s15, 2  ;;  %p188_p2 = scmp.lt.s32.totalorder %s2018_s14, 3 }
   0x5   : > { %s3025_s15 = smov (%p34_p1, %s32_s15), 0  ;;  %p189_p3 = pnand %p1564_p0, %p188_p2 }
   0x6   : > { %s1565_s24 = sshll.u32 (!%p189_p3), %s2010_s12, 5 }
   0x7   : > { %192 = sbr.rel (%p189_p3) target bundleno = 335 (0x14f), region = 32  ;;  %p230_p4 = scmp.lt.s32.totalorder (!%p189_p3), %s1565_s24, 63 }
   0xc   : > { %v1722_v0 = vld [vmem:[%s2947_s1 + $0x38] sm:$0xff]  ;;  %v1721_v1 = vld [vmem:[%s2947_s1 + $0x30] sm:$0xff]  ;;  %v1720_v2 = vld [vmem:[%s2947_s1 + $0x28] sm:$0xff]  ;;  %s3027_s24 = smov (!%p230_p4, %s1565_s24), 63 }
   0xd   : > { %519 = vmatpush.bf16.msra.mxu0 %v1722_v0  ;;  %1818 = vmatpush.bf16.msra.mxu1 %v1722_v0  ;;  %v1719_v3 = vld [vmem:[%s2947_s1 + $0x20] sm:$0xff]  ;;  %v1718_v4 = vld [vmem:[%s2947_s1 + $0x18] sm:$0xff]  ;;  %v1717_v5 = vld [vmem:[%s2947_s1 + $0x10] sm:$0xff]  ;;  %s1566_s4 = sshll.u32 %s3027_s24, 2 }
   0xe   : > { %1819 = vmatpush.bf16.msra.mxu2 %v1722_v0  ;;  %1820 = vmatpush.bf16.msra.mxu3 %v1722_v0  ;;  %v1716_v6 = vld [vmem:[%s2947_s1 + $0x8] sm:$0xff]  ;;  %v1715_v7 = vld [vmem:[%s2947_s1] sm:$0xff]  ;;  %s2093_s9 = scalar_lea.vmem %s2946_s0, %s1566_s4  ;;  %s2336_s17 = scalar_lea.vmem %s2949_s3, %s1566_s4 }
   0xf   : > { %v1699_v8 = vld [vmem:[%s2093_s9] sm:$0xff]  ;;  %v1700_v12 = vld [vmem:[%s2093_s9 + $0x8] sm:$0xff]  ;;  %v1701_v16 = vld [vmem:[%s2093_s9 + $0x10] sm:$0xff] }
  0x10   : > { %v1703_v9 = vld [vmem:[%s2093_s9 + $0x20] sm:$0xff]  ;;  %v1704_v13 = vld [vmem:[%s2093_s9 + $0x28] sm:$0xff]  ;;  %v1705_v17 = vld [vmem:[%s2093_s9 + $0x30] sm:$0xff] }
  0x11   : > { %520 = vmatpush.bf16.msra.mxu0 %v1721_v1  ;;  %1821 = vmatpush.bf16.msra.mxu1 %v1721_v1  ;;  %v1707_v10 = vld [vmem:[%s2093_s9 + $0x40] sm:$0xff]  ;;  %v1708_v14 = vld [vmem:[%s2093_s9 + $0x48] sm:$0xff]  ;;  %v1709_v18 = vld [vmem:[%s2093_s9 + $0x50] sm:$0xff] }
  0x12   : > { %1822 = vmatpush.bf16.msra.mxu2 %v1721_v1  ;;  %1823 = vmatpush.bf16.msra.mxu3 %v1721_v1  ;;  %v1711_v11 = vld [vmem:[%s2093_s9 + $0x60] sm:$0xff]  ;;  %v1712_v15 = vld [vmem:[%s2093_s9 + $0x68] sm:$0xff]  ;;  %v1713_v19 = vld [vmem:[%s2093_s9 + $0x70] sm:$0xff] }
  0x13   : > { %v1702_v20 = vld [vmem:[%s2093_s9 + $0x18] sm:$0xff]  ;;  %v2114_v24 = vld [vmem:[%s2948_s2] ss:$0 sm:$0xff] }
  0x14   : > { %v1706_v21 = vld [vmem:[%s2093_s9 + $0x38] sm:$0xff] }
  0x15   : > { %521 = vmatpush.bf16.msra.mxu0 %v1720_v2  ;;  %1824 = vmatpush.bf16.msra.mxu1 %v1720_v2  ;;  %v1710_v22 = vld [vmem:[%s2093_s9 + $0x58] sm:$0xff] }
  0x16   : > { %1825 = vmatpush.bf16.msra.mxu2 %v1720_v2  ;;  %1826 = vmatpush.bf16.msra.mxu3 %v1720_v2  ;;  %v1714_v23 = vld [vmem:[%s2093_s9 + $0x78] sm:$0xff] }
  0x19   : > { %522 = vmatpush.bf16.msra.mxu0 %v1719_v3  ;;  %1827 = vmatpush.bf16.msra.mxu1 %v1719_v3 }
  0x1a   : > { %1828 = vmatpush.bf16.msra.mxu2 %v1719_v3  ;;  %1829 = vmatpush.bf16.msra.mxu3 %v1719_v3 }
  0x1d   : > { %523 = vmatpush.bf16.msra.mxu0 %v1718_v4  ;;  %1830 = vmatpush.bf16.msra.mxu1 %v1718_v4 }
  0x1e   : > { %1831 = vmatpush.bf16.msra.mxu2 %v1718_v4  ;;  %1832 = vmatpush.bf16.msra.mxu3 %v1718_v4 }
  0x21   : > { %524 = vmatpush.bf16.msra.mxu0 %v1717_v5  ;;  %1833 = vmatpush.bf16.msra.mxu1 %v1717_v5 }
  0x22   : > { %1834 = vmatpush.bf16.msra.mxu2 %v1717_v5  ;;  %1835 = vmatpush.bf16.msra.mxu3 %v1717_v5 }
  0x25   : > { %525 = vmatpush.bf16.msra.mxu0 %v1716_v6  ;;  %1836 = vmatpush.bf16.msra.mxu1 %v1716_v6 }
  0x26   : > { %1837 = vmatpush.bf16.msra.mxu2 %v1716_v6  ;;  %1838 = vmatpush.bf16.msra.mxu3 %v1716_v6 }
  0x29   : > { %526 = vmatpush.bf16.msra.mxu0 %v1715_v7  ;;  %1839 = vmatpush.bf16.msra.mxu1 %v1715_v7 }
  0x2a   : > { %1840 = vmatpush.bf16.msra.mxu2 %v1715_v7  ;;  %1841 = vmatpush.bf16.msra.mxu3 %v1715_v7 }
  0x2c   : > { %527 = vmatmul.bf16.vlgmr.msra.gmra.mxu0 %v1699_v8  ;;  %547 = vmatmul.bf16.vlgmr.msra.gmra.mxu1 %v1703_v9 }
  0x2d   : > { %567 = vmatmul.bf16.vlgmr.msra.gmra.mxu2 %v1707_v10  ;;  %587 = vmatmul.bf16.vlgmr.msra.gmra.mxu3 %v1711_v11 }
  0x3c   : > { %532 = vmatmul.bf16.gmra.mxu0 %v1700_v12  ;;  %552 = vmatmul.bf16.gmra.mxu1 %v1704_v13 }
  0x3d   : > { %572 = vmatmul.bf16.gmra.mxu2 %v1708_v14  ;;  %592 = vmatmul.bf16.gmra.mxu3 %v1712_v15 }
  0x4c   : > { %537 = vmatmul.bf16.gmra.mxu0 %v1701_v16  ;;  %557 = vmatmul.bf16.gmra.mxu1 %v1705_v17 }
  0x4d   : > { %577 = vmatmul.bf16.gmra.mxu2 %v1709_v18  ;;  %597 = vmatmul.bf16.gmra.mxu3 %v1713_v19 }
  0x5c   : > { %542 = vmatmul.bf16.gmra.mxu0 %v1702_v20  ;;  %562 = vmatmul.bf16.gmra.mxu1 %v1706_v21 }
  0x5d   : > { %582 = vmatmul.bf16.gmra.mxu2 %v1710_v22  ;;  %602 = vmatmul.bf16.gmra.mxu3 %v1714_v23 }
  0xa9   : > { %v528_v25 = vpop.f32.mrf.mxu0  ;;  %v548_v26 = vpop.f32.mrf.mxu1 }
  0xaa   : > { %v2117_v27 = vadd.f32 %v2114_v24, %v528_v25  ;;  %v2120_v28 = vadd.f32 %v2114_v24, %v548_v26 }
  0xac   : > { %v1665_v29 = vmul.f32 -1.442695, %v2117_v27  ;;  %v1673_v30 = vmul.f32 -1.442695, %v2120_v28 }
  0xae   : > { %1867 = vpow2.f32 %v1665_v29 }
  0xaf   : > { %1869 = vpow2.f32 %v1673_v30 }
  0xb0   : > { %v568_v31 = vpop.f32.mrf.mxu2  ;;  %v588_v32 = vpop.f32.mrf.mxu3 }
  0xb1   : > { %v2125_v33 = vadd.f32 %v2114_v24, %v568_v31  ;;  %v2128_v34 = vadd.f32 %v2114_v24, %v588_v32  ;;  %v530_v35 = vpop.f32.mrf.mxu0  ;;  %v550_v36 = vpop.f32.mrf.mxu1 }
  0xb2   : > { %v2131_v37 = vadd.f32 %v2114_v24, %v530_v35  ;;  %v2134_v38 = vadd.f32 %v2114_v24, %v550_v36 }
  0xb3   : > { %v1681_v39 = vmul.f32 -1.442695, %v2125_v33  ;;  %v1689_v40 = vmul.f32 -1.442695, %v2128_v34 }
  0xb4   : > { %v1868_v41 = vpop.eup %1867  ;;  %v1666_v44 = vmul.f32 -1.442695, %v2131_v37  ;;  %v1674_v46 = vmul.f32 -1.442695, %v2134_v38 }
  0xb5   : > { %v1870_v42 = vpop.eup %1869  ;;  %v2138_v43 = vadd.f32 1.0, %v1868_v41  ;;  %1871 = vpow2.f32 %v1681_v39 }
  0xb6   : > { %v2141_v45 = vadd.f32 1.0, %v1870_v42  ;;  %1873 = vpow2.f32 %v1689_v40 }
  0xb7   : > { %1875 = vrcp.f32 %v2138_v43  ;;  %v880_v59 = vand.u32 2147483647, %v2138_v43  ;;  %v882_v60 = vand.u32 2147483648, %v2138_v43  ;;  %vm876_vm0 = vweird.f32 %v2138_v43 }
  0xb8   : > { %1877 = vrcp.f32 %v2141_v45  ;;  %v570_v47 = vpop.f32.mrf.mxu2  ;;  %v590_v48 = vpop.f32.mrf.mxu3  ;;  %vm996_vm1 = vweird.f32 %v2141_v45  ;;  %v1000_v4 = vand.u32 2147483647, %v2141_v45  ;;  %v1002_v5 = vand.u32 2147483648, %v2141_v45 }
  0xb9   : > { %1879 = vpow2.f32 %v1666_v44  ;;  %v2147_v49 = vadd.f32 %v2114_v24, %v570_v47  ;;  %v2150_v51 = vadd.f32 %v2114_v24, %v590_v48  ;;  %v533_v61 = vpop.f32.mrf.mxu0  ;;  %v553_v62 = vpop.f32.mrf.mxu1  ;;  %vm2181_vm2 = vcmp.eq.f32.partialorder %v880_v59, 8.507059e+37 }
  0xba   : > { %1881 = vpow2.f32 %v1674_v46  ;;  %v2175_v7 = vadd.f32 %v2114_v24, %v533_v61  ;;  %v2178_v8 = vadd.f32 %v2114_v24, %v553_v62  ;;  %v883_v11 = vor.u32 1.1754944e-38, %v882_v60 }
  0xbb   : > { %v1872_v50 = vpop.eup %1871  ;;  %v1682_v56 = vmul.f32 -1.442695, %v2147_v49  ;;  %v1690_v1 = vmul.f32 -1.442695, %v2150_v51  ;;  %vm2195_vm4 = vcmp.eq.f32.partialorder %v1000_v4, 8.507059e+37  ;;  %v1003_v21 = vor.u32 1.1754944e-38, %v1002_v5 }
  0xbc   : > { %v1874_v52 = vpop.eup %1873  ;;  %v2152_v53 = vadd.f32 1.0, %v1872_v50  ;;  %v1667_v23 = vmul.f32 -1.442695, %v2175_v7  ;;  %v2206_v25 = vmul.f32 -1.442695, %v2178_v8 }
  0xbd   : > { %v2154_v54 = vpop.eup %1875  ;;  %v2156_v55 = vadd.f32 1.0, %v1874_v52 }
  0xbe   : > { %v2159_v57 = vpop.eup %1877  ;;  %v872_v58 = vmul.f32 %v2154_v54, %v2138_v43  ;;  %1883 = vrcp.f32 %v2152_v53  ;;  %vm877_vm3 = vweird.f32 %v2154_v54  ;;  %v1120_v15 = vand.u32 2147483647, %v2152_v53 }
  0xbf   : > { %v1880_v63 = vpop.eup %1879  ;;  %v992_v0 = vmul.f32 %v2159_v57, %v2141_v45  ;;  %1885 = vrcp.f32 %v2156_v55  ;;  %v1122_v19 = vand.u32 2147483648, %v2152_v53  ;;  %v1242_v20 = vand.u32 2147483648, %v2156_v55  ;;  %vm2218_vm7 = vmor %vm876_vm0, %vm877_vm3 }
  0xc0   : > { %v1882_v2 = vpop.eup %1881  ;;  %v873_v3 = vsub.f32 1.0, %v872_v58  ;;  %1887 = vpow2.f32 %v1682_v56  ;;  %v2185_v12 = vadd.f32 1.0, %v1880_v63  ;;  %v573_v26 = vpop.f32.mrf.mxu2  ;;  %vm997_vm5 = vweird.f32 %v2159_v57 }
  0xc1   : > { %v993_v6 = vsub.f32 1.0, %v992_v0  ;;  %v2187_v13 = vadd.f32 1.0, %v1882_v2  ;;  %1889 = vpow2.f32 %v1690_v1  ;;  %vm1116_vm6 = vweird.f32 %v2152_v53  ;;  %vm2243_vm10 = vmor %vm996_vm1, %vm997_vm5 }
  0xc2   : > { %v874_v9 = vmul.f32 %v2154_v54, %v873_v3  ;;  %1891 = vrcp.f32 %v2185_v12  ;;  %v1240_v39 = vand.u32 2147483647, %v2156_v55  ;;  %v895_v40 = vand.u32 2147483647, %v2185_v12 }
  0xc3   : > { %v994_v14 = vmul.f32 %v2159_v57, %v993_v6  ;;  %1893 = vrcp.f32 %v2187_v13  ;;  %vm2229_vm8 = vcmp.eq.f32.partialorder %v1120_v15, 8.507059e+37  ;;  %v1123_v43 = vor.u32 1.1754944e-38, %v1122_v19 }
  0xc4   : > { %v2192_v16 = vpop.eup %1883  ;;  %v875_v17 = vadd.f32 %v2154_v54, %v874_v9  ;;  %vm1236_vm9 = vweird.f32 %v2156_v55  ;;  %v2234_v44 = vor.u32 1.1754944e-38, %v1242_v20  ;;  %v2237_v46 = vadd.f32 %v2114_v24, %v573_v26 }
  0xc5   : > { %v1112_v22 = vmul.f32 %v2192_v16, %v2152_v53  ;;  %v2208_v29 = vpop.eup %1885  ;;  %v995_v30 = vadd.f32 %v2159_v57, %v994_v14  ;;  %vm1117_vm11 = vweird.f32 %v2192_v16  ;;  %vm891_vm12 = vweird.f32 %v2185_v12 }
  0xc6   : > { %v1888_v31 = vpop.eup %1887  ;;  %v1232_v36 = vmul.f32 %v2208_v29, %v2156_v55  ;;  %v879_v41 = vsel %vm2218_vm7, %v2154_v54, %v875_v17  ;;  %v897_v58 = vand.u32 2147483648, %v2185_v12  ;;  %1895 = vpow2.f32 %v1667_v23  ;;  %vm2280_vm15 = vmor %vm1116_vm6, %vm1117_vm11 }
  0xc7   : > { %v1113_v35 = vsub.f32 1.0, %v1112_v22  ;;  %v1890_v47 = vpop.eup %1889  ;;  %v999_v56 = vsel %vm2243_vm10, %v2159_v57, %v995_v30  ;;  %v2254_v59 = vadd.f32 1.0, %v1888_v31  ;;  %v884_v45 = vsel %vm2181_vm2, %v883_v11, %v879_v41 }
  0xc8   : > { %v1233_v52 = vsub.f32 1.0, %v1232_v36  ;;  %v1892_v54 = vpop.eup %1891  ;;  %vm2261_vm13 = vcmp.eq.f32.partialorder %v895_v40, 8.507059e+37  ;;  %vm2265_vm14 = vcmp.eq.f32.partialorder %v1240_v39, 8.507059e+37  ;;  %v1015_v1 = vand.u32 2147483647, %v2187_v13 }
  0xc9   : > { %v1114_v50 = vmul.f32 %v2192_v16, %v1113_v35  ;;  %v887_v62 = vmul.f32 %v1892_v54, %v2185_v12  ;;  %v1894_v0 = vpop.eup %1893  ;;  %v1017_v2 = vand.u32 2147483648, %v2187_v13  ;;  %1897 = vrcp.f32 %v2254_v59 }
  0xca   : > { %v1234_v61 = vmul.f32 %v2208_v29, %v1233_v52  ;;  %v2272_v3 = vadd.f32 1.0, %v1890_v47  ;;  %v1004_v4 = vsel %vm2195_vm4, %v1003_v21, %v999_v56  ;;  %v1007_v9 = vmul.f32 %v1894_v0, %v2187_v13  ;;  %v535_v47 = vpop.f32.mrf.mxu0 }
  0xcb   : > { %v1115_v60 = vadd.f32 %v2192_v16, %v1114_v50  ;;  %v888_v6 = vsub.f32 1.0, %v887_v62  ;;  %vm1011_vm0 = vweird.f32 %v2187_v13  ;;  %v1351_v10 = vmul.f32 %v884_v45, %v2117_v27 }
  0xcc   : > { %v1235_v14 = vadd.f32 %v2208_v29, %v1234_v61  ;;  %vm1237_vm1 = vweird.f32 %v2208_v29  ;;  %vm892_vm2 = vweird.f32 %v1892_v54  ;;  %v898_v15 = vor.u32 1.1754944e-38, %v897_v58  ;;  %v1896_v18 = vpop.eup %1895 }
  0xcd   : > { %v1119_v11 = vsel %vm2280_vm15, %v2192_v16, %v1115_v60  ;;  %v889_v53 = vmul.f32 %v1892_v54, %v888_v6  ;;  %v1008_v17 = vsub.f32 1.0, %v1007_v9  ;;  %v1359_v19 = vmul.f32 %v1004_v4, %v2120_v28  ;;  %vm2302_vm4 = vmor %vm1236_vm9, %vm1237_vm1  ;;  %v575_v4 = vpop.f32.mrf.mxu2 }
  0xce   : > { %vm2293_vm3 = vcmp.eq.f32.partialorder %v1015_v1, 8.507059e+37  ;;  %v1018_v27 = vor.u32 1.1754944e-38, %v1017_v2  ;;  %1899 = vrcp.f32 %v2272_v3  ;;  %v1124_v16 = vsel %vm2229_vm8, %v1123_v43, %v1119_v11  ;;  %vm893_vm6 = vmor %vm891_vm12, %vm892_vm2 }
  0xcf   : > { %v890_v22 = vadd.f32 %v1892_v54, %v889_v53  ;;  %v1009_v23 = vmul.f32 %v1894_v0, %v1008_v17  ;;  %vm1012_vm5 = vweird.f32 %v1894_v0  ;;  %v1898_v28 = vpop.eup %1897  ;;  %v1239_v26 = vsel %vm2302_vm4, %v2208_v29, %v1235_v14 }
  0xd0   : > { %vm1131_vm7 = vweird.f32 %v2254_v59  ;;  %v2313_v30 = vadd.f32 1.0, %v1896_v18  ;;  %1901 = vpow2.f32 %v2206_v25  ;;  %v1127_v32 = vmul.f32 %v1898_v28, %v2254_v59  ;;  %vm1013_vm8 = vmor %vm1011_vm0, %vm1012_vm5  ;;  %v593_v25 = vpop.f32.mrf.mxu3 }
  0xd1   : > { %v894_v55 = vsel %vm893_vm6, %v1892_v54, %v890_v22  ;;  %v1010_v31 = vadd.f32 %v1894_v0, %v1009_v23  ;;  %v1135_v35 = vand.u32 2147483647, %v2254_v59  ;;  %v2319_v36 = vmul.f32 %v1124_v16, %v2125_v33 }
  0xd2   : > { %v899_v12 = vsel %vm2261_vm13, %v898_v15, %v894_v55  ;;  %v1137_v29 = vand.u32 2147483648, %v2254_v59  ;;  %1903 = vrcp.f32 %v2313_v30  ;;  %v1244_v39 = vsel %vm2265_vm14, %v2234_v44, %v1239_v26  ;;  %v538_v55 = vpop.f32.mrf.mxu0 }
  0xd3   : > { %v1352_v40 = vmul.f32 %v899_v12, %v2131_v37  ;;  %v1014_v41 = vsel %vm1013_vm8, %v1894_v0, %v1010_v31  ;;  %v1128_v33 = vsub.f32 1.0, %v1127_v32  ;;  %vm1132_vm9 = vweird.f32 %v1898_v28 }
  0xd4   : > { %v1900_v42 = vpop.eup %1899  ;;  %v1019_v13 = vsel %vm2293_vm3, %v1018_v27, %v1014_v41  ;;  %v1255_v43 = vand.u32 2147483647, %v2272_v3  ;;  %v1683_v44 = vmul.f32 -1.442695, %v2237_v46  ;;  %vm2344_vm10 = vcmp.eq.f32.partialorder %v1135_v35, 8.507059e+37  ;;  %vm1133_vm11 = vmor %vm1131_vm7, %vm1132_vm9 }
  0xd5   : > { %v1726_v37 = vpack.c.bf16 %v1352_v40, %v1351_v10  ;;  %v1360_v48 = vmul.f32 %v1019_v13, %v2134_v38  ;;  %v1129_v50 = vmul.f32 %v1898_v28, %v1128_v33  ;;  %v1247_v52 = vmul.f32 %v1900_v42, %v2272_v3  ;;  %v555_v38 = vpop.f32.mrf.mxu1 }
  0xd6   : > { %v1902_v54 = vpop.eup %1901  ;;  %v1138_v58 = vor.u32 1.1754944e-38, %v1137_v29  ;;  %v1257_v45 = vand.u32 2147483648, %v2272_v3  ;;  %1905 = vpow2.f32 %v1683_v44  ;;  %vm1251_vm12 = vweird.f32 %v2272_v3 }
  0xd7   : > { %1727 = vst [vmem:[%s2336_s17] sm:$0xff] %v1726_v37   ;;  %v1746_v60 = vpack.c.bf16 %v1360_v48, %v1359_v19  ;;  %v1130_v61 = vadd.f32 %v1898_v28, %v1129_v50  ;;  %v1248_v62 = vsub.f32 1.0, %v1247_v52  ;;  %v2350_v63 = vadd.f32 1.0, %v1902_v54 }
  0xd8   : > { %v2352_v0 = vpop.eup %1903  ;;  %vm2358_vm13 = vcmp.eq.f32.partialorder %v1255_v43, 8.507059e+37  ;;  %v2363_v1 = vadd.f32 %v2114_v24, %v593_v25  ;;  %v2366_v2 = vadd.f32 %v2114_v24, %v535_v47  ;;  %vm1252_vm14 = vweird.f32 %v1900_v42  ;;  %v595_v21 = vpop.f32.mrf.mxu3 }
  0xd9   : > { %1806 = vst [vmem:[%s2336_s17 + $0x20] sm:$0xff] %v1746_v60   ;;  %v1134_v5 = vsel %vm1133_vm11, %v1898_v28, %v1130_v61  ;;  %v1249_v6 = vmul.f32 %v1900_v42, %v1248_v62  ;;  %v902_v59 = vmul.f32 %v2352_v0, %v2313_v30  ;;  %v1258_v10 = vor.u32 1.1754944e-38, %v1257_v45  ;;  %vm1253_vm15 = vmor %vm1251_vm12, %vm1252_vm14 }
  0xda   : > { %v1139_v9 = vsel %vm2344_vm10, %v1138_v58, %v1134_v5  ;;  %1907 = vrcp.f32 %v2350_v63  ;;  %v2375_v11 = vadd.f32 %v2114_v24, %v555_v38  ;;  %v2379_v17 = vadd.f32 %v2114_v24, %v575_v4  ;;  %v578_v38 = vpop.f32.mrf.mxu2 }
  0xdb   : > { %v1368_v14 = vmul.f32 %v1139_v9, %v2147_v49  ;;  %v1250_v53 = vadd.f32 %v1900_v42, %v1249_v6  ;;  %v903_v15 = vsub.f32 1.0, %v902_v59  ;;  %v1375_v19 = vmul.f32 %v1244_v39, %v2128_v34  ;;  %v540_v59 = vpop.f32.mrf.mxu0 }
  0xdc   : > { %v1906_v18 = vpop.eup %1905  ;;  %v910_v20 = vand.u32 2147483647, %v2313_v30  ;;  %v1691_v27 = vmul.f32 -1.442695, %v2363_v1  ;;  %v1668_v16 = vmul.f32 -1.442695, %v2366_v2  ;;  %v2399_v35 = vadd.f32 %v2114_v24, %v595_v21 }
  0xdd   : > { %v1766_v49 = vpack.c.bf16 %v1368_v14, %v2319_v36  ;;  %v1254_v22 = vsel %vm1253_vm15, %v1900_v42, %v1250_v53  ;;  %v904_v23 = vmul.f32 %v2352_v0, %v903_v15  ;;  %v912_v28 = vand.u32 2147483648, %v2313_v30  ;;  %v558_v40 = vpop.f32.mrf.mxu1 }
  0xde   : > { %v1259_v34 = vsel %vm2358_vm13, %v1258_v10, %v1254_v22  ;;  %v2392_v26 = vadd.f32 1.0, %v1906_v18  ;;  %1909 = vpow2.f32 %v1691_v27  ;;  %v1676_v3 = vmul.f32 -1.442695, %v2375_v11 }
  0xdf   : > { %1810 = vst [vmem:[%s2336_s17 + $0x40] sm:$0xff] %v1766_v49   ;;  %v1376_v31 = vmul.f32 %v1259_v34, %v2150_v51  ;;  %1911 = vpow2.f32 %v1668_v16  ;;  %v1684_v32 = vmul.f32 -1.442695, %v2379_v17  ;;  %v905_v12 = vadd.f32 %v2352_v0, %v904_v23 }
  0xe0   : > { %v2401_v36 = vpop.eup %1907  ;;  %vm906_vm0 = vweird.f32 %v2313_v30  ;;  %vm907_vm1 = vweird.f32 %v2352_v0  ;;  %1913 = vrcp.f32 %v2392_v26  ;;  %vm2409_vm2 = vcmp.eq.f32.partialorder %v910_v20, 8.507059e+37 }
  0xe1   : > { %v1786_v29 = vpack.c.bf16 %v1376_v31, %v1375_v19  ;;  %v1022_v51 = vmul.f32 %v2401_v36, %v2350_v63  ;;  %v1030_v39 = vand.u32 2147483647, %v2350_v63  ;;  %1915 = vpow2.f32 %v1676_v3  ;;  %vm2415_vm3 = vmor %vm906_vm0, %vm907_vm1 }
  0xe2   : > { %v913_v30 = vor.u32 1.1754944e-38, %v912_v28  ;;  %1917 = vpow2.f32 %v1684_v32  ;;  %v1692_v42 = vmul.f32 -1.442695, %v2399_v35  ;;  %v909_v43 = vsel %vm2415_vm3, %v2352_v0, %v905_v12  ;;  %v598_v0 = vpop.f32.mrf.mxu3 }
  0xe3   : > { %1814 = vst [vmem:[%s2336_s17 + $0x60] sm:$0xff] %v1786_v29   ;;  %v1023_v33 = vsub.f32 1.0, %v1022_v51  ;;  %v1032_v44 = vand.u32 2147483648, %v2350_v63  ;;  %v1150_v47 = vand.u32 2147483647, %v2392_v26  ;;  %v2426_v37 = vadd.f32 %v2114_v24, %v538_v55  ;;  %v543_v10 = vpop.f32.mrf.mxu0 }
  0xe4   : > { %v1910_v13 = vpop.eup %1909  ;;  %v1152_v52 = vand.u32 2147483648, %v2392_v26  ;;  %1919 = vpow2.f32 %v1692_v42  ;;  %vm1026_vm4 = vweird.f32 %v2350_v63  ;;  %vm1027_vm5 = vweird.f32 %v2401_v36 }
  0xe5   : > { %v1912_v48 = vpop.eup %1911  ;;  %v1024_v50 = vmul.f32 %v2401_v36, %v1023_v33  ;;  %v2430_v54 = vadd.f32 1.0, %v1910_v13  ;;  %vm2434_vm6 = vcmp.eq.f32.partialorder %v1030_v39, 8.507059e+37  ;;  %v914_v60 = vsel %vm2409_vm2, %v913_v30, %v909_v43  ;;  %vm2454_vm7 = vmor %vm1026_vm4, %vm1027_vm5  ;;  %v560_v28 = vpop.f32.mrf.mxu1 }
  0xe6   : > { %v1914_v56 = vpop.eup %1913  ;;  %v2438_v45 = vadd.f32 1.0, %v1912_v48  ;;  %v1033_v4 = vor.u32 1.1754944e-38, %v1032_v44  ;;  %v1669_v5 = vmul.f32 -1.442695, %v2426_v37  ;;  %v2448_v6 = vadd.f32 %v2114_v24, %v558_v40 }
  0xe7   : > { %v1025_v61 = vadd.f32 %v2401_v36, %v1024_v50  ;;  %v1142_v62 = vmul.f32 %v1914_v56, %v2392_v26  ;;  %1921 = vrcp.f32 %v2430_v54  ;;  %v1916_v57 = vpop.eup %1915  ;;  %vm1146_vm8 = vweird.f32 %v2392_v26 }
  0xe8   : > { %1923 = vrcp.f32 %v2438_v45  ;;  %v1918_v9 = vpop.eup %1917  ;;  %vm2459_vm9 = vcmp.eq.f32.partialorder %v1150_v47, 8.507059e+37  ;;  %v1153_v15 = vor.u32 1.1754944e-38, %v1152_v52  ;;  %v2464_v18 = vmul.f32 %v914_v60, %v2175_v7 }
  0xe9   : > { %v1143_v14 = vsub.f32 1.0, %v1142_v62  ;;  %v1029_v19 = vsel %vm2454_vm7, %v2401_v36, %v1025_v61  ;;  %v2470_v63 = vadd.f32 %v2114_v24, %v578_v38  ;;  %v2473_v20 = vadd.f32 %v2114_v24, %v598_v0 }
  0xea   : > { %v1920_v27 = vpop.eup %1919  ;;  %vm1147_vm10 = vweird.f32 %v1914_v56  ;;  %v2475_v21 = vadd.f32 1.0, %v1916_v57  ;;  %v2478_v49 = vadd.f32 %v2114_v24, %v540_v59  ;;  %v1272_v7 = vand.u32 2147483648, %v2430_v54 }
  0xeb   : > { %v1144_v16 = vmul.f32 %v1914_v56, %v1143_v14  ;;  %v2481_v22 = vadd.f32 1.0, %v1918_v9  ;;  %1925 = vpow2.f32 %v1669_v5  ;;  %v1677_v23 = vmul.f32 -1.442695, %v2448_v6  ;;  %vm1148_vm11 = vmor %vm1146_vm8, %vm1147_vm10 }
  0xec   : > { %v1034_v3 = vsel %vm2434_vm6, %v1033_v4, %v1029_v19  ;;  %v925_v31 = vand.u32 2147483647, %v2438_v45  ;;  %1927 = vrcp.f32 %v2475_v21  ;;  %v927_v12 = vand.u32 2147483648, %v2438_v45 }
  0xed   : > { %v2484_v34 = vpop.eup %1921  ;;  %v1145_v55 = vadd.f32 %v1914_v56, %v1144_v16  ;;  %1929 = vrcp.f32 %v2481_v22  ;;  %v2496_v29 = vadd.f32 1.0, %v1920_v27  ;;  %v1270_v25 = vand.u32 2147483647, %v2430_v54 }
  0xee   : > { %v1924_v32 = vpop.eup %1923  ;;  %v1262_v36 = vmul.f32 %v2484_v34, %v2430_v54  ;;  %v2501_v40 = vadd.f32 %v2114_v24, %v560_v28  ;;  %vm921_vm12 = vweird.f32 %v2438_v45  ;;  %v1045_v26 = vand.u32 2147483647, %v2475_v21 }
  0xef   : > { %v1149_v51 = vsel %vm1148_vm11, %v1914_v56, %v1145_v55  ;;  %v917_v39 = vmul.f32 %v1924_v32, %v2438_v45  ;;  %v1047_v30 = vand.u32 2147483648, %v2475_v21  ;;  %v2507_v33 = vmul.f32 %v1034_v3, %v2178_v8 }
  0xf0   : > { %v1263_v41 = vsub.f32 1.0, %v1262_v36  ;;  %v1154_v42 = vsel %vm2459_vm9, %v1153_v15, %v1149_v51  ;;  %vm1266_vm13 = vweird.f32 %v2430_v54  ;;  %v2512_v13 = vor.u32 1.1754944e-38, %v1272_v7 }
  0xf1   : > { %v918_v43 = vsub.f32 1.0, %v917_v39  ;;  %v1926_v44 = vpop.eup %1925  ;;  %vm2514_vm14 = vcmp.eq.f32.partialorder %v925_v31, 8.507059e+37  ;;  %v928_v48 = vor.u32 1.1754944e-38, %v927_v12  ;;  %vm1041_vm15 = vweird.f32 %v2475_v21 }
  0xf2   : > { %1931 = vrcp.f32 %v2496_v29  ;;  %v1928_v8 = vpop.eup %1927  ;;  %v1264_v50 = vmul.f32 %v2484_v34, %v1263_v41  ;;  %vm1267_vm0 = vweird.f32 %v2484_v34  ;;  %vm922_vm1 = vweird.f32 %v1924_v32 }
  0xf3   : > { %v919_v52 = vmul.f32 %v1924_v32, %v918_v43  ;;  %v1930_v56 = vpop.eup %1929  ;;  %v2523_v58 = vmul.f32 %v1154_v42, %v2237_v46  ;;  %v1037_v60 = vmul.f32 %v1928_v8, %v2475_v21  ;;  %vm2526_vm2 = vcmp.eq.f32.partialorder %v1045_v26, 8.507059e+37  ;;  %vm923_vm4 = vmor %vm921_vm12, %vm922_vm1 }
  0xf4   : > { %v1048_v62 = vor.u32 1.1754944e-38, %v1047_v30  ;;  %vm1161_vm3 = vweird.f32 %v2481_v22  ;;  %v1157_v0 = vmul.f32 %v1930_v56, %v2481_v22  ;;  %v1165_v57 = vand.u32 2147483647, %v2481_v22  ;;  %vm2554_vm8 = vmor %vm1266_vm13, %vm1267_vm0 }
  0xf5   : > { %v920_v38 = vadd.f32 %v1924_v32, %v919_v52  ;;  %v1167_v4 = vand.u32 2147483648, %v2481_v22  ;;  %v1038_v46 = vsub.f32 1.0, %v1037_v60  ;;  %v1285_v5 = vand.u32 2147483647, %v2496_v29 }
  0xf6   : > { %v2537_v59 = vadd.f32 1.0, %v1926_v44  ;;  %1933 = vpow2.f32 %v1677_v23  ;;  %v1265_v9 = vadd.f32 %v2484_v34, %v1264_v50  ;;  %vm2540_vm5 = vcmp.eq.f32.partialorder %v1270_v25, 8.507059e+37 }
  0xf7   : > { %v924_v14 = vsel %vm923_vm4, %v1924_v32, %v920_v38  ;;  %v1158_v53 = vsub.f32 1.0, %v1157_v0  ;;  %v1685_v15 = vmul.f32 -1.442695, %v2470_v63  ;;  %v1039_v27 = vmul.f32 %v1928_v8, %v1038_v46 }
  0xf8   : > { %v1932_v19 = vpop.eup %1931  ;;  %v929_v45 = vsel %vm2514_vm14, %v928_v48, %v924_v14  ;;  %vm1042_vm6 = vweird.f32 %v1928_v8  ;;  %1935 = vrcp.f32 %v2537_v59  ;;  %vm1162_vm7 = vweird.f32 %v1930_v56 }
  0xf9   : > { %v1354_v16 = vmul.f32 %v929_v45, %v2366_v2  ;;  %v1159_v7 = vmul.f32 %v1930_v56, %v1158_v53  ;;  %v1277_v23 = vmul.f32 %v1932_v19, %v2496_v29  ;;  %v1040_v3 = vadd.f32 %v1928_v8, %v1039_v27  ;;  %vm1043_vm10 = vmor %vm1041_vm15, %vm1042_vm6 }
  0xfa   : > { %vm2558_vm9 = vcmp.eq.f32.partialorder %v1165_v57, 8.507059e+37  ;;  %v1168_v31 = vor.u32 1.1754944e-38, %v1167_v4  ;;  %v1287_v2 = vand.u32 2147483648, %v2496_v29  ;;  %1937 = vpow2.f32 %v1685_v15  ;;  %vm1163_vm11 = vmor %vm1161_vm3, %vm1162_vm7 }
  0xfb   : > { %v1731_v32 = vpack.c.bf16 %v1354_v16, %v2464_v18  ;;  %v1160_v36 = vadd.f32 %v1930_v56, %v1159_v7  ;;  %v1278_v54 = vsub.f32 1.0, %v1277_v23  ;;  %v1269_v51 = vsel %vm2554_vm8, %v2484_v34, %v1265_v9 }
  0xfc   : > { %v1934_v12 = vpop.eup %1933  ;;  %v1044_v25 = vsel %vm1043_vm10, %v1928_v8, %v1040_v3  ;;  %vm1282_vm12 = vweird.f32 %v1932_v19  ;;  %v1693_v39 = vmul.f32 -1.442695, %v2473_v20  ;;  %v1670_v22 = vmul.f32 -1.442695, %v2478_v49 }
  0xfd   : > { %1803 = vst [vmem:[%s2336_s17 + $0x8] sm:$0xff] %v1731_v32   ;;  %v1049_v18 = vsel %vm2526_vm2, %v1048_v62, %v1044_v25  ;;  %v1164_v21 = vsel %vm1163_vm11, %v1930_v56, %v1160_v36  ;;  %v1279_v41 = vmul.f32 %v1932_v19, %v1278_v54  ;;  %v2576_v26 = vadd.f32 1.0, %v1934_v12  ;;  %v580_v62 = vpop.f32.mrf.mxu2  ;;  %v563_v12 = vpop.f32.mrf.mxu1 }
  0xfe   : > { %v2578_v30 = vpop.eup %1935  ;;  %v1362_v34 = vmul.f32 %v1049_v18, %v2375_v11  ;;  %v1169_v42 = vsel %vm2558_vm9, %v1168_v31, %v1164_v21  ;;  %1939 = vpow2.f32 %v1693_v39  ;;  %vm1281_vm13 = vweird.f32 %v2496_v29 }
  0xff   : > { %v1370_v43 = vmul.f32 %v1169_v42, %v2379_v17  ;;  %v1280_v44 = vadd.f32 %v1932_v19, %v1279_v41  ;;  %v932_v47 = vmul.f32 %v2578_v30, %v2537_v59  ;;  %v1274_v11 = vsel %vm2540_vm5, %v2512_v13, %v1269_v51  ;;  %vm1283_vm14 = vmor %vm1281_vm13, %vm1282_vm12 }
 0x100   : > { %v1751_v48 = vpack.c.bf16 %v1362_v34, %v2507_v33  ;;  %v1288_v8 = vor.u32 1.1754944e-38, %v1287_v2  ;;  %1941 = vrcp.f32 %v2576_v26  ;;  %v1938_v50 = vpop.eup %1937  ;;  %vm1286_vm15 = vcmp.eq.f32.partialorder %v1285_v5, 8.507059e+37 }
 0x101   : > { %v1771_v17 = vpack.c.bf16 %v1370_v43, %v2523_v58  ;;  %v1284_v52 = vsel %vm1283_vm14, %v1932_v19, %v1280_v44  ;;  %v933_v29 = vsub.f32 1.0, %v932_v47  ;;  %v2596_v60 = vadd.f32 1.0, %v1938_v50 }
 0x102   : > { %1807 = vst [vmem:[%s2336_s17 + $0x28] sm:$0xff] %v1751_v48   ;;  %v1289_v56 = vsel %vm1286_vm15, %v1288_v8, %v1284_v52  ;;  %1943 = vpow2.f32 %v1670_v22  ;;  %v1377_v13 = vmul.f32 %v1274_v11, %v2363_v1  ;;  %v1678_v61 = vmul.f32 -1.442695, %v2501_v40  ;;  %v600_v1 = vpop.f32.mrf.mxu3 }
 0x103   : > { %1811 = vst [vmem:[%s2336_s17 + $0x48] sm:$0xff] %v1771_v17   ;;  %v1378_v33 = vmul.f32 %v1289_v56, %v2399_v35  ;;  %v934_v58 = vmul.f32 %v2578_v30, %v933_v29  ;;  %v2609_v46 = vadd.f32 %v2114_v24, %v580_v62  ;;  %vm936_vm0 = vweird.f32 %v2537_v59 }
 0x104   : > { %v1940_v38 = vpop.eup %1939  ;;  %1945 = vpow2.f32 %v1678_v61  ;;  %vm937_vm1 = vweird.f32 %v2578_v30  ;;  %v2621_v19 = vadd.f32 %v2114_v24, %v600_v1  ;;  %v940_v45 = vand.u32 2147483647, %v2537_v59 }
 0x105   : > { %v1791_v0 = vpack.c.bf16 %v1378_v33, %v1377_v13  ;;  %1947 = vrcp.f32 %v2596_v60  ;;  %v2606_v4 = vadd.f32 1.0, %v1940_v38  ;;  %v935_v9 = vadd.f32 %v2578_v30, %v934_v58  ;;  %vm2635_vm2 = vmor %vm936_vm0, %vm937_vm1 }
 0x106   : > { %v2603_v57 = vpop.eup %1941  ;;  %v1686_v15 = vmul.f32 -1.442695, %v2609_v46  ;;  %v942_v27 = vand.u32 2147483648, %v2537_v59  ;;  %v1060_v7 = vand.u32 2147483647, %v2576_v26  ;;  %v2629_v23 = vadd.f32 %v2114_v24, %v543_v10 }
 0x107   : > { %1815 = vst [vmem:[%s2336_s17 + $0x68] sm:$0xff] %v1791_v0   ;;  %v1052_v35 = vmul.f32 %v2603_v57, %v2576_v26  ;;  %1949 = vrcp.f32 %v2606_v4  ;;  %v1062_v55 = vand.u32 2147483648, %v2576_v26  ;;  %v939_v2 = vsel %vm2635_vm2, %v2578_v30, %v935_v9  ;;  %v583_v0 = vpop.f32.mrf.mxu2 }
 0x108   : > { %v1944_v5 = vpop.eup %1943  ;;  %v1694_v36 = vmul.f32 -1.442695, %v2621_v19  ;;  %vm941_vm3 = vcmp.eq.f32.partialorder %v940_v45, 8.507059e+37  ;;  %v943_v54 = vor.u32 1.1754944e-38, %v942_v27  ;;  %vm1056_vm4 = vweird.f32 %v2576_v26 }
 0x109   : > { %v1053_v14 = vsub.f32 1.0, %v1052_v35  ;;  %v2617_v53 = vadd.f32 1.0, %v1944_v5  ;;  %v1182_v59 = vand.u32 2147483648, %v2596_v60  ;;  %vm2649_vm5 = vcmp.eq.f32.partialorder %v1060_v7, 8.507059e+37 }
 0x10a   : > { %v1946_v16 = vpop.eup %1945  ;;  %v1671_v39 = vmul.f32 -1.442695, %v2629_v23  ;;  %v944_v21 = vsel %vm941_vm3, %v943_v54, %v939_v2  ;;  %vm1057_vm6 = vweird.f32 %v2603_v57  ;;  %v1063_v41 = vor.u32 1.1754944e-38, %v1062_v55  ;;  %v603_v1 = vpop.f32.mrf.mxu3 }
 0x10b   : > { %1951 = vrcp.f32 %v2617_v53  ;;  %v2631_v28 = vpop.eup %1947  ;;  %v2640_v31 = vadd.f32 1.0, %v1946_v16  ;;  %v1054_v32 = vmul.f32 %v2603_v57, %v1053_v14  ;;  %v1180_v30 = vand.u32 2147483647, %v2596_v60  ;;  %vm2681_vm7 = vmor %vm1056_vm4, %vm1057_vm6 }
 0x10c   : > { %1953 = vpow2.f32 %v1686_v15  ;;  %v1172_v25 = vmul.f32 %v2631_v28, %v2596_v60  ;;  %v955_v22 = vand.u32 2147483647, %v2617_v53  ;;  %v2664_v43 = vadd.f32 %v2114_v24, %v563_v12 }
 0x10d   : > { %1955 = vrcp.f32 %v2640_v31  ;;  %v2657_v18 = vpop.eup %1949  ;;  %v1055_v42 = vadd.f32 %v2603_v57, %v1054_v32  ;;  %v2666_v44 = vor.u32 1.1754944e-38, %v1182_v59  ;;  %v1300_v47 = vand.u32 2147483647, %v2606_v4 }
 0x10e   : > { %1957 = vpow2.f32 %v1694_v36  ;;  %v957_v48 = vand.u32 2147483648, %v2617_v53  ;;  %v1173_v50 = vsub.f32 1.0, %v1172_v25  ;;  %v1292_v17 = vmul.f32 %v2657_v18, %v2606_v4 }
 0x10f   : > { %1959 = vpow2.f32 %v1671_v39  ;;  %v1679_v52 = vmul.f32 -1.442695, %v2664_v43  ;;  %v2675_v29 = vmul.f32 %v944_v21, %v2426_v37  ;;  %v1302_v13 = vand.u32 2147483648, %v2606_v4 }
 0x110   : > { %v1059_v38 = vsel %vm2681_vm7, %v2603_v57, %v1055_v42  ;;  %vm1176_vm8 = vweird.f32 %v2596_v60  ;;  %vm1177_vm9 = vweird.f32 %v2631_v28  ;;  %vm951_vm10 = vweird.f32 %v2617_v53 }
 0x111   : > { %v1952_v34 = vpop.eup %1951  ;;  %vm2694_vm11 = vcmp.eq.f32.partialorder %v955_v22, 8.507059e+37  ;;  %1961 = vpow2.f32 %v1679_v52  ;;  %v1174_v57 = vmul.f32 %v2631_v28, %v1173_v50  ;;  %v1293_v5 = vsub.f32 1.0, %v1292_v17  ;;  %v545_v22 = vpop.f32.mrf.mxu0 }
 0x112   : > { %v947_v11 = vmul.f32 %v1952_v34, %v2617_v53  ;;  %v1954_v8 = vpop.eup %1953  ;;  %vm952_vm12 = vweird.f32 %v1952_v34  ;;  %vm1297_vm13 = vweird.f32 %v2657_v18  ;;  %v958_v9 = vor.u32 1.1754944e-38, %v957_v48 }
 0x113   : > { %v2686_v61 = vadd.f32 1.0, %v1954_v8  ;;  %v1956_v62 = vpop.eup %1955  ;;  %v1064_v10 = vsel %vm2649_vm5, %v1063_v41, %v1059_v38  ;;  %v1075_v45 = vand.u32 2147483647, %v2640_v31  ;;  %vm1296_vm14 = vweird.f32 %v2606_v4  ;;  %vm953_vm15 = vmor %vm951_vm10, %vm952_vm12 }
 0x114   : > { %v948_v33 = vsub.f32 1.0, %v947_v11  ;;  %v1067_v58 = vmul.f32 %v1956_v62, %v2640_v31  ;;  %v1958_v35 = vpop.eup %1957  ;;  %v1077_v16 = vand.u32 2147483648, %v2640_v31  ;;  %v2713_v3 = vadd.f32 %v2114_v24, %v583_v0  ;;  %vm2738_vm5 = vmor %vm1176_vm8, %vm1177_vm9  ;;  %v565_v11 = vpop.f32.mrf.mxu1 }
 0x115   : > { %1963 = vrcp.f32 %v2686_v61  ;;  %v1960_v27 = vpop.eup %1959  ;;  %v2710_v7 = vadd.f32 1.0, %v1958_v35  ;;  %v2716_v55 = vadd.f32 %v2114_v24, %v603_v1  ;;  %vm2718_vm0 = vcmp.eq.f32.partialorder %v1180_v30, 8.507059e+37  ;;  %vm2772_vm8 = vmor %vm1296_vm14, %vm1297_vm13 }
 0x116   : > { %v949_v26 = vmul.f32 %v1952_v34, %v948_v33  ;;  %v1068_v15 = vsub.f32 1.0, %v1067_v58  ;;  %vm1072_vm1 = vweird.f32 %v1956_v62  ;;  %v2722_v54 = vadd.f32 1.0, %v1960_v27 }
 0x117   : > { %v1175_v53 = vadd.f32 %v2631_v28, %v1174_v57  ;;  %v1294_v59 = vmul.f32 %v2657_v18, %v1293_v5  ;;  %1965 = vrcp.f32 %v2710_v7  ;;  %v1962_v24 = vpop.eup %1961  ;;  %v1363_v51 = vmul.f32 %v1064_v10, %v2448_v6 }
 0x118   : > { %v950_v14 = vadd.f32 %v1952_v34, %v949_v26  ;;  %v1069_v36 = vmul.f32 %v1956_v62, %v1068_v15  ;;  %vm1071_vm2 = vweird.f32 %v2640_v31  ;;  %vm1076_vm4 = vcmp.eq.f32.partialorder %v1075_v45, 8.507059e+37 }
 0x119   : > { %vm1073_vm3 = vmor %vm1071_vm2, %vm1072_vm1  ;;  %v1078_v41 = vor.u32 1.1754944e-38, %v1077_v16  ;;  %1967 = vrcp.f32 %v2722_v54  ;;  %v1687_v30 = vmul.f32 -1.442695, %v2713_v3  ;;  %v1695_v42 = vmul.f32 -1.442695, %v2716_v55 }
 0x11a   : > { %v954_v32 = vsel %vm953_vm15, %v1952_v34, %v950_v14  ;;  %v1070_v39 = vadd.f32 %v1956_v62, %v1069_v36  ;;  %v1179_v48 = vsel %vm2738_vm5, %v2631_v28, %v1175_v53  ;;  %v1295_v8 = vadd.f32 %v2657_v18, %v1294_v59 }
 0x11b   : > { %v959_v12 = vsel %vm2694_vm11, %v958_v9, %v954_v32  ;;  %v1964_v21 = vpop.eup %1963  ;;  %v1195_v50 = vand.u32 2147483647, %v2686_v61  ;;  %vm2752_vm6 = vcmp.eq.f32.partialorder %v1300_v47, 8.507059e+37  ;;  %v1197_v56 = vand.u32 2147483648, %v2686_v61 }
 0x11c   : > { %v1356_v25 = vmul.f32 %v959_v12, %v2478_v49  ;;  %v1074_v31 = vsel %vm1073_vm3, %v1956_v62, %v1070_v39  ;;  %v1187_v34 = vmul.f32 %v1964_v21, %v2686_v61  ;;  %v2759_v33 = vadd.f32 1.0, %v1962_v24  ;;  %v1995_v62 = vld [vmem:[%s2948_s2] ss:$0 sm:$0xff]  ;;  %v585_v39 = vpop.f32.mrf.mxu2 }
 0x11d   : > { %v1079_v60 = vsel %vm1076_vm4, %v1078_v41, %v1074_v31  ;;  %v1966_v28 = vpop.eup %1965  ;;  %vm1192_vm7 = vweird.f32 %v1964_v21  ;;  %1969 = vpow2.f32 %v1687_v30  ;;  %v2764_v47 = vadd.f32 %v1995_v62, %v545_v22 }
 0x11e   : > { %v1736_v49 = vpack.c.bf16 %v1356_v25, %v2675_v29  ;;  %v1364_v52 = vmul.f32 %v1079_v60, %v2501_v40  ;;  %v1188_v29 = vsub.f32 1.0, %v1187_v34  ;;  %v2766_v38 = vadd.f32 %v1995_v62, %v565_v11 }
 0x11f   : > { %v1307_v58 = vmul.f32 %v1966_v28, %v2710_v7  ;;  %1971 = vpow2.f32 %v1695_v42  ;;  %v2777_v0 = vpop.eup %1967  ;;  %v1184_v1 = vsel %vm2718_vm0, %v2666_v44, %v1179_v48  ;;  %v1299_v35 = vsel %vm2772_vm8, %v2657_v18, %v1295_v8 }
 0x120   : > { %1804 = vst [vmem:[%s2336_s17 + $0x10] sm:$0xff] %v1736_v49   ;;  %v1756_v37 = vpack.c.bf16 %v1364_v52, %v1363_v51  ;;  %v1189_v26 = vmul.f32 %v1964_v21, %v1188_v29  ;;  %vm1191_vm9 = vweird.f32 %v2686_v61  ;;  %1973 = vrcp.f32 %v2759_v33 }
 0x121   : > { %vm1196_vm10 = vcmp.eq.f32.partialorder %v1195_v50, 8.507059e+37  ;;  %v1308_v5 = vsub.f32 1.0, %v1307_v58  ;;  %v1315_v9 = vand.u32 2147483647, %v2710_v7  ;;  %vm1193_vm11 = vmor %vm1191_vm9, %vm1192_vm7  ;;  %v1198_v10 = vor.u32 1.1754944e-38, %v1197_v56 }
 0x122   : > { %1808 = vst [vmem:[%s2336_s17 + $0x30] sm:$0xff] %v1756_v37   ;;  %v1190_v57 = vadd.f32 %v1964_v21, %v1189_v26  ;;  %v1317_v14 = vand.u32 2147483648, %v2710_v7  ;;  %v1672_v44 = vmul.f32 -1.442695, %v2764_v47  ;;  %v1680_v15 = vmul.f32 -1.442695, %v2766_v38 }
 0x123   : > { %v1309_v45 = vmul.f32 %v1966_v28, %v1308_v5  ;;  %vm1312_vm12 = vweird.f32 %v1966_v28  ;;  %v962_v61 = vmul.f32 %v2777_v0, %v2722_v54  ;;  %v1970_v27 = vpop.eup %1969  ;;  %v1371_v16 = vmul.f32 %v1184_v1, %v2470_v63 }
 0x124   : > { %v1194_v18 = vsel %vm1193_vm11, %v1964_v21, %v1190_v57  ;;  %v1303_v2 = vor.u32 1.1754944e-38, %v1302_v13  ;;  %1975 = vpow2.f32 %v1672_v44  ;;  %vm1311_vm13 = vweird.f32 %v2710_v7 }
 0x125   : > { %v1199_v32 = vsel %vm1196_vm10, %v1198_v10, %v1194_v18  ;;  %v1972_v36 = vpop.eup %1971  ;;  %v1310_v59 = vadd.f32 %v1966_v28, %v1309_v45  ;;  %1977 = vpow2.f32 %v1680_v15  ;;  %vm1313_vm14 = vmor %vm1311_vm13, %vm1312_vm12  ;;  %vm1316_vm15 = vcmp.eq.f32.partialorder %v1315_v9, 8.507059e+37 }
 0x126   : > { %v1372_v53 = vmul.f32 %v1199_v32, %v2609_v46  ;;  %v2800_v12 = vpop.eup %1973  ;;  %v1304_v24 = vsel %vm2752_vm6, %v1303_v2, %v1299_v35  ;;  %v1318_v63 = vor.u32 1.1754944e-38, %v1317_v14  ;;  %v963_v51 = vsub.f32 1.0, %v962_v61  ;;  %v605_v46 = vpop.f32.mrf.mxu3 }
 0x127   : > { %v1314_v13 = vsel %vm1313_vm14, %v1966_v28, %v1310_v59  ;;  %v2804_v25 = vadd.f32 1.0, %v1970_v27  ;;  %v1082_v7 = vmul.f32 %v2800_v12, %v2759_v33  ;;  %v1379_v41 = vmul.f32 %v1304_v24, %v2473_v20 }
 0x128   : > { %v1776_v4 = vpack.c.bf16 %v1372_v53, %v1371_v16  ;;  %v1319_v21 = vsel %vm1316_vm15, %v1318_v63, %v1314_v13  ;;  %v2811_v6 = vadd.f32 1.0, %v1972_v36  ;;  %v2813_v31 = vadd.f32 %v1995_v62, %v585_v39 }
 0x129   : > { %v1380_v30 = vmul.f32 %v1319_v21, %v2621_v19  ;;  %v2815_v34 = vadd.f32 %v1995_v62, %v605_v46  ;;  %v964_v11 = vmul.f32 %v2777_v0, %v963_v51  ;;  %1979 = vrcp.f32 %v2804_v25 }
 0x12a   : > { %1812 = vst [vmem:[%s2336_s17 + $0x50] sm:$0xff] %v1776_v4   ;;  %v1976_v49 = vpop.eup %1975  ;;  %v1083_v8 = vsub.f32 1.0, %v1082_v7  ;;  %1981 = vrcp.f32 %v2811_v6  ;;  %vm966_vm0 = vweird.f32 %v2722_v54  ;;  %v972_v19 = vand.u32 2147483648, %v2722_v54 }
 0x12b   : > { %v1978_v42 = vpop.eup %1977  ;;  %v1796_v22 = vpack.c.bf16 %v1380_v30, %v1379_v41  ;;  %v2819_v48 = vadd.f32 1.0, %v1976_v49  ;;  %v1688_v60 = vmul.f32 -1.442695, %v2813_v31  ;;  %v965_v50 = vadd.f32 %v2777_v0, %v964_v11 }
 0x12c   : > { %v2821_v20 = vadd.f32 1.0, %v1978_v42  ;;  %vm967_vm1 = vweird.f32 %v2777_v0  ;;  %v1696_v17 = vmul.f32 -1.442695, %v2815_v34  ;;  %v1084_v52 = vmul.f32 %v2800_v12, %v1083_v8 }
 0x12d   : > { %1816 = vst [vmem:[%s2336_s17 + $0x70] sm:$0xff] %v1796_v22   ;;  %1983 = vrcp.f32 %v2819_v48  ;;  %v970_v56 = vand.u32 2147483647, %v2722_v54  ;;  %vm2837_vm2 = vmor %vm966_vm0, %vm967_vm1  ;;  %v1090_v62 = vand.u32 2147483647, %v2759_v33  ;;  %v1092_v40 = vand.u32 2147483648, %v2759_v33 }
 0x12e   : > { %1985 = vrcp.f32 %v2821_v20  ;;  %v969_v26 = vsel %vm2837_vm2, %v2777_v0, %v965_v50  ;;  %v973_v58 = vor.u32 1.1754944e-38, %v972_v19  ;;  %v1085_v54 = vadd.f32 %v2800_v12, %v1084_v52 }
 0x12f   : > { %v2834_v29 = vpop.eup %1979  ;;  %1987 = vpow2.f32 %v1688_v60  ;;  %vm1086_vm3 = vweird.f32 %v2759_v33  ;;  %vm1087_vm4 = vweird.f32 %v2800_v12  ;;  %vm971_vm5 = vcmp.eq.f32.partialorder %v970_v56, 8.507059e+37 }
 0x130   : > { %v2843_v37 = vpop.eup %1981  ;;  %1989 = vpow2.f32 %v1696_v17  ;;  %v1202_v35 = vmul.f32 %v2834_v29, %v2804_v25  ;;  %v974_v9 = vsel %vm971_vm5, %v973_v58, %v969_v26  ;;  %vm2854_vm6 = vcmp.eq.f32.partialorder %v1090_v62, 8.507059e+37  ;;  %vm2859_vm7 = vmor %vm1086_vm3, %vm1087_vm4 }
 0x131   : > { %v1093_v0 = vor.u32 1.1754944e-38, %v1092_v40  ;;  %v1322_v33 = vmul.f32 %v2843_v37, %v2811_v6  ;;  %vm981_vm8 = vweird.f32 %v2819_v48  ;;  %v985_v18 = vand.u32 2147483647, %v2819_v48 }
 0x132   : > { %v1089_v61 = vsel %vm2859_vm7, %v2800_v12, %v1085_v54  ;;  %v1203_v27 = vsub.f32 1.0, %v1202_v35  ;;  %v987_v16 = vand.u32 2147483648, %v2819_v48  ;;  %v1107_v53 = vand.u32 2147483648, %v2821_v20 }
 0x133   : > { %v1984_v1 = vpop.eup %1983  ;;  %v1105_v63 = vand.u32 2147483647, %v2821_v20  ;;  %v1323_v13 = vsub.f32 1.0, %v1322_v33  ;;  %vm1101_vm11 = vweird.f32 %v2821_v20  ;;  %v1094_v12 = vsel %vm2854_vm6, %v1093_v0, %v1089_v61 }
 0x134   : > { %v1986_v57 = vpop.eup %1985  ;;  %v977_v5 = vmul.f32 %v1984_v1, %v2819_v48  ;;  %vm982_vm9 = vweird.f32 %v1984_v1  ;;  %v988_v39 = vor.u32 1.1754944e-38, %v987_v16  ;;  %v1204_v21 = vmul.f32 %v2834_v29, %v1203_v27 }
 0x135   : > { %v1097_v14 = vmul.f32 %v1986_v57, %v2821_v20  ;;  %v1988_v45 = vpop.eup %1987  ;;  %vm1102_vm10 = vweird.f32 %v1986_v57  ;;  %vm983_vm12 = vmor %vm981_vm8, %vm982_vm9  ;;  %vm986_vm13 = vcmp.eq.f32.partialorder %v985_v18, 8.507059e+37  ;;  %v1108_v41 = vor.u32 1.1754944e-38, %v1107_v53 }
 0x136   : > { %v978_v15 = vsub.f32 1.0, %v977_v5  ;;  %v1990_v32 = vpop.eup %1989  ;;  %v2872_v59 = vadd.f32 1.0, %v1988_v45  ;;  %vm1103_vm14 = vmor %vm1101_vm11, %vm1102_vm10  ;;  %v1210_v30 = vand.u32 2147483647, %v2804_v25  ;;  %vm1106_vm15 = vcmp.eq.f32.partialorder %v1105_v63, 8.507059e+37 }
 0x137   : > { %v1098_v2 = vsub.f32 1.0, %v1097_v14  ;;  %v2875_v4 = vadd.f32 1.0, %v1990_v32  ;;  %v1357_v22 = vmul.f32 %v974_v9, %v2629_v23  ;;  %v1324_v11 = vmul.f32 %v2843_v37, %v1323_v13 }
 0x138   : > { %v979_v36 = vmul.f32 %v1984_v1, %v978_v15  ;;  %1991 = vrcp.f32 %v2872_v59  ;;  %v1365_v20 = vmul.f32 %v1094_v12, %v2664_v43  ;;  %v1212_v19 = vand.u32 2147483648, %v2804_v25 }
 0x139   : > { %v1099_v24 = vmul.f32 %v1986_v57, %v1098_v2  ;;  %1993 = vrcp.f32 %v2875_v4  ;;  %v1205_v17 = vadd.f32 %v2834_v29, %v1204_v21  ;;  %vm1207_vm0 = vweird.f32 %v2834_v29 }
 0x13a   : > { %v980_v51 = vadd.f32 %v1984_v1, %v979_v36  ;;  %vm1206_vm1 = vweird.f32 %v2804_v25  ;;  %vm2897_vm2 = vcmp.eq.f32.partialorder %v1210_v30, 8.507059e+37  ;;  %v1325_v43 = vadd.f32 %v2843_v37, %v1324_v11 }
 0x13b   : > { %v1100_v46 = vadd.f32 %v1986_v57, %v1099_v24  ;;  %vm1327_vm3 = vweird.f32 %v2843_v37  ;;  %vm2905_vm4 = vmor %vm1206_vm1, %vm1207_vm0  ;;  %v1213_v40 = vor.u32 1.1754944e-38, %v1212_v19  ;;  %v1330_v25 = vand.u32 2147483647, %v2811_v6 }
 0x13c   : > { %v984_v7 = vsel %vm983_vm12, %v1984_v1, %v980_v51  ;;  %v1332_v26 = vand.u32 2147483648, %v2811_v6  ;;  %v1209_v1 = vsel %vm2905_vm4, %v2834_v29, %v1205_v17  ;;  %vm1326_vm5 = vweird.f32 %v2811_v6 }
 0x13d   : > { %v989_v49 = vsel %vm986_vm13, %v988_v39, %v984_v7  ;;  %v1104_v42 = vsel %vm1103_vm14, %v1986_v57, %v1100_v46  ;;  %v1227_v54 = vand.u32 2147483648, %v2872_v59  ;;  %vm2917_vm6 = vmor %vm1326_vm5, %vm1327_vm3  ;;  %v1225_v9 = vand.u32 2147483647, %v2872_v59 }
 0x13e   : > { %v1358_v48 = vmul.f32 %v989_v49, %v2764_v47  ;;  %v1109_v8 = vsel %vm1106_vm15, %v1108_v41, %v1104_v42  ;;  %v1992_v50 = vpop.eup %1991  ;;  %v1347_v10 = vand.u32 2147483648, %v2875_v4  ;;  %v1329_v0 = vsel %vm2917_vm6, %v2843_v37, %v1325_v43 }
 0x13f   : > { %v1366_v60 = vmul.f32 %v1109_v8, %v2766_v38  ;;  %v1994_v23 = vpop.eup %1993  ;;  %v1217_v47 = vmul.f32 %v1992_v50, %v2872_v59  ;;  %vm1222_vm7 = vweird.f32 %v1992_v50  ;;  %v1345_v6 = vand.u32 2147483647, %v2875_v4 }
 0x140   : > { %v1741_v52 = vpack.c.bf16 %v1358_v48, %v1357_v22  ;;  %v1337_v38 = vmul.f32 %v1994_v23, %v2875_v4  ;;  %vm1342_vm8 = vweird.f32 %v1994_v23  ;;  %vm1331_vm9 = vcmp.eq.f32.partialorder %v1330_v25, 8.507059e+37 }
 0x141   : > { %v1761_v56 = vpack.c.bf16 %v1366_v60, %v1365_v20  ;;  %v1218_v58 = vsub.f32 1.0, %v1217_v47  ;;  %v1333_v14 = vor.u32 1.1754944e-38, %v1332_v26  ;;  %vm1221_vm10 = vweird.f32 %v2872_v59 }
 0x142   : > { %1805 = vst [vmem:[%s2336_s17 + $0x18] sm:$0xff] %v1741_v52   ;;  %v1338_v35 = vsub.f32 1.0, %v1337_v38  ;;  %v1214_v33 = vsel %vm2897_vm2, %v1213_v40, %v1209_v1  ;;  %vm1223_vm11 = vmor %vm1221_vm10, %vm1222_vm7  ;;  %v1228_v15 = vor.u32 1.1754944e-38, %v1227_v54  ;;  %vm1341_vm12 = vweird.f32 %v2875_v4 }
 0x143   : > { %1809 = vst [vmem:[%s2336_s17 + $0x38] sm:$0xff] %v1761_v56   ;;  %v1219_v5 = vmul.f32 %v1992_v50, %v1218_v58  ;;  %v1334_v45 = vsel %vm1331_vm9, %v1333_v14, %v1329_v0  ;;  %vm1226_vm13 = vcmp.eq.f32.partialorder %v1225_v9, 8.507059e+37  ;;  %vm1343_vm14 = vmor %vm1341_vm12, %vm1342_vm8  ;;  %v1348_v61 = vor.u32 1.1754944e-38, %v1347_v10 }
 0x144   : > { %v1339_v29 = vmul.f32 %v1994_v23, %v1338_v35  ;;  %vm1346_vm15 = vcmp.eq.f32.partialorder %v1345_v6, 8.507059e+37  ;;  %v1373_v2 = vmul.f32 %v1214_v33, %v2713_v3  ;;  %v1381_v53 = vmul.f32 %v1334_v45, %v2716_v55 }
 0x145   : > { %v1220_v44 = vadd.f32 %v1992_v50, %v1219_v5 }
 0x146   : > { %v1340_v18 = vadd.f32 %v1994_v23, %v1339_v29 }
 0x147   : > { %v1224_v37 = vsel %vm1223_vm11, %v1992_v50, %v1220_v44 }
 0x148   : > { %v1229_v27 = vsel %vm1226_vm13, %v1228_v15, %v1224_v37  ;;  %v1344_v16 = vsel %vm1343_vm14, %v1994_v23, %v1340_v18 }
 0x149   : > { %v1374_v32 = vmul.f32 %v1229_v27, %v2813_v31  ;;  %v1349_v36 = vsel %vm1346_vm15, %v1348_v61, %v1344_v16 }
 0x14a   : > { %v1382_v59 = vmul.f32 %v1349_v36, %v2815_v34 }
 0x14b   : > { %v1781_v24 = vpack.c.bf16 %v1374_v32, %v1373_v2 }
 0x14c   : > { %v1801_v63 = vpack.c.bf16 %v1382_v59, %v1381_v53 }
 0x14d   : > { %1813 = vst [vmem:[%s2336_s17 + $0x58] sm:$0xff] %v1781_v24  }
 0x14e   : > { %1817 = vst [vmem:[%s2336_s17 + $0x78] sm:$0xff] %v1801_v63  }
 0x14f PF: > { %s13_s14 = sadd.s32 1, %s2018_s14   ;;  %s3022_s12 = smov %s2014_s13 }
 0x150   : > { %p10_p5 = scmp.ge.s32.totalorder %s13_s14, 4   ;;  %s3023_s13 = smov %s3025_s15 }
 0x152   :  { %12 = sbr.rel (!%p10_p5) target bundleno = 2 (0x2), region = 76 }

// kernel: _lambda_.23
= control target key start
LH: loop header
LB: loop body
LE: loop exit
PB: predicated region body
PF: predicated region fallthrough
CT: control target
= control target key end

     0   :  { %s2639_s15 = smov 0   ;;  %s2641_s16 = smov 0   ;;  %s3706_s0 = inlined_call_operand.vmem [shape: bf16[512,256], index: 0, kind: input, shape index: {}]   ;;  %s3707_s1 = inlined_call_operand.vmem [shape: bf16[256,128], index: 1, kind: input, shape index: {}]   ;;  %s3708_s2 = inlined_call_operand.vmem [shape: f32[1,128], index: 2, kind: input, shape index: {}]   ;;  %s3709_s3 = inlined_call_operand.vmem [shape: bf16[512,128], index: 3, kind: input, shape index: {}]   ;;  %s3710_s4 = inlined_call_operand.vmem [shape: bf16[512,128], index: 4, kind: output, shape index: {}]  }
   0x1   :  { %s2643_s17 = smov 0  }
   0x2 LB: > { %s33_s18 = sadd.s32 1, %s2608_s16  ;;  %p1963_p0 = scmp.ge.s32.totalorder %s2612_s17, 1  ;;  %s2612_s17 = sphi %s2643_s17, %s14_s17   ;;  %s2608_s16 = sphi %s2641_s16, %s3792_s16   ;;  %s2604_s15 = sphi %s2639_s15, %s3791_s15  }
   0x3   : > { %p35_p1 = scmp.ge.s32.totalorder %s33_s18, 2  ;;  %p232_p2 = scmp.lt.s32.totalorder %s2612_s17, 3 }
   0x5   : > { %s3794_s18 = smov (%p35_p1, %s33_s18), 0  ;;  %p233_p3 = pnand %p1963_p0, %p232_p2 }
   0x6   : > { %s1964_s5 = sshll.u32 (!%p233_p3), %s2604_s15, 5 }
   0x7   : > { %236 = sbr.rel (%p233_p3) target bundleno = 372 (0x174), region = 36  ;;  %p287_p4 = scmp.lt.s32.totalorder (!%p233_p3), %s1964_s5, 63 }
   0xc   : > { %v2237_v0 = vld [vmem:[%s3707_s1 + $0x38] sm:$0xff]  ;;  %v2236_v2 = vld [vmem:[%s3707_s1 + $0x30] sm:$0xff]  ;;  %v2235_v4 = vld [vmem:[%s3707_s1 + $0x28] sm:$0xff]  ;;  %s3796_s5 = smov (!%p287_p4, %s1964_s5), 63 }
   0xd   : > { %v2245_v1 = vld [vmem:[%s3707_s1 + $0x78] sm:$0xff]  ;;  %715 = vmatpush.bf16.msra.mxu0 %v2237_v0  ;;  %2420 = vmatpush.bf16.msra.mxu2 %v2237_v0  ;;  %v2244_v3 = vld [vmem:[%s3707_s1 + $0x70] sm:$0xff]  ;;  %v2243_v5 = vld [vmem:[%s3707_s1 + $0x68] sm:$0xff]  ;;  %s2197_s21 = sshll.u32 %s3796_s5, 3  ;;  %s1968_s10 = sshll.u32 %s3796_s5, 2 }
   0xe   : > { %804 = vmatpush.bf16.msra.mxu1 %v2245_v1  ;;  %2428 = vmatpush.bf16.msra.mxu3 %v2245_v1  ;;  %v2234_v6 = vld [vmem:[%s3707_s1 + $0x20] sm:$0xff]  ;;  %v2233_v8 = vld [vmem:[%s3707_s1 + $0x18] sm:$0xff]  ;;  %v2232_v10 = vld [vmem:[%s3707_s1 + $0x10] sm:$0xff]  ;;  %s2705_s26 = scalar_lea.vmem %s3706_s0, %s2197_s21  ;;  %s2806_s13 = scalar_lea.vmem %s3709_s3, %s1968_s10 }
   0xf   : > { %v2242_v7 = vld [vmem:[%s3707_s1 + $0x60] sm:$0xff]  ;;  %v2241_v9 = vld [vmem:[%s3707_s1 + $0x58] sm:$0xff]  ;;  %v2240_v11 = vld [vmem:[%s3707_s1 + $0x50] sm:$0xff]  ;;  %s2938_s19 = scalar_lea.vmem %s3710_s4, %s1968_s10 }
  0x10   : > { %v2231_v12 = vld [vmem:[%s3707_s1 + $0x8] sm:$0xff]  ;;  %v2230_v14 = vld [vmem:[%s3707_s1] sm:$0xff]  ;;  %v1981_v28 = vld [vmem:[%s2705_s26 + $0x10] sm:$0xf] }
  0x11   : > { %716 = vmatpush.bf16.msra.mxu0 %v2236_v2  ;;  %2421 = vmatpush.bf16.msra.mxu2 %v2236_v2  ;;  %v2239_v13 = vld [vmem:[%s3707_s1 + $0x48] sm:$0xff]  ;;  %v2238_v15 = vld [vmem:[%s3707_s1 + $0x40] sm:$0xff]  ;;  %v2201_v29 = vld [vmem:[%s2705_s26 + $0x14] sm:$0xf0] }
  0x12   : > { %805 = vmatpush.bf16.msra.mxu1 %v2244_v3  ;;  %2429 = vmatpush.bf16.msra.mxu3 %v2244_v3  ;;  %v1973_v16 = vld [vmem:[%s2705_s26] sm:$0xf]  ;;  %v2199_v17 = vld [vmem:[%s2705_s26 + $0x4] sm:$0xf0]  ;;  %v2198_v20 = vld [vmem:[%s2705_s26 + $0x4] sm:$0xf]  ;;  %v1982_v36 = vor.u32 %v2201_v29, %v1981_v28 }
  0x13   : > { %v2037_v18 = vld [vmem:[%s2705_s26 + $0x80] sm:$0xf]  ;;  %v2215_v19 = vld [vmem:[%s2705_s26 + $0x84] sm:$0xf0]  ;;  %v1975_v21 = vld [vmem:[%s2705_s26 + $0x8] sm:$0xf0]  ;;  %v1974_v24 = vor.u32 %v2199_v17, %v1973_v16 }
  0x14   : > { %v2214_v22 = vld [vmem:[%s2705_s26 + $0x84] sm:$0xf]  ;;  %v2039_v23 = vld [vmem:[%s2705_s26 + $0x88] sm:$0xf0]  ;;  %v2038_v25 = vor.u32 %v2215_v19, %v2037_v18  ;;  %v1978_v26 = vor.u32 %v2198_v20, %v1975_v21  ;;  %v2045_v30 = vld [vmem:[%s2705_s26 + $0x90] sm:$0xf] }
  0x15   : > { %717 = vmatpush.bf16.msra.mxu0 %v2235_v4  ;;  %2422 = vmatpush.bf16.msra.mxu2 %v2235_v4  ;;  %v2042_v27 = vor.u32 %v2214_v22, %v2039_v23  ;;  %v2217_v31 = vld [vmem:[%s2705_s26 + $0x94] sm:$0xf0]  ;;  %v2200_v32 = vld [vmem:[%s2705_s26 + $0x14] sm:$0xf]  ;;  %v1983_v33 = vld [vmem:[%s2705_s26 + $0x18] sm:$0xf0] }
  0x16   : > { %806 = vmatpush.bf16.msra.mxu1 %v2243_v5  ;;  %2430 = vmatpush.bf16.msra.mxu3 %v2243_v5  ;;  %v2216_v34 = vld [vmem:[%s2705_s26 + $0x94] sm:$0xf]  ;;  %v2047_v35 = vld [vmem:[%s2705_s26 + $0x98] sm:$0xf0]  ;;  %v2046_v37 = vor.u32 %v2217_v31, %v2045_v30  ;;  %v1986_v38 = vor.u32 %v2200_v32, %v1983_v33  ;;  %v1989_v40 = vld [vmem:[%s2705_s26 + $0x20] sm:$0xf] }
  0x17   : > { %v2050_v39 = vor.u32 %v2216_v34, %v2047_v35  ;;  %v2203_v41 = vld [vmem:[%s2705_s26 + $0x24] sm:$0xf0]  ;;  %v2053_v42 = vld [vmem:[%s2705_s26 + $0xa0] sm:$0xf]  ;;  %v2202_v44 = vld [vmem:[%s2705_s26 + $0x24] sm:$0xf] }
  0x18   : > { %v2219_v43 = vld [vmem:[%s2705_s26 + $0xa4] sm:$0xf0]  ;;  %v1991_v45 = vld [vmem:[%s2705_s26 + $0x28] sm:$0xf0]  ;;  %v2218_v46 = vld [vmem:[%s2705_s26 + $0xa4] sm:$0xf]  ;;  %v1990_v48 = vor.u32 %v2203_v41, %v1989_v40 }
  0x19   : > { %718 = vmatpush.bf16.msra.mxu0 %v2234_v6  ;;  %2423 = vmatpush.bf16.msra.mxu2 %v2234_v6  ;;  %v2055_v47 = vld [vmem:[%s2705_s26 + $0xa8] sm:$0xf0]  ;;  %v2054_v49 = vor.u32 %v2219_v43, %v2053_v42  ;;  %v1994_v50 = vor.u32 %v2202_v44, %v1991_v45  ;;  %v1997_v52 = vld [vmem:[%s2705_s26 + $0x30] sm:$0xf]  ;;  %v2205_v53 = vld [vmem:[%s2705_s26 + $0x34] sm:$0xf0] }
  0x1a   : > { %807 = vmatpush.bf16.msra.mxu1 %v2242_v7  ;;  %2431 = vmatpush.bf16.msra.mxu3 %v2242_v7  ;;  %v2058_v51 = vor.u32 %v2218_v46, %v2055_v47  ;;  %v2061_v54 = vld [vmem:[%s2705_s26 + $0xb0] sm:$0xf]  ;;  %v2221_v55 = vld [vmem:[%s2705_s26 + $0xb4] sm:$0xf0]  ;;  %v2204_v56 = vld [vmem:[%s2705_s26 + $0x34] sm:$0xf]  ;;  %v1998_v60 = vor.u32 %v2205_v53, %v1997_v52 }
  0x1b   : > { %v1999_v57 = vld [vmem:[%s2705_s26 + $0x38] sm:$0xf0]  ;;  %v2220_v58 = vld [vmem:[%s2705_s26 + $0xb4] sm:$0xf]  ;;  %v2062_v61 = vor.u32 %v2221_v55, %v2061_v54  ;;  %v2005_v0 = vld [vmem:[%s2705_s26 + $0x40] sm:$0xf] }
  0x1c   : > { %v2063_v59 = vld [vmem:[%s2705_s26 + $0xb8] sm:$0xf0]  ;;  %v2002_v62 = vor.u32 %v2204_v56, %v1999_v57  ;;  %v2207_v1 = vld [vmem:[%s2705_s26 + $0x44] sm:$0xf0]  ;;  %v2069_v2 = vld [vmem:[%s2705_s26 + $0xc0] sm:$0xf] }
  0x1d   : > { %719 = vmatpush.bf16.msra.mxu0 %v2233_v8  ;;  %2424 = vmatpush.bf16.msra.mxu2 %v2233_v8  ;;  %v2066_v63 = vor.u32 %v2220_v58, %v2063_v59  ;;  %v2223_v3 = vld [vmem:[%s2705_s26 + $0xc4] sm:$0xf0]  ;;  %v2206_v4 = vld [vmem:[%s2705_s26 + $0x44] sm:$0xf]  ;;  %v2007_v5 = vld [vmem:[%s2705_s26 + $0x48] sm:$0xf0]  ;;  %v2006_v8 = vor.u32 %v2207_v1, %v2005_v0 }
  0x1e   : > { %808 = vmatpush.bf16.msra.mxu1 %v2241_v9  ;;  %2432 = vmatpush.bf16.msra.mxu3 %v2241_v9  ;;  %v2222_v6 = vld [vmem:[%s2705_s26 + $0xc4] sm:$0xf]  ;;  %v2071_v7 = vld [vmem:[%s2705_s26 + $0xc8] sm:$0xf0]  ;;  %v2070_v9 = vor.u32 %v2223_v3, %v2069_v2  ;;  %v2208_v16 = vld [vmem:[%s2705_s26 + $0x54] sm:$0xf] }
  0x1f   : > { %v2015_v17 = vld [vmem:[%s2705_s26 + $0x58] sm:$0xf0]  ;;  %v2224_v18 = vld [vmem:[%s2705_s26 + $0xd4] sm:$0xf]  ;;  %v2210_v28 = vld [vmem:[%s2705_s26 + $0x64] sm:$0xf] }
  0x20   : > { %v2079_v19 = vld [vmem:[%s2705_s26 + $0xd8] sm:$0xf0]  ;;  %v2018_v22 = vor.u32 %v2208_v16, %v2015_v17  ;;  %v2023_v29 = vld [vmem:[%s2705_s26 + $0x68] sm:$0xf0]  ;;  %v2226_v30 = vld [vmem:[%s2705_s26 + $0xe4] sm:$0xf] }
  0x21   : > { %720 = vmatpush.bf16.msra.mxu0 %v2232_v10  ;;  %2425 = vmatpush.bf16.msra.mxu2 %v2232_v10  ;;  %v2010_v10 = vor.u32 %v2206_v4, %v2007_v5  ;;  %v2082_v23 = vor.u32 %v2224_v18, %v2079_v19  ;;  %v2087_v31 = vld [vmem:[%s2705_s26 + $0xe8] sm:$0xf0]  ;;  %v2026_v34 = vor.u32 %v2210_v28, %v2023_v29  ;;  %v2212_v40 = vld [vmem:[%s2705_s26 + $0x74] sm:$0xf]  ;;  %v2031_v41 = vld [vmem:[%s2705_s26 + $0x78] sm:$0xf0] }
  0x22   : > { %809 = vmatpush.bf16.msra.mxu1 %v2240_v11  ;;  %2433 = vmatpush.bf16.msra.mxu3 %v2240_v11  ;;  %v2074_v11 = vor.u32 %v2222_v6, %v2071_v7  ;;  %v2090_v35 = vor.u32 %v2226_v30, %v2087_v31  ;;  %v2228_v42 = vld [vmem:[%s2705_s26 + $0xf4] sm:$0xf]  ;;  %v2095_v43 = vld [vmem:[%s2705_s26 + $0xf8] sm:$0xf0]  ;;  %v2034_v46 = vor.u32 %v2212_v40, %v2031_v41  ;;  %v2816_v17 = vld [vmem:[%s2806_s13] sm:$0xff]  }
  0x23   : > { %v2098_v47 = vor.u32 %v2228_v42, %v2095_v43  ;;  %v2249_v30 = vunpack.c.h.bf16 %v2816_v17 }
  0x25   : > { %721 = vmatpush.bf16.msra.mxu0 %v2231_v12  ;;  %2426 = vmatpush.bf16.msra.mxu2 %v2231_v12  ;;  %v2013_v12 = vld [vmem:[%s2705_s26 + $0x50] sm:$0xf] }
  0x26   : > { %810 = vmatpush.bf16.msra.mxu1 %v2239_v13  ;;  %2434 = vmatpush.bf16.msra.mxu3 %v2239_v13  ;;  %v2209_v13 = vld [vmem:[%s2705_s26 + $0x54] sm:$0xf0] }
  0x27   : > { %v2014_v20 = vor.u32 %v2209_v13, %v2013_v12 }
  0x29   : > { %722 = vmatpush.bf16.msra.mxu0 %v2230_v14  ;;  %2427 = vmatpush.bf16.msra.mxu2 %v2230_v14  ;;  %v2077_v14 = vld [vmem:[%s2705_s26 + $0xd0] sm:$0xf] }
  0x2a   : > { %811 = vmatpush.bf16.msra.mxu1 %v2238_v15  ;;  %2435 = vmatpush.bf16.msra.mxu3 %v2238_v15  ;;  %v2225_v15 = vld [vmem:[%s2705_s26 + $0xd4] sm:$0xf0] }
  0x2b   : > { %v2078_v21 = vor.u32 %v2225_v15, %v2077_v14 }
  0x2c   : > { %723 = vmatmul.bf16.vlgmr.msra.gmra.mxu0 %v1974_v24  ;;  %763 = vmatmul.bf16.vlgmr.msra.gmra.mxu2 %v2038_v25  ;;  %v2021_v24 = vld [vmem:[%s2705_s26 + $0x60] sm:$0xf]  ;;  %v2211_v25 = vld [vmem:[%s2705_s26 + $0x64] sm:$0xf0] }
  0x2d   : > { %812 = vmatmul.bf16.vlgmr.msra.gmra.mxu1 %v1978_v26  ;;  %852 = vmatmul.bf16.vlgmr.msra.gmra.mxu3 %v2042_v27  ;;  %v2085_v26 = vld [vmem:[%s2705_s26 + $0xe0] sm:$0xf]  ;;  %v2227_v27 = vld [vmem:[%s2705_s26 + $0xe4] sm:$0xf0]  ;;  %v2022_v32 = vor.u32 %v2211_v25, %v2021_v24 }
  0x2e   : > { %v2086_v33 = vor.u32 %v2227_v27, %v2085_v26  ;;  %v2248_v27 = vunpack.c.l.bf16 %v2816_v17 }
  0x3c   : > { %728 = vmatmul.bf16.gmra.mxu0 %v1982_v36  ;;  %768 = vmatmul.bf16.gmra.mxu2 %v2046_v37  ;;  %v2029_v36 = vld [vmem:[%s2705_s26 + $0x70] sm:$0xf]  ;;  %v2213_v37 = vld [vmem:[%s2705_s26 + $0x74] sm:$0xf0] }
  0x3d   : > { %817 = vmatmul.bf16.gmra.mxu1 %v1986_v38  ;;  %857 = vmatmul.bf16.gmra.mxu3 %v2050_v39  ;;  %v2093_v38 = vld [vmem:[%s2705_s26 + $0xf0] sm:$0xf]  ;;  %v2229_v39 = vld [vmem:[%s2705_s26 + $0xf4] sm:$0xf0]  ;;  %v2030_v44 = vor.u32 %v2213_v37, %v2029_v36 }
  0x3e   : > { %v2094_v45 = vor.u32 %v2229_v39, %v2093_v38 }
  0x4c   : > { %733 = vmatmul.bf16.gmra.mxu0 %v1990_v48  ;;  %773 = vmatmul.bf16.gmra.mxu2 %v2054_v49  ;;  %v2783_v49 = vld [vmem:[%s3708_s2] ss:$0 sm:$0xff] }
  0x4d   : > { %822 = vmatmul.bf16.gmra.mxu1 %v1994_v50  ;;  %862 = vmatmul.bf16.gmra.mxu3 %v2058_v51 }
  0x5c   : > { %738 = vmatmul.bf16.gmra.mxu0 %v1998_v60  ;;  %778 = vmatmul.bf16.gmra.mxu2 %v2062_v61 }
  0x5d   : > { %827 = vmatmul.bf16.gmra.mxu1 %v2002_v62  ;;  %867 = vmatmul.bf16.gmra.mxu3 %v2066_v63 }
  0x6c   : > { %743 = vmatmul.bf16.gmra.mxu0 %v2006_v8  ;;  %783 = vmatmul.bf16.gmra.mxu2 %v2070_v9 }
  0x6d   : > { %832 = vmatmul.bf16.gmra.mxu1 %v2010_v10  ;;  %872 = vmatmul.bf16.gmra.mxu3 %v2074_v11 }
  0x7c   : > { %748 = vmatmul.bf16.gmra.mxu0 %v2014_v20  ;;  %788 = vmatmul.bf16.gmra.mxu2 %v2078_v21  ;;  %v2820_v20 = vld [vmem:[%s2806_s13 + $0x40] sm:$0xff]  }
  0x7d   : > { %837 = vmatmul.bf16.gmra.mxu1 %v2018_v22  ;;  %877 = vmatmul.bf16.gmra.mxu3 %v2082_v23  ;;  %v2280_v29 = vunpack.c.l.bf16 %v2820_v20 }
  0x8c   : > { %753 = vmatmul.bf16.gmra.mxu0 %v2022_v32  ;;  %793 = vmatmul.bf16.gmra.mxu2 %v2086_v33 }
  0x8d   : > { %842 = vmatmul.bf16.gmra.mxu1 %v2026_v34  ;;  %882 = vmatmul.bf16.gmra.mxu3 %v2090_v35  ;;  %v2281_v34 = vunpack.c.h.bf16 %v2820_v20 }
  0x9c   : > { %758 = vmatmul.bf16.gmra.mxu0 %v2030_v44  ;;  %798 = vmatmul.bf16.gmra.mxu2 %v2094_v45 }
  0x9d   : > { %847 = vmatmul.bf16.gmra.mxu1 %v2034_v46  ;;  %887 = vmatmul.bf16.gmra.mxu3 %v2098_v47 }
  0xa9   : > { %v724_v48 = vpop.f32.mrf.mxu0 }
  0xaa   : > { %v813_v50 = vpop.f32.mrf.mxu1 }
  0xab   : > { %v814_v51 = vadd.f32 %v813_v50, %v724_v48 }
  0xad   : > { %v2786_v52 = vadd.f32 %v2783_v49, %v814_v51 }
  0xaf   : > { %v2163_v53 = vmul.f32 -1.442695, %v2786_v52  ;;  %v764_v54 = vpop.f32.mrf.mxu2 }
  0xb0   : > { %v853_v55 = vpop.f32.mrf.mxu3 }
  0xb1   : > { %2461 = vpow2.f32 %v2163_v53  ;;  %v854_v56 = vadd.f32 %v853_v55, %v764_v54  ;;  %v726_v57 = vpop.f32.mrf.mxu0 }
  0xb2   : > { %v815_v58 = vpop.f32.mrf.mxu1 }
  0xb3   : > { %v2790_v59 = vadd.f32 %v2783_v49, %v854_v56  ;;  %v816_v60 = vadd.f32 %v815_v58, %v726_v57 }
  0xb5   : > { %v2179_v61 = vmul.f32 -1.442695, %v2790_v59  ;;  %v2794_v62 = vadd.f32 %v2783_v49, %v816_v60 }
  0xb7   : > { %v2462_v63 = vpop.eup %2461  ;;  %2463 = vpow2.f32 %v2179_v61  ;;  %v2164_v0 = vmul.f32 -1.442695, %v2794_v62  ;;  %v766_v1 = vpop.f32.mrf.mxu2 }
  0xb8   : > { %v1124_v2 = vadd.f32 1.0, %v2462_v63  ;;  %v855_v3 = vpop.f32.mrf.mxu3 }
  0xb9   : > { %2465 = vpow2.f32 %v2164_v0  ;;  %v856_v4 = vadd.f32 %v855_v3, %v766_v1  ;;  %v729_v5 = vpop.f32.mrf.mxu0 }
  0xba   : > { %2467 = vrcp.f32 %v1124_v2  ;;  %v818_v6 = vpop.f32.mrf.mxu1  ;;  %v1165_v26 = vand.u32 2147483647, %v1124_v2  ;;  %v1167_v28 = vand.u32 2147483648, %v1124_v2  ;;  %vm1161_vm0 = vweird.f32 %v1124_v2 }
  0xbb   : > { %v2799_v7 = vadd.f32 %v2783_v49, %v856_v4  ;;  %v819_v8 = vadd.f32 %v818_v6, %v729_v5 }
  0xbc   : > { %vm2838_vm2 = vcmp.eq.f32.partialorder %v1165_v26, 8.507059e+37  ;;  %v1168_v45 = vor.u32 1.1754944e-38, %v1167_v28 }
  0xbd   : > { %v2464_v9 = vpop.eup %2463  ;;  %v2180_v10 = vmul.f32 -1.442695, %v2799_v7  ;;  %v2810_v11 = vadd.f32 %v2783_v49, %v819_v8 }
  0xbe   : > { %v2812_v12 = vadd.f32 1.0, %v2464_v9 }
  0xbf   : > { %v2466_v13 = vpop.eup %2465  ;;  %2469 = vpow2.f32 %v2180_v10  ;;  %v2165_v14 = vmul.f32 -1.442695, %v2810_v11  ;;  %v769_v15 = vpop.f32.mrf.mxu2 }
  0xc0   : > { %v2468_v16 = vpop.eup %2467  ;;  %2471 = vrcp.f32 %v2812_v12  ;;  %v858_v18 = vpop.f32.mrf.mxu3  ;;  %v2822_v21 = vadd.f32 1.0, %v2466_v13  ;;  %v1405_v37 = vand.u32 2147483647, %v2812_v12  ;;  %v1407_v44 = vand.u32 2147483648, %v2812_v12 }
  0xc1   : > { %v1157_v19 = vmul.f32 %v2468_v16, %v1124_v2  ;;  %2473 = vpow2.f32 %v2165_v14  ;;  %v731_v22 = vpop.f32.mrf.mxu0  ;;  %v859_v23 = vadd.f32 %v858_v18, %v769_v15  ;;  %vm1162_vm1 = vweird.f32 %v2468_v16 }
  0xc2   : > { %v820_v24 = vpop.f32.mrf.mxu1  ;;  %2475 = vrcp.f32 %v2822_v21  ;;  %vm1401_vm3 = vweird.f32 %v2812_v12  ;;  %v1180_v46 = vand.u32 2147483647, %v2822_v21  ;;  %vm2850_vm4 = vmor %vm1161_vm0, %vm1162_vm1  ;;  %vm2861_vm5 = vcmp.eq.f32.partialorder %v1405_v37, 8.507059e+37 }
  0xc3   : > { %v1158_v25 = vsub.f32 1.0, %v1157_v19  ;;  %v2829_v31 = vadd.f32 %v2783_v49, %v859_v23  ;;  %v821_v35 = vadd.f32 %v820_v24, %v731_v22  ;;  %v1182_v60 = vand.u32 2147483648, %v2822_v21 }
  0xc4   : > { %v1408_v63 = vor.u32 1.1754944e-38, %v1407_v44  ;;  %vm1176_vm7 = vweird.f32 %v2822_v21  ;;  %vm2872_vm8 = vcmp.eq.f32.partialorder %v1180_v46, 8.507059e+37 }
  0xc5   : > { %v2470_v32 = vpop.eup %2469  ;;  %v1159_v33 = vmul.f32 %v2468_v16, %v1158_v25  ;;  %v2181_v39 = vmul.f32 -1.442695, %v2829_v31  ;;  %v2857_v55 = vadd.f32 %v2783_v49, %v821_v35  ;;  %v1183_v14 = vor.u32 1.1754944e-38, %v1182_v60  ;;  %v2941_v60 = vld [vmem:[%s2806_s13 + $0x48] sm:$0xff]  }
  0xc6   : > { %v2832_v36 = vpop.eup %2471  ;;  %v2835_v38 = vadd.f32 1.0, %v2470_v32 }
  0xc7   : > { %v2474_v40 = vpop.eup %2473  ;;  %v1160_v41 = vadd.f32 %v2468_v16, %v1159_v33  ;;  %v1397_v43 = vmul.f32 %v2832_v36, %v2812_v12  ;;  %v771_v47 = vpop.f32.mrf.mxu2  ;;  %vm1402_vm6 = vweird.f32 %v2832_v36  ;;  %v2166_v9 = vmul.f32 -1.442695, %v2857_v55 }
  0xc8   : > { %2477 = vrcp.f32 %v2835_v38  ;;  %v860_v48 = vpop.f32.mrf.mxu3  ;;  %v2476_v50 = vpop.eup %2475  ;;  %v2854_v54 = vadd.f32 1.0, %v2474_v40  ;;  %v1420_v0 = vand.u32 2147483647, %v2835_v38  ;;  %v1422_v8 = vand.u32 2147483648, %v2835_v38  ;;  %vm2883_vm10 = vmor %vm1401_vm3, %vm1402_vm6 }
  0xc9   : > { %v1398_v53 = vsub.f32 1.0, %v1397_v43  ;;  %2479 = vpow2.f32 %v2181_v39  ;;  %v1164_v56 = vsel %vm2850_vm4, %v2468_v16, %v1160_v41  ;;  %v1172_v58 = vmul.f32 %v2476_v50, %v2822_v21  ;;  %v734_v1 = vpop.f32.mrf.mxu0 }
  0xca   : > { %2481 = vrcp.f32 %v2854_v54  ;;  %v823_v2 = vpop.f32.mrf.mxu1  ;;  %v1169_v5 = vsel %vm2838_vm2, %v1168_v45, %v1164_v56  ;;  %vm1177_vm9 = vweird.f32 %v2476_v50  ;;  %v861_v15 = vadd.f32 %v860_v48, %v771_v47 }
  0xcb   : > { %v1399_v61 = vmul.f32 %v2832_v36, %v1398_v53  ;;  %v1173_v3 = vsub.f32 1.0, %v1172_v58  ;;  %vm1416_vm11 = vweird.f32 %v2835_v38  ;;  %vm2889_vm12 = vcmp.eq.f32.partialorder %v1420_v0, 8.507059e+37  ;;  %vm1178_vm13 = vmor %vm1176_vm7, %vm1177_vm9 }
  0xcc   : > { %2483 = vpow2.f32 %v2166_v9  ;;  %v1636_v23 = vmul.f32 %v1169_v5, %v2786_v52  ;;  %v1423_v32 = vor.u32 1.1754944e-38, %v1422_v8  ;;  %v2904_v33 = vadd.f32 %v2783_v49, %v861_v15  ;;  %v2981_v15 = vld [vmem:[%s2806_s13 + $0x10] sm:$0xff]  }
  0xcd   : > { %v1400_v6 = vadd.f32 %v2832_v36, %v1399_v61  ;;  %v1174_v13 = vmul.f32 %v2476_v50, %v1173_v3  ;;  %v824_v35 = vadd.f32 %v823_v2, %v734_v1  ;;  %vm1191_vm14 = vweird.f32 %v2854_v54 }
  0xce   : > { %v2478_v10 = vpop.eup %2477  ;;  %v1195_v44 = vand.u32 2147483647, %v2854_v54  ;;  %v1197_v45 = vand.u32 2147483648, %v2854_v54  ;;  %v1732_v47 = vadd.f32 %v2248_v27, %v1636_v23  ;;  %v2931_v27 = vld [vmem:[%s2806_s13 + $0x8] sm:$0xff]   ;;  %v2284_v8 = vunpack.c.l.bf16 %v2941_v60 }
  0xcf   : > { %v2480_v16 = vpop.eup %2479  ;;  %v1412_v19 = vmul.f32 %v2478_v10, %v2835_v38  ;;  %v1404_v24 = vsel %vm2883_vm10, %v2832_v36, %v1400_v6  ;;  %v1175_v12 = vadd.f32 %v2476_v50, %v1174_v13  ;;  %v774_v36 = vpop.f32.mrf.mxu2  ;;  %vm1417_vm15 = vweird.f32 %v2478_v10 }
  0xd0   : > { %v2897_v25 = vadd.f32 1.0, %v2480_v16  ;;  %v2899_v26 = vpop.eup %2481  ;;  %v863_v39 = vpop.f32.mrf.mxu3  ;;  %v1409_v21 = vsel %vm2861_vm5, %v1408_v63, %v1404_v24  ;;  %v2921_v51 = vadd.f32 %v2783_v49, %v824_v35  ;;  %vm1418_vm0 = vmor %vm1416_vm11, %vm1417_vm15  ;;  %v2252_v3 = vunpack.c.l.bf16 %v2931_v27 }
  0xd1   : > { %v1413_v28 = vsub.f32 1.0, %v1412_v19  ;;  %v1179_v37 = vsel %vm1178_vm13, %v2476_v50, %v1175_v12  ;;  %v1187_v52 = vmul.f32 %v2899_v26, %v2854_v54  ;;  %v2182_v50 = vmul.f32 -1.442695, %v2904_v33  ;;  %v736_v53 = vpop.f32.mrf.mxu0 }
  0xd2   : > { %2485 = vrcp.f32 %v2897_v25  ;;  %v1184_v40 = vsel %vm2872_vm8, %v1183_v14, %v1179_v37  ;;  %v2484_v46 = vpop.eup %2483  ;;  %v1652_v56 = vmul.f32 %v1409_v21, %v2790_v59  ;;  %vm1192_vm1 = vweird.f32 %v2899_v26 }
  0xd3   : > { %v1414_v41 = vmul.f32 %v2478_v10, %v1413_v28  ;;  %v1637_v42 = vmul.f32 %v1184_v40, %v2794_v62  ;;  %v1188_v43 = vsub.f32 1.0, %v1187_v52  ;;  %v825_v62 = vpop.f32.mrf.mxu1  ;;  %v2943_v17 = vadd.f32 1.0, %v2484_v46  ;;  %vm2963_vm2 = vmor %vm1191_vm14, %vm1192_vm1 }
  0xd4   : > { %2487 = vpow2.f32 %v2182_v50  ;;  %v864_v1 = vadd.f32 %v863_v39, %v774_v36  ;;  %v1748_v5 = vadd.f32 %v2280_v29, %v1652_v56  ;;  %vm2967_vm3 = vcmp.eq.f32.partialorder %v1195_v44, 8.507059e+37  ;;  %v3013_v50 = vld [vmem:[%s2806_s13 + $0x50] sm:$0xff]  }
  0xd5   : > { %v1415_v48 = vadd.f32 %v2478_v10, %v1414_v41  ;;  %v1733_v57 = vadd.f32 %v2249_v30, %v1637_v42  ;;  %v1189_v58 = vmul.f32 %v2899_v26, %v1188_v43  ;;  %v2167_v30 = vmul.f32 -1.442695, %v2921_v51 }
  0xd6   : > { %2489 = vrcp.f32 %v2943_v17  ;;  %v2253_v9 = vunpack.c.h.bf16 %v2931_v27  ;;  %v1198_v13 = vor.u32 1.1754944e-38, %v1197_v45  ;;  %vm1431_vm4 = vweird.f32 %v2897_v25 }
  0xd7   : > { %v1419_v59 = vsel %vm1418_vm0, %v2478_v10, %v1415_v48  ;;  %v2313_v61 = vpack.c.bf16 %v1733_v57, %v1732_v47  ;;  %v1190_v0 = vadd.f32 %v2899_v26, %v1189_v58  ;;  %2491 = vpow2.f32 %v2167_v30  ;;  %v776_v18 = vpop.f32.mrf.mxu2 }
  0xd8   : > { %v2946_v38 = vpop.eup %2485  ;;  %v1424_v63 = vsel %vm2889_vm12, %v1423_v32, %v1419_v59  ;;  %v2285_v14 = vunpack.c.h.bf16 %v2941_v60  ;;  %v2984_v16 = vadd.f32 %v2783_v49, %v864_v1  ;;  %v865_v20 = vpop.f32.mrf.mxu3  ;;  %v1435_v23 = vand.u32 2147483647, %v2897_v25 }
  0xd9   : > { %v1653_v2 = vmul.f32 %v1424_v63, %v2799_v7  ;;  %v1427_v4 = vmul.f32 %v2946_v38, %v2897_v25  ;;  %2314 = vst [vmem:[%s2938_s19] sm:$0xff] %v2313_v61   ;;  %v1194_v10 = vsel %vm2963_vm2, %v2899_v26, %v1190_v0  ;;  %v826_v24 = vadd.f32 %v825_v62, %v736_v53  ;;  %v739_v21 = vpop.f32.mrf.mxu0 }
  0xda   : > { %v1199_v12 = vsel %vm2967_vm3, %v1198_v13, %v1194_v10  ;;  %v1437_v26 = vand.u32 2147483648, %v2897_v25  ;;  %v2183_v32 = vmul.f32 -1.442695, %v2984_v16  ;;  %v1210_v37 = vand.u32 2147483647, %v2943_v17 }
  0xdb   : > { %v1749_v29 = vadd.f32 %v2281_v34, %v1653_v2  ;;  %v1428_v54 = vsub.f32 1.0, %v1427_v4  ;;  %v2488_v34 = vpop.eup %2487  ;;  %v2256_v52 = vunpack.c.l.bf16 %v2981_v15  ;;  %v2998_v36 = vadd.f32 %v2783_v49, %v826_v24  ;;  %v828_v40 = vpop.f32.mrf.mxu1 }
  0xdc   : > { %v2991_v28 = vadd.f32 1.0, %v2488_v34  ;;  %v2490_v35 = vpop.eup %2489  ;;  %v866_v39 = vadd.f32 %v865_v20, %v776_v18  ;;  %vm1432_vm5 = vweird.f32 %v2946_v38  ;;  %v1638_v44 = vmul.f32 %v1199_v12, %v2810_v11 }
  0xdd   : > { %v2353_v19 = vpack.c.bf16 %v1749_v29, %v1748_v5  ;;  %v1429_v22 = vmul.f32 %v2946_v38, %v1428_v54  ;;  %v1202_v42 = vmul.f32 %v2490_v35, %v2943_v17  ;;  %v2492_v43 = vpop.eup %2491  ;;  %vm3005_vm6 = vcmp.eq.f32.partialorder %v1435_v23, 8.507059e+37  ;;  %vm3018_vm7 = vmor %vm1431_vm4, %vm1432_vm5 }
  0xde   : > { %2493 = vrcp.f32 %v2991_v28  ;;  %v1212_v46 = vand.u32 2147483648, %v2943_v17  ;;  %v3010_v48 = vadd.f32 1.0, %v2492_v43  ;;  %v2168_v53 = vmul.f32 -1.442695, %v2998_v36 }
  0xdf   : > { %2412 = vst [vmem:[%s2938_s19 + $0x40] sm:$0xff] %v2353_v19   ;;  %v1430_v41 = vadd.f32 %v2946_v38, %v1429_v22  ;;  %2495 = vpow2.f32 %v2183_v32  ;;  %v1203_v47 = vsub.f32 1.0, %v1202_v42  ;;  %v829_v62 = vadd.f32 %v828_v40, %v739_v21 }
  0xe0   : > { %v1438_v11 = vor.u32 1.1754944e-38, %v1437_v26  ;;  %vm1206_vm8 = vweird.f32 %v2943_v17  ;;  %vm3023_vm9 = vcmp.eq.f32.partialorder %v1210_v37, 8.507059e+37  ;;  %v3028_v58 = vadd.f32 %v2783_v49, %v866_v39  ;;  %v868_v6 = vpop.f32.mrf.mxu3 }
  0xe1   : > { %v1434_v59 = vsel %vm3018_vm7, %v2946_v38, %v1430_v41  ;;  %v1204_v30 = vmul.f32 %v2490_v35, %v1203_v47  ;;  %vm1207_vm10 = vweird.f32 %v2490_v35  ;;  %2497 = vrcp.f32 %v3010_v48  ;;  %v779_v38 = vpop.f32.mrf.mxu2  ;;  %v741_v43 = vpop.f32.mrf.mxu0 }
  0xe2   : > { %v1213_v25 = vor.u32 1.1754944e-38, %v1212_v46  ;;  %v2288_v61 = vunpack.c.l.bf16 %v3013_v50  ;;  %2499 = vpow2.f32 %v2168_v53  ;;  %v2184_v63 = vmul.f32 -1.442695, %v3028_v58  ;;  %vm1208_vm11 = vmor %vm1206_vm8, %vm1207_vm10 }
  0xe3   : > { %v1734_v1 = vadd.f32 %v2252_v3, %v1638_v44  ;;  %v1205_v2 = vadd.f32 %v2490_v35, %v1204_v30  ;;  %v1450_v4 = vand.u32 2147483647, %v2991_v28  ;;  %v3040_v5 = vadd.f32 %v2783_v49, %v829_v62  ;;  %v830_v44 = vpop.f32.mrf.mxu1 }
  0xe4   : > { %v2494_v0 = vpop.eup %2493  ;;  %v1439_v29 = vsel %vm3005_vm6, %v1438_v11, %v1434_v59  ;;  %v2257_v3 = vunpack.c.h.bf16 %v2981_v15  ;;  %2501 = vpow2.f32 %v2184_v63  ;;  %v1452_v13 = vand.u32 2147483648, %v2991_v28 }
  0xe5   : > { %v2496_v7 = vpop.eup %2495  ;;  %v1442_v10 = vmul.f32 %v2494_v0, %v2991_v28  ;;  %v1209_v54 = vsel %vm1208_vm11, %v2490_v35, %v1205_v2  ;;  %v2169_v20 = vmul.f32 -1.442695, %v3040_v5  ;;  %vm1446_vm12 = vweird.f32 %v2991_v28 }
  0xe6   : > { %v3050_v18 = vadd.f32 1.0, %v2496_v7  ;;  %v1214_v34 = vsel %vm3023_vm9, %v1213_v25, %v1209_v54  ;;  %v869_v17 = vadd.f32 %v868_v6, %v779_v38  ;;  %v1654_v23 = vmul.f32 %v1439_v29, %v2829_v31 }
  0xe7   : > { %v1443_v19 = vsub.f32 1.0, %v1442_v10  ;;  %v3056_v22 = vpop.eup %2497  ;;  %v1639_v24 = vmul.f32 %v1214_v34, %v2857_v55  ;;  %vm3060_vm13 = vcmp.eq.f32.partialorder %v1450_v4, 8.507059e+37  ;;  %vm1447_vm14 = vweird.f32 %v2494_v0 }
  0xe8   : > { %2503 = vrcp.f32 %v3050_v18  ;;  %v2500_v26 = vpop.eup %2499  ;;  %v1217_v35 = vmul.f32 %v3056_v22, %v3010_v48  ;;  %v1225_v37 = vand.u32 2147483647, %v3010_v48  ;;  %v1453_v31 = vor.u32 1.1754944e-38, %v1452_v13  ;;  %vm1448_vm0 = vmor %vm1446_vm12, %vm1447_vm14 }
  0xe9   : > { %v1444_v32 = vmul.f32 %v2494_v0, %v1443_v19  ;;  %v1735_v39 = vadd.f32 %v2253_v9, %v1639_v24  ;;  %v3070_v21 = vadd.f32 1.0, %v2500_v26  ;;  %2505 = vpow2.f32 %v2169_v20  ;;  %v781_v63 = vpop.f32.mrf.mxu2  ;;  %v744_v26 = vpop.f32.mrf.mxu0 }
  0xea   : > { %v2502_v55 = vpop.eup %2501  ;;  %v1218_v41 = vsub.f32 1.0, %v1217_v35  ;;  %vm1221_vm15 = vweird.f32 %v3010_v48  ;;  %v3074_v42 = vadd.f32 %v2783_v49, %v869_v17  ;;  %v1750_v45 = vadd.f32 %v2284_v8, %v1654_v23 }
  0xeb   : > { %v1445_v40 = vadd.f32 %v2494_v0, %v1444_v32  ;;  %v2318_v27 = vpack.c.bf16 %v1735_v39, %v1734_v1  ;;  %v1227_v9 = vand.u32 2147483648, %v3010_v48  ;;  %2507 = vrcp.f32 %v3070_v21  ;;  %v833_v32 = vpop.f32.mrf.mxu1 }
  0xec   : > { %v1219_v47 = vmul.f32 %v3056_v22, %v1218_v41  ;;  %vm3084_vm1 = vcmp.eq.f32.partialorder %v1225_v37, 8.507059e+37  ;;  %v3088_v62 = vadd.f32 1.0, %v2502_v55  ;;  %vm1222_vm2 = vweird.f32 %v3056_v22 }
  0xed   : > { %v1449_v46 = vsel %vm1448_vm0, %v2494_v0, %v1445_v40  ;;  %2405 = vst [vmem:[%s2938_s19 + $0x8] sm:$0xff] %v2318_v27   ;;  %v1465_v28 = vand.u32 2147483647, %v3050_v18  ;;  %v2185_v11 = vmul.f32 -1.442695, %v3074_v42  ;;  %v1467_v25 = vand.u32 2147483648, %v3050_v18  ;;  %v870_v0 = vpop.f32.mrf.mxu3  ;;  %vm3111_vm3 = vmor %vm1221_vm15, %vm1222_vm2 }
  0xee   : > { %v3090_v56 = vpop.eup %2503  ;;  %v1454_v8 = vsel %vm3060_vm13, %v1453_v31, %v1449_v46  ;;  %v1220_v59 = vadd.f32 %v3056_v22, %v1219_v47  ;;  %v1228_v2 = vor.u32 1.1754944e-38, %v1227_v9  ;;  %2509 = vrcp.f32 %v3088_v62 }
  0xef   : > { %v1655_v57 = vmul.f32 %v1454_v8, %v2904_v33  ;;  %v1457_v30 = vmul.f32 %v3090_v56, %v3050_v18  ;;  %v2506_v1 = vpop.eup %2505  ;;  %v2289_v4 = vunpack.c.h.bf16 %v3013_v50  ;;  %v831_v38 = vadd.f32 %v830_v44, %v741_v43 }
  0xf0   : > { %vm1461_vm4 = vweird.f32 %v3050_v18  ;;  %v1240_v29 = vand.u32 2147483647, %v3070_v21  ;;  %v1224_v60 = vsel %vm3111_vm3, %v3056_v22, %v1220_v59  ;;  %vm3120_vm5 = vcmp.eq.f32.partialorder %v1465_v28, 8.507059e+37 }
  0xf1   : > { %v1751_v6 = vadd.f32 %v2285_v14, %v1655_v57  ;;  %v1458_v7 = vsub.f32 1.0, %v1457_v30  ;;  %v2508_v10 = vpop.eup %2507  ;;  %v1242_v48 = vand.u32 2147483648, %v3070_v21  ;;  %v3125_v54 = vadd.f32 1.0, %v2506_v1  ;;  %v784_v28 = vpop.f32.mrf.mxu2 }
  0xf2   : > { %2511 = vpow2.f32 %v2185_v11  ;;  %v1468_v34 = vor.u32 1.1754944e-38, %v1467_v25  ;;  %v1232_v19 = vmul.f32 %v2508_v10, %v3070_v21  ;;  %vm1462_vm6 = vweird.f32 %v3090_v56 }
  0xf3   : > { %v2358_v13 = vpack.c.bf16 %v1751_v6, %v1750_v45  ;;  %v1459_v20 = vmul.f32 %v3090_v56, %v1458_v7  ;;  %vm1236_vm7 = vweird.f32 %v3070_v21  ;;  %v1480_v17 = vand.u32 2147483647, %v3088_v62  ;;  %vm3149_vm9 = vmor %vm1461_vm4, %vm1462_vm6  ;;  %v835_v14 = vpop.f32.mrf.mxu1 }
  0xf4   : > { %2513 = vrcp.f32 %v3125_v54  ;;  %v1229_v22 = vsel %vm3084_vm1, %v1228_v2, %v1224_v60  ;;  %v1233_v24 = vsub.f32 1.0, %v1232_v19  ;;  %v1482_v12 = vand.u32 2147483648, %v3088_v62  ;;  %v2510_v35 = vpop.eup %2509  ;;  %v3205_v19 = vld [vmem:[%s2806_s13 + $0x18] sm:$0xff]  }
  0xf5   : > { %2413 = vst [vmem:[%s2938_s19 + $0x48] sm:$0xff] %v2358_v13   ;;  %v1460_v23 = vadd.f32 %v3090_v56, %v1459_v20  ;;  %vm3138_vm8 = vcmp.eq.f32.partialorder %v1240_v29, 8.507059e+37  ;;  %v1243_v39 = vor.u32 1.1754944e-38, %v1242_v48  ;;  %v3143_v31 = vadd.f32 %v2783_v49, %v831_v38  ;;  %v873_v11 = vpop.f32.mrf.mxu3 }
  0xf6   : > { %v871_v55 = vadd.f32 %v870_v0, %v781_v63  ;;  %v1234_v41 = vmul.f32 %v2508_v10, %v1233_v24  ;;  %vm1237_vm10 = vweird.f32 %v2508_v10  ;;  %v1472_v43 = vmul.f32 %v2510_v35, %v3088_v62 }
  0xf7   : > { %vm1476_vm11 = vweird.f32 %v3088_v62  ;;  %v1640_v45 = vmul.f32 %v1229_v22, %v2921_v51  ;;  %v1464_v27 = vsel %vm3149_vm9, %v3090_v56, %v1460_v23  ;;  %vm3159_vm12 = vcmp.eq.f32.partialorder %v1480_v17, 8.507059e+37  ;;  %vm1238_vm13 = vmor %vm1236_vm7, %vm1237_vm10  ;;  %v3208_v17 = vld [vmem:[%s2806_s13 + $0x58] sm:$0xff]  }
  0xf8   : > { %v2512_v44 = vpop.eup %2511  ;;  %v2170_v18 = vmul.f32 -1.442695, %v3143_v31  ;;  %v1235_v46 = vadd.f32 %v2508_v10, %v1234_v41  ;;  %v1473_v47 = vsub.f32 1.0, %v1472_v43  ;;  %v1483_v53 = vor.u32 1.1754944e-38, %v1482_v12 }
  0xf9   : > { %v3164_v8 = vadd.f32 1.0, %v2512_v44  ;;  %vm1477_vm14 = vweird.f32 %v2510_v35  ;;  %v3172_v51 = vadd.f32 %v2783_v49, %v871_v55  ;;  %v834_v56 = vadd.f32 %v833_v32, %v744_v26  ;;  %v786_v37 = vpop.f32.mrf.mxu2 }
  0xfa   : > { %v3166_v57 = vpop.eup %2513  ;;  %2515 = vpow2.f32 %v2170_v18  ;;  %v1469_v59 = vsel %vm3120_vm5, %v1468_v34, %v1464_v27  ;;  %v1239_v30 = vsel %vm1238_vm13, %v2508_v10, %v1235_v46  ;;  %v1474_v25 = vmul.f32 %v2510_v35, %v1473_v47  ;;  %vm1478_vm0 = vmor %vm1476_vm11, %vm1477_vm14 }
  0xfb   : > { %v1247_v63 = vmul.f32 %v3166_v57, %v3125_v54  ;;  %v1736_v0 = vadd.f32 %v2256_v52, %v1640_v45  ;;  %v1244_v21 = vsel %vm3138_vm8, %v1243_v39, %v1239_v30  ;;  %vm1251_vm15 = vweird.f32 %v3125_v54  ;;  %v3257_v30 = vld [vmem:[%s2806_s13 + $0x20] sm:$0xff]  }
  0xfc   : > { %2517 = vrcp.f32 %v3164_v8  ;;  %v1641_v1 = vmul.f32 %v1244_v21, %v2998_v36  ;;  %v1475_v2 = vadd.f32 %v2510_v35, %v1474_v25  ;;  %v1255_v6 = vand.u32 2147483647, %v3125_v54 }
  0xfd   : > { %v1248_v38 = vsub.f32 1.0, %v1247_v63  ;;  %v1656_v33 = vmul.f32 %v1469_v59, %v2984_v16  ;;  %v2186_v52 = vmul.f32 -1.442695, %v3172_v51  ;;  %v3192_v7 = vadd.f32 %v2783_v49, %v834_v56  ;;  %v746_v16 = vpop.f32.mrf.mxu0  ;;  %v875_v39 = vpop.f32.mrf.mxu3 }
  0xfe   : > { %v874_v29 = vadd.f32 %v873_v11, %v784_v28  ;;  %v1737_v36 = vadd.f32 %v2257_v3, %v1641_v1  ;;  %v1479_v10 = vsel %vm1478_vm0, %v2510_v35, %v1475_v2  ;;  %vm1252_vm1 = vweird.f32 %v3166_v57  ;;  %v838_v63 = vpop.f32.mrf.mxu1  ;;  %v3263_v2 = vld [vmem:[%s2806_s13 + $0x60] sm:$0xff]  }
  0xff   : > { %v1249_v60 = vmul.f32 %v3166_v57, %v1248_v38  ;;  %v1484_v48 = vsel %vm3159_vm12, %v1483_v53, %v1479_v10  ;;  %v1257_v13 = vand.u32 2147483648, %v3125_v54  ;;  %2519 = vpow2.f32 %v2186_v52  ;;  %vm3218_vm2 = vmor %vm1251_vm15, %vm1252_vm1 }
 0x100   : > { %v2516_v62 = vpop.eup %2515  ;;  %v2171_v20 = vmul.f32 -1.442695, %v3192_v7  ;;  %v2323_v15 = vpack.c.bf16 %v1737_v36, %v1736_v0  ;;  %v1657_v3 = vmul.f32 %v1484_v48, %v3028_v58  ;;  %v3223_v58 = vadd.f32 %v2783_v49, %v874_v29 }
 0x101   : > { %v1250_v34 = vadd.f32 %v3166_v57, %v1249_v60  ;;  %v3210_v22 = vadd.f32 1.0, %v2516_v62  ;;  %v836_v12 = vadd.f32 %v835_v14, %v746_v16  ;;  %v1752_v26 = vadd.f32 %v2288_v61, %v1656_v33  ;;  %v789_v48 = vpop.f32.mrf.mxu2 }
 0x102   : > { %v3212_v23 = vpop.eup %2517  ;;  %2521 = vpow2.f32 %v2171_v20  ;;  %2406 = vst [vmem:[%s2938_s19 + $0x10] sm:$0xff] %v2323_v15   ;;  %v1753_v32 = vadd.f32 %v2289_v4, %v1657_v3  ;;  %v1258_v55 = vor.u32 1.1754944e-38, %v1257_v13  ;;  %v2260_v40 = vunpack.c.l.bf16 %v3205_v19 }
 0x103   : > { %v1254_v54 = vsel %vm3218_vm2, %v3166_v57, %v1250_v34  ;;  %v1487_v35 = vmul.f32 %v3212_v23, %v3164_v8  ;;  %v2292_v41 = vunpack.c.l.bf16 %v3208_v17  ;;  %2523 = vrcp.f32 %v3210_v22 }
 0x104   : > { %v2363_v61 = vpack.c.bf16 %v1753_v32, %v1752_v26  ;;  %vm1256_vm3 = vcmp.eq.f32.partialorder %v1255_v6, 8.507059e+37  ;;  %v2261_v4 = vunpack.c.h.bf16 %v3205_v19  ;;  %vm1491_vm4 = vweird.f32 %v3164_v8 }
 0x105   : > { %v1488_v50 = vsub.f32 1.0, %v1487_v35  ;;  %v2520_v43 = vpop.eup %2519  ;;  %v1259_v44 = vsel %vm1256_vm3, %v1258_v55, %v1254_v54  ;;  %v2187_v45 = vmul.f32 -1.442695, %v3223_v58  ;;  %v3242_v27 = vadd.f32 %v2783_v49, %v836_v12  ;;  %v749_v25 = vpop.f32.mrf.mxu0 }
 0x106   : > { %2414 = vst [vmem:[%s2938_s19 + $0x50] sm:$0xff] %v2363_v61   ;;  %v1495_v18 = vand.u32 2147483647, %v3164_v8  ;;  %v1497_v46 = vand.u32 2147483648, %v3164_v8  ;;  %v3248_v47 = vadd.f32 1.0, %v2520_v43  ;;  %v876_v57 = vadd.f32 %v875_v39, %v786_v37  ;;  %v878_v13 = vpop.f32.mrf.mxu3 }
 0x107   : > { %v1489_v9 = vmul.f32 %v3212_v23, %v1488_v50  ;;  %v1270_v28 = vand.u32 2147483647, %v3210_v22  ;;  %2525 = vpow2.f32 %v2187_v45  ;;  %v2172_v11 = vmul.f32 -1.442695, %v3242_v27 }
 0x108   : > { %v2522_v53 = vpop.eup %2521  ;;  %v1642_v56 = vmul.f32 %v1259_v44, %v3040_v5  ;;  %vm1492_vm5 = vweird.f32 %v3212_v23  ;;  %v1272_v59 = vand.u32 2147483648, %v3210_v22  ;;  %2527 = vrcp.f32 %v3248_v47 }
 0x109   : > { %v2524_v0 = vpop.eup %2523  ;;  %v1490_v21 = vadd.f32 %v3212_v23, %v1489_v9  ;;  %v3260_v1 = vadd.f32 1.0, %v2522_v53  ;;  %2529 = vpow2.f32 %v2172_v11  ;;  %v3266_v5 = vadd.f32 %v2783_v49, %v876_v57  ;;  %vm3287_vm9 = vmor %vm1491_vm4, %vm1492_vm5  ;;  %v3324_v53 = vpop.f32.mrf.mxu1 }
 0x10a   : > { %vm3268_vm6 = vcmp.eq.f32.partialorder %v1495_v18, 8.507059e+37  ;;  %v1498_v6 = vor.u32 1.1754944e-38, %v1497_v46  ;;  %v1262_v33 = vmul.f32 %v2524_v0, %v3210_v22  ;;  %v2293_v52 = vunpack.c.h.bf16 %v3208_v17  ;;  %v791_v29 = vpop.f32.mrf.mxu2 }
 0x10b   : > { %vm1266_vm7 = vweird.f32 %v3210_v22  ;;  %vm3275_vm8 = vcmp.eq.f32.partialorder %v1270_v28, 8.507059e+37  ;;  %2531 = vrcp.f32 %v3260_v1  ;;  %v2264_v36 = vunpack.c.l.bf16 %v3257_v30 }
 0x10c   : > { %v3281_v10 = vadd.f32 %v2260_v40, %v1642_v56  ;;  %v1263_v16 = vsub.f32 1.0, %v1262_v33  ;;  %v1510_v14 = vand.u32 2147483647, %v3248_v47  ;;  %v2296_v62 = vunpack.c.l.bf16 %v3263_v2 }
 0x10d   : > { %v2526_v20 = vpop.eup %2525  ;;  %v1494_v15 = vsel %vm3287_vm9, %v3212_v23, %v1490_v21  ;;  %v1273_v3 = vor.u32 1.1754944e-38, %v1272_v59  ;;  %v2188_v34 = vmul.f32 -1.442695, %v3266_v5  ;;  %v839_v8 = vadd.f32 %v838_v63, %v749_v25  ;;  %v3322_v46 = vpop.f32.mrf.mxu0 }
 0x10e   : > { %v2528_v24 = vpop.eup %2527  ;;  %v1264_v12 = vmul.f32 %v2524_v0, %v1263_v16  ;;  %vm1267_vm10 = vweird.f32 %v2524_v0  ;;  %v1512_v26 = vand.u32 2147483648, %v3248_v47  ;;  %v2265_v32 = vunpack.c.h.bf16 %v3257_v30  ;;  %v880_v60 = vpop.f32.mrf.mxu3 }
 0x10f   : > { %v2530_v54 = vpop.eup %2529  ;;  %v1502_v35 = vmul.f32 %v2528_v24, %v3248_v47  ;;  %vm1506_vm11 = vweird.f32 %v3248_v47  ;;  %v3301_v37 = vadd.f32 1.0, %v2526_v20  ;;  %2533 = vpow2.f32 %v2188_v34  ;;  %vm1268_vm13 = vmor %vm1266_vm7, %vm1267_vm10 }
 0x110   : > { %v1499_v23 = vsel %vm3268_vm6, %v1498_v6, %v1494_v15  ;;  %v1265_v39 = vadd.f32 %v2524_v0, %v1264_v12  ;;  %vm3305_vm12 = vcmp.eq.f32.partialorder %v1510_v14, 8.507059e+37  ;;  %v3309_v40 = vadd.f32 1.0, %v2530_v54 }
 0x111   : > { %v3311_v61 = vpop.eup %2531  ;;  %v1503_v50 = vsub.f32 1.0, %v1502_v35  ;;  %2535 = vrcp.f32 %v3301_v37  ;;  %v3317_v43 = vadd.f32 %v2783_v49, %v839_v8  ;;  %v879_v44 = vadd.f32 %v878_v13, %v789_v48 }
 0x112   : > { %v1269_v45 = vsel %vm1268_vm13, %v2524_v0, %v1265_v39  ;;  %v1513_v9 = vor.u32 1.1754944e-38, %v1512_v26  ;;  %v1277_v18 = vmul.f32 %v3311_v61, %v3260_v1  ;;  %vm1281_vm14 = vweird.f32 %v3260_v1  ;;  %v843_v39 = vpop.f32.mrf.mxu1 }
 0x113   : > { %v1274_v22 = vsel %vm3275_vm8, %v1273_v3, %v1269_v45  ;;  %v1504_v28 = vmul.f32 %v2528_v24, %v1503_v50  ;;  %vm1507_vm15 = vweird.f32 %v2528_v24  ;;  %2537 = vrcp.f32 %v3309_v40 }
 0x114   : > { %v1658_v11 = vmul.f32 %v1499_v23, %v3074_v42  ;;  %v1643_v57 = vmul.f32 %v1274_v22, %v3143_v31  ;;  %v1278_v56 = vsub.f32 1.0, %v1277_v18  ;;  %v1285_v59 = vand.u32 2147483647, %v3260_v1  ;;  %vm1508_vm0 = vmor %vm1506_vm11, %vm1507_vm15 }
 0x115   : > { %v2534_v25 = vpop.eup %2533  ;;  %v1505_v63 = vadd.f32 %v2528_v24, %v1504_v28  ;;  %v1287_v0 = vand.u32 2147483648, %v3260_v1  ;;  %v2173_v21 = vmul.f32 -1.442695, %v3317_v43  ;;  %v3335_v38 = vadd.f32 %v2783_v49, %v879_v44  ;;  %v754_v23 = vpop.f32.mrf.mxu0 }
 0x116   : > { %v1739_v6 = vadd.f32 %v2261_v4, %v1643_v57  ;;  %v1279_v42 = vmul.f32 %v3311_v61, %v1278_v56  ;;  %v1525_v31 = vand.u32 2147483647, %v3301_v37  ;;  %v3343_v33 = vadd.f32 1.0, %v2534_v25 }
 0x117   : > { %v3345_v16 = vpop.eup %2535  ;;  %v1509_v14 = vsel %vm1508_vm0, %v2528_v24, %v1505_v63  ;;  %vm1282_vm1 = vweird.f32 %v3311_v61  ;;  %v1527_v49 = vand.u32 2147483648, %v3301_v37  ;;  %2539 = vpow2.f32 %v2173_v21  ;;  %v794_v63 = vpop.f32.mrf.mxu2 }
 0x118   : > { %v2328_v19 = vpack.c.bf16 %v1739_v6, %v3281_v10  ;;  %v1514_v4 = vsel %vm3305_vm12, %v1513_v9, %v1509_v14  ;;  %v1280_v47 = vadd.f32 %v3311_v61, %v1279_v42  ;;  %v1517_v48 = vmul.f32 %v3345_v16, %v3301_v37  ;;  %vm3372_vm3 = vmor %vm1281_vm14, %vm1282_vm1 }
 0x119   : > { %v2538_v13 = vpop.eup %2537  ;;  %v1754_v20 = vadd.f32 %v2292_v41, %v1658_v11  ;;  %v1659_v15 = vmul.f32 %v1514_v4, %v3172_v51  ;;  %2541 = vrcp.f32 %v3343_v33  ;;  %v2297_v3 = vunpack.c.h.bf16 %v3263_v2 }
 0x11a   : > { %2407 = vst [vmem:[%s2938_s19 + $0x18] sm:$0xff] %v2328_v19   ;;  %vm3361_vm2 = vcmp.eq.f32.partialorder %v1285_v59, 8.507059e+37  ;;  %v1288_v34 = vor.u32 1.1754944e-38, %v1287_v0  ;;  %v1518_v8 = vsub.f32 1.0, %v1517_v48  ;;  %v1292_v24 = vmul.f32 %v2538_v13, %v3309_v40  ;;  %v883_v0 = vpop.f32.mrf.mxu3 }
 0x11b   : > { %v1755_v12 = vadd.f32 %v2293_v52, %v1659_v15  ;;  %vm1521_vm4 = vweird.f32 %v3301_v37  ;;  %v1528_v41 = vor.u32 1.1754944e-38, %v1527_v49  ;;  %v1300_v26 = vand.u32 2147483647, %v3309_v40 }
 0x11c   : > { %v1284_v54 = vsel %vm3372_vm3, %v3311_v61, %v1280_v47  ;;  %v1519_v17 = vmul.f32 %v3345_v16, %v1518_v8  ;;  %vm3382_vm5 = vcmp.eq.f32.partialorder %v1525_v31, 8.507059e+37  ;;  %v1293_v1 = vsub.f32 1.0, %v1292_v24  ;;  %v845_v8 = vpop.f32.mrf.mxu1 }
 0x11d   : > { %v2189_v35 = vmul.f32 -1.442695, %v3335_v38  ;;  %v2540_v55 = vpop.eup %2539  ;;  %v2368_v50 = vpack.c.bf16 %v1755_v12, %v1754_v20  ;;  %vm1522_vm6 = vweird.f32 %v3345_v16  ;;  %vm1296_vm7 = vweird.f32 %v3309_v40 }
 0x11e   : > { %v1302_v61 = vand.u32 2147483648, %v3309_v40  ;;  %v1520_v44 = vadd.f32 %v3345_v16, %v1519_v17  ;;  %v1294_v45 = vmul.f32 %v2538_v13, %v1293_v1  ;;  %vm1297_vm8 = vweird.f32 %v2538_v13  ;;  %vm3401_vm9 = vmor %vm1521_vm4, %vm1522_vm6  ;;  %v3423_v40 = vld [vmem:[%s3708_s2] ss:$0 sm:$0xff] }
 0x11f   : > { %v3391_v9 = vadd.f32 1.0, %v2540_v55  ;;  %v2542_v18 = vpop.eup %2541  ;;  %2415 = vst [vmem:[%s2938_s19 + $0x58] sm:$0xff] %v2368_v50   ;;  %v1289_v22 = vsel %vm3361_vm2, %v1288_v34, %v1284_v54  ;;  %v1540_v28 = vand.u32 2147483647, %v3343_v33  ;;  %2543 = vpow2.f32 %v2189_v35  ;;  %vm1298_vm11 = vmor %vm1296_vm7, %vm1297_vm8  ;;  %v756_v34 = vpop.f32.mrf.mxu0 }
 0x120   : > { %v841_v11 = vadd.f32 %v3324_v53, %v3322_v46  ;;  %v1295_v56 = vadd.f32 %v2538_v13, %v1294_v45  ;;  %vm1301_vm10 = vcmp.eq.f32.partialorder %v1300_v26, 8.507059e+37  ;;  %v1532_v59 = vmul.f32 %v2542_v18, %v3343_v33  ;;  %v796_v1 = vpop.f32.mrf.mxu2 }
 0x121   : > { %v1542_v25 = vand.u32 2147483648, %v3343_v33  ;;  %v1303_v21 = vor.u32 1.1754944e-38, %v1302_v61  ;;  %2545 = vrcp.f32 %v3391_v9  ;;  %v881_v37 = vadd.f32 %v880_v60, %v791_v29  ;;  %v3468_v61 = vld [vmem:[%s2806_s13 + $0x68] sm:$0xff]  }
 0x122   : > { %v844_v46 = vadd.f32 %v843_v39, %v754_v23  ;;  %v1644_v53 = vmul.f32 %v1289_v22, %v3192_v7  ;;  %v1524_v6 = vsel %vm3401_vm9, %v3345_v16, %v1520_v44  ;;  %v1299_v42 = vsel %vm1298_vm11, %v2538_v13, %v1295_v56  ;;  %v885_v35 = vpop.f32.mrf.mxu3 }
 0x123   : > { %v1533_v31 = vsub.f32 1.0, %v1532_v59  ;;  %v1304_v14 = vsel %vm1301_vm10, %v1303_v21, %v1299_v42  ;;  %vm1536_vm12 = vweird.f32 %v3343_v33  ;;  %vm3416_vm13 = vcmp.eq.f32.partialorder %v1540_v28, 8.507059e+37 }
 0x124   : > { %v3426_v7 = vadd.f32 %v3423_v40, %v841_v11  ;;  %v1645_v29 = vmul.f32 %v1304_v14, %v3242_v27  ;;  %vm1537_vm14 = vweird.f32 %v2542_v18  ;;  %v1543_v16 = vor.u32 1.1754944e-38, %v1542_v25 }
 0x125   : > { %v1534_v60 = vmul.f32 %v2542_v18, %v1533_v31  ;;  %v2544_v19 = vpop.eup %2543  ;;  %v1529_v4 = vsel %vm3382_vm5, %v1528_v41, %v1524_v6  ;;  %v3433_v48 = vadd.f32 %v3423_v40, %v881_v37  ;;  %v3436_v13 = vadd.f32 %v3423_v40, %v844_v46  ;;  %vm1538_vm15 = vmor %vm1536_vm12, %vm1537_vm14  ;;  %v848_v31 = vpop.f32.mrf.mxu1 }
 0x126   : > { %v2174_v47 = vmul.f32 -1.442695, %v3426_v7  ;;  %v1740_v20 = vadd.f32 %v2264_v36, %v1644_v53  ;;  %v1741_v27 = vadd.f32 %v2265_v32, %v1645_v29  ;;  %v3442_v10 = vadd.f32 1.0, %v2544_v19 }
 0x127   : > { %v1535_v15 = vadd.f32 %v2542_v18, %v1534_v60  ;;  %v2546_v24 = vpop.eup %2545  ;;  %v2190_v12 = vmul.f32 -1.442695, %v3433_v48  ;;  %v2175_v51 = vmul.f32 -1.442695, %v3436_v13  ;;  %v884_v41 = vadd.f32 %v883_v0, %v794_v63  ;;  %v759_v42 = vpop.f32.mrf.mxu0 }
 0x128   : > { %2547 = vpow2.f32 %v2174_v47  ;;  %v1660_v36 = vmul.f32 %v1529_v4, %v3223_v58  ;;  %v2333_v30 = vpack.c.bf16 %v1741_v27, %v1740_v20  ;;  %v1307_v26 = vmul.f32 %v2546_v24, %v3391_v9  ;;  %v3507_v4 = vld [vmem:[%s2806_s13 + $0x30] sm:$0xff]  }
 0x129   : > { %v1539_v32 = vsel %vm1538_vm15, %v2542_v18, %v1535_v15  ;;  %2549 = vrcp.f32 %v3442_v10  ;;  %v846_v33 = vadd.f32 %v845_v8, %v756_v34  ;;  %vm1311_vm0 = vweird.f32 %v3391_v9 }
 0x12a   : > { %v1544_v54 = vsel %vm3416_vm13, %v1543_v16, %v1539_v32  ;;  %2408 = vst [vmem:[%s2938_s19 + $0x20] sm:$0xff] %v2333_v30   ;;  %v1308_v52 = vsub.f32 1.0, %v1307_v26  ;;  %2551 = vpow2.f32 %v2190_v12  ;;  %v1317_v58 = vand.u32 2147483648, %v3391_v9 }
 0x12b   : > { %v1661_v17 = vmul.f32 %v1544_v54, %v3266_v5  ;;  %2553 = vpow2.f32 %v2175_v51  ;;  %v3458_v23 = vadd.f32 %v3423_v40, %v884_v41  ;;  %v1756_v39 = vadd.f32 %v2296_v62, %v1660_v36  ;;  %v3465_v5 = vld [vmem:[%s2806_s13 + $0x28] sm:$0xff]  }
 0x12c   : > { %v1309_v50 = vmul.f32 %v2546_v24, %v1308_v52  ;;  %vm1312_vm1 = vweird.f32 %v2546_v24  ;;  %v1315_v45 = vand.u32 2147483647, %v3391_v9  ;;  %v3473_v22 = vadd.f32 %v3423_v40, %v846_v33 }
 0x12d   : > { %v1757_v55 = vadd.f32 %v2297_v3, %v1661_v17  ;;  %v2191_v18 = vmul.f32 -1.442695, %v3458_v23  ;;  %v886_v28 = vadd.f32 %v885_v35, %v796_v1  ;;  %vm3481_vm2 = vmor %vm1311_vm0, %vm1312_vm1  ;;  %v2268_v56 = vunpack.c.l.bf16 %v3465_v5 }
 0x12e   : > { %v2548_v44 = vpop.eup %2547  ;;  %v1310_v11 = vadd.f32 %v2546_v24, %v1309_v50  ;;  %v2300_v59 = vunpack.c.l.bf16 %v3468_v61  ;;  %v2176_v25 = vmul.f32 -1.442695, %v3473_v22  ;;  %v1318_v21 = vor.u32 1.1754944e-38, %v1317_v58 }
 0x12f   : > { %v2373_v62 = vpack.c.bf16 %v1757_v55, %v1756_v39  ;;  %v3475_v2 = vadd.f32 1.0, %v2548_v44  ;;  %v3477_v3 = vpop.eup %2549  ;;  %2555 = vpow2.f32 %v2191_v18  ;;  %vm1316_vm3 = vcmp.eq.f32.partialorder %v1315_v45, 8.507059e+37 }
 0x130   : > { %v2552_v63 = vpop.eup %2551  ;;  %v1314_v0 = vsel %vm3481_vm2, %v2546_v24, %v1310_v11  ;;  %v1547_v9 = vmul.f32 %v3477_v3, %v3442_v10  ;;  %v1555_v46 = vand.u32 2147483647, %v3442_v10  ;;  %v1557_v53 = vand.u32 2147483648, %v3442_v10 }
 0x131   : > { %2416 = vst [vmem:[%s2938_s19 + $0x60] sm:$0xff] %v2373_v62   ;;  %2557 = vrcp.f32 %v3475_v2  ;;  %v2554_v37 = vpop.eup %2553  ;;  %v3497_v6 = vadd.f32 %v3423_v40, %v886_v28  ;;  %v1319_v14 = vsel %vm1316_vm3, %v1318_v21, %v1314_v0  ;;  %v3499_v29 = vadd.f32 1.0, %v2552_v63 }
 0x132   : > { %v1548_v49 = vsub.f32 1.0, %v1547_v9  ;;  %v3501_v60 = vadd.f32 1.0, %v2554_v37  ;;  %vm1551_vm4 = vweird.f32 %v3442_v10  ;;  %v2269_v16 = vunpack.c.h.bf16 %v3465_v5 }
 0x133   : > { %v2301_v19 = vunpack.c.h.bf16 %v3468_v61  ;;  %2559 = vpow2.f32 %v2176_v25  ;;  %v1330_v20 = vand.u32 2147483647, %v3475_v2  ;;  %v849_v27 = vadd.f32 %v848_v31, %v759_v42  ;;  %v799_v31 = vpop.f32.mrf.mxu2 }
 0x134   : > { %v1549_v47 = vmul.f32 %v3477_v3, %v1548_v49  ;;  %2561 = vrcp.f32 %v3499_v29  ;;  %v1646_v34 = vmul.f32 %v1319_v14, %v3317_v43  ;;  %vm3513_vm5 = vcmp.eq.f32.partialorder %v1555_v46, 8.507059e+37  ;;  %v888_v14 = vpop.f32.mrf.mxu3 }
 0x135   : > { %v2556_v15 = vpop.eup %2555  ;;  %v1332_v24 = vand.u32 2147483648, %v3475_v2  ;;  %2563 = vrcp.f32 %v3501_v60  ;;  %v1558_v51 = vor.u32 1.1754944e-38, %v1557_v53  ;;  %v2272_v41 = vunpack.c.l.bf16 %v3507_v4 }
 0x136   : > { %v3520_v36 = vadd.f32 1.0, %v2556_v15  ;;  %v2192_v30 = vmul.f32 -1.442695, %v3497_v6  ;;  %v1550_v32 = vadd.f32 %v3477_v3, %v1549_v47  ;;  %vm1552_vm6 = vweird.f32 %v3477_v3 }
 0x137   : > { %v2558_v12 = vpop.eup %2557  ;;  %v2273_v26 = vunpack.c.h.bf16 %v3507_v4  ;;  %vm1326_vm7 = vweird.f32 %v3475_v2  ;;  %vm3528_vm8 = vcmp.eq.f32.partialorder %v1330_v20, 8.507059e+37  ;;  %v3534_v33 = vadd.f32 %v3423_v40, %v849_v27  ;;  %vm3541_vm9 = vmor %vm1551_vm4, %vm1552_vm6 }
 0x138   : > { %v1322_v43 = vmul.f32 %v2558_v12, %v3475_v2  ;;  %2565 = vrcp.f32 %v3520_v36  ;;  %v3536_v52 = vadd.f32 %v2268_v56, %v1646_v34  ;;  %v1333_v35 = vor.u32 1.1754944e-38, %v1332_v24 }
 0x139   : > { %v2560_v17 = vpop.eup %2559  ;;  %v1570_v58 = vand.u32 2147483647, %v3499_v29  ;;  %v1572_v50 = vand.u32 2147483648, %v3499_v29  ;;  %v1345_v44 = vand.u32 2147483647, %v3501_v60  ;;  %2567 = vpow2.f32 %v2192_v30 }
 0x13a   : > { %v1323_v1 = vsub.f32 1.0, %v1322_v43  ;;  %v2562_v39 = vpop.eup %2561  ;;  %v3547_v45 = vadd.f32 1.0, %v2560_v17  ;;  %v1554_v28 = vsel %vm3541_vm9, %v3477_v3, %v1550_v32  ;;  %vm1327_vm10 = vweird.f32 %v2558_v12 }
 0x13b   : > { %v2564_v18 = vpop.eup %2563  ;;  %v1562_v10 = vmul.f32 %v2562_v39, %v3499_v29  ;;  %vm1566_vm11 = vweird.f32 %v3499_v29  ;;  %vm1341_vm12 = vweird.f32 %v3501_v60  ;;  %v1347_v57 = vand.u32 2147483648, %v3501_v60  ;;  %vm1328_vm14 = vmor %vm1326_vm7, %vm1327_vm10 }
 0x13c   : > { %v1324_v62 = vmul.f32 %v2558_v12, %v1323_v1  ;;  %v1337_v11 = vmul.f32 %v2564_v18, %v3501_v60  ;;  %vm3557_vm13 = vcmp.eq.f32.partialorder %v1570_v58, 8.507059e+37  ;;  %2569 = vrcp.f32 %v3547_v45 }
 0x13d   : > { %v1563_v25 = vsub.f32 1.0, %v1562_v10  ;;  %v1559_v0 = vsel %vm3513_vm5, %v1558_v51, %v1554_v28  ;;  %v1573_v21 = vor.u32 1.1754944e-38, %v1572_v50  ;;  %vm3568_vm15 = vcmp.eq.f32.partialorder %v1345_v44, 8.507059e+37  ;;  %v850_v10 = vpop.f32.mrf.mxu1 }
 0x13e   : > { %v1325_v56 = vadd.f32 %v2558_v12, %v1324_v62  ;;  %v3562_v3 = vpop.eup %2565  ;;  %v1338_v9 = vsub.f32 1.0, %v1337_v11  ;;  %vm1567_vm0 = vweird.f32 %v2562_v39  ;;  %vm1342_vm1 = vweird.f32 %v2564_v18  ;;  %v761_v62 = vpop.f32.mrf.mxu0 }
 0x13f   : > { %v1564_v53 = vmul.f32 %v2562_v39, %v1563_v25  ;;  %v1577_v42 = vmul.f32 %v3562_v3, %v3520_v36  ;;  %v2568_v49 = vpop.eup %2567  ;;  %v1348_v20 = vor.u32 1.1754944e-38, %v1347_v57  ;;  %vm1581_vm2 = vweird.f32 %v3520_v36  ;;  %vm1568_vm3 = vmor %vm1566_vm11, %vm1567_vm0  ;;  %v890_v25 = vpop.f32.mrf.mxu3 }
 0x140   : > { %v1329_v46 = vsel %vm1328_vm14, %v2558_v12, %v1325_v56  ;;  %v1339_v2 = vmul.f32 %v2564_v18, %v1338_v9  ;;  %v3578_v8 = vadd.f32 1.0, %v2568_v49  ;;  %v1662_v24 = vmul.f32 %v1559_v0, %v3335_v38  ;;  %vm3591_vm4 = vmor %vm1341_vm12, %vm1342_vm1  ;;  %v801_v56 = vpop.f32.mrf.mxu2 }
 0x141   : > { %v1334_v47 = vsel %vm3528_vm8, %v1333_v35, %v1329_v46  ;;  %v1565_v15 = vadd.f32 %v2562_v39, %v1564_v53  ;;  %v1578_v34 = vsub.f32 1.0, %v1577_v42  ;;  %v1585_v51 = vand.u32 2147483647, %v3520_v36  ;;  %v2403_v53 = vld [vmem:[%s2806_s13 + $0x70] sm:$0xff]  }
 0x142   : > { %v1647_v27 = vmul.f32 %v1334_v47, %v3426_v7  ;;  %v1340_v12 = vadd.f32 %v2564_v18, %v1339_v2  ;;  %v2177_v30 = vmul.f32 -1.442695, %v3534_v33  ;;  %v2570_v32 = vpop.eup %2569  ;;  %2571 = vrcp.f32 %v3578_v8 }
 0x143   : > { %v1569_v43 = vsel %vm1568_vm3, %v2562_v39, %v1565_v15  ;;  %v1579_v29 = vmul.f32 %v3562_v3, %v1578_v34  ;;  %v1352_v17 = vmul.f32 %v2570_v32, %v3547_v45  ;;  %v1360_v35 = vand.u32 2147483647, %v3547_v45 }
 0x144   : > { %v1743_v7 = vadd.f32 %v2269_v16, %v1647_v27  ;;  %v1574_v54 = vsel %vm3557_vm13, %v1573_v21, %v1569_v43  ;;  %v1344_v5 = vsel %vm3591_vm4, %v2564_v18, %v1340_v12  ;;  %v1587_v16 = vand.u32 2147483648, %v3520_v36 }
 0x145   : > { %v1663_v1 = vmul.f32 %v1574_v54, %v3433_v48  ;;  %v889_v58 = vadd.f32 %v888_v14, %v799_v31  ;;  %v1758_v39 = vadd.f32 %v2300_v59, %v1662_v24  ;;  %vm1582_vm5 = vweird.f32 %v3562_v3 }
 0x146   : > { %v2338_v60 = vpack.c.bf16 %v1743_v7, %v3536_v52  ;;  %v1353_v55 = vsub.f32 1.0, %v1352_v17  ;;  %v1362_v50 = vand.u32 2147483648, %v3547_v45  ;;  %v1349_v52 = vsel %vm3568_vm15, %v1348_v20, %v1344_v5  ;;  %vm3633_vm10 = vmor %vm1581_vm2, %vm1582_vm5 }
 0x147   : > { %v1759_v44 = vadd.f32 %v2301_v19, %v1663_v1  ;;  %v1580_v48 = vadd.f32 %v3562_v3, %v1579_v29  ;;  %2573 = vpow2.f32 %v2177_v30  ;;  %vm3616_vm6 = vcmp.eq.f32.partialorder %v1585_v51, 8.507059e+37 }
 0x148   : > { %2409 = vst [vmem:[%s2938_s19 + $0x28] sm:$0xff] %v2338_v60   ;;  %v1588_v59 = vor.u32 1.1754944e-38, %v1587_v16  ;;  %v1354_v28 = vmul.f32 %v2570_v32, %v1353_v55  ;;  %vm1357_vm7 = vweird.f32 %v2570_v32  ;;  %v2572_v11 = vpop.eup %2571  ;;  %vm1356_vm8 = vweird.f32 %v3547_v45 }
 0x149   : > { %v2378_v57 = vpack.c.bf16 %v1759_v44, %v1758_v39  ;;  %vm3621_vm9 = vcmp.eq.f32.partialorder %v1360_v35, 8.507059e+37  ;;  %v3626_v19 = vadd.f32 %v3423_v40, %v889_v58  ;;  %v1648_v63 = vmul.f32 %v1349_v52, %v3436_v13  ;;  %vm1358_vm11 = vmor %vm1356_vm8, %vm1357_vm7 }
 0x14a   : > { %v1355_v45 = vadd.f32 %v2570_v32, %v1354_v28  ;;  %v1363_v21 = vor.u32 1.1754944e-38, %v1362_v50  ;;  %v1592_v9 = vmul.f32 %v2572_v11, %v3578_v8  ;;  %v1584_v37 = vsel %vm3633_vm10, %v3562_v3, %v1580_v48  ;;  %v2396_v48 = vld [vmem:[%s2806_s13 + $0x38] sm:$0xff]  }
 0x14b   : > { %2417 = vst [vmem:[%s2938_s19 + $0x68] sm:$0xff] %v2378_v57   ;;  %v1600_v13 = vand.u32 2147483647, %v3578_v8  ;;  %v2193_v46 = vmul.f32 -1.442695, %v3626_v19  ;;  %v851_v36 = vadd.f32 %v850_v10, %v761_v62  ;;  %v1602_v14 = vand.u32 2147483648, %v3578_v8 }
 0x14c   : > { %v1359_v42 = vsel %vm1358_vm11, %v2570_v32, %v1355_v45  ;;  %v1593_v31 = vsub.f32 1.0, %v1592_v9  ;;  %v891_v49 = vadd.f32 %v890_v25, %v801_v56  ;;  %vm1597_vm12 = vweird.f32 %v2572_v11 }
 0x14d   : > { %v2574_v47 = vpop.eup %2573  ;;  %v1364_v2 = vsel %vm3621_vm9, %v1363_v21, %v1359_v42  ;;  %2575 = vpow2.f32 %v2193_v46  ;;  %v3650_v3 = vadd.f32 %v3423_v40, %v851_v36  ;;  %v1589_v24 = vsel %vm3616_vm6, %v1588_v59, %v1584_v37 }
 0x14e   : > { %v1649_v20 = vmul.f32 %v1364_v2, %v3473_v22  ;;  %v1594_v27 = vmul.f32 %v2572_v11, %v1593_v31  ;;  %v3653_v15 = vadd.f32 1.0, %v2574_v47  ;;  %v3656_v34 = vadd.f32 %v3423_v40, %v891_v49 }
 0x14f   : > { %v2304_v12 = vunpack.c.l.bf16 %v2403_v53  ;;  %vm1596_vm13 = vweird.f32 %v3578_v8  ;;  %v2178_v51 = vmul.f32 -1.442695, %v3650_v3  ;;  %v1744_v30 = vadd.f32 %v2272_v41, %v1648_v63 }
 0x150   : > { %v1745_v22 = vadd.f32 %v2273_v26, %v1649_v20  ;;  %v1595_v32 = vadd.f32 %v2572_v11, %v1594_v27  ;;  %2577 = vrcp.f32 %v3653_v15  ;;  %vm1598_vm14 = vmor %vm1596_vm13, %vm1597_vm12  ;;  %v1603_v40 = vor.u32 1.1754944e-38, %v1602_v14  ;;  %v2404_v27 = vld [vmem:[%s2806_s13 + $0x78] sm:$0xff]  }
 0x151   : > { %v2305_v7 = vunpack.c.h.bf16 %v2403_v53  ;;  %2579 = vpow2.f32 %v2178_v51  ;;  %v2194_v43 = vmul.f32 -1.442695, %v3656_v34  ;;  %v1664_v8 = vmul.f32 %v1589_v24, %v3458_v23 }
 0x152   : > { %v2343_v38 = vpack.c.bf16 %v1745_v22, %v1744_v30  ;;  %v1599_v29 = vsel %vm1598_vm14, %v2572_v11, %v1595_v32  ;;  %vm1601_vm15 = vcmp.eq.f32.partialorder %v1600_v13, 8.507059e+37  ;;  %vm1371_vm0 = vweird.f32 %v3653_v15 }
 0x153   : > { %v2576_v41 = vpop.eup %2575  ;;  %v1604_v4 = vsel %vm1601_vm15, %v1603_v40, %v1599_v29  ;;  %2581 = vpow2.f32 %v2194_v43  ;;  %v1760_v16 = vadd.f32 %v2304_v12, %v1664_v8  ;;  %v1377_v28 = vand.u32 2147483648, %v3653_v15 }
 0x154   : > { %2410 = vst [vmem:[%s2938_s19 + $0x30] sm:$0xff] %v2343_v38   ;;  %v1665_v26 = vmul.f32 %v1604_v4, %v3497_v6  ;;  %v1154_v54 = vadd.f32 1.0, %v2576_v41  ;;  %v1375_v62 = vand.u32 2147483647, %v3653_v15  ;;  %v2276_v61 = vunpack.c.l.bf16 %v2396_v48 }
 0x155   : > { %v2277_v25 = vunpack.c.h.bf16 %v2396_v48  ;;  %v1378_v37 = vor.u32 1.1754944e-38, %v1377_v28  ;;  %v2309_v41 = vunpack.c.h.bf16 %v2404_v27 }
 0x156   : > { %v2578_v5 = vpop.eup %2577  ;;  %v1761_v17 = vadd.f32 %v2305_v7, %v1665_v26  ;;  %2583 = vrcp.f32 %v1154_v54  ;;  %v1615_v56 = vand.u32 2147483647, %v1154_v54  ;;  %v1617_v21 = vand.u32 2147483648, %v1154_v54 }
 0x157   : > { %v2580_v60 = vpop.eup %2579  ;;  %v1367_v1 = vmul.f32 %v2578_v5, %v3653_v15  ;;  %vm1372_vm1 = vweird.f32 %v2578_v5  ;;  %vm1611_vm4 = vweird.f32 %v1154_v54  ;;  %vm1376_vm5 = vcmp.eq.f32.partialorder %v1375_v62, 8.507059e+37 }
 0x158   : > { %v2383_v23 = vpack.c.bf16 %v1761_v17, %v1760_v16  ;;  %v1139_v35 = vadd.f32 1.0, %v2580_v60  ;;  %vm3678_vm2 = vmor %vm1371_vm0, %vm1372_vm1  ;;  %vm1616_vm8 = vcmp.eq.f32.partialorder %v1615_v56, 8.507059e+37  ;;  %v1618_v47 = vor.u32 1.1754944e-38, %v1617_v21 }
 0x159   : > { %v2582_v58 = vpop.eup %2581  ;;  %v1368_v39 = vsub.f32 1.0, %v1367_v1  ;;  %v2308_v7 = vunpack.c.l.bf16 %v2404_v27 }
 0x15a   : > { %2418 = vst [vmem:[%s2938_s19 + $0x70] sm:$0xff] %v2383_v23   ;;  %2585 = vrcp.f32 %v1139_v35  ;;  %v1155_v50 = vadd.f32 1.0, %v2582_v58  ;;  %v1392_v13 = vand.u32 2147483648, %v1139_v35  ;;  %v1390_v42 = vand.u32 2147483647, %v1139_v35 }
 0x15b   : > { %v1369_v55 = vmul.f32 %v2578_v5, %v1368_v39  ;;  %vm1386_vm9 = vweird.f32 %v1139_v35 }
 0x15c   : > { %v2584_v44 = vpop.eup %2583  ;;  %2587 = vrcp.f32 %v1155_v50  ;;  %v1632_v20 = vand.u32 2147483648, %v1155_v50  ;;  %v1393_v15 = vor.u32 1.1754944e-38, %v1392_v13  ;;  %v1630_v12 = vand.u32 2147483647, %v1155_v50 }
 0x15d   : > { %v1607_v52 = vmul.f32 %v2584_v44, %v1154_v54  ;;  %v1370_v6 = vadd.f32 %v2578_v5, %v1369_v55  ;;  %vm1612_vm3 = vweird.f32 %v2584_v44  ;;  %vm1391_vm12 = vcmp.eq.f32.partialorder %v1390_v42, 8.507059e+37 }
 0x15e   : > { %vm3684_vm6 = vmor %vm1611_vm4, %vm1612_vm3  ;;  %vm1626_vm13 = vweird.f32 %v1155_v50  ;;  %v1633_v8 = vor.u32 1.1754944e-38, %v1632_v20  ;;  %vm1631_vm15 = vcmp.eq.f32.partialorder %v1630_v12, 8.507059e+37 }
 0x15f   : > { %v1608_v18 = vsub.f32 1.0, %v1607_v52  ;;  %v1374_v0 = vsel %vm3678_vm2, %v2578_v5, %v1370_v6 }
 0x160   : > { %v2586_v59 = vpop.eup %2585  ;;  %v1379_v31 = vsel %vm1376_vm5, %v1378_v37, %v1374_v0 }
 0x161   : > { %v1609_v10 = vmul.f32 %v2584_v44, %v1608_v18  ;;  %v1382_v11 = vmul.f32 %v2586_v59, %v1139_v35  ;;  %vm1387_vm7 = vweird.f32 %v2586_v59  ;;  %v1650_v51 = vmul.f32 %v1379_v31, %v3534_v33 }
 0x162   : > { %v2588_v63 = vpop.eup %2587  ;;  %vm1388_vm10 = vmor %vm1386_vm9, %vm1387_vm7 }
 0x163   : > { %v1610_v45 = vadd.f32 %v2584_v44, %v1609_v10  ;;  %v1383_v9 = vsub.f32 1.0, %v1382_v11  ;;  %v1622_v46 = vmul.f32 %v2588_v63, %v1155_v50  ;;  %vm1627_vm11 = vweird.f32 %v2588_v63 }
 0x164   : > { %vm1628_vm14 = vmor %vm1626_vm13, %vm1627_vm11  ;;  %v1746_v4 = vadd.f32 %v2276_v61, %v1650_v51 }
 0x165   : > { %v1384_v53 = vmul.f32 %v2586_v59, %v1383_v9  ;;  %v1614_v14 = vsel %vm3684_vm6, %v2584_v44, %v1610_v45  ;;  %v1623_v49 = vsub.f32 1.0, %v1622_v46 }
 0x166   : > { %v1619_v30 = vsel %vm1616_vm8, %v1618_v47, %v1614_v14 }
 0x167   : > { %v1385_v2 = vadd.f32 %v2586_v59, %v1384_v53  ;;  %v1624_v24 = vmul.f32 %v2588_v63, %v1623_v49  ;;  %v1666_v38 = vmul.f32 %v1619_v30, %v3626_v19 }
 0x169   : > { %v1389_v22 = vsel %vm1388_vm10, %v2586_v59, %v1385_v2  ;;  %v1625_v40 = vadd.f32 %v2588_v63, %v1624_v24  ;;  %v1762_v16 = vadd.f32 %v2308_v7, %v1666_v38 }
 0x16a   : > { %v1394_v32 = vsel %vm1391_vm12, %v1393_v15, %v1389_v22 }
 0x16b   : > { %v1651_v43 = vmul.f32 %v1394_v32, %v3650_v3  ;;  %v1629_v29 = vsel %vm1628_vm14, %v2588_v63, %v1625_v40 }
 0x16c   : > { %v1634_v26 = vsel %vm1631_vm15, %v1633_v8, %v1629_v29 }
 0x16d   : > { %v1747_v33 = vadd.f32 %v2277_v25, %v1651_v43  ;;  %v1667_v54 = vmul.f32 %v1634_v26, %v3656_v34 }
 0x16f   : > { %v2348_v5 = vpack.c.bf16 %v1747_v33, %v1746_v4  ;;  %v1763_v17 = vadd.f32 %v2309_v41, %v1667_v54 }
 0x171   : > { %2411 = vst [vmem:[%s2938_s19 + $0x38] sm:$0xff] %v2348_v5   ;;  %v2388_v60 = vpack.c.bf16 %v1763_v17, %v1762_v16 }
 0x173   : > { %2419 = vst [vmem:[%s2938_s19 + $0x78] sm:$0xff] %v2388_v60  }
 0x174 PF: > { %s14_s17 = sadd.s32 1, %s2612_s17   ;;  %s3791_s15 = smov %s2608_s16 }
 0x175   : > { %p11_p5 = scmp.ge.s32.totalorder %s14_s17, 4   ;;  %s3792_s16 = smov %s3794_s18 }
 0x177   :  { %13 = sbr.rel (!%p11_p5) target bundleno = 2 (0x2), region = 83 }

// kernel: _lambda_.24
= control target key start
LH: loop header
LB: loop body
LE: loop exit
PB: predicated region body
PF: predicated region fallthrough
CT: control target
= control target key end

     0   :  { %s1639_s1 = inlined_call_operand.vmem [shape: bf16[256,128], index: 1, kind: input, shape index: {}]   ;;  %s1640_s0 = inlined_call_operand.vmem [shape: bf16[128,256], index: 0, kind: input, shape index: {}]   ;;  %s1641_s2 = inlined_call_operand.vmem [shape: f32[1,128], index: 2, kind: input, shape index: {}]   ;;  %s1642_s3 = inlined_call_operand.vmem [shape: bf16[128,128], index: 3, kind: output, shape index: {}]  }
   0x1   :  { %v966_v0 = vld [vmem:[%s1639_s1 + $0x38] sm:$0xff]  ;;  %v965_v2 = vld [vmem:[%s1639_s1 + $0x30] sm:$0xff]  ;;  %v964_v4 = vld [vmem:[%s1639_s1 + $0x28] sm:$0xff] }
   0x2   :  { %v974_v1 = vld [vmem:[%s1639_s1 + $0x78] sm:$0xff]  ;;  %274 = vmatpush.bf16.msra.mxu0 %v966_v0  ;;  %1022 = vmatpush.bf16.msra.mxu2 %v966_v0  ;;  %v973_v3 = vld [vmem:[%s1639_s1 + $0x70] sm:$0xff]  ;;  %v972_v5 = vld [vmem:[%s1639_s1 + $0x68] sm:$0xff] }
   0x3   :  { %323 = vmatpush.bf16.msra.mxu1 %v974_v1  ;;  %1030 = vmatpush.bf16.msra.mxu3 %v974_v1  ;;  %v963_v6 = vld [vmem:[%s1639_s1 + $0x20] sm:$0xff]  ;;  %v962_v8 = vld [vmem:[%s1639_s1 + $0x18] sm:$0xff]  ;;  %v961_v10 = vld [vmem:[%s1639_s1 + $0x10] sm:$0xff] }
   0x4   :  { %v971_v7 = vld [vmem:[%s1639_s1 + $0x60] sm:$0xff]  ;;  %v970_v9 = vld [vmem:[%s1639_s1 + $0x58] sm:$0xff]  ;;  %v969_v11 = vld [vmem:[%s1639_s1 + $0x50] sm:$0xff] }
   0x5   :  { %v960_v12 = vld [vmem:[%s1639_s1 + $0x8] sm:$0xff]  ;;  %v959_v14 = vld [vmem:[%s1639_s1] sm:$0xff]  ;;  %v809_v28 = vld [vmem:[%s1640_s0 + $0x10] sm:$0xf] }
   0x6   :  { %275 = vmatpush.bf16.msra.mxu0 %v965_v2  ;;  %1023 = vmatpush.bf16.msra.mxu2 %v965_v2  ;;  %v968_v13 = vld [vmem:[%s1639_s1 + $0x48] sm:$0xff]  ;;  %v967_v15 = vld [vmem:[%s1639_s1 + $0x40] sm:$0xff]  ;;  %v946_v29 = vld [vmem:[%s1640_s0 + $0x14] sm:$0xf0] }
   0x7   :  { %324 = vmatpush.bf16.msra.mxu1 %v973_v3  ;;  %1031 = vmatpush.bf16.msra.mxu3 %v973_v3  ;;  %v801_v16 = vld [vmem:[%s1640_s0] sm:$0xf]  ;;  %v944_v17 = vld [vmem:[%s1640_s0 + $0x4] sm:$0xf0]  ;;  %v943_v20 = vld [vmem:[%s1640_s0 + $0x4] sm:$0xf]  ;;  %v810_v36 = vor.u32 %v946_v29, %v809_v28 }
   0x8   :  { %v833_v18 = vld [vmem:[%s1640_s0 + $0x40] sm:$0xf]  ;;  %v952_v19 = vld [vmem:[%s1640_s0 + $0x44] sm:$0xf0]  ;;  %v803_v21 = vld [vmem:[%s1640_s0 + $0x8] sm:$0xf0]  ;;  %v802_v24 = vor.u32 %v944_v17, %v801_v16 }
   0x9   :  { %v951_v22 = vld [vmem:[%s1640_s0 + $0x44] sm:$0xf]  ;;  %v835_v23 = vld [vmem:[%s1640_s0 + $0x48] sm:$0xf0]  ;;  %v834_v25 = vor.u32 %v952_v19, %v833_v18  ;;  %v806_v26 = vor.u32 %v943_v20, %v803_v21  ;;  %v841_v30 = vld [vmem:[%s1640_s0 + $0x50] sm:$0xf] }
   0xa   :  { %276 = vmatpush.bf16.msra.mxu0 %v964_v4  ;;  %1024 = vmatpush.bf16.msra.mxu2 %v964_v4  ;;  %v838_v27 = vor.u32 %v951_v22, %v835_v23  ;;  %v954_v31 = vld [vmem:[%s1640_s0 + $0x54] sm:$0xf0]  ;;  %v945_v32 = vld [vmem:[%s1640_s0 + $0x14] sm:$0xf]  ;;  %v811_v33 = vld [vmem:[%s1640_s0 + $0x18] sm:$0xf0] }
   0xb   :  { %325 = vmatpush.bf16.msra.mxu1 %v972_v5  ;;  %1032 = vmatpush.bf16.msra.mxu3 %v972_v5  ;;  %v953_v34 = vld [vmem:[%s1640_s0 + $0x54] sm:$0xf]  ;;  %v843_v35 = vld [vmem:[%s1640_s0 + $0x58] sm:$0xf0]  ;;  %v842_v37 = vor.u32 %v954_v31, %v841_v30  ;;  %v814_v38 = vor.u32 %v945_v32, %v811_v33  ;;  %v817_v40 = vld [vmem:[%s1640_s0 + $0x20] sm:$0xf] }
   0xc   :  { %v846_v39 = vor.u32 %v953_v34, %v843_v35  ;;  %v948_v41 = vld [vmem:[%s1640_s0 + $0x24] sm:$0xf0]  ;;  %v849_v42 = vld [vmem:[%s1640_s0 + $0x60] sm:$0xf]  ;;  %v947_v44 = vld [vmem:[%s1640_s0 + $0x24] sm:$0xf] }
   0xd   :  { %v956_v43 = vld [vmem:[%s1640_s0 + $0x64] sm:$0xf0]  ;;  %v819_v45 = vld [vmem:[%s1640_s0 + $0x28] sm:$0xf0]  ;;  %v955_v46 = vld [vmem:[%s1640_s0 + $0x64] sm:$0xf]  ;;  %v818_v48 = vor.u32 %v948_v41, %v817_v40 }
   0xe   :  { %277 = vmatpush.bf16.msra.mxu0 %v963_v6  ;;  %1025 = vmatpush.bf16.msra.mxu2 %v963_v6  ;;  %v851_v47 = vld [vmem:[%s1640_s0 + $0x68] sm:$0xf0]  ;;  %v850_v49 = vor.u32 %v956_v43, %v849_v42  ;;  %v822_v50 = vor.u32 %v947_v44, %v819_v45  ;;  %v825_v52 = vld [vmem:[%s1640_s0 + $0x30] sm:$0xf]  ;;  %v950_v53 = vld [vmem:[%s1640_s0 + $0x34] sm:$0xf0] }
   0xf   :  { %326 = vmatpush.bf16.msra.mxu1 %v971_v7  ;;  %1033 = vmatpush.bf16.msra.mxu3 %v971_v7  ;;  %v854_v51 = vor.u32 %v955_v46, %v851_v47  ;;  %v857_v54 = vld [vmem:[%s1640_s0 + $0x70] sm:$0xf]  ;;  %v958_v55 = vld [vmem:[%s1640_s0 + $0x74] sm:$0xf0]  ;;  %v949_v56 = vld [vmem:[%s1640_s0 + $0x34] sm:$0xf]  ;;  %v826_v60 = vor.u32 %v950_v53, %v825_v52 }
  0x10   :  { %v827_v57 = vld [vmem:[%s1640_s0 + $0x38] sm:$0xf0]  ;;  %v957_v58 = vld [vmem:[%s1640_s0 + $0x74] sm:$0xf]  ;;  %v858_v61 = vor.u32 %v958_v55, %v857_v54  ;;  %v1270_v1 = vld [vmem:[%s1641_s2] ss:$0 sm:$0xff] }
  0x11   :  { %v859_v59 = vld [vmem:[%s1640_s0 + $0x78] sm:$0xf0]  ;;  %v830_v62 = vor.u32 %v949_v56, %v827_v57 }
  0x12   :  { %278 = vmatpush.bf16.msra.mxu0 %v962_v8  ;;  %1026 = vmatpush.bf16.msra.mxu2 %v962_v8  ;;  %v862_v63 = vor.u32 %v957_v58, %v859_v59 }
  0x13   :  { %327 = vmatpush.bf16.msra.mxu1 %v970_v9  ;;  %1034 = vmatpush.bf16.msra.mxu3 %v970_v9 }
  0x16   :  { %279 = vmatpush.bf16.msra.mxu0 %v961_v10  ;;  %1027 = vmatpush.bf16.msra.mxu2 %v961_v10 }
  0x17   :  { %328 = vmatpush.bf16.msra.mxu1 %v969_v11  ;;  %1035 = vmatpush.bf16.msra.mxu3 %v969_v11 }
  0x1a   :  { %280 = vmatpush.bf16.msra.mxu0 %v960_v12  ;;  %1028 = vmatpush.bf16.msra.mxu2 %v960_v12 }
  0x1b   :  { %329 = vmatpush.bf16.msra.mxu1 %v968_v13  ;;  %1036 = vmatpush.bf16.msra.mxu3 %v968_v13 }
  0x1e   :  { %281 = vmatpush.bf16.msra.mxu0 %v959_v14  ;;  %1029 = vmatpush.bf16.msra.mxu2 %v959_v14 }
  0x1f   :  { %330 = vmatpush.bf16.msra.mxu1 %v967_v15  ;;  %1037 = vmatpush.bf16.msra.mxu3 %v967_v15 }
  0x21   :  { %282 = vmatmul.bf16.vlgmr.msra.gmra.mxu0 %v802_v24  ;;  %302 = vmatmul.bf16.vlgmr.msra.gmra.mxu2 %v834_v25 }
  0x22   :  { %331 = vmatmul.bf16.vlgmr.msra.gmra.mxu1 %v806_v26  ;;  %351 = vmatmul.bf16.vlgmr.msra.gmra.mxu3 %v838_v27 }
  0x31   :  { %287 = vmatmul.bf16.gmra.mxu0 %v810_v36  ;;  %307 = vmatmul.bf16.gmra.mxu2 %v842_v37 }
  0x32   :  { %336 = vmatmul.bf16.gmra.mxu1 %v814_v38  ;;  %356 = vmatmul.bf16.gmra.mxu3 %v846_v39 }
  0x41   :  { %292 = vmatmul.bf16.gmra.mxu0 %v818_v48  ;;  %312 = vmatmul.bf16.gmra.mxu2 %v850_v49 }
  0x42   :  { %341 = vmatmul.bf16.gmra.mxu1 %v822_v50  ;;  %361 = vmatmul.bf16.gmra.mxu3 %v854_v51 }
  0x51   :  { %297 = vmatmul.bf16.gmra.mxu0 %v826_v60  ;;  %317 = vmatmul.bf16.gmra.mxu2 %v858_v61 }
  0x52   :  { %346 = vmatmul.bf16.gmra.mxu1 %v830_v62  ;;  %366 = vmatmul.bf16.gmra.mxu3 %v862_v63 }
  0x9e   :  { %v283_v0 = vpop.f32.mrf.mxu0 }
  0x9f   :  { %v332_v2 = vpop.f32.mrf.mxu1 }
  0xa0   :  { %v333_v3 = vadd.f32 %v332_v2, %v283_v0 }
  0xa2   :  { %v1273_v4 = vadd.f32 %v1270_v1, %v333_v3 }
  0xa4   :  { %v927_v5 = vmul.f32 -1.442695, %v1273_v4  ;;  %v303_v6 = vpop.f32.mrf.mxu2 }
  0xa5   :  { %v352_v7 = vpop.f32.mrf.mxu3 }
  0xa6   :  { %1039 = vpow2.f32 %v927_v5  ;;  %v353_v8 = vadd.f32 %v352_v7, %v303_v6  ;;  %v285_v9 = vpop.f32.mrf.mxu0 }
  0xa7   :  { %v334_v10 = vpop.f32.mrf.mxu1 }
  0xa8   :  { %v1277_v11 = vadd.f32 %v1270_v1, %v353_v8  ;;  %v335_v12 = vadd.f32 %v334_v10, %v285_v9 }
  0xaa   :  { %v935_v13 = vmul.f32 -1.442695, %v1277_v11  ;;  %v1281_v14 = vadd.f32 %v1270_v1, %v335_v12 }
  0xac   :  { %v1040_v15 = vpop.eup %1039  ;;  %1041 = vpow2.f32 %v935_v13  ;;  %v928_v16 = vmul.f32 -1.442695, %v1281_v14  ;;  %v305_v17 = vpop.f32.mrf.mxu2 }
  0xad   :  { %v1284_v18 = vadd.f32 1.0, %v1040_v15  ;;  %v354_v19 = vpop.f32.mrf.mxu3 }
  0xae   :  { %1043 = vpow2.f32 %v928_v16  ;;  %v355_v20 = vadd.f32 %v354_v19, %v305_v17  ;;  %v288_v21 = vpop.f32.mrf.mxu0 }
  0xaf   :  { %1045 = vrcp.f32 %v1284_v18  ;;  %v337_v22 = vpop.f32.mrf.mxu1  ;;  %v516_v45 = vand.u32 2147483647, %v1284_v18  ;;  %vm512_vm0 = vweird.f32 %v1284_v18  ;;  %v518_v49 = vand.u32 2147483648, %v1284_v18 }
  0xb0   :  { %v1288_v23 = vadd.f32 %v1270_v1, %v355_v20  ;;  %v338_v24 = vadd.f32 %v337_v22, %v288_v21 }
  0xb1   :  { %vm1331_vm2 = vcmp.eq.f32.partialorder %v516_v45, 8.507059e+37  ;;  %v519_v3 = vor.u32 1.1754944e-38, %v518_v49 }
  0xb2   :  { %v1042_v25 = vpop.eup %1041  ;;  %v936_v26 = vmul.f32 -1.442695, %v1288_v23  ;;  %v1292_v27 = vadd.f32 %v1270_v1, %v338_v24 }
  0xb3   :  { %v1294_v28 = vadd.f32 1.0, %v1042_v25 }
  0xb4   :  { %v1044_v29 = vpop.eup %1043  ;;  %1047 = vpow2.f32 %v936_v26  ;;  %v929_v30 = vmul.f32 -1.442695, %v1292_v27  ;;  %v308_v31 = vpop.f32.mrf.mxu2 }
  0xb5   :  { %v1297_v32 = vpop.eup %1045  ;;  %1049 = vrcp.f32 %v1294_v28  ;;  %v357_v33 = vpop.f32.mrf.mxu3  ;;  %v1302_v35 = vadd.f32 1.0, %v1044_v29  ;;  %v636_v51 = vand.u32 2147483647, %v1294_v28  ;;  %v638_v53 = vand.u32 2147483648, %v1294_v28 }
  0xb6   :  { %v508_v34 = vmul.f32 %v1297_v32, %v1284_v18  ;;  %1051 = vpow2.f32 %v929_v30  ;;  %v290_v36 = vpop.f32.mrf.mxu0  ;;  %v358_v37 = vadd.f32 %v357_v33, %v308_v31  ;;  %vm513_vm1 = vweird.f32 %v1297_v32 }
  0xb7   :  { %v339_v38 = vpop.f32.mrf.mxu1  ;;  %1053 = vrcp.f32 %v1302_v35  ;;  %v531_v54 = vand.u32 2147483647, %v1302_v35  ;;  %v533_v55 = vand.u32 2147483648, %v1302_v35  ;;  %vm632_vm3 = vweird.f32 %v1294_v28  ;;  %vm1346_vm6 = vmor %vm512_vm0, %vm513_vm1 }
  0xb8   :  { %v509_v39 = vsub.f32 1.0, %v508_v34  ;;  %v1306_v40 = vadd.f32 %v1270_v1, %v358_v37  ;;  %v340_v42 = vadd.f32 %v339_v38, %v290_v36  ;;  %v639_v6 = vor.u32 1.1754944e-38, %v638_v53 }
  0xb9   :  { %vm527_vm4 = vweird.f32 %v1302_v35  ;;  %vm1340_vm5 = vcmp.eq.f32.partialorder %v531_v54, 8.507059e+37  ;;  %vm1351_vm8 = vcmp.eq.f32.partialorder %v636_v51, 8.507059e+37  ;;  %v534_v12 = vor.u32 1.1754944e-38, %v533_v55 }
  0xba   :  { %v1048_v41 = vpop.eup %1047  ;;  %v510_v44 = vmul.f32 %v1297_v32, %v509_v39  ;;  %v937_v47 = vmul.f32 -1.442695, %v1306_v40  ;;  %v1327_v60 = vadd.f32 %v1270_v1, %v340_v42 }
  0xbb   :  { %v1308_v43 = vpop.eup %1049  ;;  %v1312_v46 = vadd.f32 1.0, %v1048_v41 }
  0xbc   :  { %v1052_v48 = vpop.eup %1051  ;;  %v628_v50 = vmul.f32 %v1308_v43, %v1294_v28  ;;  %v310_v52 = vpop.f32.mrf.mxu2  ;;  %v511_v62 = vadd.f32 %v1297_v32, %v510_v44  ;;  %vm633_vm7 = vweird.f32 %v1308_v43  ;;  %v930_v13 = vmul.f32 -1.442695, %v1327_v60 }
  0xbd   :  { %1055 = vrcp.f32 %v1312_v46  ;;  %v359_v56 = vpop.f32.mrf.mxu3  ;;  %v1054_v57 = vpop.eup %1053  ;;  %v1324_v59 = vadd.f32 1.0, %v1052_v48  ;;  %vm647_vm10 = vweird.f32 %v1312_v46  ;;  %v651_v26 = vand.u32 2147483647, %v1312_v46  ;;  %vm1380_vm12 = vmor %vm632_vm3, %vm633_vm7 }
  0xbe   :  { %v629_v58 = vsub.f32 1.0, %v628_v50  ;;  %1057 = vpow2.f32 %v937_v47  ;;  %v293_v61 = vpop.f32.mrf.mxu0  ;;  %v523_v0 = vmul.f32 %v1054_v57, %v1302_v35  ;;  %v360_v15 = vadd.f32 %v359_v56, %v310_v52 }
  0xbf   :  { %v342_v2 = vpop.f32.mrf.mxu1  ;;  %1059 = vrcp.f32 %v1324_v59  ;;  %v515_v17 = vsel %vm1346_vm6, %v1297_v32, %v511_v62  ;;  %vm528_vm9 = vweird.f32 %v1054_v57  ;;  %v653_v36 = vand.u32 2147483648, %v1312_v46 }
  0xc0   :  { %v630_v5 = vmul.f32 %v1308_v43, %v629_v58  ;;  %v524_v7 = vsub.f32 1.0, %v523_v0  ;;  %v343_v19 = vadd.f32 %v342_v2, %v293_v61  ;;  %1061 = vpow2.f32 %v930_v13  ;;  %vm529_vm11 = vmor %vm527_vm4, %vm528_vm9 }
  0xc1   :  { %v1366_v30 = vadd.f32 %v1270_v1, %v360_v15  ;;  %v520_v33 = vsel %vm1331_vm2, %v519_v3, %v515_v17  ;;  %vm652_vm14 = vcmp.eq.f32.partialorder %v651_v26, 8.507059e+37  ;;  %v654_v54 = vor.u32 1.1754944e-38, %v653_v36 }
  0xc2   :  { %v525_v18 = vmul.f32 %v1054_v57, %v524_v7  ;;  %v631_v21 = vadd.f32 %v1308_v43, %v630_v5  ;;  %v1388_v35 = vadd.f32 %v1270_v1, %v343_v19  ;;  %v747_v48 = vmul.f32 %v520_v33, %v1273_v4 }
  0xc3   :  { %v1056_v16 = vpop.eup %1055  ;;  %v938_v51 = vmul.f32 -1.442695, %v1366_v30  ;;  %v546_v0 = vand.u32 2147483647, %v1324_v59  ;;  %v548_v5 = vand.u32 2147483648, %v1324_v59  ;;  %vm542_vm0 = vweird.f32 %v1324_v59 }
  0xc4   :  { %v1058_v20 = vpop.eup %1057  ;;  %v643_v22 = vmul.f32 %v1056_v16, %v1312_v46  ;;  %v313_v24 = vpop.f32.mrf.mxu2  ;;  %v526_v25 = vadd.f32 %v1054_v57, %v525_v18  ;;  %v635_v42 = vsel %vm1380_vm12, %v1308_v43, %v631_v21  ;;  %vm648_vm13 = vweird.f32 %v1056_v16 }
  0xc5   :  { %v1363_v29 = vadd.f32 1.0, %v1058_v20  ;;  %v362_v31 = vpop.f32.mrf.mxu3  ;;  %v1368_v32 = vpop.eup %1059  ;;  %v640_v55 = vsel %vm1351_vm8, %v639_v6, %v635_v42  ;;  %vm649_vm15 = vmor %vm647_vm10, %vm648_vm13  ;;  %vm1433_vm2 = vcmp.eq.f32.partialorder %v546_v0, 8.507059e+37 }
  0xc6   :  { %v644_v34 = vsub.f32 1.0, %v643_v22  ;;  %v363_v37 = vadd.f32 %v362_v31, %v313_v24  ;;  %v530_v39 = vsel %vm529_vm11, %v1054_v57, %v526_v25  ;;  %v538_v41 = vmul.f32 %v1368_v32, %v1324_v59  ;;  %v295_v45 = vpop.f32.mrf.mxu0  ;;  %v1062_v52 = vpop.eup %1061 }
  0xc7   :  { %1063 = vrcp.f32 %v1363_v29  ;;  %v535_v28 = vsel %vm1340_vm5, %v534_v12, %v530_v39  ;;  %v344_v47 = vpop.f32.mrf.mxu1  ;;  %v1406_v4 = vadd.f32 1.0, %v1062_v52  ;;  %v755_v2 = vmul.f32 %v640_v55, %v1277_v11 }
  0xc8   :  { %v645_v44 = vmul.f32 %v1056_v16, %v644_v34  ;;  %v748_v49 = vmul.f32 %v535_v28, %v1281_v14  ;;  %v539_v50 = vsub.f32 1.0, %v538_v41  ;;  %v1399_v43 = vadd.f32 %v1270_v1, %v363_v37 }
  0xc9   :  { %v931_v14 = vmul.f32 -1.442695, %v1388_v35  ;;  %1065 = vpow2.f32 %v938_v51  ;;  %v345_v61 = vadd.f32 %v344_v47, %v295_v45  ;;  %vm543_vm1 = vweird.f32 %v1368_v32 }
  0xca   :  { %v646_v53 = vadd.f32 %v1056_v16, %v645_v44  ;;  %v978_v56 = vpack.c.bf16 %v748_v49, %v747_v48  ;;  %v540_v58 = vmul.f32 %v1368_v32, %v539_v50  ;;  %1067 = vrcp.f32 %v1406_v4  ;;  %vm1440_vm3 = vmor %vm542_vm0, %vm543_vm1 }
  0xcb   :  { %v939_v46 = vmul.f32 -1.442695, %v1399_v43  ;;  %1069 = vpow2.f32 %v931_v14  ;;  %v1425_v7 = vadd.f32 %v1270_v1, %v345_v61  ;;  %v666_v24 = vand.u32 2147483647, %v1363_v29 }
  0xcc   :  { %v650_v57 = vsel %vm649_vm15, %v1056_v16, %v646_v53  ;;  %979 = vst [vmem:[%s1642_s3] sm:$0xff] %v978_v56   ;;  %v315_v8 = vpop.f32.mrf.mxu2  ;;  %v541_v12 = vadd.f32 %v1368_v32, %v540_v58  ;;  %v549_v16 = vor.u32 1.1754944e-38, %v548_v5  ;;  %v668_v25 = vand.u32 2147483648, %v1363_v29 }
  0xcd   :  { %v1410_v62 = vpop.eup %1063  ;;  %v655_v63 = vsel %vm652_vm14, %v654_v54, %v650_v57  ;;  %v364_v9 = vpop.f32.mrf.mxu3  ;;  %1071 = vpow2.f32 %v939_v46  ;;  %vm662_vm4 = vweird.f32 %v1363_v29  ;;  %v561_v39 = vand.u32 2147483647, %v1406_v4 }
  0xce   :  { %v756_v3 = vmul.f32 %v655_v63, %v1288_v23  ;;  %v658_v6 = vmul.f32 %v1410_v62, %v1363_v29  ;;  %v932_v23 = vmul.f32 -1.442695, %v1425_v7  ;;  %v365_v18 = vadd.f32 %v364_v9, %v315_v8  ;;  %v298_v19 = vpop.f32.mrf.mxu0 }
  0xcf   :  { %v1066_v13 = vpop.eup %1065  ;;  %v347_v20 = vpop.f32.mrf.mxu1  ;;  %v545_v31 = vsel %vm1440_vm3, %v1368_v32, %v541_v12  ;;  %vm663_vm5 = vweird.f32 %v1410_v62  ;;  %vm1465_vm6 = vcmp.eq.f32.partialorder %v666_v24, 8.507059e+37  ;;  %v669_v45 = vor.u32 1.1754944e-38, %v668_v25 }
  0xd0   :  { %v998_v10 = vpack.c.bf16 %v756_v3, %v755_v2  ;;  %v659_v11 = vsub.f32 1.0, %v658_v6  ;;  %v1068_v21 = vpop.eup %1067  ;;  %v1446_v26 = vadd.f32 1.0, %v1066_v13  ;;  %1073 = vpow2.f32 %v932_v23  ;;  %vm1472_vm7 = vmor %vm662_vm4, %vm663_vm5 }
  0xd1   :  { %v553_v33 = vmul.f32 %v1068_v21, %v1406_v4  ;;  %v1454_v59 = vadd.f32 %v1270_v1, %v365_v18  ;;  %v1070_v34 = vpop.eup %1069  ;;  %v348_v37 = vadd.f32 %v347_v20, %v298_v19  ;;  %v550_v28 = vsel %vm1433_vm2, %v549_v16, %v545_v31 }
  0xd2   :  { %1018 = vst [vmem:[%s1642_s3 + $0x20] sm:$0xff] %v998_v10   ;;  %v660_v17 = vmul.f32 %v1410_v62, %v659_v11  ;;  %1075 = vrcp.f32 %v1446_v26  ;;  %v1460_v41 = vadd.f32 1.0, %v1070_v34  ;;  %v563_v47 = vand.u32 2147483648, %v1406_v4 }
  0xd3   :  { %v554_v38 = vsub.f32 1.0, %v553_v33  ;;  %v940_v32 = vmul.f32 -1.442695, %v1454_v59  ;;  %v1072_v42 = vpop.eup %1071  ;;  %vm557_vm8 = vweird.f32 %v1406_v4  ;;  %vm558_vm9 = vweird.f32 %v1068_v21 }
  0xd4   :  { %v661_v36 = vadd.f32 %v1410_v62, %v660_v17  ;;  %1077 = vrcp.f32 %v1460_v41  ;;  %v1481_v52 = vadd.f32 1.0, %v1072_v42  ;;  %v1484_v29 = vadd.f32 %v1270_v1, %v348_v37  ;;  %vm559_vm11 = vmor %vm557_vm8, %vm558_vm9  ;;  %v318_v58 = vpop.f32.mrf.mxu2 }
  0xd5   :  { %v555_v49 = vmul.f32 %v1068_v21, %v554_v38  ;;  %1079 = vpow2.f32 %v940_v32  ;;  %v749_v53 = vmul.f32 %v550_v28, %v1292_v27  ;;  %vm562_vm10 = vcmp.eq.f32.partialorder %v561_v39, 8.507059e+37  ;;  %v367_v61 = vpop.f32.mrf.mxu3 }
  0xd6   :  { %v1074_v50 = vpop.eup %1073  ;;  %v665_v51 = vsel %vm1472_vm7, %v1410_v62, %v661_v36  ;;  %v564_v4 = vor.u32 1.1754944e-38, %v563_v47  ;;  %v681_v14 = vand.u32 2147483647, %v1446_v26  ;;  %v683_v57 = vand.u32 2147483648, %v1446_v26  ;;  %v300_v38 = vpop.f32.mrf.mxu0 }
  0xd7   :  { %v556_v54 = vadd.f32 %v1068_v21, %v555_v49  ;;  %v1487_v55 = vadd.f32 1.0, %v1074_v50  ;;  %1081 = vrcp.f32 %v1481_v52  ;;  %v670_v62 = vsel %vm1465_vm6, %v669_v45, %v665_v51  ;;  %v349_v39 = vpop.f32.mrf.mxu1 }
  0xd8   :  { %v1076_v56 = vpop.eup %1075  ;;  %vm677_vm12 = vweird.f32 %v1446_v26  ;;  %v578_v46 = vand.u32 2147483648, %v1460_v41  ;;  %v933_v2 = vmul.f32 -1.442695, %v1484_v29  ;;  %v576_v8 = vand.u32 2147483647, %v1460_v41 }
  0xd9   :  { %v560_v63 = vsel %vm559_vm11, %v1068_v21, %v556_v54  ;;  %v673_v27 = vmul.f32 %v1076_v56, %v1446_v26  ;;  %1083 = vrcp.f32 %v1487_v55  ;;  %v368_v9 = vadd.f32 %v367_v61, %v318_v58 }
  0xda   :  { %v565_v0 = vsel %vm562_vm10, %v564_v4, %v560_v63  ;;  %v1499_v3 = vpop.eup %1077  ;;  %v757_v12 = vmul.f32 %v670_v62, %v1306_v40  ;;  %vm1504_vm13 = vcmp.eq.f32.partialorder %v681_v14, 8.507059e+37  ;;  %v684_v23 = vor.u32 1.1754944e-38, %v683_v57 }
  0xdb   :  { %v750_v5 = vmul.f32 %v565_v0, %v1327_v60  ;;  %v674_v6 = vsub.f32 1.0, %v673_v27  ;;  %v1080_v10 = vpop.eup %1079  ;;  %v568_v13 = vmul.f32 %v1499_v3, %v1460_v41  ;;  %vm678_vm14 = vweird.f32 %v1076_v56 }
  0xdc   :  { %v1510_v17 = vadd.f32 1.0, %v1080_v10  ;;  %vm572_vm15 = vweird.f32 %v1460_v41  ;;  %v579_v19 = vor.u32 1.1754944e-38, %v578_v46  ;;  %1085 = vpow2.f32 %v933_v2  ;;  %vm679_vm1 = vmor %vm677_vm12, %vm678_vm14  ;;  %v320_v49 = vpop.f32.mrf.mxu2 }
  0xdd   :  { %v983_v15 = vpack.c.bf16 %v750_v5, %v749_v53  ;;  %v675_v16 = vmul.f32 %v1076_v56, %v674_v6  ;;  %v1512_v60 = vpop.eup %1081  ;;  %v569_v18 = vsub.f32 1.0, %v568_v13  ;;  %vm1518_vm0 = vcmp.eq.f32.partialorder %v576_v8, 8.507059e+37  ;;  %v369_v50 = vpop.f32.mrf.mxu3 }
  0xde   :  { %v688_v21 = vmul.f32 %v1512_v60, %v1481_v52  ;;  %1087 = vrcp.f32 %v1510_v17  ;;  %v1526_v22 = vadd.f32 %v1270_v1, %v368_v9  ;;  %vm692_vm2 = vweird.f32 %v1481_v52 }
  0xdf   :  { %1015 = vst [vmem:[%s1642_s3 + $0x8] sm:$0xff] %v983_v15   ;;  %v676_v40 = vadd.f32 %v1076_v56, %v675_v16  ;;  %v1084_v24 = vpop.eup %1083  ;;  %v570_v25 = vmul.f32 %v1499_v3, %v569_v18  ;;  %v696_v31 = vand.u32 2147483647, %v1481_v52  ;;  %v698_v33 = vand.u32 2147483648, %v1481_v52 }
  0xe0   :  { %vm573_vm3 = vweird.f32 %v1499_v3  ;;  %v689_v36 = vsub.f32 1.0, %v688_v21  ;;  %v583_v37 = vmul.f32 %v1084_v24, %v1487_v55  ;;  %v591_v42 = vand.u32 2147483647, %v1487_v55 }
  0xe1   :  { %v680_v34 = vsel %vm679_vm1, %v1076_v56, %v676_v40  ;;  %v571_v32 = vadd.f32 %v1499_v3, %v570_v25  ;;  %v593_v28 = vand.u32 2147483648, %v1487_v55  ;;  %v941_v48 = vmul.f32 -1.442695, %v1526_v22  ;;  %vm1548_vm4 = vmor %vm572_vm15, %vm573_vm3 }
  0xe2   :  { %v685_v26 = vsel %vm1504_vm13, %v684_v23, %v680_v34  ;;  %v690_v45 = vmul.f32 %v1512_v60, %v689_v36  ;;  %v584_v47 = vsub.f32 1.0, %v583_v37  ;;  %v1086_v51 = vpop.eup %1085  ;;  %vm693_vm5 = vweird.f32 %v1512_v60 }
  0xe3   :  { %v758_v44 = vmul.f32 %v685_v26, %v1366_v30  ;;  %vm587_vm6 = vweird.f32 %v1487_v55  ;;  %vm588_vm7 = vweird.f32 %v1084_v24  ;;  %v350_v30 = vadd.f32 %v349_v39, %v300_v38  ;;  %vm1570_vm9 = vmor %vm692_vm2, %vm693_vm5 }
  0xe4   :  { %v1088_v54 = vpop.eup %1087  ;;  %v575_v4 = vsel %vm1548_vm4, %v1499_v3, %v571_v32  ;;  %v691_v14 = vadd.f32 %v1512_v60, %v690_v45  ;;  %v585_v57 = vmul.f32 %v1084_v24, %v584_v47  ;;  %vm1558_vm8 = vcmp.eq.f32.partialorder %v591_v42, 8.507059e+37  ;;  %vm589_vm10 = vmor %vm587_vm6, %vm588_vm7 }
  0xe5   :  { %v1003_v56 = vpack.c.bf16 %v758_v44, %v757_v12  ;;  %v703_v58 = vmul.f32 %v1088_v54, %v1510_v17  ;;  %v1563_v61 = vadd.f32 1.0, %v1086_v51  ;;  %v370_v62 = vadd.f32 %v369_v50, %v320_v49 }
  0xe6   :  { %v586_v27 = vadd.f32 %v1084_v24, %v585_v57  ;;  %v594_v0 = vor.u32 1.1754944e-38, %v593_v28  ;;  %1089 = vpow2.f32 %v941_v48  ;;  %v1575_v46 = vadd.f32 %v1270_v1, %v350_v30 }
  0xe7   :  { %1019 = vst [vmem:[%s1642_s3 + $0x28] sm:$0xff] %v1003_v56   ;;  %v580_v2 = vsel %vm1518_vm0, %v579_v19, %v575_v4  ;;  %v704_v3 = vsub.f32 1.0, %v703_v58  ;;  %v711_v52 = vand.u32 2147483647, %v1510_v17  ;;  %1091 = vrcp.f32 %v1563_v61 }
  0xe8   :  { %v695_v5 = vsel %vm1570_vm9, %v1512_v60, %v691_v14  ;;  %v590_v6 = vsel %vm589_vm10, %v1084_v24, %v586_v27  ;;  %vm708_vm11 = vweird.f32 %v1088_v54  ;;  %v713_v8 = vand.u32 2147483648, %v1510_v17 }
  0xe9   :  { %v595_v9 = vsel %vm1558_vm8, %v594_v0, %v590_v6  ;;  %v705_v10 = vmul.f32 %v1088_v54, %v704_v3  ;;  %v934_v55 = vmul.f32 -1.442695, %v1575_v46  ;;  %v1592_v12 = vadd.f32 %v1270_v1, %v370_v62 }
  0xea   :  { %v751_v11 = vmul.f32 %v580_v2, %v1388_v35  ;;  %vm697_vm12 = vcmp.eq.f32.partialorder %v696_v31, 8.507059e+37  ;;  %v699_v23 = vor.u32 1.1754944e-38, %v698_v33  ;;  %v752_v13 = vmul.f32 %v595_v9, %v1425_v7 }
  0xeb   :  { %v706_v15 = vadd.f32 %v1088_v54, %v705_v10  ;;  %vm707_vm13 = vweird.f32 %v1510_v17  ;;  %1093 = vpow2.f32 %v934_v55  ;;  %v942_v16 = vmul.f32 -1.442695, %v1592_v12 }
  0xec   :  { %v1090_v60 = vpop.eup %1089  ;;  %v700_v18 = vsel %vm697_vm12, %v699_v23, %v695_v5  ;;  %v988_v19 = vpack.c.bf16 %v752_v13, %v751_v11  ;;  %vm709_vm14 = vmor %vm707_vm13, %vm708_vm11  ;;  %v714_v40 = vor.u32 1.1754944e-38, %v713_v8  ;;  %vm712_vm15 = vcmp.eq.f32.partialorder %v711_v52, 8.507059e+37 }
  0xed   :  { %v1092_v1 = vpop.eup %1091  ;;  %v710_v20 = vsel %vm709_vm14, %v1088_v54, %v706_v15  ;;  %v505_v35 = vadd.f32 1.0, %v1090_v60  ;;  %1095 = vpow2.f32 %v942_v16  ;;  %v759_v21 = vmul.f32 %v700_v18, %v1399_v43 }
  0xee   :  { %1016 = vst [vmem:[%s1642_s3 + $0x10] sm:$0xff] %v988_v19   ;;  %v715_v7 = vsel %vm712_vm15, %v714_v40, %v710_v20  ;;  %v598_v17 = vmul.f32 %v1092_v1, %v1563_v61  ;;  %v606_v43 = vand.u32 2147483647, %v1563_v61  ;;  %vm602_vm0 = vweird.f32 %v1563_v61 }
  0xef   :  { %v760_v24 = vmul.f32 %v715_v7, %v1454_v59  ;;  %1097 = vrcp.f32 %v505_v35  ;;  %v608_v59 = vand.u32 2147483648, %v1563_v61  ;;  %vm603_vm1 = vweird.f32 %v1092_v1 }
  0xf0   :  { %v599_v33 = vsub.f32 1.0, %v598_v17  ;;  %vm1611_vm2 = vmor %vm602_vm0, %vm603_vm1  ;;  %vm1615_vm3 = vcmp.eq.f32.partialorder %v606_v43, 8.507059e+37  ;;  %v728_v4 = vand.u32 2147483648, %v505_v35  ;;  %vm722_vm6 = vweird.f32 %v505_v35 }
  0xf1   :  { %v1094_v25 = vpop.eup %1093  ;;  %v1008_v31 = vpack.c.bf16 %v760_v24, %v759_v21  ;;  %v609_v50 = vor.u32 1.1754944e-38, %v608_v59  ;;  %v726_v41 = vand.u32 2147483647, %v505_v35 }
  0xf2   :  { %v498_v34 = vadd.f32 1.0, %v1094_v25  ;;  %v600_v39 = vmul.f32 %v1092_v1, %v599_v33  ;;  %v729_v5 = vor.u32 1.1754944e-38, %v728_v4 }
  0xf3   :  { %v1096_v36 = vpop.eup %1095  ;;  %1020 = vst [vmem:[%s1642_s3 + $0x30] sm:$0xff] %v1008_v31   ;;  %vm727_vm12 = vcmp.eq.f32.partialorder %v726_v41, 8.507059e+37 }
  0xf4   :  { %1099 = vrcp.f32 %v498_v34  ;;  %v506_v38 = vadd.f32 1.0, %v1096_v36  ;;  %v601_v28 = vadd.f32 %v1092_v1, %v600_v39  ;;  %v623_v53 = vand.u32 2147483648, %v498_v34 }
  0xf5   :  { %v1098_v37 = vpop.eup %1097  ;;  %v621_v57 = vand.u32 2147483647, %v498_v34  ;;  %vm617_vm7 = vweird.f32 %v498_v34 }
  0xf6   :  { %v718_v26 = vmul.f32 %v1098_v37, %v505_v35  ;;  %1101 = vrcp.f32 %v506_v38  ;;  %v605_v30 = vsel %vm1611_vm2, %v1092_v1, %v601_v28  ;;  %vm723_vm4 = vweird.f32 %v1098_v37 }
  0xf7   :  { %v610_v61 = vsel %vm1615_vm3, %v609_v50, %v605_v30  ;;  %vm1623_vm8 = vmor %vm722_vm6, %vm723_vm4  ;;  %v624_v27 = vor.u32 1.1754944e-38, %v623_v53  ;;  %v743_v0 = vand.u32 2147483648, %v506_v38  ;;  %v741_v52 = vand.u32 2147483647, %v506_v38 }
  0xf8   :  { %v719_v32 = vsub.f32 1.0, %v718_v26  ;;  %vm622_vm11 = vcmp.eq.f32.partialorder %v621_v57, 8.507059e+37  ;;  %vm737_vm13 = vweird.f32 %v506_v38  ;;  %v753_v10 = vmul.f32 %v610_v61, %v1484_v29 }
  0xf9   :  { %v744_v23 = vor.u32 1.1754944e-38, %v743_v0  ;;  %vm742_vm15 = vcmp.eq.f32.partialorder %v741_v52, 8.507059e+37 }
  0xfa   :  { %v1100_v42 = vpop.eup %1099  ;;  %v720_v44 = vmul.f32 %v1098_v37, %v719_v32 }
  0xfb   :  { %v613_v45 = vmul.f32 %v1100_v42, %v498_v34  ;;  %vm618_vm5 = vweird.f32 %v1100_v42 }
  0xfc   :  { %v1102_v47 = vpop.eup %1101  ;;  %v721_v54 = vadd.f32 %v1098_v37, %v720_v44  ;;  %vm619_vm9 = vmor %vm617_vm7, %vm618_vm5 }
  0xfd   :  { %v614_v51 = vsub.f32 1.0, %v613_v45  ;;  %v733_v56 = vmul.f32 %v1102_v47, %v506_v38  ;;  %vm738_vm10 = vweird.f32 %v1102_v47 }
  0xfe   :  { %v725_v2 = vsel %vm1623_vm8, %v1098_v37, %v721_v54  ;;  %vm739_vm14 = vmor %vm737_vm13, %vm738_vm10 }
  0xff   :  { %v615_v14 = vmul.f32 %v1100_v42, %v614_v51  ;;  %v734_v58 = vsub.f32 1.0, %v733_v56  ;;  %v730_v55 = vsel %vm727_vm12, %v729_v5, %v725_v2 }
 0x100   :  { %v761_v60 = vmul.f32 %v730_v55, %v1526_v22 }
 0x101   :  { %v616_v63 = vadd.f32 %v1100_v42, %v615_v14  ;;  %v735_v3 = vmul.f32 %v1102_v47, %v734_v58 }
 0x103   :  { %v620_v6 = vsel %vm619_vm9, %v1100_v42, %v616_v63  ;;  %v736_v9 = vadd.f32 %v1102_v47, %v735_v3 }
 0x104   :  { %v625_v8 = vsel %vm622_vm11, %v624_v27, %v620_v6 }
 0x105   :  { %v754_v11 = vmul.f32 %v625_v8, %v1575_v46  ;;  %v740_v13 = vsel %vm739_vm14, %v1102_v47, %v736_v9 }
 0x106   :  { %v745_v16 = vsel %vm742_vm15, %v744_v23, %v740_v13 }
 0x107   :  { %v993_v15 = vpack.c.bf16 %v754_v11, %v753_v10  ;;  %v762_v18 = vmul.f32 %v745_v16, %v1592_v12 }
 0x109   :  { %1017 = vst [vmem:[%s1642_s3 + $0x18] sm:$0xff] %v993_v15   ;;  %v1013_v19 = vpack.c.bf16 %v762_v18, %v761_v60 }
 0x10b   :  { %1021 = vst [vmem:[%s1642_s3 + $0x38] sm:$0xff] %v1013_v19  }

// kernel: _lambda_.25
= control target key start
LH: loop header
LB: loop body
LE: loop exit
PB: predicated region body
PF: predicated region fallthrough
CT: control target
= control target key end

     0   :  { %s581_s1 = inlined_call_operand.vmem [shape: bf16[128,128], index: 1, kind: input, shape index: {}]   ;;  %s582_s2 = inlined_call_operand.vmem [shape: f32[1,128], index: 2, kind: input, shape index: {}]   ;;  %s583_s0 = inlined_call_operand.vmem [shape: bf16[128,128], index: 0, kind: input, shape index: {}]   ;;  %s584_s3 = inlined_call_operand.vmem [shape: bf16[128,128], index: 3, kind: output, shape index: {}]  }
   0x1   :  { %v413_v0 = vld [vmem:[%s581_s1 + $0x38] sm:$0xff]  ;;  %v412_v1 = vld [vmem:[%s581_s1 + $0x30] sm:$0xff]  ;;  %v411_v2 = vld [vmem:[%s581_s1 + $0x28] sm:$0xff] }
   0x2   :  { %178 = vmatpush.bf16.msra.mxu0 %v413_v0  ;;  %461 = vmatpush.bf16.msra.mxu1 %v413_v0  ;;  %v410_v3 = vld [vmem:[%s581_s1 + $0x20] sm:$0xff]  ;;  %v409_v4 = vld [vmem:[%s581_s1 + $0x18] sm:$0xff]  ;;  %v408_v5 = vld [vmem:[%s581_s1 + $0x10] sm:$0xff] }
   0x3   :  { %462 = vmatpush.bf16.msra.mxu2 %v413_v0  ;;  %463 = vmatpush.bf16.msra.mxu3 %v413_v0  ;;  %v407_v6 = vld [vmem:[%s581_s1 + $0x8] sm:$0xff]  ;;  %v406_v7 = vld [vmem:[%s581_s1] sm:$0xff]  ;;  %v400_v9 = vld [vmem:[%s583_s0 + $0x10] sm:$0xff] }
   0x4   :  { %v398_v8 = vld [vmem:[%s583_s0] sm:$0xff]  ;;  %v404_v11 = vld [vmem:[%s583_s0 + $0x30] sm:$0xff]  ;;  %v399_v12 = vld [vmem:[%s583_s0 + $0x8] sm:$0xff] }
   0x5   :  { %v402_v10 = vld [vmem:[%s583_s0 + $0x20] sm:$0xff]  ;;  %v401_v13 = vld [vmem:[%s583_s0 + $0x18] sm:$0xff]  ;;  %v403_v14 = vld [vmem:[%s583_s0 + $0x28] sm:$0xff] }
   0x6   :  { %179 = vmatpush.bf16.msra.mxu0 %v412_v1  ;;  %464 = vmatpush.bf16.msra.mxu1 %v412_v1  ;;  %v405_v15 = vld [vmem:[%s583_s0 + $0x38] sm:$0xff]  ;;  %v485_v18 = vld [vmem:[%s582_s2] ss:$0 sm:$0xff] }
   0x7   :  { %465 = vmatpush.bf16.msra.mxu2 %v412_v1  ;;  %466 = vmatpush.bf16.msra.mxu3 %v412_v1 }
   0xa   :  { %180 = vmatpush.bf16.msra.mxu0 %v411_v2  ;;  %467 = vmatpush.bf16.msra.mxu1 %v411_v2 }
   0xb   :  { %468 = vmatpush.bf16.msra.mxu2 %v411_v2  ;;  %469 = vmatpush.bf16.msra.mxu3 %v411_v2 }
   0xe   :  { %181 = vmatpush.bf16.msra.mxu0 %v410_v3  ;;  %470 = vmatpush.bf16.msra.mxu1 %v410_v3 }
   0xf   :  { %471 = vmatpush.bf16.msra.mxu2 %v410_v3  ;;  %472 = vmatpush.bf16.msra.mxu3 %v410_v3 }
  0x12   :  { %182 = vmatpush.bf16.msra.mxu0 %v409_v4  ;;  %473 = vmatpush.bf16.msra.mxu1 %v409_v4 }
  0x13   :  { %474 = vmatpush.bf16.msra.mxu2 %v409_v4  ;;  %475 = vmatpush.bf16.msra.mxu3 %v409_v4 }
  0x16   :  { %183 = vmatpush.bf16.msra.mxu0 %v408_v5  ;;  %476 = vmatpush.bf16.msra.mxu1 %v408_v5 }
  0x17   :  { %477 = vmatpush.bf16.msra.mxu2 %v408_v5  ;;  %478 = vmatpush.bf16.msra.mxu3 %v408_v5 }
  0x1a   :  { %184 = vmatpush.bf16.msra.mxu0 %v407_v6  ;;  %479 = vmatpush.bf16.msra.mxu1 %v407_v6 }
  0x1b   :  { %480 = vmatpush.bf16.msra.mxu2 %v407_v6  ;;  %481 = vmatpush.bf16.msra.mxu3 %v407_v6 }
  0x1e   :  { %185 = vmatpush.bf16.msra.mxu0 %v406_v7  ;;  %482 = vmatpush.bf16.msra.mxu1 %v406_v7 }
  0x1f   :  { %483 = vmatpush.bf16.msra.mxu2 %v406_v7  ;;  %484 = vmatpush.bf16.msra.mxu3 %v406_v7 }
  0x21   :  { %186 = vmatmul.bf16.vlgmr.msra.gmra.mxu0 %v398_v8  ;;  %196 = vmatmul.bf16.vlgmr.msra.gmra.mxu1 %v400_v9 }
  0x22   :  { %206 = vmatmul.bf16.vlgmr.msra.gmra.mxu2 %v402_v10  ;;  %216 = vmatmul.bf16.vlgmr.msra.gmra.mxu3 %v404_v11 }
  0x31   :  { %191 = vmatmul.bf16.gmra.mxu0 %v399_v12  ;;  %201 = vmatmul.bf16.gmra.mxu1 %v401_v13 }
  0x32   :  { %211 = vmatmul.bf16.gmra.mxu2 %v403_v14  ;;  %221 = vmatmul.bf16.gmra.mxu3 %v405_v15 }
  0x9e   :  { %v187_v16 = vpop.f32.mrf.mxu0  ;;  %v197_v17 = vpop.f32.mrf.mxu1 }
  0x9f   :  { %v282_v23 = vadd.f32 %v485_v18, %v187_v16  ;;  %v286_v24 = vadd.f32 %v485_v18, %v197_v17 }
  0xa5   :  { %v207_v19 = vpop.f32.mrf.mxu2  ;;  %v217_v20 = vpop.f32.mrf.mxu3 }
  0xa6   :  { %v189_v21 = vpop.f32.mrf.mxu0  ;;  %v199_v22 = vpop.f32.mrf.mxu1  ;;  %v290_v31 = vadd.f32 %v485_v18, %v207_v19  ;;  %v294_v32 = vadd.f32 %v485_v18, %v217_v20 }
  0xa7   :  { %v283_v25 = vadd.f32 %v485_v18, %v189_v21  ;;  %v287_v26 = vadd.f32 %v485_v18, %v199_v22 }
  0xa9   :  { %v417_v27 = vpack.c.bf16 %v283_v25, %v282_v23  ;;  %v427_v28 = vpack.c.bf16 %v287_v26, %v286_v24 }
  0xab   :  { %418 = vst [vmem:[%s584_s3] sm:$0xff] %v417_v27  }
  0xac   :  { %455 = vst [vmem:[%s584_s3 + $0x10] sm:$0xff] %v427_v28  }
  0xad   :  { %v209_v29 = vpop.f32.mrf.mxu2  ;;  %v219_v30 = vpop.f32.mrf.mxu3 }
  0xae   :  { %v291_v33 = vadd.f32 %v485_v18, %v209_v29  ;;  %v295_v34 = vadd.f32 %v485_v18, %v219_v30  ;;  %v192_v35 = vpop.f32.mrf.mxu0  ;;  %v202_v36 = vpop.f32.mrf.mxu1 }
  0xaf   :  { %v284_v43 = vadd.f32 %v485_v18, %v192_v35  ;;  %v288_v44 = vadd.f32 %v485_v18, %v202_v36 }
  0xb0   :  { %v437_v37 = vpack.c.bf16 %v291_v33, %v290_v31  ;;  %v447_v38 = vpack.c.bf16 %v295_v34, %v294_v32 }
  0xb2   :  { %457 = vst [vmem:[%s584_s3 + $0x20] sm:$0xff] %v437_v37  }
  0xb3   :  { %459 = vst [vmem:[%s584_s3 + $0x30] sm:$0xff] %v447_v38  }
  0xb5   :  { %v212_v39 = vpop.f32.mrf.mxu2  ;;  %v222_v40 = vpop.f32.mrf.mxu3 }
  0xb6   :  { %v194_v41 = vpop.f32.mrf.mxu0  ;;  %v204_v42 = vpop.f32.mrf.mxu1  ;;  %v292_v51 = vadd.f32 %v485_v18, %v212_v39  ;;  %v296_v52 = vadd.f32 %v485_v18, %v222_v40 }
  0xb7   :  { %v285_v45 = vadd.f32 %v485_v18, %v194_v41  ;;  %v289_v46 = vadd.f32 %v485_v18, %v204_v42 }
  0xb9   :  { %v422_v47 = vpack.c.bf16 %v285_v45, %v284_v43  ;;  %v432_v48 = vpack.c.bf16 %v289_v46, %v288_v44 }
  0xbb   :  { %454 = vst [vmem:[%s584_s3 + $0x8] sm:$0xff] %v422_v47  }
  0xbc   :  { %456 = vst [vmem:[%s584_s3 + $0x18] sm:$0xff] %v432_v48  }
  0xbd   :  { %v214_v49 = vpop.f32.mrf.mxu2  ;;  %v224_v50 = vpop.f32.mrf.mxu3 }
  0xbe   :  { %v293_v53 = vadd.f32 %v485_v18, %v214_v49  ;;  %v297_v54 = vadd.f32 %v485_v18, %v224_v50 }
  0xc0   :  { %v442_v55 = vpack.c.bf16 %v293_v53, %v292_v51  ;;  %v452_v56 = vpack.c.bf16 %v297_v54, %v296_v52 }
  0xc2   :  { %458 = vst [vmem:[%s584_s3 + $0x28] sm:$0xff] %v442_v55  }
  0xc3   :  { %460 = vst [vmem:[%s584_s3 + $0x38] sm:$0xff] %v452_v56  }

// kernel: _lambda_.26
= control target key start
LH: loop header
LB: loop body
LE: loop exit
PB: predicated region body
PF: predicated region fallthrough
CT: control target
= control target key end

     0   :  { %s1392_s1 = inlined_call_operand.vmem [shape: bf16[128,128], index: 1, kind: input, shape index: {}]   ;;  %s1393_s2 = inlined_call_operand.vmem [shape: f32[1,128], index: 2, kind: input, shape index: {}]   ;;  %s1394_s0 = inlined_call_operand.vmem [shape: bf16[128,128], index: 0, kind: input, shape index: {}]   ;;  %s1395_s3 = inlined_call_operand.vmem [shape: bf16[128,128], index: 3, kind: output, shape index: {}]  }
   0x1   :  { %v749_v0 = vld [vmem:[%s1392_s1 + $0x38] sm:$0xff]  ;;  %v748_v1 = vld [vmem:[%s1392_s1 + $0x30] sm:$0xff]  ;;  %v747_v2 = vld [vmem:[%s1392_s1 + $0x28] sm:$0xff] }
   0x2   :  { %178 = vmatpush.bf16.msra.mxu0 %v749_v0  ;;  %797 = vmatpush.bf16.msra.mxu1 %v749_v0  ;;  %v746_v3 = vld [vmem:[%s1392_s1 + $0x20] sm:$0xff]  ;;  %v745_v4 = vld [vmem:[%s1392_s1 + $0x18] sm:$0xff]  ;;  %v744_v5 = vld [vmem:[%s1392_s1 + $0x10] sm:$0xff] }
   0x3   :  { %798 = vmatpush.bf16.msra.mxu2 %v749_v0  ;;  %799 = vmatpush.bf16.msra.mxu3 %v749_v0  ;;  %v743_v6 = vld [vmem:[%s1392_s1 + $0x8] sm:$0xff]  ;;  %v742_v7 = vld [vmem:[%s1392_s1] sm:$0xff]  ;;  %v736_v9 = vld [vmem:[%s1394_s0 + $0x10] sm:$0xff] }
   0x4   :  { %v734_v8 = vld [vmem:[%s1394_s0] sm:$0xff]  ;;  %v740_v11 = vld [vmem:[%s1394_s0 + $0x30] sm:$0xff]  ;;  %v735_v12 = vld [vmem:[%s1394_s0 + $0x8] sm:$0xff] }
   0x5   :  { %v738_v10 = vld [vmem:[%s1394_s0 + $0x20] sm:$0xff]  ;;  %v737_v13 = vld [vmem:[%s1394_s0 + $0x18] sm:$0xff]  ;;  %v739_v14 = vld [vmem:[%s1394_s0 + $0x28] sm:$0xff] }
   0x6   :  { %179 = vmatpush.bf16.msra.mxu0 %v748_v1  ;;  %800 = vmatpush.bf16.msra.mxu1 %v748_v1  ;;  %v741_v15 = vld [vmem:[%s1394_s0 + $0x38] sm:$0xff]  ;;  %v957_v16 = vld [vmem:[%s1393_s2] ss:$0 sm:$0xff] }
   0x7   :  { %801 = vmatpush.bf16.msra.mxu2 %v748_v1  ;;  %802 = vmatpush.bf16.msra.mxu3 %v748_v1 }
   0xa   :  { %180 = vmatpush.bf16.msra.mxu0 %v747_v2  ;;  %803 = vmatpush.bf16.msra.mxu1 %v747_v2 }
   0xb   :  { %804 = vmatpush.bf16.msra.mxu2 %v747_v2  ;;  %805 = vmatpush.bf16.msra.mxu3 %v747_v2 }
   0xe   :  { %181 = vmatpush.bf16.msra.mxu0 %v746_v3  ;;  %806 = vmatpush.bf16.msra.mxu1 %v746_v3 }
   0xf   :  { %807 = vmatpush.bf16.msra.mxu2 %v746_v3  ;;  %808 = vmatpush.bf16.msra.mxu3 %v746_v3 }
  0x12   :  { %182 = vmatpush.bf16.msra.mxu0 %v745_v4  ;;  %809 = vmatpush.bf16.msra.mxu1 %v745_v4 }
  0x13   :  { %810 = vmatpush.bf16.msra.mxu2 %v745_v4  ;;  %811 = vmatpush.bf16.msra.mxu3 %v745_v4 }
  0x16   :  { %183 = vmatpush.bf16.msra.mxu0 %v744_v5  ;;  %812 = vmatpush.bf16.msra.mxu1 %v744_v5 }
  0x17   :  { %813 = vmatpush.bf16.msra.mxu2 %v744_v5  ;;  %814 = vmatpush.bf16.msra.mxu3 %v744_v5 }
  0x1a   :  { %184 = vmatpush.bf16.msra.mxu0 %v743_v6  ;;  %815 = vmatpush.bf16.msra.mxu1 %v743_v6 }
  0x1b   :  { %816 = vmatpush.bf16.msra.mxu2 %v743_v6  ;;  %817 = vmatpush.bf16.msra.mxu3 %v743_v6 }
  0x1e   :  { %185 = vmatpush.bf16.msra.mxu0 %v742_v7  ;;  %818 = vmatpush.bf16.msra.mxu1 %v742_v7 }
  0x1f   :  { %819 = vmatpush.bf16.msra.mxu2 %v742_v7  ;;  %820 = vmatpush.bf16.msra.mxu3 %v742_v7 }
  0x21   :  { %186 = vmatmul.bf16.vlgmr.msra.gmra.mxu0 %v734_v8  ;;  %196 = vmatmul.bf16.vlgmr.msra.gmra.mxu1 %v736_v9 }
  0x22   :  { %206 = vmatmul.bf16.vlgmr.msra.gmra.mxu2 %v738_v10  ;;  %216 = vmatmul.bf16.vlgmr.msra.gmra.mxu3 %v740_v11 }
  0x31   :  { %191 = vmatmul.bf16.gmra.mxu0 %v735_v12  ;;  %201 = vmatmul.bf16.gmra.mxu1 %v737_v13 }
  0x32   :  { %211 = vmatmul.bf16.gmra.mxu2 %v739_v14  ;;  %221 = vmatmul.bf16.gmra.mxu3 %v741_v15 }
  0x9e   :  { %v187_v17 = vpop.f32.mrf.mxu0  ;;  %v197_v18 = vpop.f32.mrf.mxu1 }
  0x9f   :  { %v960_v19 = vadd.f32 %v957_v16, %v187_v17  ;;  %v963_v20 = vadd.f32 %v957_v16, %v197_v18 }
  0xa1   :  { %v718_v21 = vmul.f32 -1.442695, %v960_v19  ;;  %v722_v22 = vmul.f32 -1.442695, %v963_v20 }
  0xa3   :  { %822 = vpow2.f32 %v718_v21 }
  0xa4   :  { %824 = vpow2.f32 %v722_v22 }
  0xa5   :  { %v207_v23 = vpop.f32.mrf.mxu2  ;;  %v217_v24 = vpop.f32.mrf.mxu3 }
  0xa6   :  { %v968_v25 = vadd.f32 %v957_v16, %v207_v23  ;;  %v971_v26 = vadd.f32 %v957_v16, %v217_v24  ;;  %v189_v27 = vpop.f32.mrf.mxu0  ;;  %v199_v28 = vpop.f32.mrf.mxu1 }
  0xa7   :  { %v974_v29 = vadd.f32 %v957_v16, %v189_v27  ;;  %v977_v30 = vadd.f32 %v957_v16, %v199_v28 }
  0xa8   :  { %v726_v31 = vmul.f32 -1.442695, %v968_v25  ;;  %v730_v32 = vmul.f32 -1.442695, %v971_v26 }
  0xa9   :  { %v823_v33 = vpop.eup %822  ;;  %v719_v36 = vmul.f32 -1.442695, %v974_v29  ;;  %v723_v38 = vmul.f32 -1.442695, %v977_v30 }
  0xaa   :  { %v825_v34 = vpop.eup %824  ;;  %v981_v35 = vadd.f32 1.0, %v823_v33  ;;  %826 = vpow2.f32 %v726_v31 }
  0xab   :  { %v984_v37 = vadd.f32 1.0, %v825_v34  ;;  %828 = vpow2.f32 %v730_v32 }
  0xac   :  { %830 = vrcp.f32 %v981_v35  ;;  %v371_v51 = vand.u32 2147483647, %v981_v35  ;;  %v373_v53 = vand.u32 2147483648, %v981_v35  ;;  %vm367_vm0 = vweird.f32 %v981_v35 }
  0xad   :  { %832 = vrcp.f32 %v984_v37  ;;  %v209_v39 = vpop.f32.mrf.mxu2  ;;  %v219_v40 = vpop.f32.mrf.mxu3  ;;  %vm427_vm1 = vweird.f32 %v984_v37  ;;  %v431_v61 = vand.u32 2147483647, %v984_v37  ;;  %v433_v62 = vand.u32 2147483648, %v984_v37 }
  0xae   :  { %834 = vpow2.f32 %v719_v36  ;;  %v990_v41 = vadd.f32 %v957_v16, %v209_v39  ;;  %v993_v43 = vadd.f32 %v957_v16, %v219_v40  ;;  %v192_v56 = vpop.f32.mrf.mxu0  ;;  %v202_v59 = vpop.f32.mrf.mxu1  ;;  %vm1018_vm2 = vcmp.eq.f32.partialorder %v371_v51, 8.507059e+37 }
  0xaf   :  { %836 = vpow2.f32 %v723_v38  ;;  %v1027_v3 = vadd.f32 %v957_v16, %v192_v56  ;;  %v374_v4 = vor.u32 1.1754944e-38, %v373_v53  ;;  %v1031_v6 = vadd.f32 %v957_v16, %v202_v59 }
  0xb0   :  { %v827_v42 = vpop.eup %826  ;;  %v727_v48 = vmul.f32 -1.442695, %v990_v41  ;;  %v731_v55 = vmul.f32 -1.442695, %v993_v43  ;;  %vm1039_vm4 = vcmp.eq.f32.partialorder %v431_v61, 8.507059e+37  ;;  %v434_v11 = vor.u32 1.1754944e-38, %v433_v62 }
  0xb1   :  { %v829_v44 = vpop.eup %828  ;;  %v995_v45 = vadd.f32 1.0, %v827_v42  ;;  %v720_v17 = vmul.f32 -1.442695, %v1027_v3  ;;  %v724_v28 = vmul.f32 -1.442695, %v1031_v6 }
  0xb2   :  { %v997_v46 = vpop.eup %830  ;;  %v999_v47 = vadd.f32 1.0, %v829_v44 }
  0xb3   :  { %v1002_v49 = vpop.eup %832  ;;  %v363_v50 = vmul.f32 %v997_v46, %v981_v35  ;;  %838 = vrcp.f32 %v995_v45  ;;  %vm368_vm3 = vweird.f32 %v997_v46  ;;  %v493_v9 = vand.u32 2147483648, %v995_v45 }
  0xb4   :  { %v835_v52 = vpop.eup %834  ;;  %v423_v54 = vmul.f32 %v1002_v49, %v984_v37  ;;  %840 = vrcp.f32 %v999_v47  ;;  %v553_v13 = vand.u32 2147483648, %v999_v47  ;;  %vm428_vm5 = vweird.f32 %v1002_v49  ;;  %vm1054_vm6 = vmor %vm367_vm0, %vm368_vm3 }
  0xb5   :  { %v837_v57 = vpop.eup %836  ;;  %v364_v58 = vsub.f32 1.0, %v363_v50  ;;  %842 = vpow2.f32 %v727_v48  ;;  %v1022_v1 = vadd.f32 1.0, %v835_v52  ;;  %v212_v18 = vpop.f32.mrf.mxu2  ;;  %v491_v24 = vand.u32 2147483647, %v995_v45  ;;  %vm1074_vm8 = vmor %vm427_vm1, %vm428_vm5 }
  0xb6   :  { %v424_v60 = vsub.f32 1.0, %v423_v54  ;;  %v1024_v2 = vadd.f32 1.0, %v837_v57  ;;  %844 = vpow2.f32 %v731_v55  ;;  %vm487_vm7 = vweird.f32 %v995_v45 }
  0xb7   :  { %v365_v63 = vmul.f32 %v997_v46, %v364_v58  ;;  %846 = vrcp.f32 %v1022_v1  ;;  %v1066_v32 = vor.u32 1.1754944e-38, %v493_v9  ;;  %v551_v33 = vand.u32 2147483647, %v999_v47 }
  0xb8   :  { %v425_v5 = vmul.f32 %v1002_v49, %v424_v60  ;;  %848 = vrcp.f32 %v1024_v2  ;;  %v386_v34 = vand.u32 2147483647, %v1022_v1  ;;  %v1078_v39 = vor.u32 1.1754944e-38, %v553_v13 }
  0xb9   :  { %v1033_v7 = vpop.eup %838  ;;  %v366_v8 = vadd.f32 %v997_v46, %v365_v63  ;;  %vm382_vm9 = vweird.f32 %v1022_v1  ;;  %v1082_v40 = vadd.f32 %v957_v16, %v212_v18  ;;  %vm547_vm11 = vweird.f32 %v999_v47 }
  0xba   :  { %v483_v12 = vmul.f32 %v1033_v7, %v995_v45  ;;  %v1046_v14 = vpop.eup %840  ;;  %v426_v15 = vadd.f32 %v1002_v49, %v425_v5  ;;  %vm488_vm10 = vweird.f32 %v1033_v7  ;;  %850 = vpow2.f32 %v720_v17 }
  0xbb   :  { %v843_v21 = vpop.eup %842  ;;  %v543_v27 = vmul.f32 %v1046_v14, %v999_v47  ;;  %v370_v31 = vsel %vm1054_vm6, %v997_v46, %v366_v8  ;;  %v388_v51 = vand.u32 2147483648, %v1022_v1  ;;  %vm1096_vm12 = vcmp.eq.f32.partialorder %v386_v34, 8.507059e+37  ;;  %vm1131_vm3 = vmor %vm487_vm7, %vm488_vm10  ;;  %v222_v47 = vpop.f32.mrf.mxu3 }
  0xbc   :  { %v484_v23 = vsub.f32 1.0, %v483_v12  ;;  %v845_v35 = vpop.eup %844  ;;  %v430_v44 = vsel %vm1074_vm8, %v1002_v49, %v426_v15  ;;  %v1089_v37 = vadd.f32 1.0, %v843_v21  ;;  %v375_v46 = vsel %vm1018_vm2, %v374_v4, %v370_v31 }
  0xbd   :  { %v544_v38 = vsub.f32 1.0, %v543_v27  ;;  %v847_v42 = vpop.eup %846  ;;  %v446_v49 = vand.u32 2147483647, %v1024_v2  ;;  %v1102_v54 = vadd.f32 1.0, %v845_v35  ;;  %v435_v55 = vsel %vm1039_vm4, %v434_v11, %v430_v44 }
  0xbe   :  { %v485_v48 = vmul.f32 %v1033_v7, %v484_v23  ;;  %v378_v50 = vmul.f32 %v847_v42, %v1022_v1  ;;  %v849_v52 = vpop.eup %848  ;;  %852 = vrcp.f32 %v1089_v37  ;;  %vm1106_vm13 = vcmp.eq.f32.partialorder %v491_v24, 8.507059e+37 }
  0xbf   :  { %v545_v57 = vmul.f32 %v1046_v14, %v544_v38  ;;  %v438_v59 = vmul.f32 %v849_v52, %v1024_v2  ;;  %v602_v60 = vmul.f32 %v375_v46, %v960_v19  ;;  %vm548_vm14 = vweird.f32 %v1046_v14 }
  0xc0   :  { %v379_v58 = vsub.f32 1.0, %v378_v50  ;;  %vm442_vm15 = vweird.f32 %v1024_v2  ;;  %v448_v61 = vand.u32 2147483648, %v1024_v2  ;;  %v486_v62 = vadd.f32 %v1033_v7, %v485_v48  ;;  %v851_v5 = vpop.eup %850  ;;  %vm1148_vm7 = vmor %vm547_vm11, %vm548_vm14 }
  0xc1   :  { %vm1117_vm0 = vcmp.eq.f32.partialorder %v551_v33, 8.507059e+37  ;;  %vm383_vm1 = vweird.f32 %v847_v42  ;;  %v439_v4 = vsub.f32 1.0, %v438_v59  ;;  %v606_v8 = vmul.f32 %v435_v55, %v963_v20  ;;  %v214_v59 = vpop.f32.mrf.mxu2 }
  0xc2   :  { %v380_v0 = vmul.f32 %v847_v42, %v379_v58  ;;  %v389_v9 = vor.u32 1.1754944e-38, %v388_v51  ;;  %vm1122_vm2 = vcmp.eq.f32.partialorder %v446_v49, 8.507059e+37  ;;  %854 = vrcp.f32 %v1102_v54  ;;  %vm384_vm5 = vmor %vm382_vm9, %vm383_vm1  ;;  %v204_v49 = vpop.f32.mrf.mxu1 }
  0xc3   :  { %v546_v11 = vadd.f32 %v1046_v14, %v545_v57  ;;  %v440_v13 = vmul.f32 %v849_v52, %v439_v4  ;;  %vm443_vm4 = vweird.f32 %v849_v52  ;;  %v449_v15 = vor.u32 1.1754944e-38, %v448_v61 }
  0xc4   :  { %v381_v12 = vadd.f32 %v847_v42, %v380_v0  ;;  %v853_v20 = vpop.eup %852  ;;  %vm502_vm6 = vweird.f32 %v1089_v37  ;;  %v1139_v17 = vadd.f32 1.0, %v851_v5  ;;  %856 = vpow2.f32 %v724_v28  ;;  %vm444_vm8 = vmor %vm442_vm15, %vm443_vm4 }
  0xc5   :  { %v490_v45 = vsel %vm1131_vm3, %v1033_v7, %v486_v62  ;;  %v441_v21 = vadd.f32 %v849_v52, %v440_v13  ;;  %v498_v22 = vmul.f32 %v853_v20, %v1089_v37  ;;  %v506_v7 = vand.u32 2147483647, %v1089_v37 }
  0xc6   :  { %v385_v1 = vsel %vm384_vm5, %v847_v42, %v381_v12  ;;  %v508_v24 = vand.u32 2147483648, %v1089_v37  ;;  %858 = vrcp.f32 %v1139_v17  ;;  %v550_v27 = vsel %vm1148_vm7, %v1046_v14, %v546_v11  ;;  %v224_v12 = vpop.f32.mrf.mxu3 }
  0xc7   :  { %v390_v23 = vsel %vm1096_vm12, %v389_v9, %v385_v1  ;;  %v445_v31 = vsel %vm444_vm8, %v849_v52, %v441_v21  ;;  %v499_v33 = vsub.f32 1.0, %v498_v22  ;;  %v495_v2 = vsel %vm1106_vm13, %v1066_v32, %v490_v45 }
  0xc8   :  { %v603_v28 = vmul.f32 %v390_v23, %v974_v29  ;;  %v855_v34 = vpop.eup %854  ;;  %v450_v35 = vsel %vm1122_vm2, %v449_v15, %v445_v31  ;;  %vm503_vm9 = vweird.f32 %v853_v20  ;;  %v728_v36 = vmul.f32 -1.442695, %v1082_v40  ;;  %v194_v29 = vpop.f32.mrf.mxu0 }
  0xc9   :  { %v607_v42 = vmul.f32 %v450_v35, %v977_v30  ;;  %v500_v44 = vmul.f32 %v853_v20, %v499_v33  ;;  %v558_v14 = vmul.f32 %v855_v34, %v1102_v54  ;;  %v555_v48 = vsel %vm1117_vm0, %v1078_v39, %v550_v27  ;;  %vm504_vm11 = vmor %vm502_vm6, %vm503_vm9 }
  0xca   :  { %v753_v38 = vpack.c.bf16 %v603_v28, %v602_v60  ;;  %v857_v46 = vpop.eup %856  ;;  %vm1175_vm10 = vcmp.eq.f32.partialorder %v506_v7, 8.507059e+37  ;;  %v509_v50 = vor.u32 1.1754944e-38, %v508_v24  ;;  %860 = vpow2.f32 %v728_v36 }
  0xcb   :  { %v763_v30 = vpack.c.bf16 %v607_v42, %v606_v8  ;;  %v501_v51 = vadd.f32 %v853_v20, %v500_v44  ;;  %v559_v52 = vsub.f32 1.0, %v558_v14  ;;  %v1182_v53 = vadd.f32 1.0, %v857_v46 }
  0xcc   :  { %754 = vst [vmem:[%s1395_s3] sm:$0xff] %v753_v38   ;;  %v1184_v55 = vpop.eup %858  ;;  %v566_v39 = vand.u32 2147483647, %v1102_v54  ;;  %v568_v56 = vand.u32 2147483648, %v1102_v54  ;;  %v1192_v57 = vadd.f32 %v957_v16, %v222_v47  ;;  %v1195_v58 = vadd.f32 %v957_v16, %v194_v29 }
  0xcd   :  { %791 = vst [vmem:[%s1395_s3 + $0x10] sm:$0xff] %v763_v30   ;;  %v505_v60 = vsel %vm504_vm11, %v853_v20, %v501_v51  ;;  %v560_v61 = vmul.f32 %v855_v34, %v559_v52  ;;  %vm563_vm12 = vweird.f32 %v855_v34  ;;  %v393_v37 = vmul.f32 %v1184_v55, %v1139_v17 }
  0xce   :  { %v610_v62 = vmul.f32 %v495_v2, %v968_v25  ;;  %v510_v63 = vsel %vm1175_vm10, %v509_v50, %v505_v60  ;;  %862 = vrcp.f32 %v1182_v53  ;;  %v1207_v0 = vadd.f32 %v957_v16, %v204_v49 }
  0xcf   :  { %v611_v4 = vmul.f32 %v510_v63, %v990_v41  ;;  %v561_v5 = vadd.f32 %v855_v34, %v560_v61  ;;  %vm562_vm13 = vweird.f32 %v1102_v54  ;;  %v1212_v8 = vadd.f32 %v957_v16, %v214_v59 }
  0xd0   :  { %v861_v9 = vpop.eup %860  ;;  %v614_v19 = vmul.f32 %v555_v48, %v971_v26  ;;  %vm564_vm14 = vmor %vm562_vm13, %vm563_vm12  ;;  %v569_v25 = vor.u32 1.1754944e-38, %v568_v56  ;;  %v732_v10 = vmul.f32 -1.442695, %v1192_v57  ;;  %v721_v11 = vmul.f32 -1.442695, %v1195_v58 }
  0xd1   :  { %v773_v13 = vpack.c.bf16 %v611_v4, %v610_v62  ;;  %v565_v20 = vsel %vm564_vm14, %v855_v34, %v561_v5  ;;  %vm567_vm15 = vcmp.eq.f32.partialorder %v566_v39, 8.507059e+37  ;;  %v394_v41 = vsub.f32 1.0, %v393_v37 }
  0xd2   :  { %v570_v15 = vsel %vm567_vm15, %v569_v25, %v565_v20  ;;  %v1217_v45 = vadd.f32 1.0, %v861_v9  ;;  %864 = vpow2.f32 %v732_v10  ;;  %v725_v54 = vmul.f32 -1.442695, %v1207_v0 }
  0xd3   :  { %793 = vst [vmem:[%s1395_s3 + $0x20] sm:$0xff] %v773_v13   ;;  %v615_v26 = vmul.f32 %v570_v15, %v993_v43  ;;  %866 = vpow2.f32 %v721_v11  ;;  %v729_v18 = vmul.f32 -1.442695, %v1212_v8  ;;  %v1226_v1 = vadd.f32 %v957_v16, %v224_v12 }
  0xd4   :  { %v1228_v21 = vpop.eup %862  ;;  %868 = vrcp.f32 %v1217_v45  ;;  %v395_v7 = vmul.f32 %v1184_v55, %v394_v41  ;;  %vm397_vm0 = vweird.f32 %v1139_v17  ;;  %v401_v27 = vand.u32 2147483647, %v1139_v17 }
  0xd5   :  { %v783_v22 = vpack.c.bf16 %v615_v26, %v614_v19  ;;  %v453_v23 = vmul.f32 %v1228_v21, %v1182_v53  ;;  %870 = vpow2.f32 %v725_v54  ;;  %v733_v43 = vmul.f32 -1.442695, %v1226_v1 }
  0xd6   :  { %872 = vpow2.f32 %v729_v18  ;;  %v396_v33 = vadd.f32 %v1184_v55, %v395_v7  ;;  %vm398_vm1 = vweird.f32 %v1184_v55  ;;  %v403_v34 = vand.u32 2147483648, %v1139_v17 }
  0xd7   :  { %795 = vst [vmem:[%s1395_s3 + $0x30] sm:$0xff] %v783_v22   ;;  %v454_v24 = vsub.f32 1.0, %v453_v23  ;;  %874 = vpow2.f32 %v733_v43  ;;  %v461_v42 = vand.u32 2147483647, %v1182_v53  ;;  %vm1257_vm2 = vmor %vm397_vm0, %vm398_vm1  ;;  %v463_v29 = vand.u32 2147483648, %v1182_v53 }
  0xd8   :  { %v865_v16 = vpop.eup %864  ;;  %v400_v48 = vsel %vm1257_vm2, %v1184_v55, %v396_v33  ;;  %vm402_vm3 = vcmp.eq.f32.partialorder %v401_v27, 8.507059e+37  ;;  %v404_v32 = vor.u32 1.1754944e-38, %v403_v34  ;;  %v521_v50 = vand.u32 2147483647, %v1217_v45 }
  0xd9   :  { %v867_v47 = vpop.eup %866  ;;  %v1240_v28 = vadd.f32 1.0, %v865_v16  ;;  %v455_v38 = vmul.f32 %v1228_v21, %v454_v24  ;;  %vm457_vm4 = vweird.f32 %v1182_v53  ;;  %v523_v51 = vand.u32 2147483648, %v1217_v45 }
  0xda   :  { %v1242_v31 = vpop.eup %868  ;;  %v1247_v2 = vadd.f32 1.0, %v867_v47  ;;  %vm458_vm5 = vweird.f32 %v1228_v21  ;;  %vm1273_vm6 = vcmp.eq.f32.partialorder %v461_v42, 8.507059e+37  ;;  %v405_v59 = vsel %vm402_vm3, %v404_v32, %v400_v48 }
  0xdb   :  { %v513_v35 = vmul.f32 %v1242_v31, %v1217_v45  ;;  %876 = vrcp.f32 %v1240_v28  ;;  %v871_v36 = vpop.eup %870  ;;  %v456_v49 = vadd.f32 %v1228_v21, %v455_v38  ;;  %v464_v60 = vor.u32 1.1754944e-38, %v463_v29  ;;  %vm1294_vm9 = vmor %vm457_vm4, %vm458_vm5 }
  0xdc   :  { %878 = vrcp.f32 %v1247_v2  ;;  %v873_v44 = vpop.eup %872  ;;  %v1269_v52 = vadd.f32 1.0, %v871_v36  ;;  %vm517_vm7 = vweird.f32 %v1217_v45  ;;  %vm1283_vm8 = vcmp.eq.f32.partialorder %v521_v50, 8.507059e+37 }
  0xdd   :  { %v514_v46 = vsub.f32 1.0, %v513_v35  ;;  %v875_v30 = vpop.eup %874  ;;  %v1277_v55 = vadd.f32 1.0, %v873_v44  ;;  %vm518_vm10 = vweird.f32 %v1242_v31  ;;  %v524_v9 = vor.u32 1.1754944e-38, %v523_v51 }
  0xde   :  { %880 = vrcp.f32 %v1269_v52  ;;  %v1290_v63 = vadd.f32 1.0, %v875_v30  ;;  %v460_v25 = vsel %vm1294_vm9, %v1228_v21, %v456_v49  ;;  %v416_v11 = vand.u32 2147483647, %v1247_v2  ;;  %vm1311_vm12 = vmor %vm517_vm7, %vm518_vm10 }
  0xdf   :  { %v515_v17 = vmul.f32 %v1242_v31, %v514_v46  ;;  %882 = vrcp.f32 %v1277_v55  ;;  %v418_v53 = vand.u32 2147483648, %v1247_v2  ;;  %v604_v12 = vmul.f32 %v405_v59, %v1027_v3 }
  0xe0   :  { %vm577_vm11 = vweird.f32 %v1240_v28  ;;  %v581_v13 = vand.u32 2147483647, %v1240_v28  ;;  %v583_v15 = vand.u32 2147483648, %v1240_v28  ;;  %vm412_vm13 = vweird.f32 %v1247_v2 }
  0xe1   :  { %v1279_v56 = vpop.eup %876  ;;  %v516_v5 = vadd.f32 %v1242_v31, %v515_v17  ;;  %v476_v54 = vand.u32 2147483647, %v1269_v52  ;;  %884 = vrcp.f32 %v1290_v63  ;;  %v465_v26 = vsel %vm1273_vm6, %v464_v60, %v460_v25 }
  0xe2   :  { %v879_v61 = vpop.eup %878  ;;  %v573_v62 = vmul.f32 %v1279_v56, %v1240_v28  ;;  %vm1325_vm15 = vcmp.eq.f32.partialorder %v416_v11, 8.507059e+37  ;;  %v419_v7 = vor.u32 1.1754944e-38, %v418_v53  ;;  %vm578_vm0 = vweird.f32 %v1279_v56 }
  0xe3   :  { %v408_v19 = vmul.f32 %v879_v61, %v1247_v2  ;;  %v520_v45 = vsel %vm1311_vm12, %v1242_v31, %v516_v5  ;;  %vm413_vm14 = vweird.f32 %v879_v61  ;;  %vm472_vm1 = vweird.f32 %v1269_v52  ;;  %vm1357_vm7 = vmor %vm577_vm11, %vm578_vm0 }
  0xe4   :  { %v574_v10 = vsub.f32 1.0, %v573_v62  ;;  %v881_v3 = vpop.eup %880  ;;  %v525_v47 = vsel %vm1283_vm8, %v524_v9, %v520_v45  ;;  %vm414_vm2 = vmor %vm412_vm13, %vm413_vm14  ;;  %vm1337_vm3 = vcmp.eq.f32.partialorder %v476_v54, 8.507059e+37  ;;  %v478_v33 = vand.u32 2147483648, %v1269_v52 }
  0xe5   :  { %v409_v20 = vsub.f32 1.0, %v408_v19  ;;  %v883_v21 = vpop.eup %882  ;;  %v468_v43 = vmul.f32 %v881_v3, %v1269_v52  ;;  %vm1342_vm4 = vcmp.eq.f32.partialorder %v581_v13, 8.507059e+37  ;;  %v536_v38 = vand.u32 2147483647, %v1277_v55 }
  0xe6   :  { %v575_v22 = vmul.f32 %v1279_v56, %v574_v10  ;;  %v528_v24 = vmul.f32 %v883_v21, %v1277_v55  ;;  %v538_v42 = vand.u32 2147483648, %v1277_v55  ;;  %vm473_vm5 = vweird.f32 %v881_v3 }
  0xe7   :  { %v410_v18 = vmul.f32 %v879_v61, %v409_v20  ;;  %v469_v27 = vsub.f32 1.0, %v468_v43  ;;  %v885_v44 = vpop.eup %884  ;;  %vm533_vm6 = vweird.f32 %v883_v21  ;;  %v479_v17 = vor.u32 1.1754944e-38, %v478_v33  ;;  %vm474_vm9 = vmor %vm472_vm1, %vm473_vm5 }
  0xe8   :  { %v529_v36 = vsub.f32 1.0, %v528_v24  ;;  %v576_v2 = vadd.f32 %v1279_v56, %v575_v22  ;;  %v588_v32 = vmul.f32 %v885_v44, %v1290_v63  ;;  %vm532_vm8 = vweird.f32 %v1277_v55 }
  0xe9   :  { %v411_v16 = vadd.f32 %v879_v61, %v410_v18  ;;  %v470_v29 = vmul.f32 %v881_v3, %v469_v27  ;;  %v596_v51 = vand.u32 2147483647, %v1290_v63  ;;  %vm537_vm10 = vcmp.eq.f32.partialorder %v536_v38, 8.507059e+37  ;;  %vm534_vm11 = vmor %vm532_vm8, %vm533_vm6 }
  0xea   :  { %v530_v48 = vmul.f32 %v883_v21, %v529_v36  ;;  %v589_v39 = vsub.f32 1.0, %v588_v32  ;;  %v580_v28 = vsel %vm1357_vm7, %v1279_v56, %v576_v2  ;;  %v539_v60 = vor.u32 1.1754944e-38, %v538_v42 }
  0xeb   :  { %v415_v35 = vsel %vm414_vm2, %v879_v61, %v411_v16  ;;  %v471_v30 = vadd.f32 %v881_v3, %v470_v29  ;;  %v598_v61 = vand.u32 2147483648, %v1290_v63  ;;  %vm593_vm12 = vweird.f32 %v885_v44 }
  0xec   :  { %v420_v14 = vsel %vm1325_vm15, %v419_v7, %v415_v35  ;;  %v590_v37 = vmul.f32 %v885_v44, %v589_v39  ;;  %v608_v62 = vmul.f32 %v465_v26, %v1031_v6  ;;  %v584_v4 = vor.u32 1.1754944e-38, %v583_v15 }
  0xed   :  { %v605_v46 = vmul.f32 %v420_v14, %v1195_v58  ;;  %v531_v58 = vadd.f32 %v883_v21, %v530_v48  ;;  %v475_v59 = vsel %vm474_vm9, %v881_v3, %v471_v30  ;;  %v612_v9 = vmul.f32 %v525_v47, %v1082_v40 }
  0xee   :  { %v480_v52 = vsel %vm1337_vm3, %v479_v17, %v475_v59  ;;  %v591_v25 = vadd.f32 %v885_v44, %v590_v37  ;;  %vm592_vm13 = vweird.f32 %v1290_v63  ;;  %v585_v10 = vsel %vm1342_vm4, %v584_v4, %v580_v28 }
  0xef   :  { %v758_v49 = vpack.c.bf16 %v605_v46, %v604_v12  ;;  %v535_v55 = vsel %vm534_vm11, %v883_v21, %v531_v58  ;;  %v609_v56 = vmul.f32 %v480_v52, %v1207_v0  ;;  %vm594_vm14 = vmor %vm592_vm13, %vm593_vm12  ;;  %v599_v53 = vor.u32 1.1754944e-38, %v598_v61 }
  0xf0   :  { %v540_v5 = vsel %vm537_vm10, %v539_v60, %v535_v55  ;;  %v595_v13 = vsel %vm594_vm14, %v885_v44, %v591_v25  ;;  %vm597_vm15 = vcmp.eq.f32.partialorder %v596_v51, 8.507059e+37  ;;  %v616_v40 = vmul.f32 %v585_v10, %v1192_v57 }
  0xf1   :  { %790 = vst [vmem:[%s1395_s3 + $0x8] sm:$0xff] %v758_v49   ;;  %v613_v19 = vmul.f32 %v540_v5, %v1212_v8  ;;  %v768_v11 = vpack.c.bf16 %v609_v56, %v608_v62  ;;  %v600_v6 = vsel %vm597_vm15, %v599_v53, %v595_v13 }
  0xf2   :  { %v617_v0 = vmul.f32 %v600_v6, %v1226_v1 }
  0xf3   :  { %v778_v12 = vpack.c.bf16 %v613_v19, %v612_v9  ;;  %792 = vst [vmem:[%s1395_s3 + $0x18] sm:$0xff] %v768_v11  }
  0xf4   :  { %v788_v8 = vpack.c.bf16 %v617_v0, %v616_v40 }
  0xf5   :  { %794 = vst [vmem:[%s1395_s3 + $0x28] sm:$0xff] %v778_v12  }
  0xf6   :  { %796 = vst [vmem:[%s1395_s3 + $0x38] sm:$0xff] %v788_v8  }

// kernel: _lambda_.28
= control target key start
LH: loop header
LB: loop body
LE: loop exit
PB: predicated region body
PF: predicated region fallthrough
CT: control target
= control target key end

     0   :  { %v59_v0 = vmov 0.0   ;;  %vm40_vm0 = vcmask 1041409   ;;  %s85_s1 = inlined_call_operand.vmem [shape: f32[2,128], index: 1, kind: output, shape index: {}]   ;;  %s86_s0 = inlined_call_operand.vmem [shape: bf16[2,16,128], index: 0, kind: input, shape index: {}]  }
   0x1   :  { %12 = vst [vmem:[%s85_s1] sm:$0x3] %v59_v0  ;;  %v50_v1 = vld [vmem:[%s86_s0] sm:$0xff]   ;;  %v57_v2 = vld [vmem:[%s86_s0 + $0x8] sm:$0xff]  }
   0x2   :  { %v51_v3 = vunpack.c.l.bf16 %v50_v1  ;;  %v52_v4 = vunpack.c.h.bf16 %v50_v1  ;;  %v55_v5 = vunpack.c.l.bf16 %v57_v2  ;;  %v56_v6 = vunpack.c.h.bf16 %v57_v2 }
   0x4   :  { %v22_v7 = vadd.f32 %v52_v4, %v51_v3  ;;  %v29_v8 = vadd.f32 %v56_v6, %v55_v5 }
   0x6   :  { %v23_v9 = vrot.slane %v22_v7, 4  ;;  %v30_v10 = vrot.slane %v29_v8, 4 }
   0x8   :  { %v24_v11 = vadd.f32 %v23_v9, %v22_v7  ;;  %v31_v12 = vadd.f32 %v30_v10, %v29_v8  ;;  %v13_v21 = vld [vmem:[%s85_s1] sm:$0x3] }
   0xa   :  { %v25_v13 = vrot.slane %v24_v11, 2  ;;  %v32_v14 = vrot.slane %v31_v12, 2 }
   0xc   :  { %v26_v15 = vadd.f32 %v25_v13, %v24_v11  ;;  %v33_v16 = vadd.f32 %v32_v14, %v31_v12 }
   0xe   :  { %v27_v17 = vrot.slane %v26_v15, 1  ;;  %v34_v18 = vrot.slane %v33_v16, 1 }
  0x10   :  { %v28_v19 = vadd.f32 %v27_v17, %v26_v15  ;;  %v35_v20 = vadd.f32 %v34_v18, %v33_v16 }
  0x12   :  { %v36_v22 = vmul.f32 0.0625, %v28_v19  ;;  %v37_v23 = vmul.f32 0.0625, %v35_v20 }
  0x14   :  { %v41_v24 = vsel %vm40_vm0, %v37_v23, %v36_v22 }
  0x15   :  { %v43_v25 = vadd.f32 %v41_v24, %v13_v21 }
  0x17   :  { %44 = vst [vmem:[%s85_s1] sm:$0x3] %v43_v25 }

// kernel: _lambda_.27
= control target key start
LH: loop header
LB: loop body
LE: loop exit
PB: predicated region body
PF: predicated region fallthrough
CT: control target
= control target key end

     0   :  { %s634_s0 = inlined_call_operand.vmem [shape: bf16[9,32,128], index: 0, kind: input, shape index: {}]   ;;  %s635_s1 = inlined_call_operand.vmem [shape: f32[9,1,128], index: 1, kind: input, shape index: {}]   ;;  %s636_s2 = inlined_call_operand.vmem [shape: f32[1,128], index: 2, kind: input, shape index: {}]   ;;  %s637_s3 = inlined_call_operand.vmem [shape: bf16[32,128], index: 3, kind: output, shape index: {}]  }
   0x1   :  { %v355_v0 = vld [vmem:[%s634_s0] sm:$0xff]   ;;  %v436_v1 = vld [vmem:[%s634_s0 + $0x8] sm:$0xff]   ;;  %v437_v7 = vld [vmem:[%s634_s0 + $0x10] sm:$0xff]  }
   0x2   :  { %v356_v2 = vunpack.c.l.bf16 %v355_v0  ;;  %v357_v3 = vunpack.c.h.bf16 %v355_v0  ;;  %v360_v4 = vunpack.c.l.bf16 %v436_v1  ;;  %v361_v5 = vunpack.c.h.bf16 %v436_v1  ;;  %v454_v6 = vld [vmem:[%s635_s1] ss:$0 sm:$0xff]  ;;  %v438_v8 = vld [vmem:[%s634_s0 + $0x18] sm:$0xff]   ;;  %v455_v13 = vld [vmem:[%s635_s1 + $0x1] ss:$0 sm:$0xff] }
   0x3   :  { %v364_v9 = vunpack.c.l.bf16 %v437_v7  ;;  %v365_v10 = vunpack.c.h.bf16 %v437_v7  ;;  %v368_v11 = vunpack.c.l.bf16 %v438_v8  ;;  %v369_v12 = vunpack.c.h.bf16 %v438_v8  ;;  %v439_v14 = vld [vmem:[%s634_s0 + $0x20] sm:$0xff]   ;;  %v440_v19 = vld [vmem:[%s634_s0 + $0x28] sm:$0xff]   ;;  %v441_v29 = vld [vmem:[%s634_s0 + $0x30] sm:$0xff]  }
   0x4   :  { %v26_v15 = vmul.f32 %v454_v6, %v356_v2  ;;  %v27_v16 = vmul.f32 %v454_v6, %v357_v3  ;;  %v28_v17 = vmul.f32 %v454_v6, %v360_v4  ;;  %v29_v18 = vmul.f32 %v454_v6, %v361_v5  ;;  %v456_v20 = vld [vmem:[%s635_s1 + $0x2] ss:$0 sm:$0xff]  ;;  %v442_v30 = vld [vmem:[%s634_s0 + $0x38] sm:$0xff]   ;;  %v457_v35 = vld [vmem:[%s635_s1 + $0x3] ss:$0 sm:$0xff] }
   0x5   :  { %v48_v21 = vmul.f32 %v455_v13, %v364_v9  ;;  %v49_v22 = vmul.f32 %v455_v13, %v365_v10  ;;  %v50_v23 = vmul.f32 %v455_v13, %v368_v11  ;;  %v51_v24 = vmul.f32 %v455_v13, %v369_v12  ;;  %v443_v44 = vld [vmem:[%s634_s0 + $0x40] sm:$0xff]   ;;  %v444_v45 = vld [vmem:[%s634_s0 + $0x48] sm:$0xff]   ;;  %v445_v59 = vld [vmem:[%s634_s0 + $0x50] sm:$0xff]  }
   0x6   :  { %v372_v25 = vunpack.c.l.bf16 %v439_v14  ;;  %v373_v26 = vunpack.c.h.bf16 %v439_v14  ;;  %v376_v27 = vunpack.c.l.bf16 %v440_v19  ;;  %v377_v28 = vunpack.c.h.bf16 %v440_v19  ;;  %v458_v50 = vld [vmem:[%s635_s1 + $0x4] ss:$0 sm:$0xff]  ;;  %v446_v60 = vld [vmem:[%s634_s0 + $0x58] sm:$0xff]   ;;  %v459_v1 = vld [vmem:[%s635_s1 + $0x5] ss:$0 sm:$0xff] }
   0x7   :  { %v52_v31 = vadd.f32 %v48_v21, %v26_v15  ;;  %v53_v32 = vadd.f32 %v49_v22, %v27_v16  ;;  %v54_v33 = vadd.f32 %v50_v23, %v28_v17  ;;  %v55_v34 = vadd.f32 %v51_v24, %v29_v18  ;;  %v447_v10 = vld [vmem:[%s634_s0 + $0x60] sm:$0xff]   ;;  %v448_v11 = vld [vmem:[%s634_s0 + $0x68] sm:$0xff]  }
   0x8   :  { %v70_v36 = vmul.f32 %v456_v20, %v372_v25  ;;  %v71_v37 = vmul.f32 %v456_v20, %v373_v26  ;;  %v72_v38 = vmul.f32 %v456_v20, %v376_v27  ;;  %v73_v39 = vmul.f32 %v456_v20, %v377_v28  ;;  %v460_v16 = vld [vmem:[%s635_s1 + $0x6] ss:$0 sm:$0xff]  ;;  %v449_v25 = vld [vmem:[%s634_s0 + $0x70] sm:$0xff]   ;;  %v450_v26 = vld [vmem:[%s634_s0 + $0x78] sm:$0xff]  }
   0x9   :  { %v380_v40 = vunpack.c.l.bf16 %v441_v29  ;;  %v381_v41 = vunpack.c.h.bf16 %v441_v29  ;;  %v384_v42 = vunpack.c.l.bf16 %v442_v30  ;;  %v385_v43 = vunpack.c.h.bf16 %v442_v30 }
   0xa   :  { %v74_v46 = vadd.f32 %v70_v36, %v52_v31  ;;  %v75_v47 = vadd.f32 %v71_v37, %v53_v32  ;;  %v76_v48 = vadd.f32 %v72_v38, %v54_v33  ;;  %v77_v49 = vadd.f32 %v73_v39, %v55_v34  ;;  %v461_v31 = vld [vmem:[%s635_s1 + $0x7] ss:$0 sm:$0xff] }
   0xb   :  { %v92_v51 = vmul.f32 %v457_v35, %v380_v40  ;;  %v93_v52 = vmul.f32 %v457_v35, %v381_v41  ;;  %v94_v53 = vmul.f32 %v457_v35, %v384_v42  ;;  %v95_v54 = vmul.f32 %v457_v35, %v385_v43  ;;  %v451_v40 = vld [vmem:[%s634_s0 + $0x80] sm:$0xff]   ;;  %v452_v41 = vld [vmem:[%s634_s0 + $0x88] sm:$0xff]  }
   0xc   :  { %v388_v55 = vunpack.c.l.bf16 %v443_v44  ;;  %v389_v56 = vunpack.c.h.bf16 %v443_v44  ;;  %v392_v57 = vunpack.c.l.bf16 %v444_v45  ;;  %v393_v58 = vunpack.c.h.bf16 %v444_v45 }
   0xd   :  { %v96_v61 = vadd.f32 %v92_v51, %v74_v46  ;;  %v97_v62 = vadd.f32 %v93_v52, %v75_v47  ;;  %v98_v63 = vadd.f32 %v94_v53, %v76_v48  ;;  %v99_v0 = vadd.f32 %v95_v54, %v77_v49  ;;  %v462_v46 = vld [vmem:[%s635_s1 + $0x8] ss:$0 sm:$0xff] }
   0xe   :  { %v114_v2 = vmul.f32 %v458_v50, %v388_v55  ;;  %v115_v3 = vmul.f32 %v458_v50, %v389_v56  ;;  %v116_v4 = vmul.f32 %v458_v50, %v392_v57  ;;  %v117_v5 = vmul.f32 %v458_v50, %v393_v58 }
   0xf   :  { %v396_v6 = vunpack.c.l.bf16 %v445_v59  ;;  %v397_v7 = vunpack.c.h.bf16 %v445_v59  ;;  %v400_v8 = vunpack.c.l.bf16 %v446_v60  ;;  %v401_v9 = vunpack.c.h.bf16 %v446_v60 }
  0x10   :  { %v118_v12 = vadd.f32 %v114_v2, %v96_v61  ;;  %v119_v13 = vadd.f32 %v115_v3, %v97_v62  ;;  %v120_v14 = vadd.f32 %v116_v4, %v98_v63  ;;  %v121_v15 = vadd.f32 %v117_v5, %v99_v0  ;;  %v463_v63 = vld [vmem:[%s636_s2] ss:$0 sm:$0xff] }
  0x11   :  { %v136_v17 = vmul.f32 %v459_v1, %v396_v6  ;;  %v137_v18 = vmul.f32 %v459_v1, %v397_v7  ;;  %v138_v19 = vmul.f32 %v459_v1, %v400_v8  ;;  %v139_v20 = vmul.f32 %v459_v1, %v401_v9 }
  0x12   :  { %v404_v21 = vunpack.c.l.bf16 %v447_v10  ;;  %v405_v22 = vunpack.c.h.bf16 %v447_v10  ;;  %v408_v23 = vunpack.c.l.bf16 %v448_v11  ;;  %v409_v24 = vunpack.c.h.bf16 %v448_v11 }
  0x13   :  { %v140_v27 = vadd.f32 %v136_v17, %v118_v12  ;;  %v141_v28 = vadd.f32 %v137_v18, %v119_v13  ;;  %v142_v29 = vadd.f32 %v138_v19, %v120_v14  ;;  %v143_v30 = vadd.f32 %v139_v20, %v121_v15 }
  0x14   :  { %v158_v32 = vmul.f32 %v460_v16, %v404_v21  ;;  %v159_v33 = vmul.f32 %v460_v16, %v405_v22  ;;  %v160_v34 = vmul.f32 %v460_v16, %v408_v23  ;;  %v161_v35 = vmul.f32 %v460_v16, %v409_v24 }
  0x15   :  { %v412_v36 = vunpack.c.l.bf16 %v449_v25  ;;  %v413_v37 = vunpack.c.h.bf16 %v449_v25  ;;  %v416_v38 = vunpack.c.l.bf16 %v450_v26  ;;  %v417_v39 = vunpack.c.h.bf16 %v450_v26 }
  0x16   :  { %v162_v42 = vadd.f32 %v158_v32, %v140_v27  ;;  %v163_v43 = vadd.f32 %v159_v33, %v141_v28  ;;  %v164_v44 = vadd.f32 %v160_v34, %v142_v29  ;;  %v165_v45 = vadd.f32 %v161_v35, %v143_v30 }
  0x17   :  { %v180_v47 = vmul.f32 %v461_v31, %v412_v36  ;;  %v181_v48 = vmul.f32 %v461_v31, %v413_v37  ;;  %v182_v49 = vmul.f32 %v461_v31, %v416_v38  ;;  %v183_v50 = vmul.f32 %v461_v31, %v417_v39 }
  0x18   :  { %v420_v51 = vunpack.c.l.bf16 %v451_v40  ;;  %v421_v52 = vunpack.c.h.bf16 %v451_v40  ;;  %v424_v53 = vunpack.c.l.bf16 %v452_v41  ;;  %v425_v54 = vunpack.c.h.bf16 %v452_v41 }
  0x19   :  { %v184_v55 = vadd.f32 %v180_v47, %v162_v42  ;;  %v185_v56 = vadd.f32 %v181_v48, %v163_v43  ;;  %v186_v57 = vadd.f32 %v182_v49, %v164_v44  ;;  %v187_v58 = vadd.f32 %v183_v50, %v165_v45 }
  0x1a   :  { %v202_v59 = vmul.f32 %v462_v46, %v420_v51  ;;  %v203_v60 = vmul.f32 %v462_v46, %v421_v52  ;;  %v204_v61 = vmul.f32 %v462_v46, %v424_v53  ;;  %v205_v62 = vmul.f32 %v462_v46, %v425_v54 }
  0x1c   :  { %v206_v0 = vadd.f32 %v202_v59, %v184_v55  ;;  %v207_v1 = vadd.f32 %v203_v60, %v185_v56  ;;  %v208_v2 = vadd.f32 %v204_v61, %v186_v57  ;;  %v209_v3 = vadd.f32 %v205_v62, %v187_v58 }
  0x1e   :  { %v584_v4 = vadd.f32 %v463_v63, %v206_v0  ;;  %v586_v5 = vadd.f32 %v463_v63, %v207_v1  ;;  %v588_v6 = vadd.f32 %v463_v63, %v208_v2  ;;  %v590_v7 = vadd.f32 %v463_v63, %v209_v3 }
  0x20   :  { %v350_v8 = vmul.f32 -1.442695, %v584_v4  ;;  %v351_v9 = vmul.f32 -1.442695, %v586_v5  ;;  %v352_v10 = vmul.f32 -1.442695, %v588_v6 }
  0x21   :  { %v353_v11 = vmul.f32 -1.442695, %v590_v7 }
  0x22   :  { %464 = vpow2.f32 %v350_v8 }
  0x23   :  { %466 = vpow2.f32 %v351_v9 }
  0x24   :  { %468 = vpow2.f32 %v352_v10 }
  0x25   :  { %470 = vpow2.f32 %v353_v11 }
  0x28   :  { %v465_v12 = vpop.eup %464 }
  0x29   :  { %v467_v13 = vpop.eup %466  ;;  %v230_v14 = vadd.f32 1.0, %v465_v12 }
  0x2a   :  { %v469_v15 = vpop.eup %468  ;;  %v231_v16 = vadd.f32 1.0, %v467_v13 }
  0x2b   :  { %v471_v17 = vpop.eup %470  ;;  %v232_v18 = vadd.f32 1.0, %v469_v15  ;;  %472 = vrcp.f32 %v230_v14  ;;  %v243_v20 = vand.u32 2147483647, %v230_v14  ;;  %v245_v21 = vand.u32 2147483648, %v230_v14 }
  0x2c   :  { %v233_v19 = vadd.f32 1.0, %v471_v17  ;;  %474 = vrcp.f32 %v231_v16  ;;  %v260_v23 = vand.u32 2147483648, %v231_v16  ;;  %vm239_vm0 = vweird.f32 %v230_v14 }
  0x2d   :  { %476 = vrcp.f32 %v232_v18  ;;  %vm596_vm1 = vcmp.eq.f32.partialorder %v243_v20, 8.507059e+37  ;;  %vm254_vm2 = vweird.f32 %v231_v16  ;;  %v246_v28 = vor.u32 1.1754944e-38, %v245_v21 }
  0x2e   :  { %478 = vrcp.f32 %v233_v19  ;;  %v258_v30 = vand.u32 2147483647, %v231_v16  ;;  %vm269_vm3 = vweird.f32 %v232_v18  ;;  %v273_v33 = vand.u32 2147483647, %v232_v18 }
  0x2f   :  { %v261_v36 = vor.u32 1.1754944e-38, %v260_v23  ;;  %v275_v37 = vand.u32 2147483648, %v232_v18  ;;  %vm284_vm8 = vweird.f32 %v233_v19  ;;  %v288_v43 = vand.u32 2147483647, %v233_v19 }
  0x30   :  { %v290_v44 = vand.u32 2147483648, %v233_v19  ;;  %vm259_vm11 = vcmp.eq.f32.partialorder %v258_v30, 8.507059e+37  ;;  %vm274_vm13 = vcmp.eq.f32.partialorder %v273_v33, 8.507059e+37 }
  0x31   :  { %v473_v22 = vpop.eup %472  ;;  %v276_v51 = vor.u32 1.1754944e-38, %v275_v37  ;;  %vm289_vm15 = vcmp.eq.f32.partialorder %v288_v43, 8.507059e+37 }
  0x32   :  { %v475_v24 = vpop.eup %474  ;;  %v235_v25 = vmul.f32 %v473_v22, %v230_v14  ;;  %vm240_vm4 = vweird.f32 %v473_v22  ;;  %v291_v57 = vor.u32 1.1754944e-38, %v290_v44 }
  0x33   :  { %v477_v27 = vpop.eup %476  ;;  %v250_v29 = vmul.f32 %v475_v24, %v231_v16  ;;  %vm255_vm5 = vweird.f32 %v475_v24  ;;  %vm601_vm7 = vmor %vm239_vm0, %vm240_vm4 }
  0x34   :  { %v236_v31 = vsub.f32 1.0, %v235_v25  ;;  %v265_v32 = vmul.f32 %v477_v27, %v232_v18  ;;  %v479_v34 = vpop.eup %478  ;;  %vm270_vm6 = vweird.f32 %v477_v27  ;;  %vm606_vm9 = vmor %vm254_vm2, %vm255_vm5 }
  0x35   :  { %v251_v35 = vsub.f32 1.0, %v250_v29  ;;  %v280_v40 = vmul.f32 %v479_v34, %v233_v19  ;;  %vm285_vm10 = vweird.f32 %v479_v34  ;;  %vm611_vm12 = vmor %vm269_vm3, %vm270_vm6 }
  0x36   :  { %v237_v38 = vmul.f32 %v473_v22, %v236_v31  ;;  %v266_v39 = vsub.f32 1.0, %v265_v32  ;;  %vm286_vm14 = vmor %vm284_vm8, %vm285_vm10 }
  0x37   :  { %v252_v42 = vmul.f32 %v475_v24, %v251_v35  ;;  %v281_v48 = vsub.f32 1.0, %v280_v40 }
  0x38   :  { %v238_v45 = vadd.f32 %v473_v22, %v237_v38  ;;  %v267_v47 = vmul.f32 %v477_v27, %v266_v39 }
  0x39   :  { %v253_v49 = vadd.f32 %v475_v24, %v252_v42  ;;  %v282_v54 = vmul.f32 %v479_v34, %v281_v48 }
  0x3a   :  { %v242_v52 = vsel %vm601_vm7, %v473_v22, %v238_v45  ;;  %v268_v53 = vadd.f32 %v477_v27, %v267_v47 }
  0x3b   :  { %v247_v55 = vsel %vm596_vm1, %v246_v28, %v242_v52  ;;  %v257_v56 = vsel %vm606_vm9, %v475_v24, %v253_v49  ;;  %v283_v60 = vadd.f32 %v479_v34, %v282_v54 }
  0x3c   :  { %v262_v58 = vsel %vm259_vm11, %v261_v36, %v257_v56  ;;  %v272_v59 = vsel %vm611_vm12, %v477_v27, %v268_v53  ;;  %v294_v61 = vmul.f32 %v247_v55, %v584_v4 }
  0x3d   :  { %v277_v62 = vsel %vm274_vm13, %v276_v51, %v272_v59  ;;  %v295_v63 = vmul.f32 %v262_v58, %v586_v5  ;;  %v287_v0 = vsel %vm286_vm14, %v479_v34, %v283_v60 }
  0x3e   :  { %v296_v1 = vmul.f32 %v277_v62, %v588_v6  ;;  %v292_v2 = vsel %vm289_vm15, %v291_v57, %v287_v0 }
  0x3f   :  { %v429_v3 = vpack.c.bf16 %v295_v63, %v294_v61  ;;  %v297_v8 = vmul.f32 %v292_v2, %v590_v7 }
  0x41   :  { %430 = vst [vmem:[%s637_s3] sm:$0xff] %v429_v3   ;;  %v434_v9 = vpack.c.bf16 %v297_v8, %v296_v1 }
  0x43   :  { %453 = vst [vmem:[%s637_s3 + $0x8] sm:$0xff] %v434_v9  }

// kernel: _lambda_.29
= control target key start
LH: loop header
LB: loop body
LE: loop exit
PB: predicated region body
PF: predicated region fallthrough
CT: control target
= control target key end

     0   :  { %s233_s1 = inlined_call_operand.vmem [shape: bf16[128,128], index: 1, kind: input, shape index: {}]   ;;  %s234_s2 = inlined_call_operand.vmem [shape: f32[1,128], index: 2, kind: input, shape index: {}]   ;;  %s235_s0 = inlined_call_operand.vmem [shape: bf16[8,128], index: 0, kind: input, shape index: {}]   ;;  %s236_s3 = inlined_call_operand.vmem [shape: f32[8,128], index: 3, kind: output, shape index: {}]  }
   0x1   :  { %v174_v0 = vld [vmem:[%s233_s1 + $0x38] sm:$0xff]  ;;  %v173_v1 = vld [vmem:[%s233_s1 + $0x30] sm:$0xff]  ;;  %v172_v2 = vld [vmem:[%s233_s1 + $0x28] sm:$0xff] }
   0x2   :  { %85 = vmatpush.bf16.msra.mxu0 %v174_v0  ;;  %v171_v3 = vld [vmem:[%s233_s1 + $0x20] sm:$0xff]  ;;  %v170_v4 = vld [vmem:[%s233_s1 + $0x18] sm:$0xff]  ;;  %v169_v5 = vld [vmem:[%s233_s1 + $0x10] sm:$0xff] }
   0x3   :  { %v168_v6 = vld [vmem:[%s233_s1 + $0x8] sm:$0xff]  ;;  %v167_v7 = vld [vmem:[%s233_s1] sm:$0xff] }
   0x4   :  { %v20_v8 = vld [vmem:[%s235_s0] sm:$0xf] }
   0x5   :  { %v175_v9 = vld [vmem:[%s234_s2] ss:$0 sm:$0xff] }
   0x6   :  { %86 = vmatpush.bf16.msra.mxu0 %v173_v1 }
   0xa   :  { %87 = vmatpush.bf16.msra.mxu0 %v172_v2 }
   0xe   :  { %88 = vmatpush.bf16.msra.mxu0 %v171_v3 }
  0x12   :  { %89 = vmatpush.bf16.msra.mxu0 %v170_v4 }
  0x16   :  { %90 = vmatpush.bf16.msra.mxu0 %v169_v5 }
  0x1a   :  { %91 = vmatpush.bf16.msra.mxu0 %v168_v6 }
  0x1e   :  { %92 = vmatpush.bf16.msra.mxu0 %v167_v7 }
  0x21   :  { %93 = vmatmul.bf16.vlgmr.msra.gmra.mxu0 %v20_v8 }
  0x9e   :  { %v94_v10 = vpop.f32.mrf.mxu0 }
  0x9f   :  { %v108_v11 = vadd.f32 %v175_v9, %v94_v10 }
  0xa1   :  { %v166_v12 = vmul.f32 -1.442695, %v108_v11 }
  0xa3   :  { %176 = vpow2.f32 %v166_v12 }
  0xa6   :  { %v96_v13 = vpop.f32.mrf.mxu0 }
  0xa9   :  { %v177_v14 = vpop.eup %176 }
  0xaa   :  { %v112_v15 = vadd.f32 1.0, %v177_v14 }
  0xac   :  { %178 = vrcp.f32 %v112_v15  ;;  %v124_v19 = vand.u32 2147483648, %v112_v15  ;;  %v122_v21 = vand.u32 2147483647, %v112_v15  ;;  %vm118_vm1 = vweird.f32 %v112_v15 }
  0xae   :  { %v125_v23 = vor.u32 1.1754944e-38, %v124_v19  ;;  %vm123_vm3 = vcmp.eq.f32.partialorder %v122_v21, 8.507059e+37 }
  0xb2   :  { %v179_v16 = vpop.eup %178 }
  0xb3   :  { %v114_v17 = vmul.f32 %v179_v16, %v112_v15  ;;  %vm119_vm0 = vweird.f32 %v179_v16 }
  0xb4   :  { %vm120_vm2 = vmor %vm118_vm1, %vm119_vm0 }
  0xb5   :  { %v115_v18 = vsub.f32 1.0, %v114_v17 }
  0xb7   :  { %v116_v20 = vmul.f32 %v179_v16, %v115_v18 }
  0xb9   :  { %v117_v22 = vadd.f32 %v179_v16, %v116_v20 }
  0xbb   :  { %v121_v24 = vsel %vm120_vm2, %v179_v16, %v117_v22 }
  0xbc   :  { %v126_v25 = vsel %vm123_vm3, %v125_v23, %v121_v24 }
  0xbd   :  { %v128_v26 = vmul.f32 %v126_v25, %v108_v11 }
  0xbf   :  { %129 = vst [vmem:[%s236_s3] sm:$0xff] %v128_v26 }

// kernel: _lambda_.30
= control target key start
LH: loop header
LB: loop body
LE: loop exit
PB: predicated region body
PF: predicated region fallthrough
CT: control target
= control target key end

     0   :  { %s232_s1 = inlined_call_operand.vmem [shape: bf16[128,128], index: 1, kind: input, shape index: {}]   ;;  %s233_s2 = inlined_call_operand.vmem [shape: f32[1,128], index: 2, kind: input, shape index: {}]   ;;  %s234_s0 = inlined_call_operand.vmem [shape: bf16[8,128], index: 0, kind: input, shape index: {}]   ;;  %s235_s3 = inlined_call_operand.vmem [shape: f32[8,128], index: 3, kind: output, shape index: {}]  }
   0x1   :  { %v173_v0 = vld [vmem:[%s232_s1 + $0x38] sm:$0xff]  ;;  %v172_v1 = vld [vmem:[%s232_s1 + $0x30] sm:$0xff]  ;;  %v171_v2 = vld [vmem:[%s232_s1 + $0x28] sm:$0xff] }
   0x2   :  { %85 = vmatpush.bf16.msra.mxu0 %v173_v0  ;;  %v170_v3 = vld [vmem:[%s232_s1 + $0x20] sm:$0xff]  ;;  %v169_v4 = vld [vmem:[%s232_s1 + $0x18] sm:$0xff]  ;;  %v168_v5 = vld [vmem:[%s232_s1 + $0x10] sm:$0xff] }
   0x3   :  { %v167_v6 = vld [vmem:[%s232_s1 + $0x8] sm:$0xff]  ;;  %v166_v7 = vld [vmem:[%s232_s1] sm:$0xff] }
   0x4   :  { %v20_v8 = vld [vmem:[%s234_s0] sm:$0xf] }
   0x5   :  { %v174_v9 = vld [vmem:[%s233_s2] ss:$0 sm:$0xff] }
   0x6   :  { %86 = vmatpush.bf16.msra.mxu0 %v172_v1 }
   0xa   :  { %87 = vmatpush.bf16.msra.mxu0 %v171_v2 }
   0xe   :  { %88 = vmatpush.bf16.msra.mxu0 %v170_v3 }
  0x12   :  { %89 = vmatpush.bf16.msra.mxu0 %v169_v4 }
  0x16   :  { %90 = vmatpush.bf16.msra.mxu0 %v168_v5 }
  0x1a   :  { %91 = vmatpush.bf16.msra.mxu0 %v167_v6 }
  0x1e   :  { %92 = vmatpush.bf16.msra.mxu0 %v166_v7 }
  0x21   :  { %93 = vmatmul.bf16.vlgmr.msra.gmra.mxu0 %v20_v8 }
  0x9e   :  { %v94_v10 = vpop.f32.mrf.mxu0 }
  0x9f   :  { %v108_v11 = vadd.f32 %v174_v9, %v94_v10 }
  0xa1   :  { %v165_v12 = vmul.f32 -1.442695, %v108_v11 }
  0xa3   :  { %175 = vpow2.f32 %v165_v12 }
  0xa6   :  { %v96_v13 = vpop.f32.mrf.mxu0 }
  0xa9   :  { %v176_v14 = vpop.eup %175 }
  0xaa   :  { %v112_v15 = vadd.f32 1.0, %v176_v14 }
  0xac   :  { %177 = vrcp.f32 %v112_v15  ;;  %v124_v19 = vand.u32 2147483648, %v112_v15  ;;  %v122_v21 = vand.u32 2147483647, %v112_v15  ;;  %vm118_vm1 = vweird.f32 %v112_v15 }
  0xae   :  { %v125_v23 = vor.u32 1.1754944e-38, %v124_v19  ;;  %vm123_vm3 = vcmp.eq.f32.partialorder %v122_v21, 8.507059e+37 }
  0xb2   :  { %v178_v16 = vpop.eup %177 }
  0xb3   :  { %v114_v17 = vmul.f32 %v178_v16, %v112_v15  ;;  %vm119_vm0 = vweird.f32 %v178_v16 }
  0xb4   :  { %vm120_vm2 = vmor %vm118_vm1, %vm119_vm0 }
  0xb5   :  { %v115_v18 = vsub.f32 1.0, %v114_v17 }
  0xb7   :  { %v116_v20 = vmul.f32 %v178_v16, %v115_v18 }
  0xb9   :  { %v117_v22 = vadd.f32 %v178_v16, %v116_v20 }
  0xbb   :  { %v121_v24 = vsel %vm120_vm2, %v178_v16, %v117_v22 }
  0xbc   :  { %v126_v25 = vsel %vm123_vm3, %v125_v23, %v121_v24 }
  0xbd   :  { %128 = vst [vmem:[%s235_s3] sm:$0xff] %v126_v25 }

// kernel: _lambda_.31
= control target key start
LH: loop header
LB: loop body
LE: loop exit
PB: predicated region body
PF: predicated region fallthrough
CT: control target
= control target key end

     0   :  { %s98_s0 = inlined_call_operand.vmem [shape: bf16[2,16,128], index: 0, kind: input, shape index: {}]   ;;  %s99_s1 = inlined_call_operand.vmem [shape: f32[2,1,128], index: 1, kind: input, shape index: {}]   ;;  %s100_s2 = inlined_call_operand.vmem [shape: bf16[2,16,128], index: 2, kind: output, shape index: {}]  }
   0x1   :  { %v44_v0 = vld [vmem:[%s98_s0] sm:$0xff]   ;;  %v61_v4 = vld [vmem:[%s98_s0 + $0x8] sm:$0xff]  }
   0x2   :  { %v63_v1 = vld [vmem:[%s99_s1] ss:$0 sm:$0xff]  ;;  %v45_v2 = vunpack.c.l.bf16 %v44_v0  ;;  %v46_v3 = vunpack.c.h.bf16 %v44_v0  ;;  %v64_v5 = vld [vmem:[%s99_s1 + $0x1] ss:$0 sm:$0xff]  ;;  %v49_v6 = vunpack.c.l.bf16 %v61_v4  ;;  %v50_v7 = vunpack.c.h.bf16 %v61_v4 }
   0x4   :  { %v27_v8 = vmul.f32 %v63_v1, %v45_v2  ;;  %v28_v9 = vmul.f32 %v63_v1, %v46_v3  ;;  %v29_v10 = vmul.f32 %v64_v5, %v49_v6  ;;  %v30_v11 = vmul.f32 %v64_v5, %v50_v7 }
   0x6   :  { %v54_v12 = vpack.c.bf16 %v28_v9, %v27_v8  ;;  %v59_v13 = vpack.c.bf16 %v30_v11, %v29_v10 }
   0x8   :  { %55 = vst [vmem:[%s100_s2] sm:$0xff] %v54_v12  }
   0x9   :  { %62 = vst [vmem:[%s100_s2 + $0x8] sm:$0xff] %v59_v13  }

// kernel: _lambda_.32
= control target key start
LH: loop header
LB: loop body
LE: loop exit
PB: predicated region body
PF: predicated region fallthrough
CT: control target
= control target key end

     0   :  { %s289_s1 = inlined_call_operand.vmem [shape: bf16[128,128], index: 1, kind: input, shape index: {}]   ;;  %s290_s2 = inlined_call_operand.vmem [shape: f32[1,128], index: 2, kind: input, shape index: {}]   ;;  %s291_s0 = inlined_call_operand.vmem [shape: bf16[32,128], index: 0, kind: input, shape index: {}]   ;;  %s292_s3 = inlined_call_operand.vmem [shape: bf16[32,128], index: 3, kind: output, shape index: {}]  }
   0x1   :  { %v209_v0 = vld [vmem:[%s289_s1 + $0x38] sm:$0xff]  ;;  %v208_v1 = vld [vmem:[%s289_s1 + $0x30] sm:$0xff]  ;;  %v207_v2 = vld [vmem:[%s289_s1 + $0x28] sm:$0xff] }
   0x2   :  { %106 = vmatpush.bf16.msra.mxu0 %v209_v0  ;;  %221 = vmatpush.bf16.msra.mxu1 %v209_v0  ;;  %v206_v3 = vld [vmem:[%s289_s1 + $0x20] sm:$0xff]  ;;  %v205_v4 = vld [vmem:[%s289_s1 + $0x18] sm:$0xff]  ;;  %v204_v5 = vld [vmem:[%s289_s1 + $0x10] sm:$0xff] }
   0x3   :  { %v203_v6 = vld [vmem:[%s289_s1 + $0x8] sm:$0xff]  ;;  %v202_v7 = vld [vmem:[%s289_s1] sm:$0xff] }
   0x4   :  { %v200_v8 = vld [vmem:[%s291_s0] sm:$0xff]  ;;  %v201_v9 = vld [vmem:[%s291_s0 + $0x8] sm:$0xff] }
   0x5   :  { %v229_v12 = vld [vmem:[%s290_s2] ss:$0 sm:$0xff] }
   0x6   :  { %107 = vmatpush.bf16.msra.mxu0 %v208_v1  ;;  %222 = vmatpush.bf16.msra.mxu1 %v208_v1 }
   0xa   :  { %108 = vmatpush.bf16.msra.mxu0 %v207_v2  ;;  %223 = vmatpush.bf16.msra.mxu1 %v207_v2 }
   0xe   :  { %109 = vmatpush.bf16.msra.mxu0 %v206_v3  ;;  %224 = vmatpush.bf16.msra.mxu1 %v206_v3 }
  0x12   :  { %110 = vmatpush.bf16.msra.mxu0 %v205_v4  ;;  %225 = vmatpush.bf16.msra.mxu1 %v205_v4 }
  0x16   :  { %111 = vmatpush.bf16.msra.mxu0 %v204_v5  ;;  %226 = vmatpush.bf16.msra.mxu1 %v204_v5 }
  0x1a   :  { %112 = vmatpush.bf16.msra.mxu0 %v203_v6  ;;  %227 = vmatpush.bf16.msra.mxu1 %v203_v6 }
  0x1e   :  { %113 = vmatpush.bf16.msra.mxu0 %v202_v7  ;;  %228 = vmatpush.bf16.msra.mxu1 %v202_v7 }
  0x21   :  { %114 = vmatmul.bf16.vlgmr.msra.gmra.mxu0 %v200_v8  ;;  %119 = vmatmul.bf16.vlgmr.msra.gmra.mxu1 %v201_v9 }
  0x9e   :  { %v115_v10 = vpop.f32.mrf.mxu0  ;;  %v120_v11 = vpop.f32.mrf.mxu1 }
  0x9f   :  { %v144_v15 = vadd.f32 %v229_v12, %v115_v10  ;;  %v146_v16 = vadd.f32 %v229_v12, %v120_v11 }
  0xa6   :  { %v117_v13 = vpop.f32.mrf.mxu0  ;;  %v122_v14 = vpop.f32.mrf.mxu1 }
  0xa7   :  { %v145_v17 = vadd.f32 %v229_v12, %v117_v13  ;;  %v147_v18 = vadd.f32 %v229_v12, %v122_v14 }
  0xa9   :  { %v213_v19 = vpack.c.bf16 %v145_v17, %v144_v15  ;;  %v218_v20 = vpack.c.bf16 %v147_v18, %v146_v16 }
  0xab   :  { %214 = vst [vmem:[%s292_s3] sm:$0xff] %v213_v19  }
  0xac   :  { %220 = vst [vmem:[%s292_s3 + $0x8] sm:$0xff] %v218_v20  }

// kernel: _lambda_.33
= control target key start
LH: loop header
LB: loop body
LE: loop exit
PB: predicated region body
PF: predicated region fallthrough
CT: control target
= control target key end

     0   :  { %s775_s1 = inlined_call_operand.vmem [shape: bf16[128,256], index: 1, kind: input, shape index: {}]   ;;  %s776_s0 = inlined_call_operand.vmem [shape: bf16[32,128], index: 0, kind: input, shape index: {}]   ;;  %s777_s2 = inlined_call_operand.vmem [shape: f32[1,256], index: 2, kind: input, shape index: {}]   ;;  %s778_s3 = inlined_call_operand.vmem [shape: bf16[32,256], index: 3, kind: output, shape index: {}]  }
   0x1   :  { %v463_v0 = vld [vmem:[%s775_s1 + $0x70] sm:$0xf]  ;;  %v494_v1 = vld [vmem:[%s775_s1 + $0x74] sm:$0xf0]  ;;  %v493_v2 = vld [vmem:[%s775_s1 + $0x74] sm:$0xf] }
   0x2   :  { %v464_v3 = vor.u32 %v494_v1, %v463_v0  ;;  %v465_v4 = vld [vmem:[%s775_s1 + $0x78] sm:$0xf0]  ;;  %v455_v5 = vld [vmem:[%s775_s1 + $0x60] sm:$0xf]  ;;  %v492_v6 = vld [vmem:[%s775_s1 + $0x64] sm:$0xf0] }
   0x3   :  { %v468_v7 = vor.u32 %v493_v2, %v465_v4  ;;  %v491_v8 = vld [vmem:[%s775_s1 + $0x64] sm:$0xf]  ;;  %v457_v9 = vld [vmem:[%s775_s1 + $0x68] sm:$0xf0]  ;;  %v456_v10 = vor.u32 %v492_v6, %v455_v5  ;;  %v447_v12 = vld [vmem:[%s775_s1 + $0x50] sm:$0xf] }
   0x4   :  { %146 = vmatpush.bf16.msra.mxu0 %v464_v3  ;;  %495 = vmatpush.bf16.msra.mxu2 %v464_v3  ;;  %v460_v11 = vor.u32 %v491_v8, %v457_v9  ;;  %v490_v13 = vld [vmem:[%s775_s1 + $0x54] sm:$0xf0]  ;;  %v489_v14 = vld [vmem:[%s775_s1 + $0x54] sm:$0xf]  ;;  %v449_v15 = vld [vmem:[%s775_s1 + $0x58] sm:$0xf0] }
   0x5   :  { %165 = vmatpush.bf16.msra.mxu1 %v468_v7  ;;  %503 = vmatpush.bf16.msra.mxu3 %v468_v7  ;;  %v448_v16 = vor.u32 %v490_v13, %v447_v12  ;;  %v452_v17 = vor.u32 %v489_v14, %v449_v15  ;;  %v439_v18 = vld [vmem:[%s775_s1 + $0x40] sm:$0xf]  ;;  %v488_v19 = vld [vmem:[%s775_s1 + $0x44] sm:$0xf0]  ;;  %v487_v20 = vld [vmem:[%s775_s1 + $0x44] sm:$0xf] }
   0x6   :  { %v441_v21 = vld [vmem:[%s775_s1 + $0x48] sm:$0xf0]  ;;  %v440_v22 = vor.u32 %v488_v19, %v439_v18  ;;  %v431_v24 = vld [vmem:[%s775_s1 + $0x30] sm:$0xf]  ;;  %v486_v25 = vld [vmem:[%s775_s1 + $0x34] sm:$0xf0] }
   0x7   :  { %v444_v23 = vor.u32 %v487_v20, %v441_v21  ;;  %v485_v26 = vld [vmem:[%s775_s1 + $0x34] sm:$0xf]  ;;  %v433_v27 = vld [vmem:[%s775_s1 + $0x38] sm:$0xf0]  ;;  %v432_v28 = vor.u32 %v486_v25, %v431_v24  ;;  %v423_v30 = vld [vmem:[%s775_s1 + $0x20] sm:$0xf] }
   0x8   :  { %147 = vmatpush.bf16.msra.mxu0 %v456_v10  ;;  %496 = vmatpush.bf16.msra.mxu2 %v456_v10  ;;  %v436_v29 = vor.u32 %v485_v26, %v433_v27  ;;  %v484_v31 = vld [vmem:[%s775_s1 + $0x24] sm:$0xf0]  ;;  %v483_v32 = vld [vmem:[%s775_s1 + $0x24] sm:$0xf]  ;;  %v425_v33 = vld [vmem:[%s775_s1 + $0x28] sm:$0xf0] }
   0x9   :  { %166 = vmatpush.bf16.msra.mxu1 %v460_v11  ;;  %504 = vmatpush.bf16.msra.mxu3 %v460_v11  ;;  %v424_v34 = vor.u32 %v484_v31, %v423_v30  ;;  %v428_v35 = vor.u32 %v483_v32, %v425_v33  ;;  %v415_v36 = vld [vmem:[%s775_s1 + $0x10] sm:$0xf]  ;;  %v482_v37 = vld [vmem:[%s775_s1 + $0x14] sm:$0xf0]  ;;  %v481_v38 = vld [vmem:[%s775_s1 + $0x14] sm:$0xf] }
   0xa   :  { %v417_v39 = vld [vmem:[%s775_s1 + $0x18] sm:$0xf0]  ;;  %v416_v40 = vor.u32 %v482_v37, %v415_v36  ;;  %v407_v42 = vld [vmem:[%s775_s1] sm:$0xf]  ;;  %v480_v43 = vld [vmem:[%s775_s1 + $0x4] sm:$0xf0] }
   0xb   :  { %v420_v41 = vor.u32 %v481_v38, %v417_v39  ;;  %v479_v44 = vld [vmem:[%s775_s1 + $0x4] sm:$0xf]  ;;  %v409_v45 = vld [vmem:[%s775_s1 + $0x8] sm:$0xf0]  ;;  %v408_v46 = vor.u32 %v480_v43, %v407_v42  ;;  %v211_v50 = vld [vmem:[%s777_s2] sm:$0x3] }
   0xc   :  { %148 = vmatpush.bf16.msra.mxu0 %v448_v16  ;;  %497 = vmatpush.bf16.msra.mxu2 %v448_v16  ;;  %v412_v47 = vor.u32 %v479_v44, %v409_v45  ;;  %v477_v48 = vld [vmem:[%s776_s0] sm:$0xff]  ;;  %v478_v49 = vld [vmem:[%s776_s0 + $0x8] sm:$0xff]  ;;  %v213_v51 = vperm.slane %v211_v50, 0  ;;  %v214_v52 = vperm.slane %v211_v50, 1 }
   0xd   :  { %167 = vmatpush.bf16.msra.mxu1 %v452_v17  ;;  %505 = vmatpush.bf16.msra.mxu3 %v452_v17 }
  0x10   :  { %149 = vmatpush.bf16.msra.mxu0 %v440_v22  ;;  %498 = vmatpush.bf16.msra.mxu2 %v440_v22 }
  0x11   :  { %168 = vmatpush.bf16.msra.mxu1 %v444_v23  ;;  %506 = vmatpush.bf16.msra.mxu3 %v444_v23 }
  0x14   :  { %150 = vmatpush.bf16.msra.mxu0 %v432_v28  ;;  %499 = vmatpush.bf16.msra.mxu2 %v432_v28 }
  0x15   :  { %169 = vmatpush.bf16.msra.mxu1 %v436_v29  ;;  %507 = vmatpush.bf16.msra.mxu3 %v436_v29 }
  0x18   :  { %151 = vmatpush.bf16.msra.mxu0 %v424_v34  ;;  %500 = vmatpush.bf16.msra.mxu2 %v424_v34 }
  0x19   :  { %170 = vmatpush.bf16.msra.mxu1 %v428_v35  ;;  %508 = vmatpush.bf16.msra.mxu3 %v428_v35 }
  0x1c   :  { %152 = vmatpush.bf16.msra.mxu0 %v416_v40  ;;  %501 = vmatpush.bf16.msra.mxu2 %v416_v40 }
  0x1d   :  { %171 = vmatpush.bf16.msra.mxu1 %v420_v41  ;;  %509 = vmatpush.bf16.msra.mxu3 %v420_v41 }
  0x20   :  { %153 = vmatpush.bf16.msra.mxu0 %v408_v46  ;;  %502 = vmatpush.bf16.msra.mxu2 %v408_v46 }
  0x21   :  { %172 = vmatpush.bf16.msra.mxu1 %v412_v47  ;;  %510 = vmatpush.bf16.msra.mxu3 %v412_v47 }
  0x23   :  { %154 = vmatmul.bf16.vlgmr.msra.gmra.mxu0 %v477_v48  ;;  %159 = vmatmul.bf16.vlgmr.msra.gmra.mxu2 %v478_v49 }
  0x24   :  { %173 = vmatmul.bf16.vlgmr.msra.gmra.mxu1 %v477_v48  ;;  %178 = vmatmul.bf16.vlgmr.msra.gmra.mxu3 %v478_v49 }
  0xa0   :  { %v155_v53 = vpop.f32.mrf.mxu0 }
  0xa1   :  { %v668_v54 = vadd.f32 %v213_v51, %v155_v53  ;;  %v174_v55 = vpop.f32.mrf.mxu1 }
  0xa2   :  { %v670_v56 = vadd.f32 %v214_v52, %v174_v55 }
  0xa3   :  { %v469_v57 = vmul.f32 -1.442695, %v668_v54 }
  0xa4   :  { %v470_v58 = vmul.f32 -1.442695, %v670_v56 }
  0xa5   :  { %511 = vpow2.f32 %v469_v57 }
  0xa6   :  { %513 = vpow2.f32 %v470_v58  ;;  %v160_v59 = vpop.f32.mrf.mxu2 }
  0xa7   :  { %v674_v60 = vadd.f32 %v213_v51, %v160_v59  ;;  %v179_v61 = vpop.f32.mrf.mxu3 }
  0xa8   :  { %v676_v62 = vadd.f32 %v214_v52, %v179_v61  ;;  %v157_v63 = vpop.f32.mrf.mxu0 }
  0xa9   :  { %v473_v0 = vmul.f32 -1.442695, %v674_v60  ;;  %v679_v1 = vadd.f32 %v213_v51, %v157_v63  ;;  %v176_v2 = vpop.f32.mrf.mxu1 }
  0xaa   :  { %v474_v3 = vmul.f32 -1.442695, %v676_v62  ;;  %v682_v4 = vadd.f32 %v214_v52, %v176_v2 }
  0xab   :  { %v512_v5 = vpop.eup %511  ;;  %515 = vpow2.f32 %v473_v0  ;;  %v471_v6 = vmul.f32 -1.442695, %v679_v1 }
  0xac   :  { %v514_v7 = vpop.eup %513  ;;  %v249_v8 = vadd.f32 1.0, %v512_v5  ;;  %517 = vpow2.f32 %v474_v3  ;;  %v472_v9 = vmul.f32 -1.442695, %v682_v4 }
  0xad   :  { %v250_v10 = vadd.f32 1.0, %v514_v7  ;;  %519 = vpow2.f32 %v471_v6 }
  0xae   :  { %521 = vrcp.f32 %v249_v8  ;;  %v162_v11 = vpop.f32.mrf.mxu2  ;;  %v266_v14 = vand.u32 2147483647, %v249_v8  ;;  %v268_v15 = vand.u32 2147483648, %v249_v8  ;;  %vm262_vm0 = vweird.f32 %v249_v8 }
  0xaf   :  { %523 = vrcp.f32 %v250_v10  ;;  %v686_v12 = vadd.f32 %v213_v51, %v162_v11  ;;  %v281_v17 = vand.u32 2147483647, %v250_v10  ;;  %v283_v18 = vand.u32 2147483648, %v250_v10  ;;  %v181_v22 = vpop.f32.mrf.mxu3 }
  0xb0   :  { %525 = vpow2.f32 %v472_v9  ;;  %vm277_vm1 = vweird.f32 %v250_v10  ;;  %vm694_vm2 = vcmp.eq.f32.partialorder %v266_v14, 8.507059e+37  ;;  %v269_v28 = vor.u32 1.1754944e-38, %v268_v15 }
  0xb1   :  { %v516_v13 = vpop.eup %515  ;;  %v475_v24 = vmul.f32 -1.442695, %v686_v12  ;;  %vm699_vm3 = vcmp.eq.f32.partialorder %v281_v17, 8.507059e+37  ;;  %v284_v32 = vor.u32 1.1754944e-38, %v283_v18  ;;  %v703_v33 = vadd.f32 %v214_v52, %v181_v22 }
  0xb2   :  { %v518_v16 = vpop.eup %517  ;;  %v688_v19 = vadd.f32 1.0, %v516_v13 }
  0xb3   :  { %v520_v20 = vpop.eup %519  ;;  %v690_v21 = vadd.f32 1.0, %v518_v16  ;;  %v476_v45 = vmul.f32 -1.442695, %v703_v33 }
  0xb4   :  { %v522_v23 = vpop.eup %521  ;;  %527 = vrcp.f32 %v688_v19  ;;  %v326_v35 = vand.u32 2147483647, %v688_v19  ;;  %v328_v36 = vand.u32 2147483648, %v688_v19  ;;  %v707_v37 = vadd.f32 1.0, %v520_v20 }
  0xb5   :  { %v524_v25 = vpop.eup %523  ;;  %v258_v26 = vmul.f32 %v522_v23, %v249_v8  ;;  %529 = vrcp.f32 %v690_v21  ;;  %vm263_vm4 = vweird.f32 %v522_v23  ;;  %v341_v41 = vand.u32 2147483647, %v690_v21 }
  0xb6   :  { %v526_v29 = vpop.eup %525  ;;  %v273_v30 = vmul.f32 %v524_v25, %v250_v10  ;;  %531 = vpow2.f32 %v475_v24  ;;  %v343_v42 = vand.u32 2147483648, %v690_v21  ;;  %vm278_vm5 = vweird.f32 %v524_v25  ;;  %vm264_vm8 = vmor %vm262_vm0, %vm263_vm4 }
  0xb7   :  { %v259_v34 = vsub.f32 1.0, %v258_v26  ;;  %v709_v39 = vadd.f32 1.0, %v526_v29  ;;  %533 = vrcp.f32 %v707_v37  ;;  %vm322_vm6 = vweird.f32 %v688_v19  ;;  %vm279_vm10 = vmor %vm277_vm1, %vm278_vm5 }
  0xb8   :  { %v274_v38 = vsub.f32 1.0, %v273_v30  ;;  %vm337_vm7 = vweird.f32 %v690_v21  ;;  %vm721_vm9 = vcmp.eq.f32.partialorder %v326_v35, 8.507059e+37  ;;  %v329_v51 = vor.u32 1.1754944e-38, %v328_v36 }
  0xb9   :  { %v260_v40 = vmul.f32 %v522_v23, %v259_v34  ;;  %535 = vrcp.f32 %v709_v39  ;;  %vm727_vm11 = vcmp.eq.f32.partialorder %v341_v41, 8.507059e+37  ;;  %v344_v58 = vor.u32 1.1754944e-38, %v343_v42 }
  0xba   :  { %v528_v43 = vpop.eup %527  ;;  %v275_v44 = vmul.f32 %v524_v25, %v274_v38  ;;  %vm292_vm12 = vweird.f32 %v707_v37  ;;  %v296_v13 = vand.u32 2147483647, %v707_v37  ;;  %v298_v14 = vand.u32 2147483648, %v707_v37 }
  0xbb   :  { %v530_v46 = vpop.eup %529  ;;  %v261_v47 = vadd.f32 %v522_v23, %v260_v40  ;;  %v318_v48 = vmul.f32 %v528_v43, %v688_v19  ;;  %vm323_vm13 = vweird.f32 %v528_v43  ;;  %v311_v20 = vand.u32 2147483647, %v709_v39 }
  0xbc   :  { %v276_v49 = vadd.f32 %v524_v25, %v275_v44  ;;  %v333_v52 = vmul.f32 %v530_v46, %v690_v21  ;;  %v532_v59 = vpop.eup %531  ;;  %vm338_vm14 = vweird.f32 %v530_v46  ;;  %vm324_vm15 = vmor %vm322_vm6, %vm323_vm13  ;;  %v313_v26 = vand.u32 2147483648, %v709_v39 }
  0xbd   :  { %v265_v53 = vsel %vm264_vm8, %v522_v23, %v261_v47  ;;  %v319_v55 = vsub.f32 1.0, %v318_v48  ;;  %v534_v2 = vpop.eup %533  ;;  %v255_v15 = vadd.f32 1.0, %v532_v59  ;;  %vm339_vm0 = vmor %vm337_vm7, %vm338_vm14  ;;  %vm297_vm4 = vcmp.eq.f32.partialorder %v296_v13, 8.507059e+37 }
  0xbe   :  { %v270_v61 = vsel %vm694_vm2, %v269_v28, %v265_v53  ;;  %v280_v63 = vsel %vm279_vm10, %v524_v25, %v276_v49  ;;  %v334_v0 = vsub.f32 1.0, %v333_v52  ;;  %v288_v9 = vmul.f32 %v534_v2, %v707_v37 }
  0xbf   :  { %v377_v3 = vmul.f32 %v270_v61, %v668_v54  ;;  %v285_v5 = vsel %vm699_vm3, %v284_v32, %v280_v63  ;;  %v320_v6 = vmul.f32 %v528_v43, %v319_v55  ;;  %v536_v10 = vpop.eup %535  ;;  %vm293_vm1 = vweird.f32 %v534_v2 }
  0xc0   :  { %v378_v7 = vmul.f32 %v285_v5, %v670_v56  ;;  %v335_v8 = vmul.f32 %v530_v46, %v334_v0  ;;  %v289_v17 = vsub.f32 1.0, %v288_v9  ;;  %v303_v18 = vmul.f32 %v536_v10, %v709_v39  ;;  %vm294_vm3 = vmor %vm292_vm12, %vm293_vm1 }
  0xc1   :  { %v321_v11 = vadd.f32 %v528_v43, %v320_v6  ;;  %537 = vrcp.f32 %v255_v15  ;;  %vm308_vm2 = vweird.f32 %v536_v10  ;;  %v299_v30 = vor.u32 1.1754944e-38, %v298_v14 }
  0xc2   :  { %v385_v16 = vpack.c.bf16 %v378_v7, %v377_v3  ;;  %v336_v54 = vadd.f32 %v530_v46, %v335_v8  ;;  %v290_v23 = vmul.f32 %v534_v2, %v289_v17  ;;  %v304_v24 = vsub.f32 1.0, %v303_v18 }
  0xc3   :  { %v325_v56 = vsel %vm324_vm15, %v528_v43, %v321_v11  ;;  %539 = vpow2.f32 %v476_v45  ;;  %vm307_vm5 = vweird.f32 %v709_v39  ;;  %v314_v36 = vor.u32 1.1754944e-38, %v313_v26 }
  0xc4   :  { %389 = vst [vmem:[%s778_s3] sm:$0xff] %v385_v16  ;;  %v330_v19 = vsel %vm721_vm9, %v329_v51, %v325_v56  ;;  %v340_v22 = vsel %vm339_vm0, %v530_v46, %v336_v54  ;;  %v291_v28 = vadd.f32 %v534_v2, %v290_v23  ;;  %v305_v29 = vmul.f32 %v536_v10, %v304_v24  ;;  %vm309_vm6 = vmor %vm307_vm5, %vm308_vm2 }
  0xc5   :  { %v381_v25 = vmul.f32 %v330_v19, %v674_v60  ;;  %v345_v21 = vsel %vm727_vm11, %v344_v58, %v340_v22  ;;  %vm312_vm7 = vcmp.eq.f32.partialorder %v311_v20, 8.507059e+37  ;;  %vm352_vm9 = vweird.f32 %v255_v15 }
  0xc6   :  { %v382_v27 = vmul.f32 %v345_v21, %v676_v62  ;;  %v295_v32 = vsel %vm294_vm3, %v534_v2, %v291_v28  ;;  %v306_v60 = vadd.f32 %v536_v10, %v305_v29  ;;  %v356_v48 = vand.u32 2147483647, %v255_v15 }
  0xc7   :  { %v538_v34 = vpop.eup %537  ;;  %v300_v35 = vsel %vm297_vm4, %v299_v30, %v295_v32 }
  0xc8   :  { %v387_v31 = vpack.c.bf16 %v382_v27, %v381_v25  ;;  %v379_v62 = vmul.f32 %v300_v35, %v679_v1  ;;  %v310_v37 = vsel %vm309_vm6, %v536_v10, %v306_v60  ;;  %v348_v38 = vmul.f32 %v538_v34, %v255_v15 }
  0xc9   :  { %v315_v40 = vsel %vm312_vm7, %v314_v36, %v310_v37  ;;  %v540_v41 = vpop.eup %539  ;;  %vm353_vm8 = vweird.f32 %v538_v34  ;;  %v358_v1 = vand.u32 2147483648, %v255_v15  ;;  %vm357_vm11 = vcmp.eq.f32.partialorder %v356_v48, 8.507059e+37 }
  0xca   :  { %391 = vst [vmem:[%s778_s3 + $0x10] sm:$0xff] %v387_v31  ;;  %v380_v42 = vmul.f32 %v315_v40, %v682_v4  ;;  %v349_v43 = vsub.f32 1.0, %v348_v38  ;;  %v256_v39 = vadd.f32 1.0, %v540_v41  ;;  %vm354_vm10 = vmor %vm352_vm9, %vm353_vm8 }
  0xcb   :  { %v359_v4 = vor.u32 1.1754944e-38, %v358_v1 }
  0xcc   :  { %v386_v44 = vpack.c.bf16 %v380_v42, %v379_v62  ;;  %541 = vrcp.f32 %v256_v39  ;;  %v350_v45 = vmul.f32 %v538_v34, %v349_v43  ;;  %v373_v52 = vand.u32 2147483648, %v256_v39 }
  0xcd   :  { %v371_v55 = vand.u32 2147483647, %v256_v39  ;;  %vm367_vm13 = vweird.f32 %v256_v39 }
  0xce   :  { %390 = vst [vmem:[%s778_s3 + $0x8] sm:$0xff] %v386_v44  ;;  %v351_v46 = vadd.f32 %v538_v34, %v350_v45  ;;  %v374_v59 = vor.u32 1.1754944e-38, %v373_v52 }
  0xcf   :  { %vm372_vm15 = vcmp.eq.f32.partialorder %v371_v55, 8.507059e+37 }
  0xd0   :  { %v355_v50 = vsel %vm354_vm10, %v538_v34, %v351_v46 }
  0xd1   :  { %v360_v57 = vsel %vm357_vm11, %v359_v4, %v355_v50 }
  0xd2   :  { %v542_v47 = vpop.eup %541  ;;  %v383_v61 = vmul.f32 %v360_v57, %v686_v12 }
  0xd3   :  { %v363_v49 = vmul.f32 %v542_v47, %v256_v39  ;;  %vm368_vm12 = vweird.f32 %v542_v47 }
  0xd4   :  { %vm369_vm14 = vmor %vm367_vm13, %vm368_vm12 }
  0xd5   :  { %v364_v51 = vsub.f32 1.0, %v363_v49 }
  0xd7   :  { %v365_v53 = vmul.f32 %v542_v47, %v364_v51 }
  0xd9   :  { %v366_v58 = vadd.f32 %v542_v47, %v365_v53 }
  0xdb   :  { %v370_v63 = vsel %vm369_vm14, %v542_v47, %v366_v58 }
  0xdc   :  { %v375_v0 = vsel %vm372_vm15, %v374_v59, %v370_v63 }
  0xdd   :  { %v384_v2 = vmul.f32 %v375_v0, %v703_v33 }
  0xdf   :  { %v388_v3 = vpack.c.bf16 %v384_v2, %v383_v61 }
  0xe1   :  { %392 = vst [vmem:[%s778_s3 + $0x18] sm:$0xff] %v388_v3 }

// kernel: _lambda_.35
= control target key start
LH: loop header
LB: loop body
LE: loop exit
PB: predicated region body
PF: predicated region fallthrough
CT: control target
= control target key end

     0   :  { %v88_v0 = vmov 0.0   ;;  %vm64_vm0 = vcmask 1041408   ;;  %vm72_vm1 = vcmask 1041409   ;;  %vm74_vm2 = vcmask 1043459   ;;  %s120_s1 = inlined_call_operand.vmem [shape: f32[2,256], index: 1, kind: output, shape index: {}]   ;;  %s121_s0 = inlined_call_operand.vmem [shape: bf16[2,16,256], index: 0, kind: input, shape index: {}]  }
   0x1   :  { %12 = vst [vmem:[%s120_s1] sm:$0xf] %v88_v0  ;;  %v14_v1 = vld [vmem:[%s121_s0] sm:$0xff]  ;;  %v15_v2 = vld [vmem:[%s121_s0 + $0x8] sm:$0xff]  ;;  %v16_v3 = vld [vmem:[%s121_s0 + $0x10] sm:$0xff]  ;;  %vm76_vm3 = vcmask 1045509   ;;  %vm78_vm4 = vcmask 1047559  }
   0x2   :  { %v17_v4 = vld [vmem:[%s121_s0 + $0x18] sm:$0xff]  ;;  %v18_v5 = vunpack.c.l.bf16 %v14_v1  ;;  %v19_v6 = vunpack.c.h.bf16 %v14_v1  ;;  %v20_v7 = vunpack.c.l.bf16 %v15_v2  ;;  %v21_v8 = vunpack.c.h.bf16 %v15_v2 }
   0x3   :  { %v22_v9 = vunpack.c.l.bf16 %v16_v3  ;;  %v23_v10 = vunpack.c.h.bf16 %v16_v3  ;;  %v24_v11 = vunpack.c.l.bf16 %v17_v4  ;;  %v25_v12 = vunpack.c.h.bf16 %v17_v4 }
   0x4   :  { %v26_v13 = vadd.f32 %v20_v7, %v18_v5  ;;  %v33_v14 = vadd.f32 %v21_v8, %v19_v6 }
   0x5   :  { %v40_v15 = vadd.f32 %v24_v11, %v22_v9  ;;  %v47_v16 = vadd.f32 %v25_v12, %v23_v10 }
   0x6   :  { %v27_v17 = vrot.slane %v26_v13, 4  ;;  %v34_v18 = vrot.slane %v33_v14, 4 }
   0x7   :  { %v41_v19 = vrot.slane %v40_v15, 4  ;;  %v48_v20 = vrot.slane %v47_v16, 4 }
   0x8   :  { %v28_v21 = vadd.f32 %v27_v17, %v26_v13  ;;  %v35_v22 = vadd.f32 %v34_v18, %v33_v14  ;;  %v13_v51 = vld [vmem:[%s120_s1] sm:$0xf] }
   0x9   :  { %v42_v23 = vadd.f32 %v41_v19, %v40_v15  ;;  %v49_v24 = vadd.f32 %v48_v20, %v47_v16 }
   0xa   :  { %v29_v25 = vrot.slane %v28_v21, 2  ;;  %v36_v26 = vrot.slane %v35_v22, 2 }
   0xb   :  { %v43_v27 = vrot.slane %v42_v23, 2  ;;  %v50_v28 = vrot.slane %v49_v24, 2 }
   0xc   :  { %v30_v29 = vadd.f32 %v29_v25, %v28_v21  ;;  %v37_v30 = vadd.f32 %v36_v26, %v35_v22 }
   0xd   :  { %v44_v31 = vadd.f32 %v43_v27, %v42_v23  ;;  %v51_v32 = vadd.f32 %v50_v28, %v49_v24 }
   0xe   :  { %v31_v33 = vrot.slane %v30_v29, 1  ;;  %v38_v34 = vrot.slane %v37_v30, 1 }
   0xf   :  { %v45_v35 = vrot.slane %v44_v31, 1  ;;  %v52_v36 = vrot.slane %v51_v32, 1 }
  0x10   :  { %v32_v37 = vadd.f32 %v31_v33, %v30_v29  ;;  %v39_v38 = vadd.f32 %v38_v34, %v37_v30 }
  0x11   :  { %v46_v39 = vadd.f32 %v45_v35, %v44_v31  ;;  %v53_v40 = vadd.f32 %v52_v36, %v51_v32 }
  0x12   :  { %v55_v41 = vmul.f32 0.0625, %v39_v38  ;;  %v54_v42 = vmul.f32 0.0625, %v32_v37 }
  0x13   :  { %v56_v43 = vmul.f32 0.0625, %v46_v39  ;;  %v57_v44 = vmul.f32 0.0625, %v53_v40 }
  0x14   :  { %v62_v45 = vrot.slane %v55_v41, 6 }
  0x15   :  { %v63_v46 = vrot.slane %v57_v44, 6 }
  0x16   :  { %v65_v47 = vsel %vm64_vm0, %v54_v42, %v62_v45 }
  0x17   :  { %v66_v48 = vsel %vm64_vm0, %v56_v43, %v63_v46 }
  0x18   :  { %v71_v49 = vrot.slane %v66_v48, 7 }
  0x1a   :  { %v73_v50 = vsel %vm72_vm1, %v71_v49, %v65_v47 }
  0x1b   :  { %v75_v52 = vsel %vm74_vm2, %v71_v49, %v73_v50 }
  0x1c   :  { %v77_v53 = vsel %vm76_vm3, %v71_v49, %v75_v52 }
  0x1d   :  { %v79_v54 = vsel %vm78_vm4, %v71_v49, %v77_v53 }
  0x1e   :  { %v81_v55 = vadd.f32 %v79_v54, %v13_v51 }
  0x20   :  { %82 = vst [vmem:[%s120_s1] sm:$0xf] %v81_v55 }

// kernel: _lambda_.34
= control target key start
LH: loop header
LB: loop body
LE: loop exit
PB: predicated region body
PF: predicated region fallthrough
CT: control target
= control target key end

     0   :  { %s981_s0 = inlined_call_operand.vmem [shape: bf16[9,32,256], index: 0, kind: input, shape index: {}]   ;;  %s982_s1 = inlined_call_operand.vmem [shape: f32[9,1,256], index: 1, kind: input, shape index: {}]   ;;  %s983_s2 = inlined_call_operand.vmem [shape: f32[1,256], index: 2, kind: input, shape index: {}]   ;;  %s984_s3 = inlined_call_operand.vmem [shape: bf16[32,256], index: 3, kind: output, shape index: {}]  }
   0x1   :  { %v14_v0 = vld [vmem:[%s981_s0] sm:$0xff]  ;;  %v15_v1 = vld [vmem:[%s981_s0 + $0x8] sm:$0xff]  ;;  %v16_v2 = vld [vmem:[%s981_s0 + $0x10] sm:$0xff] }
   0x2   :  { %v17_v3 = vld [vmem:[%s981_s0 + $0x18] sm:$0xff]  ;;  %v26_v4 = vld [vmem:[%s982_s1] sm:$0x3]  ;;  %v18_v6 = vunpack.c.l.bf16 %v14_v0  ;;  %v19_v7 = vunpack.c.h.bf16 %v14_v0  ;;  %v20_v8 = vunpack.c.l.bf16 %v15_v1  ;;  %v21_v9 = vunpack.c.h.bf16 %v15_v1  ;;  %v523_v10 = vld [vmem:[%s981_s0 + $0x28] sm:$0xff] }
   0x3   :  { %v522_v5 = vld [vmem:[%s981_s0 + $0x20] sm:$0xff]  ;;  %v524_v11 = vld [vmem:[%s981_s0 + $0x30] sm:$0xff]  ;;  %v22_v12 = vunpack.c.l.bf16 %v16_v2  ;;  %v23_v13 = vunpack.c.h.bf16 %v16_v2  ;;  %v28_v14 = vperm.slane %v26_v4, 0  ;;  %v29_v15 = vperm.slane %v26_v4, 1  ;;  %v525_v18 = vld [vmem:[%s981_s0 + $0x38] sm:$0xff] }
   0x4   :  { %v24_v16 = vunpack.c.l.bf16 %v17_v3  ;;  %v25_v17 = vunpack.c.h.bf16 %v17_v3  ;;  %v53_v19 = vunpack.c.l.bf16 %v522_v5  ;;  %v54_v20 = vunpack.c.h.bf16 %v522_v5  ;;  %v526_v21 = vld [vmem:[%s982_s1 + $0x2] sm:$0x3]  ;;  %v528_v39 = vld [vmem:[%s981_s0 + $0x48] sm:$0xff]  ;;  %v529_v46 = vld [vmem:[%s981_s0 + $0x50] sm:$0xff] }
   0x5   :  { %v55_v22 = vunpack.c.l.bf16 %v523_v10  ;;  %v56_v23 = vunpack.c.h.bf16 %v523_v10  ;;  %v57_v24 = vunpack.c.l.bf16 %v524_v11  ;;  %v58_v25 = vunpack.c.h.bf16 %v524_v11  ;;  %v527_v34 = vld [vmem:[%s981_s0 + $0x40] sm:$0xff]  ;;  %v530_v47 = vld [vmem:[%s981_s0 + $0x58] sm:$0xff] }
   0x6   :  { %v32_v26 = vmul.f32 %v28_v14, %v18_v6  ;;  %v33_v27 = vmul.f32 %v29_v15, %v19_v7  ;;  %v34_v28 = vmul.f32 %v28_v14, %v20_v8  ;;  %v35_v29 = vmul.f32 %v29_v15, %v21_v9  ;;  %v531_v54 = vld [vmem:[%s982_s1 + $0x4] sm:$0x3]  ;;  %v533_v6 = vld [vmem:[%s981_s0 + $0x68] sm:$0xff]  ;;  %v534_v7 = vld [vmem:[%s981_s0 + $0x70] sm:$0xff] }
   0x7   :  { %v59_v30 = vunpack.c.l.bf16 %v525_v18  ;;  %v60_v31 = vunpack.c.h.bf16 %v525_v18  ;;  %v64_v32 = vperm.slane %v526_v21, 0  ;;  %v65_v33 = vperm.slane %v526_v21, 1  ;;  %v532_v59 = vld [vmem:[%s981_s0 + $0x60] sm:$0xff]  ;;  %v535_v18 = vld [vmem:[%s981_s0 + $0x78] sm:$0xff] }
   0x8   :  { %v36_v35 = vmul.f32 %v28_v14, %v22_v12  ;;  %v37_v36 = vmul.f32 %v29_v15, %v23_v13  ;;  %v38_v37 = vmul.f32 %v28_v14, %v24_v16  ;;  %v39_v38 = vmul.f32 %v29_v15, %v25_v17 }
   0x9   :  { %v68_v40 = vmul.f32 %v64_v32, %v53_v19  ;;  %v69_v41 = vmul.f32 %v65_v33, %v54_v20  ;;  %v70_v42 = vmul.f32 %v64_v32, %v55_v22  ;;  %v71_v43 = vmul.f32 %v65_v33, %v56_v23  ;;  %v536_v19 = vld [vmem:[%s982_s1 + $0x6] sm:$0x3] }
   0xa   :  { %v72_v44 = vmul.f32 %v64_v32, %v57_v24  ;;  %v73_v45 = vmul.f32 %v65_v33, %v58_v25  ;;  %v89_v48 = vunpack.c.l.bf16 %v527_v34  ;;  %v90_v49 = vunpack.c.h.bf16 %v527_v34 }
   0xb   :  { %v74_v50 = vmul.f32 %v64_v32, %v59_v30  ;;  %v75_v51 = vmul.f32 %v65_v33, %v60_v31  ;;  %v91_v52 = vunpack.c.l.bf16 %v528_v39  ;;  %v92_v53 = vunpack.c.h.bf16 %v528_v39  ;;  %v537_v32 = vld [vmem:[%s981_s0 + $0x80] sm:$0xff] }
   0xc   :  { %v76_v55 = vadd.f32 %v68_v40, %v32_v26  ;;  %v77_v56 = vadd.f32 %v69_v41, %v33_v27  ;;  %v78_v57 = vadd.f32 %v70_v42, %v34_v28  ;;  %v79_v58 = vadd.f32 %v71_v43, %v35_v29 }
   0xd   :  { %v93_v60 = vunpack.c.l.bf16 %v529_v46  ;;  %v94_v61 = vunpack.c.h.bf16 %v529_v46  ;;  %v95_v62 = vunpack.c.l.bf16 %v530_v47  ;;  %v96_v63 = vunpack.c.h.bf16 %v530_v47 }
   0xe   :  { %v80_v0 = vadd.f32 %v72_v44, %v36_v35  ;;  %v81_v1 = vadd.f32 %v73_v45, %v37_v36  ;;  %v100_v2 = vperm.slane %v531_v54, 0  ;;  %v101_v3 = vperm.slane %v531_v54, 1  ;;  %v539_v44 = vld [vmem:[%s981_s0 + $0x90] sm:$0xff]  ;;  %v540_v45 = vld [vmem:[%s981_s0 + $0x98] sm:$0xff] }
   0xf   :  { %v82_v4 = vadd.f32 %v74_v50, %v38_v37  ;;  %v83_v5 = vadd.f32 %v75_v51, %v39_v38  ;;  %v125_v8 = vunpack.c.l.bf16 %v532_v59  ;;  %v126_v9 = vunpack.c.h.bf16 %v532_v59  ;;  %v538_v37 = vld [vmem:[%s981_s0 + $0x88] sm:$0xff] }
  0x10   :  { %v104_v10 = vmul.f32 %v100_v2, %v89_v48  ;;  %v105_v11 = vmul.f32 %v101_v3, %v90_v49  ;;  %v106_v12 = vmul.f32 %v100_v2, %v91_v52  ;;  %v107_v13 = vmul.f32 %v101_v3, %v92_v53  ;;  %v541_v52 = vld [vmem:[%s982_s1 + $0x8] sm:$0x3] }
  0x11   :  { %v108_v14 = vmul.f32 %v100_v2, %v93_v60  ;;  %v109_v15 = vmul.f32 %v101_v3, %v94_v61  ;;  %v110_v16 = vmul.f32 %v100_v2, %v95_v62  ;;  %v111_v17 = vmul.f32 %v101_v3, %v96_v63 }
  0x12   :  { %v127_v20 = vunpack.c.l.bf16 %v533_v6  ;;  %v128_v21 = vunpack.c.h.bf16 %v533_v6  ;;  %v129_v22 = vunpack.c.l.bf16 %v534_v7  ;;  %v130_v23 = vunpack.c.h.bf16 %v534_v7 }
  0x13   :  { %v112_v24 = vadd.f32 %v104_v10, %v76_v55  ;;  %v113_v25 = vadd.f32 %v105_v11, %v77_v56  ;;  %v114_v26 = vadd.f32 %v106_v12, %v78_v57  ;;  %v115_v27 = vadd.f32 %v107_v13, %v79_v58  ;;  %v542_v57 = vld [vmem:[%s981_s0 + $0xa0] sm:$0xff] }
  0x14   :  { %v131_v28 = vunpack.c.l.bf16 %v535_v18  ;;  %v132_v29 = vunpack.c.h.bf16 %v535_v18  ;;  %v136_v30 = vperm.slane %v536_v19, 0  ;;  %v137_v31 = vperm.slane %v536_v19, 1 }
  0x15   :  { %v116_v33 = vadd.f32 %v108_v14, %v80_v0  ;;  %v117_v34 = vadd.f32 %v109_v15, %v81_v1  ;;  %v118_v35 = vadd.f32 %v110_v16, %v82_v4  ;;  %v119_v36 = vadd.f32 %v111_v17, %v83_v5  ;;  %v543_v4 = vld [vmem:[%s981_s0 + $0xa8] sm:$0xff]  ;;  %v544_v5 = vld [vmem:[%s981_s0 + $0xb0] sm:$0xff]  ;;  %v545_v16 = vld [vmem:[%s981_s0 + $0xb8] sm:$0xff] }
  0x16   :  { %v140_v38 = vmul.f32 %v136_v30, %v125_v8  ;;  %v141_v39 = vmul.f32 %v137_v31, %v126_v9  ;;  %v142_v40 = vmul.f32 %v136_v30, %v127_v20  ;;  %v143_v41 = vmul.f32 %v137_v31, %v128_v21  ;;  %v546_v17 = vld [vmem:[%s982_s1 + $0xa] sm:$0x3] }
  0x17   :  { %v144_v42 = vmul.f32 %v136_v30, %v129_v22  ;;  %v145_v43 = vmul.f32 %v137_v31, %v130_v23  ;;  %v161_v46 = vunpack.c.l.bf16 %v537_v32  ;;  %v162_v47 = vunpack.c.h.bf16 %v537_v32 }
  0x18   :  { %v146_v48 = vmul.f32 %v136_v30, %v131_v28  ;;  %v147_v49 = vmul.f32 %v137_v31, %v132_v29  ;;  %v163_v50 = vunpack.c.l.bf16 %v538_v37  ;;  %v164_v51 = vunpack.c.h.bf16 %v538_v37  ;;  %v547_v30 = vld [vmem:[%s981_s0 + $0xc0] sm:$0xff] }
  0x19   :  { %v148_v53 = vadd.f32 %v140_v38, %v112_v24  ;;  %v149_v54 = vadd.f32 %v141_v39, %v113_v25  ;;  %v150_v55 = vadd.f32 %v142_v40, %v114_v26  ;;  %v151_v56 = vadd.f32 %v143_v41, %v115_v27 }
  0x1a   :  { %v165_v58 = vunpack.c.l.bf16 %v539_v44  ;;  %v166_v59 = vunpack.c.h.bf16 %v539_v44  ;;  %v167_v60 = vunpack.c.l.bf16 %v540_v45  ;;  %v168_v61 = vunpack.c.h.bf16 %v540_v45 }
  0x1b   :  { %v152_v62 = vadd.f32 %v144_v42, %v116_v33  ;;  %v153_v63 = vadd.f32 %v145_v43, %v117_v34  ;;  %v172_v0 = vperm.slane %v541_v52, 0  ;;  %v173_v1 = vperm.slane %v541_v52, 1  ;;  %v549_v42 = vld [vmem:[%s981_s0 + $0xd0] sm:$0xff]  ;;  %v550_v43 = vld [vmem:[%s981_s0 + $0xd8] sm:$0xff] }
  0x1c   :  { %v154_v2 = vadd.f32 %v146_v48, %v118_v35  ;;  %v155_v3 = vadd.f32 %v147_v49, %v119_v36  ;;  %v197_v6 = vunpack.c.l.bf16 %v542_v57  ;;  %v198_v7 = vunpack.c.h.bf16 %v542_v57  ;;  %v548_v35 = vld [vmem:[%s981_s0 + $0xc8] sm:$0xff] }
  0x1d   :  { %v176_v8 = vmul.f32 %v172_v0, %v161_v46  ;;  %v177_v9 = vmul.f32 %v173_v1, %v162_v47  ;;  %v178_v10 = vmul.f32 %v172_v0, %v163_v50  ;;  %v179_v11 = vmul.f32 %v173_v1, %v164_v51  ;;  %v551_v50 = vld [vmem:[%s982_s1 + $0xc] sm:$0x3] }
  0x1e   :  { %v180_v12 = vmul.f32 %v172_v0, %v165_v58  ;;  %v181_v13 = vmul.f32 %v173_v1, %v166_v59  ;;  %v182_v14 = vmul.f32 %v172_v0, %v167_v60  ;;  %v183_v15 = vmul.f32 %v173_v1, %v168_v61 }
  0x1f   :  { %v199_v18 = vunpack.c.l.bf16 %v543_v4  ;;  %v200_v19 = vunpack.c.h.bf16 %v543_v4  ;;  %v201_v20 = vunpack.c.l.bf16 %v544_v5  ;;  %v202_v21 = vunpack.c.h.bf16 %v544_v5 }
  0x20   :  { %v184_v22 = vadd.f32 %v176_v8, %v148_v53  ;;  %v185_v23 = vadd.f32 %v177_v9, %v149_v54  ;;  %v186_v24 = vadd.f32 %v178_v10, %v150_v55  ;;  %v187_v25 = vadd.f32 %v179_v11, %v151_v56  ;;  %v552_v55 = vld [vmem:[%s981_s0 + $0xe0] sm:$0xff] }
  0x21   :  { %v203_v26 = vunpack.c.l.bf16 %v545_v16  ;;  %v204_v27 = vunpack.c.h.bf16 %v545_v16  ;;  %v208_v28 = vperm.slane %v546_v17, 0  ;;  %v209_v29 = vperm.slane %v546_v17, 1 }
  0x22   :  { %v188_v31 = vadd.f32 %v180_v12, %v152_v62  ;;  %v189_v32 = vadd.f32 %v181_v13, %v153_v63  ;;  %v190_v33 = vadd.f32 %v182_v14, %v154_v2  ;;  %v191_v34 = vadd.f32 %v183_v15, %v155_v3  ;;  %v553_v2 = vld [vmem:[%s981_s0 + $0xe8] sm:$0xff]  ;;  %v554_v3 = vld [vmem:[%s981_s0 + $0xf0] sm:$0xff]  ;;  %v555_v14 = vld [vmem:[%s981_s0 + $0xf8] sm:$0xff] }
  0x23   :  { %v212_v36 = vmul.f32 %v208_v28, %v197_v6  ;;  %v213_v37 = vmul.f32 %v209_v29, %v198_v7  ;;  %v214_v38 = vmul.f32 %v208_v28, %v199_v18  ;;  %v215_v39 = vmul.f32 %v209_v29, %v200_v19  ;;  %v556_v15 = vld [vmem:[%s982_s1 + $0xe] sm:$0x3] }
  0x24   :  { %v216_v40 = vmul.f32 %v208_v28, %v201_v20  ;;  %v217_v41 = vmul.f32 %v209_v29, %v202_v21  ;;  %v233_v44 = vunpack.c.l.bf16 %v547_v30  ;;  %v234_v45 = vunpack.c.h.bf16 %v547_v30 }
  0x25   :  { %v218_v46 = vmul.f32 %v208_v28, %v203_v26  ;;  %v219_v47 = vmul.f32 %v209_v29, %v204_v27  ;;  %v235_v48 = vunpack.c.l.bf16 %v548_v35  ;;  %v236_v49 = vunpack.c.h.bf16 %v548_v35  ;;  %v557_v28 = vld [vmem:[%s981_s0 + $0x100] sm:$0xff] }
  0x26   :  { %v220_v51 = vadd.f32 %v212_v36, %v184_v22  ;;  %v221_v52 = vadd.f32 %v213_v37, %v185_v23  ;;  %v222_v53 = vadd.f32 %v214_v38, %v186_v24  ;;  %v223_v54 = vadd.f32 %v215_v39, %v187_v25 }
  0x27   :  { %v237_v56 = vunpack.c.l.bf16 %v549_v42  ;;  %v238_v57 = vunpack.c.h.bf16 %v549_v42  ;;  %v239_v58 = vunpack.c.l.bf16 %v550_v43  ;;  %v240_v59 = vunpack.c.h.bf16 %v550_v43 }
  0x28   :  { %v224_v60 = vadd.f32 %v216_v40, %v188_v31  ;;  %v225_v61 = vadd.f32 %v217_v41, %v189_v32  ;;  %v244_v62 = vperm.slane %v551_v50, 0  ;;  %v245_v63 = vperm.slane %v551_v50, 1  ;;  %v559_v40 = vld [vmem:[%s981_s0 + $0x110] sm:$0xff]  ;;  %v560_v41 = vld [vmem:[%s981_s0 + $0x118] sm:$0xff] }
  0x29   :  { %v226_v0 = vadd.f32 %v218_v46, %v190_v33  ;;  %v227_v1 = vadd.f32 %v219_v47, %v191_v34  ;;  %v269_v4 = vunpack.c.l.bf16 %v552_v55  ;;  %v270_v5 = vunpack.c.h.bf16 %v552_v55  ;;  %v558_v33 = vld [vmem:[%s981_s0 + $0x108] sm:$0xff] }
  0x2a   :  { %v248_v6 = vmul.f32 %v244_v62, %v233_v44  ;;  %v249_v7 = vmul.f32 %v245_v63, %v234_v45  ;;  %v250_v8 = vmul.f32 %v244_v62, %v235_v48  ;;  %v251_v9 = vmul.f32 %v245_v63, %v236_v49  ;;  %v561_v48 = vld [vmem:[%s982_s1 + $0x10] sm:$0x3] }
  0x2b   :  { %v252_v10 = vmul.f32 %v244_v62, %v237_v56  ;;  %v253_v11 = vmul.f32 %v245_v63, %v238_v57  ;;  %v254_v12 = vmul.f32 %v244_v62, %v239_v58  ;;  %v255_v13 = vmul.f32 %v245_v63, %v240_v59 }
  0x2c   :  { %v271_v16 = vunpack.c.l.bf16 %v553_v2  ;;  %v272_v17 = vunpack.c.h.bf16 %v553_v2  ;;  %v273_v18 = vunpack.c.l.bf16 %v554_v3  ;;  %v274_v19 = vunpack.c.h.bf16 %v554_v3 }
  0x2d   :  { %v256_v20 = vadd.f32 %v248_v6, %v220_v51  ;;  %v257_v21 = vadd.f32 %v249_v7, %v221_v52  ;;  %v258_v22 = vadd.f32 %v250_v8, %v222_v53  ;;  %v259_v23 = vadd.f32 %v251_v9, %v223_v54  ;;  %v336_v53 = vld [vmem:[%s983_s2] sm:$0x3] }
  0x2e   :  { %v275_v24 = vunpack.c.l.bf16 %v555_v14  ;;  %v276_v25 = vunpack.c.h.bf16 %v555_v14  ;;  %v280_v26 = vperm.slane %v556_v15, 0  ;;  %v281_v27 = vperm.slane %v556_v15, 1 }
  0x2f   :  { %v260_v29 = vadd.f32 %v252_v10, %v224_v60  ;;  %v261_v30 = vadd.f32 %v253_v11, %v225_v61  ;;  %v262_v31 = vadd.f32 %v254_v12, %v226_v0  ;;  %v263_v32 = vadd.f32 %v255_v13, %v227_v1 }
  0x30   :  { %v284_v34 = vmul.f32 %v280_v26, %v269_v4  ;;  %v285_v35 = vmul.f32 %v281_v27, %v270_v5  ;;  %v286_v36 = vmul.f32 %v280_v26, %v271_v16  ;;  %v287_v37 = vmul.f32 %v281_v27, %v272_v17 }
  0x31   :  { %v288_v38 = vmul.f32 %v280_v26, %v273_v18  ;;  %v289_v39 = vmul.f32 %v281_v27, %v274_v19  ;;  %v305_v42 = vunpack.c.l.bf16 %v557_v28  ;;  %v306_v43 = vunpack.c.h.bf16 %v557_v28 }
  0x32   :  { %v290_v44 = vmul.f32 %v280_v26, %v275_v24  ;;  %v291_v45 = vmul.f32 %v281_v27, %v276_v25  ;;  %v307_v46 = vunpack.c.l.bf16 %v558_v33  ;;  %v308_v47 = vunpack.c.h.bf16 %v558_v33 }
  0x33   :  { %v292_v49 = vadd.f32 %v284_v34, %v256_v20  ;;  %v293_v50 = vadd.f32 %v285_v35, %v257_v21  ;;  %v294_v51 = vadd.f32 %v286_v36, %v258_v22  ;;  %v295_v52 = vadd.f32 %v287_v37, %v259_v23 }
  0x34   :  { %v309_v54 = vunpack.c.l.bf16 %v559_v40  ;;  %v310_v55 = vunpack.c.h.bf16 %v559_v40  ;;  %v311_v56 = vunpack.c.l.bf16 %v560_v41  ;;  %v312_v57 = vunpack.c.h.bf16 %v560_v41 }
  0x35   :  { %v296_v58 = vadd.f32 %v288_v38, %v260_v29  ;;  %v297_v59 = vadd.f32 %v289_v39, %v261_v30  ;;  %v316_v60 = vperm.slane %v561_v48, 0  ;;  %v317_v61 = vperm.slane %v561_v48, 1 }
  0x36   :  { %v298_v62 = vadd.f32 %v290_v44, %v262_v31  ;;  %v299_v63 = vadd.f32 %v291_v45, %v263_v32  ;;  %v338_v0 = vperm.slane %v336_v53, 0  ;;  %v339_v1 = vperm.slane %v336_v53, 1 }
  0x37   :  { %v320_v2 = vmul.f32 %v316_v60, %v305_v42  ;;  %v321_v3 = vmul.f32 %v317_v61, %v306_v43  ;;  %v322_v4 = vmul.f32 %v316_v60, %v307_v46  ;;  %v323_v5 = vmul.f32 %v317_v61, %v308_v47 }
  0x38   :  { %v324_v6 = vmul.f32 %v316_v60, %v309_v54  ;;  %v325_v7 = vmul.f32 %v317_v61, %v310_v55  ;;  %v326_v8 = vmul.f32 %v316_v60, %v311_v56  ;;  %v327_v9 = vmul.f32 %v317_v61, %v312_v57 }
  0x39   :  { %v328_v10 = vadd.f32 %v320_v2, %v292_v49  ;;  %v329_v11 = vadd.f32 %v321_v3, %v293_v50  ;;  %v330_v12 = vadd.f32 %v322_v4, %v294_v51  ;;  %v331_v13 = vadd.f32 %v323_v5, %v295_v52 }
  0x3a   :  { %v332_v14 = vadd.f32 %v324_v6, %v296_v58  ;;  %v333_v15 = vadd.f32 %v325_v7, %v297_v59  ;;  %v334_v16 = vadd.f32 %v326_v8, %v298_v62  ;;  %v335_v17 = vadd.f32 %v327_v9, %v299_v63 }
  0x3b   :  { %v760_v18 = vadd.f32 %v338_v0, %v328_v10  ;;  %v762_v19 = vadd.f32 %v339_v1, %v329_v11  ;;  %v764_v20 = vadd.f32 %v338_v0, %v330_v12  ;;  %v766_v21 = vadd.f32 %v339_v1, %v331_v13 }
  0x3c   :  { %v768_v22 = vadd.f32 %v338_v0, %v332_v14  ;;  %v770_v23 = vadd.f32 %v339_v1, %v333_v15  ;;  %v775_v27 = vadd.f32 %v338_v0, %v334_v16  ;;  %v778_v29 = vadd.f32 %v339_v1, %v335_v17 }
  0x3d   :  { %v562_v24 = vmul.f32 -1.442695, %v760_v18  ;;  %v563_v25 = vmul.f32 -1.442695, %v762_v19  ;;  %v564_v26 = vmul.f32 -1.442695, %v764_v20 }
  0x3e   :  { %v565_v28 = vmul.f32 -1.442695, %v766_v21  ;;  %v566_v30 = vmul.f32 -1.442695, %v768_v22  ;;  %v567_v31 = vmul.f32 -1.442695, %v770_v23 }
  0x3f   :  { %570 = vpow2.f32 %v562_v24  ;;  %v568_v32 = vmul.f32 -1.442695, %v775_v27  ;;  %v569_v33 = vmul.f32 -1.442695, %v778_v29 }
  0x40   :  { %572 = vpow2.f32 %v563_v25 }
  0x41   :  { %574 = vpow2.f32 %v564_v26 }
  0x42   :  { %576 = vpow2.f32 %v565_v28 }
  0x43   :  { %578 = vpow2.f32 %v566_v30 }
  0x44   :  { %580 = vpow2.f32 %v567_v31 }
  0x45   :  { %v571_v34 = vpop.eup %570  ;;  %582 = vpow2.f32 %v568_v32 }
  0x46   :  { %v573_v35 = vpop.eup %572  ;;  %v374_v36 = vadd.f32 1.0, %v571_v34  ;;  %584 = vpow2.f32 %v569_v33 }
  0x47   :  { %v575_v37 = vpop.eup %574  ;;  %v784_v38 = vadd.f32 1.0, %v573_v35 }
  0x48   :  { %v577_v39 = vpop.eup %576  ;;  %v786_v40 = vadd.f32 1.0, %v575_v37  ;;  %586 = vrcp.f32 %v374_v36  ;;  %v393_v45 = vand.u32 2147483648, %v374_v36  ;;  %vm387_vm0 = vweird.f32 %v374_v36 }
  0x49   :  { %v579_v41 = vpop.eup %578  ;;  %v788_v42 = vadd.f32 1.0, %v577_v39  ;;  %588 = vrcp.f32 %v784_v38  ;;  %v408_v46 = vand.u32 2147483648, %v784_v38  ;;  %v391_v48 = vand.u32 2147483647, %v374_v36 }
  0x4a   :  { %v581_v43 = vpop.eup %580  ;;  %v791_v44 = vadd.f32 1.0, %v579_v41  ;;  %590 = vrcp.f32 %v786_v40  ;;  %vm402_vm1 = vweird.f32 %v784_v38  ;;  %v406_v51 = vand.u32 2147483647, %v784_v38 }
  0x4b   :  { %v583_v47 = vpop.eup %582  ;;  %v796_v50 = vadd.f32 1.0, %v581_v43  ;;  %v423_v52 = vand.u32 2147483648, %v786_v40  ;;  %592 = vrcp.f32 %v788_v42  ;;  %v803_v54 = vor.u32 1.1754944e-38, %v393_v45 }
  0x4c   :  { %v585_v49 = vpop.eup %584  ;;  %vm417_vm2 = vweird.f32 %v786_v40  ;;  %v421_v55 = vand.u32 2147483647, %v786_v40  ;;  %594 = vrcp.f32 %v791_v44  ;;  %v810_v57 = vadd.f32 1.0, %v583_v47 }
  0x4d   :  { %v813_v59 = vor.u32 1.1754944e-38, %v408_v46  ;;  %v436_v60 = vand.u32 2147483647, %v788_v42  ;;  %v816_v61 = vadd.f32 1.0, %v585_v49  ;;  %vm432_vm3 = vweird.f32 %v788_v42 }
  0x4e   :  { %v801_v53 = vpop.eup %586  ;;  %v438_v63 = vand.u32 2147483648, %v788_v42  ;;  %vm825_vm5 = vcmp.eq.f32.partialorder %v391_v48, 8.507059e+37  ;;  %vm829_vm6 = vcmp.eq.f32.partialorder %v406_v51, 8.507059e+37  ;;  %v424_v4 = vor.u32 1.1754944e-38, %v423_v52 }
  0x4f   :  { %v808_v56 = vpop.eup %588  ;;  %v383_v58 = vmul.f32 %v801_v53, %v374_v36  ;;  %vm388_vm4 = vweird.f32 %v801_v53  ;;  %596 = vrcp.f32 %v796_v50  ;;  %vm837_vm8 = vcmp.eq.f32.partialorder %v421_v55, 8.507059e+37 }
  0x50   :  { %v398_v62 = vmul.f32 %v808_v56, %v784_v38  ;;  %v822_v0 = vpop.eup %590  ;;  %vm403_vm7 = vweird.f32 %v808_v56  ;;  %vm447_vm9 = vweird.f32 %v791_v44  ;;  %vm843_vm10 = vcmp.eq.f32.partialorder %v436_v60, 8.507059e+37  ;;  %vm856_vm12 = vmor %vm387_vm0, %vm388_vm4 }
  0x51   :  { %v384_v1 = vsub.f32 1.0, %v383_v58  ;;  %v413_v6 = vmul.f32 %v822_v0, %v786_v40  ;;  %v593_v8 = vpop.eup %592  ;;  %v451_v11 = vand.u32 2147483647, %v791_v44  ;;  %v453_v12 = vand.u32 2147483648, %v791_v44  ;;  %vm867_vm13 = vmor %vm402_vm1, %vm403_vm7 }
  0x52   :  { %v399_v5 = vsub.f32 1.0, %v398_v62  ;;  %v595_v13 = vpop.eup %594  ;;  %vm418_vm11 = vweird.f32 %v822_v0  ;;  %v428_v16 = vmul.f32 %v593_v8, %v788_v42  ;;  %v439_v25 = vor.u32 1.1754944e-38, %v438_v63 }
  0x53   :  { %v385_v9 = vmul.f32 %v801_v53, %v384_v1  ;;  %v414_v15 = vsub.f32 1.0, %v413_v6  ;;  %v443_v26 = vmul.f32 %v595_v13, %v791_v44  ;;  %v466_v28 = vand.u32 2147483647, %v796_v50  ;;  %vm874_vm15 = vmor %vm417_vm2, %vm418_vm11 }
  0x54   :  { %v400_v14 = vmul.f32 %v808_v56, %v399_v5  ;;  %v429_v33 = vsub.f32 1.0, %v428_v16  ;;  %vm433_vm14 = vweird.f32 %v593_v8  ;;  %vm448_vm0 = vweird.f32 %v595_v13 }
  0x55   :  { %v386_v17 = vadd.f32 %v801_v53, %v385_v9  ;;  %v415_v32 = vmul.f32 %v822_v0, %v414_v15  ;;  %v597_v34 = vpop.eup %596  ;;  %v444_v36 = vsub.f32 1.0, %v443_v26  ;;  %vm462_vm4 = vweird.f32 %v796_v50  ;;  %vm893_vm2 = vmor %vm432_vm3, %vm433_vm14 }
  0x56   :  { %v401_v30 = vadd.f32 %v808_v56, %v400_v14  ;;  %598 = vrcp.f32 %v810_v57  ;;  %v430_v38 = vmul.f32 %v593_v8, %v429_v33  ;;  %vm881_vm1 = vcmp.eq.f32.partialorder %v451_v11, 8.507059e+37  ;;  %vm903_vm7 = vmor %vm447_vm9, %vm448_vm0 }
  0x57   :  { %v416_v37 = vadd.f32 %v822_v0, %v415_v32  ;;  %v454_v41 = vor.u32 1.1754944e-38, %v453_v12  ;;  %v390_v40 = vsel %vm856_vm12, %v801_v53, %v386_v17  ;;  %v445_v46 = vmul.f32 %v595_v13, %v444_v36 }
  0x58   :  { %v405_v43 = vsel %vm867_vm13, %v808_v56, %v401_v30  ;;  %v458_v47 = vmul.f32 %v597_v34, %v796_v50  ;;  %v431_v49 = vadd.f32 %v593_v8, %v430_v38  ;;  %vm907_vm11 = vcmp.eq.f32.partialorder %v466_v28, 8.507059e+37 }
  0x59   :  { %v420_v48 = vsel %vm874_vm15, %v822_v0, %v416_v37  ;;  %v468_v52 = vand.u32 2147483648, %v796_v50  ;;  %v446_v53 = vadd.f32 %v595_v13, %v445_v46  ;;  %vm463_vm3 = vweird.f32 %v597_v34 }
  0x5a   :  { %v459_v55 = vsub.f32 1.0, %v458_v47  ;;  %vm477_vm12 = vweird.f32 %v810_v57  ;;  %v395_v56 = vsel %vm825_vm5, %v803_v54, %v390_v40  ;;  %v410_v44 = vsel %vm829_vm6, %v813_v59, %v405_v43  ;;  %vm932_vm5 = vmor %vm462_vm4, %vm463_vm3 }
  0x5b   :  { %v435_v58 = vsel %vm893_vm2, %v593_v8, %v431_v49  ;;  %600 = vrcp.f32 %v816_v61  ;;  %v425_v62 = vsel %vm837_vm8, %v424_v4, %v420_v48  ;;  %v450_v0 = vsel %vm903_vm7, %v595_v13, %v446_v53 }
  0x5c   :  { %v599_v60 = vpop.eup %598  ;;  %v440_v63 = vsel %vm843_vm10, %v439_v25, %v435_v58  ;;  %v460_v54 = vmul.f32 %v597_v34, %v459_v55  ;;  %v455_v1 = vsel %vm881_vm1, %v454_v41, %v450_v0  ;;  %v469_v2 = vor.u32 1.1754944e-38, %v468_v52 }
  0x5d   :  { %v473_v3 = vmul.f32 %v599_v60, %v810_v57  ;;  %v481_v4 = vand.u32 2147483647, %v810_v57  ;;  %v483_v6 = vand.u32 2147483648, %v810_v57  ;;  %v502_v7 = vmul.f32 %v395_v56, %v760_v18 }
  0x5e   :  { %v461_v5 = vadd.f32 %v597_v34, %v460_v54  ;;  %v503_v8 = vmul.f32 %v410_v44, %v762_v19  ;;  %vm478_vm6 = vweird.f32 %v599_v60  ;;  %v504_v50 = vmul.f32 %v425_v62, %v764_v20 }
  0x5f   :  { %v474_v9 = vsub.f32 1.0, %v473_v3  ;;  %v505_v10 = vmul.f32 %v440_v63, %v766_v21  ;;  %v506_v12 = vmul.f32 %v455_v1, %v768_v22  ;;  %vm950_vm8 = vmor %vm477_vm12, %vm478_vm6  ;;  %vm954_vm9 = vcmp.eq.f32.partialorder %v481_v4, 8.507059e+37 }
  0x60   :  { %v465_v11 = vsel %vm932_vm5, %v597_v34, %v461_v5  ;;  %v510_v13 = vpack.c.bf16 %v503_v8, %v502_v7  ;;  %v484_v24 = vor.u32 1.1754944e-38, %v483_v6  ;;  %vm492_vm10 = vweird.f32 %v816_v61 }
  0x61   :  { %v601_v14 = vpop.eup %600  ;;  %v470_v15 = vsel %vm907_vm11, %v469_v2, %v465_v11  ;;  %v475_v16 = vmul.f32 %v599_v60, %v474_v9  ;;  %v511_v18 = vpack.c.bf16 %v505_v10, %v504_v50  ;;  %v498_v57 = vand.u32 2147483648, %v816_v61 }
  0x62   :  { %v488_v21 = vmul.f32 %v601_v14, %v816_v61  ;;  %v507_v22 = vmul.f32 %v470_v15, %v770_v23  ;;  %514 = vst [vmem:[%s984_s3] sm:$0xff] %v510_v13  ;;  %vm493_vm13 = vweird.f32 %v601_v14  ;;  %v496_v26 = vand.u32 2147483647, %v816_v61 }
  0x63   :  { %v476_v17 = vadd.f32 %v599_v60, %v475_v16  ;;  %515 = vst [vmem:[%s984_s3 + $0x8] sm:$0xff] %v511_v18  ;;  %vm494_vm14 = vmor %vm492_vm10, %vm493_vm13  ;;  %v499_v32 = vor.u32 1.1754944e-38, %v498_v57 }
  0x64   :  { %v489_v25 = vsub.f32 1.0, %v488_v21  ;;  %v512_v28 = vpack.c.bf16 %v507_v22, %v506_v12  ;;  %vm497_vm15 = vcmp.eq.f32.partialorder %v496_v26, 8.507059e+37 }
  0x65   :  { %v480_v23 = vsel %vm950_vm8, %v599_v60, %v476_v17 }
  0x66   :  { %v490_v30 = vmul.f32 %v601_v14, %v489_v25  ;;  %516 = vst [vmem:[%s984_s3 + $0x10] sm:$0xff] %v512_v28  ;;  %v485_v31 = vsel %vm954_vm9, %v484_v24, %v480_v23 }
  0x67   :  { %v508_v35 = vmul.f32 %v485_v31, %v775_v27 }
  0x68   :  { %v491_v33 = vadd.f32 %v601_v14, %v490_v30 }
  0x6a   :  { %v495_v34 = vsel %vm494_vm14, %v601_v14, %v491_v33 }
  0x6b   :  { %v500_v61 = vsel %vm497_vm15, %v499_v32, %v495_v34 }
  0x6c   :  { %v509_v36 = vmul.f32 %v500_v61, %v778_v29 }
  0x6e   :  { %v513_v37 = vpack.c.bf16 %v509_v36, %v508_v35 }
  0x70   :  { %517 = vst [vmem:[%s984_s3 + $0x18] sm:$0xff] %v513_v37 }

// kernel: _lambda_.36
= control target key start
LH: loop header
LB: loop body
LE: loop exit
PB: predicated region body
PF: predicated region fallthrough
CT: control target
= control target key end

     0   :  { %s381_s1 = inlined_call_operand.vmem [shape: bf16[256,128], index: 1, kind: input, shape index: {}]   ;;  %s382_s0 = inlined_call_operand.vmem [shape: bf16[8,256], index: 0, kind: input, shape index: {}]   ;;  %s383_s2 = inlined_call_operand.vmem [shape: f32[1,128], index: 2, kind: input, shape index: {}]   ;;  %s384_s3 = inlined_call_operand.vmem [shape: f32[8,128], index: 3, kind: output, shape index: {}]  }
   0x1   :  { %v290_v0 = vld [vmem:[%s381_s1 + $0x38] sm:$0xff]  ;;  %v289_v2 = vld [vmem:[%s381_s1 + $0x30] sm:$0xff]  ;;  %v288_v4 = vld [vmem:[%s381_s1 + $0x28] sm:$0xff] }
   0x2   :  { %v298_v1 = vld [vmem:[%s381_s1 + $0x78] sm:$0xff]  ;;  %156 = vmatpush.bf16.msra.mxu0 %v290_v0  ;;  %v297_v3 = vld [vmem:[%s381_s1 + $0x70] sm:$0xff]  ;;  %v296_v5 = vld [vmem:[%s381_s1 + $0x68] sm:$0xff] }
   0x3   :  { %169 = vmatpush.bf16.msra.mxu1 %v298_v1  ;;  %v287_v6 = vld [vmem:[%s381_s1 + $0x20] sm:$0xff]  ;;  %v286_v8 = vld [vmem:[%s381_s1 + $0x18] sm:$0xff]  ;;  %v285_v10 = vld [vmem:[%s381_s1 + $0x10] sm:$0xff] }
   0x4   :  { %v295_v7 = vld [vmem:[%s381_s1 + $0x60] sm:$0xff]  ;;  %v294_v9 = vld [vmem:[%s381_s1 + $0x58] sm:$0xff]  ;;  %v293_v11 = vld [vmem:[%s381_s1 + $0x50] sm:$0xff] }
   0x5   :  { %v284_v12 = vld [vmem:[%s381_s1 + $0x8] sm:$0xff]  ;;  %v20_v14 = vld [vmem:[%s382_s0] sm:$0xff] }
   0x6   :  { %157 = vmatpush.bf16.msra.mxu0 %v289_v2  ;;  %v292_v13 = vld [vmem:[%s381_s1 + $0x48] sm:$0xff]  ;;  %v54_v15 = vunpack.c.l.b16 %v20_v14  ;;  %v55_v16 = vunpack.c.h.b16 %v20_v14  ;;  %v283_v17 = vld [vmem:[%s381_s1] sm:$0xff] }
   0x7   :  { %170 = vmatpush.bf16.msra.mxu1 %v297_v3  ;;  %v291_v18 = vld [vmem:[%s381_s1 + $0x40] sm:$0xff] }
   0x8   :  { %v56_v19 = vpack.c.b16 %v54_v15, %v54_v15  ;;  %v57_v20 = vpack.c.b16 %v55_v16, %v55_v16  ;;  %v299_v21 = vld [vmem:[%s383_s2] ss:$0 sm:$0xff] }
   0xa   :  { %158 = vmatpush.bf16.msra.mxu0 %v288_v4 }
   0xb   :  { %171 = vmatpush.bf16.msra.mxu1 %v296_v5 }
   0xe   :  { %159 = vmatpush.bf16.msra.mxu0 %v287_v6 }
   0xf   :  { %172 = vmatpush.bf16.msra.mxu1 %v295_v7 }
  0x12   :  { %160 = vmatpush.bf16.msra.mxu0 %v286_v8 }
  0x13   :  { %173 = vmatpush.bf16.msra.mxu1 %v294_v9 }
  0x16   :  { %161 = vmatpush.bf16.msra.mxu0 %v285_v10 }
  0x17   :  { %174 = vmatpush.bf16.msra.mxu1 %v293_v11 }
  0x1a   :  { %162 = vmatpush.bf16.msra.mxu0 %v284_v12 }
  0x1b   :  { %175 = vmatpush.bf16.msra.mxu1 %v292_v13 }
  0x1e   :  { %163 = vmatpush.bf16.msra.mxu0 %v283_v17 }
  0x1f   :  { %176 = vmatpush.bf16.msra.mxu1 %v291_v18 }
  0x21   :  { %164 = vmatmul.bf16.vlgmr.msra.gmra.mxu0 %v56_v19 }
  0x22   :  { %177 = vmatmul.bf16.vlgmr.msra.gmra.mxu1 %v57_v20 }
  0x9e   :  { %v165_v22 = vpop.f32.mrf.mxu0 }
  0x9f   :  { %v178_v23 = vpop.f32.mrf.mxu1 }
  0xa0   :  { %v179_v24 = vadd.f32 %v178_v23, %v165_v22 }
  0xa2   :  { %v192_v25 = vadd.f32 %v299_v21, %v179_v24 }
  0xa4   :  { %v282_v26 = vmul.f32 -1.442695, %v192_v25 }
  0xa6   :  { %300 = vpow2.f32 %v282_v26  ;;  %v167_v27 = vpop.f32.mrf.mxu0 }
  0xa7   :  { %v180_v28 = vpop.f32.mrf.mxu1 }
  0xac   :  { %v301_v29 = vpop.eup %300 }
  0xad   :  { %v196_v30 = vadd.f32 1.0, %v301_v29 }
  0xaf   :  { %302 = vrcp.f32 %v196_v30  ;;  %v208_v34 = vand.u32 2147483648, %v196_v30  ;;  %v206_v36 = vand.u32 2147483647, %v196_v30  ;;  %vm202_vm1 = vweird.f32 %v196_v30 }
  0xb1   :  { %v209_v38 = vor.u32 1.1754944e-38, %v208_v34  ;;  %vm207_vm3 = vcmp.eq.f32.partialorder %v206_v36, 8.507059e+37 }
  0xb5   :  { %v303_v31 = vpop.eup %302 }
  0xb6   :  { %v198_v32 = vmul.f32 %v303_v31, %v196_v30  ;;  %vm203_vm0 = vweird.f32 %v303_v31 }
  0xb7   :  { %vm204_vm2 = vmor %vm202_vm1, %vm203_vm0 }
  0xb8   :  { %v199_v33 = vsub.f32 1.0, %v198_v32 }
  0xba   :  { %v200_v35 = vmul.f32 %v303_v31, %v199_v33 }
  0xbc   :  { %v201_v37 = vadd.f32 %v303_v31, %v200_v35 }
  0xbe   :  { %v205_v39 = vsel %vm204_vm2, %v303_v31, %v201_v37 }
  0xbf   :  { %v210_v40 = vsel %vm207_vm3, %v209_v38, %v205_v39 }
  0xc0   :  { %v212_v41 = vmul.f32 %v210_v40, %v192_v25 }
  0xc2   :  { %213 = vst [vmem:[%s384_s3] sm:$0xff] %v212_v41 }

// kernel: _lambda_.37
= control target key start
LH: loop header
LB: loop body
LE: loop exit
PB: predicated region body
PF: predicated region fallthrough
CT: control target
= control target key end

     0   :  { %s424_s1 = inlined_call_operand.vmem [shape: bf16[128,256], index: 1, kind: input, shape index: {}]   ;;  %s425_s0 = inlined_call_operand.vmem [shape: bf16[8,128], index: 0, kind: input, shape index: {}]   ;;  %s426_s2 = inlined_call_operand.vmem [shape: f32[1,256], index: 2, kind: input, shape index: {}]   ;;  %s427_s3 = inlined_call_operand.vmem [shape: f32[8,256], index: 3, kind: output, shape index: {}]  }
   0x1   :  { %v264_v0 = vld [vmem:[%s424_s1 + $0x70] sm:$0xf]  ;;  %v287_v1 = vld [vmem:[%s424_s1 + $0x74] sm:$0xf0]  ;;  %v286_v2 = vld [vmem:[%s424_s1 + $0x74] sm:$0xf] }
   0x2   :  { %v265_v3 = vor.u32 %v287_v1, %v264_v0  ;;  %v266_v4 = vld [vmem:[%s424_s1 + $0x78] sm:$0xf0]  ;;  %v256_v5 = vld [vmem:[%s424_s1 + $0x60] sm:$0xf]  ;;  %v285_v6 = vld [vmem:[%s424_s1 + $0x64] sm:$0xf0] }
   0x3   :  { %v269_v7 = vor.u32 %v286_v2, %v266_v4  ;;  %v284_v8 = vld [vmem:[%s424_s1 + $0x64] sm:$0xf]  ;;  %v258_v9 = vld [vmem:[%s424_s1 + $0x68] sm:$0xf0]  ;;  %v257_v10 = vor.u32 %v285_v6, %v256_v5  ;;  %v248_v12 = vld [vmem:[%s424_s1 + $0x50] sm:$0xf] }
   0x4   :  { %119 = vmatpush.bf16.msra.mxu0 %v265_v3  ;;  %v261_v11 = vor.u32 %v284_v8, %v258_v9  ;;  %v283_v13 = vld [vmem:[%s424_s1 + $0x54] sm:$0xf0]  ;;  %v282_v14 = vld [vmem:[%s424_s1 + $0x54] sm:$0xf]  ;;  %v250_v15 = vld [vmem:[%s424_s1 + $0x58] sm:$0xf0] }
   0x5   :  { %132 = vmatpush.bf16.msra.mxu1 %v269_v7  ;;  %v249_v16 = vor.u32 %v283_v13, %v248_v12  ;;  %v253_v17 = vor.u32 %v282_v14, %v250_v15  ;;  %v240_v18 = vld [vmem:[%s424_s1 + $0x40] sm:$0xf]  ;;  %v281_v19 = vld [vmem:[%s424_s1 + $0x44] sm:$0xf0]  ;;  %v280_v20 = vld [vmem:[%s424_s1 + $0x44] sm:$0xf] }
   0x6   :  { %v242_v21 = vld [vmem:[%s424_s1 + $0x48] sm:$0xf0]  ;;  %v241_v22 = vor.u32 %v281_v19, %v240_v18  ;;  %v232_v24 = vld [vmem:[%s424_s1 + $0x30] sm:$0xf]  ;;  %v279_v25 = vld [vmem:[%s424_s1 + $0x34] sm:$0xf0] }
   0x7   :  { %v245_v23 = vor.u32 %v280_v20, %v242_v21  ;;  %v278_v26 = vld [vmem:[%s424_s1 + $0x34] sm:$0xf]  ;;  %v234_v27 = vld [vmem:[%s424_s1 + $0x38] sm:$0xf0]  ;;  %v233_v28 = vor.u32 %v279_v25, %v232_v24  ;;  %v224_v30 = vld [vmem:[%s424_s1 + $0x20] sm:$0xf] }
   0x8   :  { %120 = vmatpush.bf16.msra.mxu0 %v257_v10  ;;  %v237_v29 = vor.u32 %v278_v26, %v234_v27  ;;  %v277_v31 = vld [vmem:[%s424_s1 + $0x24] sm:$0xf0]  ;;  %v276_v32 = vld [vmem:[%s424_s1 + $0x24] sm:$0xf]  ;;  %v226_v33 = vld [vmem:[%s424_s1 + $0x28] sm:$0xf0] }
   0x9   :  { %133 = vmatpush.bf16.msra.mxu1 %v261_v11  ;;  %v225_v34 = vor.u32 %v277_v31, %v224_v30  ;;  %v229_v35 = vor.u32 %v276_v32, %v226_v33  ;;  %v216_v36 = vld [vmem:[%s424_s1 + $0x10] sm:$0xf]  ;;  %v275_v37 = vld [vmem:[%s424_s1 + $0x14] sm:$0xf0]  ;;  %v274_v38 = vld [vmem:[%s424_s1 + $0x14] sm:$0xf] }
   0xa   :  { %v218_v39 = vld [vmem:[%s424_s1 + $0x18] sm:$0xf0]  ;;  %v217_v40 = vor.u32 %v275_v37, %v216_v36  ;;  %v208_v42 = vld [vmem:[%s424_s1] sm:$0xf]  ;;  %v273_v43 = vld [vmem:[%s424_s1 + $0x4] sm:$0xf0] }
   0xb   :  { %v221_v41 = vor.u32 %v274_v38, %v218_v39  ;;  %v272_v44 = vld [vmem:[%s424_s1 + $0x4] sm:$0xf]  ;;  %v210_v45 = vld [vmem:[%s424_s1 + $0x8] sm:$0xf0]  ;;  %v209_v46 = vor.u32 %v273_v43, %v208_v42  ;;  %v22_v48 = vld [vmem:[%s425_s0] sm:$0xf] }
   0xc   :  { %121 = vmatpush.bf16.msra.mxu0 %v249_v16  ;;  %v213_v47 = vor.u32 %v272_v44, %v210_v45  ;;  %v154_v49 = vld [vmem:[%s426_s2] sm:$0x3] }
   0xd   :  { %134 = vmatpush.bf16.msra.mxu1 %v253_v17  ;;  %v156_v50 = vperm.slane %v154_v49, 0  ;;  %v157_v51 = vperm.slane %v154_v49, 1 }
  0x10   :  { %122 = vmatpush.bf16.msra.mxu0 %v241_v22 }
  0x11   :  { %135 = vmatpush.bf16.msra.mxu1 %v245_v23 }
  0x14   :  { %123 = vmatpush.bf16.msra.mxu0 %v233_v28 }
  0x15   :  { %136 = vmatpush.bf16.msra.mxu1 %v237_v29 }
  0x18   :  { %124 = vmatpush.bf16.msra.mxu0 %v225_v34 }
  0x19   :  { %137 = vmatpush.bf16.msra.mxu1 %v229_v35 }
  0x1c   :  { %125 = vmatpush.bf16.msra.mxu0 %v217_v40 }
  0x1d   :  { %138 = vmatpush.bf16.msra.mxu1 %v221_v41 }
  0x20   :  { %126 = vmatpush.bf16.msra.mxu0 %v209_v46 }
  0x21   :  { %139 = vmatpush.bf16.msra.mxu1 %v213_v47 }
  0x23   :  { %127 = vmatmul.bf16.vlgmr.msra.gmra.mxu0 %v22_v48 }
  0x24   :  { %140 = vmatmul.bf16.vlgmr.msra.gmra.mxu1 %v22_v48 }
  0xa0   :  { %v128_v52 = vpop.f32.mrf.mxu0 }
  0xa1   :  { %v160_v53 = vadd.f32 %v156_v50, %v128_v52  ;;  %v141_v54 = vpop.f32.mrf.mxu1 }
  0xa2   :  { %v161_v55 = vadd.f32 %v157_v51, %v141_v54 }
  0xa3   :  { %v270_v56 = vmul.f32 -1.442695, %v160_v53 }
  0xa4   :  { %v271_v57 = vmul.f32 -1.442695, %v161_v55 }
  0xa5   :  { %288 = vpow2.f32 %v270_v56 }
  0xa6   :  { %290 = vpow2.f32 %v271_v57 }
  0xa8   :  { %v130_v58 = vpop.f32.mrf.mxu0 }
  0xa9   :  { %v143_v59 = vpop.f32.mrf.mxu1 }
  0xab   :  { %v289_v60 = vpop.eup %288 }
  0xac   :  { %v291_v61 = vpop.eup %290  ;;  %v168_v62 = vadd.f32 1.0, %v289_v60 }
  0xad   :  { %v169_v63 = vadd.f32 1.0, %v291_v61 }
  0xae   :  { %292 = vrcp.f32 %v168_v62  ;;  %v181_v5 = vand.u32 2147483648, %v168_v62  ;;  %v179_v8 = vand.u32 2147483647, %v168_v62  ;;  %vm175_vm2 = vweird.f32 %v168_v62 }
  0xaf   :  { %294 = vrcp.f32 %v169_v63  ;;  %v196_v9 = vand.u32 2147483648, %v169_v63  ;;  %v194_v11 = vand.u32 2147483647, %v169_v63  ;;  %vm190_vm4 = vweird.f32 %v169_v63 }
  0xb0   :  { %v182_v13 = vor.u32 1.1754944e-38, %v181_v5  ;;  %vm180_vm5 = vcmp.eq.f32.partialorder %v179_v8, 8.507059e+37 }
  0xb1   :  { %v197_v16 = vor.u32 1.1754944e-38, %v196_v9  ;;  %vm195_vm7 = vcmp.eq.f32.partialorder %v194_v11, 8.507059e+37 }
  0xb4   :  { %v293_v0 = vpop.eup %292 }
  0xb5   :  { %v295_v1 = vpop.eup %294  ;;  %v171_v2 = vmul.f32 %v293_v0, %v168_v62  ;;  %vm176_vm0 = vweird.f32 %v293_v0 }
  0xb6   :  { %v186_v3 = vmul.f32 %v295_v1, %v169_v63  ;;  %vm191_vm1 = vweird.f32 %v295_v1  ;;  %vm177_vm3 = vmor %vm175_vm2, %vm176_vm0 }
  0xb7   :  { %v172_v4 = vsub.f32 1.0, %v171_v2  ;;  %vm192_vm6 = vmor %vm190_vm4, %vm191_vm1 }
  0xb8   :  { %v187_v6 = vsub.f32 1.0, %v186_v3 }
  0xb9   :  { %v173_v7 = vmul.f32 %v293_v0, %v172_v4 }
  0xba   :  { %v188_v10 = vmul.f32 %v295_v1, %v187_v6 }
  0xbb   :  { %v174_v12 = vadd.f32 %v293_v0, %v173_v7 }
  0xbc   :  { %v189_v14 = vadd.f32 %v295_v1, %v188_v10 }
  0xbd   :  { %v178_v15 = vsel %vm177_vm3, %v293_v0, %v174_v12 }
  0xbe   :  { %v183_v17 = vsel %vm180_vm5, %v182_v13, %v178_v15  ;;  %v193_v18 = vsel %vm192_vm6, %v295_v1, %v189_v14 }
  0xbf   :  { %200 = vst [vmem:[%s427_s3] sm:$0xff] %v183_v17  ;;  %v198_v19 = vsel %vm195_vm7, %v197_v16, %v193_v18 }
  0xc0   :  { %201 = vst [vmem:[%s427_s3 + $0x8] sm:$0xff] %v198_v19 }

// kernel: _lambda_.38
= control target key start
LH: loop header
LB: loop body
LE: loop exit
PB: predicated region body
PF: predicated region fallthrough
CT: control target
= control target key end

     0   :  { %s100_s0 = inlined_call_operand.vmem [shape: bf16[2,16,256], index: 0, kind: input, shape index: {}]   ;;  %s101_s1 = inlined_call_operand.vmem [shape: f32[2,1,256], index: 1, kind: input, shape index: {}]   ;;  %s102_s2 = inlined_call_operand.vmem [shape: bf16[2,16,256], index: 2, kind: output, shape index: {}]  }
   0x1   :  { %v11_v0 = vld [vmem:[%s100_s0] sm:$0xff]  ;;  %v12_v2 = vld [vmem:[%s100_s0 + $0x8] sm:$0xff]  ;;  %v13_v7 = vld [vmem:[%s100_s0 + $0x10] sm:$0xff] }
   0x2   :  { %v23_v1 = vld [vmem:[%s101_s1] sm:$0x3]  ;;  %v15_v3 = vunpack.c.l.bf16 %v11_v0  ;;  %v16_v4 = vunpack.c.h.bf16 %v11_v0  ;;  %v24_v8 = vld [vmem:[%s101_s1 + $0x2] sm:$0x3]  ;;  %v14_v9 = vld [vmem:[%s100_s0 + $0x18] sm:$0xff]  ;;  %v17_v10 = vunpack.c.l.bf16 %v12_v2  ;;  %v18_v11 = vunpack.c.h.bf16 %v12_v2 }
   0x3   :  { %v27_v5 = vperm.slane %v23_v1, 0  ;;  %v28_v6 = vperm.slane %v23_v1, 1  ;;  %v19_v12 = vunpack.c.l.bf16 %v13_v7  ;;  %v20_v13 = vunpack.c.h.bf16 %v13_v7 }
   0x4   :  { %v29_v16 = vperm.slane %v24_v8, 0  ;;  %v30_v17 = vperm.slane %v24_v8, 1  ;;  %v21_v20 = vunpack.c.l.bf16 %v14_v9  ;;  %v22_v21 = vunpack.c.h.bf16 %v14_v9 }
   0x5   :  { %v35_v14 = vmul.f32 %v27_v5, %v15_v3  ;;  %v36_v15 = vmul.f32 %v28_v6, %v16_v4  ;;  %v37_v18 = vmul.f32 %v27_v5, %v17_v10  ;;  %v38_v19 = vmul.f32 %v28_v6, %v18_v11 }
   0x6   :  { %v39_v23 = vmul.f32 %v29_v16, %v19_v12  ;;  %v40_v24 = vmul.f32 %v30_v17, %v20_v13  ;;  %v41_v26 = vmul.f32 %v29_v16, %v21_v20  ;;  %v42_v27 = vmul.f32 %v30_v17, %v22_v21 }
   0x7   :  { %v43_v22 = vpack.c.bf16 %v36_v15, %v35_v14  ;;  %v44_v25 = vpack.c.bf16 %v38_v19, %v37_v18 }
   0x8   :  { %v45_v28 = vpack.c.bf16 %v40_v24, %v39_v23  ;;  %v46_v29 = vpack.c.bf16 %v42_v27, %v41_v26 }
   0x9   :  { %47 = vst [vmem:[%s102_s2] sm:$0xff] %v43_v22 }
   0xa   :  { %48 = vst [vmem:[%s102_s2 + $0x8] sm:$0xff] %v44_v25 }
   0xb   :  { %49 = vst [vmem:[%s102_s2 + $0x10] sm:$0xff] %v45_v28 }
   0xc   :  { %50 = vst [vmem:[%s102_s2 + $0x18] sm:$0xff] %v46_v29 }

// kernel: _lambda_.39
= control target key start
LH: loop header
LB: loop body
LE: loop exit
PB: predicated region body
PF: predicated region fallthrough
CT: control target
= control target key end

     0   :  { %s480_s1 = inlined_call_operand.vmem [shape: bf16[256,128], index: 1, kind: input, shape index: {}]   ;;  %s481_s0 = inlined_call_operand.vmem [shape: bf16[32,256], index: 0, kind: input, shape index: {}]   ;;  %s482_s2 = inlined_call_operand.vmem [shape: f32[1,128], index: 2, kind: input, shape index: {}]   ;;  %s483_s3 = inlined_call_operand.vmem [shape: bf16[32,128], index: 3, kind: output, shape index: {}]  }
   0x1   :  { %v342_v0 = vld [vmem:[%s480_s1 + $0x38] sm:$0xff]  ;;  %v341_v2 = vld [vmem:[%s480_s1 + $0x30] sm:$0xff]  ;;  %v340_v4 = vld [vmem:[%s480_s1 + $0x28] sm:$0xff] }
   0x2   :  { %v350_v1 = vld [vmem:[%s480_s1 + $0x78] sm:$0xff]  ;;  %178 = vmatpush.bf16.msra.mxu0 %v342_v0  ;;  %362 = vmatpush.bf16.msra.mxu2 %v342_v0  ;;  %v349_v3 = vld [vmem:[%s480_s1 + $0x70] sm:$0xff]  ;;  %v348_v5 = vld [vmem:[%s480_s1 + $0x68] sm:$0xff] }
   0x3   :  { %197 = vmatpush.bf16.msra.mxu1 %v350_v1  ;;  %370 = vmatpush.bf16.msra.mxu3 %v350_v1  ;;  %v339_v6 = vld [vmem:[%s480_s1 + $0x20] sm:$0xff]  ;;  %v338_v8 = vld [vmem:[%s480_s1 + $0x18] sm:$0xff]  ;;  %v337_v10 = vld [vmem:[%s480_s1 + $0x10] sm:$0xff] }
   0x4   :  { %v347_v7 = vld [vmem:[%s480_s1 + $0x60] sm:$0xff]  ;;  %v346_v9 = vld [vmem:[%s480_s1 + $0x58] sm:$0xff]  ;;  %v345_v11 = vld [vmem:[%s480_s1 + $0x50] sm:$0xff] }
   0x5   :  { %v336_v12 = vld [vmem:[%s480_s1 + $0x8] sm:$0xff]  ;;  %v335_v14 = vld [vmem:[%s480_s1] sm:$0xff]  ;;  %v261_v18 = vld [vmem:[%s481_s0 + $0x10] sm:$0xf] }
   0x6   :  { %179 = vmatpush.bf16.msra.mxu0 %v341_v2  ;;  %363 = vmatpush.bf16.msra.mxu2 %v341_v2  ;;  %v344_v13 = vld [vmem:[%s480_s1 + $0x48] sm:$0xff]  ;;  %v343_v15 = vld [vmem:[%s480_s1 + $0x40] sm:$0xff]  ;;  %v334_v19 = vld [vmem:[%s481_s0 + $0x14] sm:$0xf0] }
   0x7   :  { %198 = vmatpush.bf16.msra.mxu1 %v349_v3  ;;  %371 = vmatpush.bf16.msra.mxu3 %v349_v3  ;;  %v253_v16 = vld [vmem:[%s481_s0] sm:$0xf]  ;;  %v332_v17 = vld [vmem:[%s481_s0 + $0x4] sm:$0xf0]  ;;  %v331_v20 = vld [vmem:[%s481_s0 + $0x4] sm:$0xf]  ;;  %v262_v25 = vor.u32 %v334_v19, %v261_v18 }
   0x8   :  { %v255_v21 = vld [vmem:[%s481_s0 + $0x8] sm:$0xf0]  ;;  %v333_v22 = vld [vmem:[%s481_s0 + $0x14] sm:$0xf]  ;;  %v263_v23 = vld [vmem:[%s481_s0 + $0x18] sm:$0xf0]  ;;  %v254_v24 = vor.u32 %v332_v17, %v253_v16 }
   0x9   :  { %v258_v26 = vor.u32 %v331_v20, %v255_v21  ;;  %v266_v27 = vor.u32 %v333_v22, %v263_v23  ;;  %v378_v33 = vld [vmem:[%s482_s2] ss:$0 sm:$0xff] }
   0xa   :  { %180 = vmatpush.bf16.msra.mxu0 %v340_v4  ;;  %364 = vmatpush.bf16.msra.mxu2 %v340_v4 }
   0xb   :  { %199 = vmatpush.bf16.msra.mxu1 %v348_v5  ;;  %372 = vmatpush.bf16.msra.mxu3 %v348_v5 }
   0xe   :  { %181 = vmatpush.bf16.msra.mxu0 %v339_v6  ;;  %365 = vmatpush.bf16.msra.mxu2 %v339_v6 }
   0xf   :  { %200 = vmatpush.bf16.msra.mxu1 %v347_v7  ;;  %373 = vmatpush.bf16.msra.mxu3 %v347_v7 }
  0x12   :  { %182 = vmatpush.bf16.msra.mxu0 %v338_v8  ;;  %366 = vmatpush.bf16.msra.mxu2 %v338_v8 }
  0x13   :  { %201 = vmatpush.bf16.msra.mxu1 %v346_v9  ;;  %374 = vmatpush.bf16.msra.mxu3 %v346_v9 }
  0x16   :  { %183 = vmatpush.bf16.msra.mxu0 %v337_v10  ;;  %367 = vmatpush.bf16.msra.mxu2 %v337_v10 }
  0x17   :  { %202 = vmatpush.bf16.msra.mxu1 %v345_v11  ;;  %375 = vmatpush.bf16.msra.mxu3 %v345_v11 }
  0x1a   :  { %184 = vmatpush.bf16.msra.mxu0 %v336_v12  ;;  %368 = vmatpush.bf16.msra.mxu2 %v336_v12 }
  0x1b   :  { %203 = vmatpush.bf16.msra.mxu1 %v344_v13  ;;  %376 = vmatpush.bf16.msra.mxu3 %v344_v13 }
  0x1e   :  { %185 = vmatpush.bf16.msra.mxu0 %v335_v14  ;;  %369 = vmatpush.bf16.msra.mxu2 %v335_v14 }
  0x1f   :  { %204 = vmatpush.bf16.msra.mxu1 %v343_v15  ;;  %377 = vmatpush.bf16.msra.mxu3 %v343_v15 }
  0x21   :  { %186 = vmatmul.bf16.vlgmr.msra.gmra.mxu0 %v254_v24  ;;  %191 = vmatmul.bf16.vlgmr.msra.gmra.mxu2 %v262_v25 }
  0x22   :  { %205 = vmatmul.bf16.vlgmr.msra.gmra.mxu1 %v258_v26  ;;  %210 = vmatmul.bf16.vlgmr.msra.gmra.mxu3 %v266_v27 }
  0x9e   :  { %v187_v28 = vpop.f32.mrf.mxu0 }
  0x9f   :  { %v206_v29 = vpop.f32.mrf.mxu1 }
  0xa0   :  { %v207_v32 = vadd.f32 %v206_v29, %v187_v28 }
  0xa2   :  { %v235_v37 = vadd.f32 %v378_v33, %v207_v32 }
  0xa4   :  { %v192_v30 = vpop.f32.mrf.mxu2 }
  0xa5   :  { %v211_v31 = vpop.f32.mrf.mxu3 }
  0xa6   :  { %v189_v34 = vpop.f32.mrf.mxu0  ;;  %v212_v39 = vadd.f32 %v211_v31, %v192_v30 }
  0xa7   :  { %v208_v35 = vpop.f32.mrf.mxu1 }
  0xa8   :  { %v209_v36 = vadd.f32 %v208_v35, %v189_v34  ;;  %v237_v44 = vadd.f32 %v378_v33, %v212_v39 }
  0xaa   :  { %v236_v38 = vadd.f32 %v378_v33, %v209_v36 }
  0xac   :  { %v354_v40 = vpack.c.bf16 %v236_v38, %v235_v37  ;;  %v194_v41 = vpop.f32.mrf.mxu2 }
  0xad   :  { %v213_v42 = vpop.f32.mrf.mxu3 }
  0xae   :  { %355 = vst [vmem:[%s483_s3] sm:$0xff] %v354_v40   ;;  %v214_v43 = vadd.f32 %v213_v42, %v194_v41 }
  0xb0   :  { %v238_v45 = vadd.f32 %v378_v33, %v214_v43 }
  0xb2   :  { %v359_v46 = vpack.c.bf16 %v238_v45, %v237_v44 }
  0xb4   :  { %361 = vst [vmem:[%s483_s3 + $0x8] sm:$0xff] %v359_v46  }

// kernel: _lambda_.40
= control target key start
LH: loop header
LB: loop body
LE: loop exit
PB: predicated region body
PF: predicated region fallthrough
CT: control target
= control target key end

     0   :  { %s1146_s12 = smov 0   ;;  %s1148_s13 = smov 0   ;;  %s1389_s0 = inlined_call_operand.vmem [shape: bf16[32,128], index: 0, kind: input, shape index: {}]   ;;  %s1390_s1 = inlined_call_operand.vmem [shape: bf16[128,1280], index: 1, kind: input, shape index: {}]   ;;  %s1391_s2 = inlined_call_operand.vmem [shape: f32[1,1280], index: 2, kind: input, shape index: {}]   ;;  %s1392_s3 = inlined_call_operand.vmem [shape: bf16[32,1280], index: 3, kind: output, shape index: {}]  }
   0x1   :  { %s1150_s14 = smov 0   ;;  %s1152_s15 = smov 0  }
   0x2   :  { %s1154_s16 = smov 0  }
   0x3 LB: > { %s28_s17 = sadd.s32 1, %s1120_s15  ;;  %s881_s18 = sadd.s32 4294967295, %s1124_s16   ;;  %s1124_s16 = sphi %s1154_s16, %s13_s16   ;;  %s1120_s15 = sphi %s1152_s15, %s1405_s15   ;;  %s1116_s14 = sphi %s1150_s14, %s1404_s14   ;;  %s1112_s13 = sphi %s1148_s13, %s1403_s13   ;;  %s1108_s12 = sphi %s1146_s12, %s1402_s12  }
   0x4   : > { %p30_p0 = scmp.ge.s32.totalorder %s28_s17, 5  ;;  %p76_p1 = scmp.ne.s32.totalorder %s1112_s13, %s1108_s12 }
   0x5   : > { %p77_p2 = scmp.eq.s32.totalorder %s1124_s16, 0  ;;  %p134_p4 = scmp.eq.s32.totalorder %s881_s18, 4 }
   0x6   : > { %s1407_s17 = smov (%p30_p0, %s28_s17), 0  ;;  %s69_s20 = sadd.s32 1, %s1112_s13 }
   0x7   : > { %p78_p3 = por %p77_p2, %p76_p1  ;;  %s65_s19 = ssub.s32 %s1120_s15, %s1407_s17 }
   0x8   : > { %p67_p5 = scmp.eq.s32.totalorder %s65_s19, 0  ;;  %p1181_p6 = por %p134_p4, %p76_p1 }
   0x9   : > { %p885_p7 = scmp.ge.s32.totalorder %s1124_s16, 5 }
   0xa   : > { %s1186_s22 = scalar_select %p67_p5, %s1112_s13, %s69_s20  }
   0xb   : > { %168 = sbr.rel (%p885_p7) target bundleno = 36 (0x24), region = 20 }
  0x10   : > { %171 = sbr.rel (!%p78_p3) target bundleno = 36 (0x24), region = 24  ;;  %s173_s23 = sand.u32 (%p78_p3), 1, %s1112_s13  }
  0x11   : > { %s978_s24 = sshll.u32 (%p78_p3), %s1120_s15, 3  ;;  %s886_s25 = sshll.u32 (%p78_p3), %s173_s23, 7 }
  0x12   : > { %s1194_s28 = scalar_lea.vmem (%p78_p3), %s1390_s1, %s978_s24  ;;  %s175_s29 = scalar_lea.vmem (%p78_p3), [#allocation3], %s886_s25 }
  0x13   : > { %v240_v0 = vld [vmem:[%s1194_s28] sm:$0xff] (%p78_p3)  ;;  %v242_v1 = vld [vmem:[%s1194_s28 + $0x28] sm:$0xff] (%p78_p3)  ;;  %v244_v2 = vld [vmem:[%s1194_s28 + $0x50] sm:$0xff] (%p78_p3) }
  0x14   : > { %241 = vst [vmem:[%s175_s29] sm:$0xff] (%p78_p3), %v240_v0  ;;  %v246_v3 = vld [vmem:[%s1194_s28 + $0x78] sm:$0xff] (%p78_p3)  ;;  %v248_v4 = vld [vmem:[%s1194_s28 + $0xa0] sm:$0xff] (%p78_p3)  ;;  %v250_v5 = vld [vmem:[%s1194_s28 + $0xc8] sm:$0xff] (%p78_p3) }
  0x15   : > { %243 = vst [vmem:[%s175_s29 + $0x8] sm:$0xff] %v242_v1  ;;  %v252_v6 = vld [vmem:[%s1194_s28 + $0xf0] sm:$0xff]  ;;  %v254_v7 = vld [vmem:[%s1194_s28 + $0x118] sm:$0xff]  ;;  %v256_v8 = vld [vmem:[%s1194_s28 + $0x140] sm:$0xff] }
  0x16   : > { %245 = vst [vmem:[%s175_s29 + $0x10] sm:$0xff] %v244_v2  ;;  %v258_v9 = vld [vmem:[%s1194_s28 + $0x168] sm:$0xff]  ;;  %v260_v10 = vld [vmem:[%s1194_s28 + $0x190] sm:$0xff]  ;;  %v262_v11 = vld [vmem:[%s1194_s28 + $0x1b8] sm:$0xff] }
  0x17   : > { %247 = vst [vmem:[%s175_s29 + $0x18] sm:$0xff] %v246_v3  ;;  %v264_v12 = vld [vmem:[%s1194_s28 + $0x1e0] sm:$0xff]  ;;  %v266_v13 = vld [vmem:[%s1194_s28 + $0x208] sm:$0xff]  ;;  %v268_v14 = vld [vmem:[%s1194_s28 + $0x230] sm:$0xff] }
  0x18   : > { %249 = vst [vmem:[%s175_s29 + $0x20] sm:$0xff] %v248_v4  ;;  %v270_v15 = vld [vmem:[%s1194_s28 + $0x258] sm:$0xff] }
  0x19   : > { %251 = vst [vmem:[%s175_s29 + $0x28] sm:$0xff] %v250_v5 }
  0x1a   : > { %253 = vst [vmem:[%s175_s29 + $0x30] sm:$0xff] %v252_v6 }
  0x1b   : > { %255 = vst [vmem:[%s175_s29 + $0x38] sm:$0xff] %v254_v7 }
  0x1c   : > { %257 = vst [vmem:[%s175_s29 + $0x40] sm:$0xff] %v256_v8 }
  0x1d   : > { %259 = vst [vmem:[%s175_s29 + $0x48] sm:$0xff] %v258_v9 }
  0x1e   : > { %261 = vst [vmem:[%s175_s29 + $0x50] sm:$0xff] %v260_v10 }
  0x1f   : > { %263 = vst [vmem:[%s175_s29 + $0x58] sm:$0xff] %v262_v11 }
  0x20   : > { %265 = vst [vmem:[%s175_s29 + $0x60] sm:$0xff] %v264_v12 }
  0x21   : > { %267 = vst [vmem:[%s175_s29 + $0x68] sm:$0xff] %v266_v13 }
  0x22   : > { %269 = vst [vmem:[%s175_s29 + $0x70] sm:$0xff] %v268_v14 }
  0x23   : > { %271 = vst [vmem:[%s175_s29 + $0x78] sm:$0xff] %v270_v15 }
  0x24 PF: > { %p889_p8 = scmp.ge.s32.totalorder %s1124_s16, 1  ;;  %p284_p9 = scmp.lt.s32.totalorder %s1124_s16, 6 }
  0x26   : > { %p285_p10 = pnand %p889_p8, %p284_p9 }
  0x27   : > { %s291_s30 = sand.u32 (!%p285_p10), 1, %s1108_s12   ;;  %s892_s10 = sshll.u32 (!%p285_p10), %s1116_s14, 1 }
  0x28   : > { %288 = sbr.rel (%p285_p10) target bundleno = 278 (0x116), region = 66  ;;  %s890_s4 = sshll.u32 (!%p285_p10), %s291_s30, 7 }
  0x29   : > { %s1217_s5 = scalar_lea.vmem (!%p285_p10), [#allocation3], %s890_s4  ;;  %p337_p11 = scmp.lt.s32.totalorder (!%p285_p10), %s892_s10, 9 }
  0x2a   : > { %s891_s20 = sshll.u32 (!%p285_p10), %s291_s30, 5 }
  0x2b   : > { %s1342_s12 = scalar_lea.vmem (!%p285_p10), [#allocation4], %s891_s20 }
  0x2d   : > { %v959_v16 = vld [vmem:[%s1217_s5 + $0x70] sm:$0xf]  ;;  %v996_v17 = vld [vmem:[%s1217_s5 + $0x74] sm:$0xf0]  ;;  %v995_v18 = vld [vmem:[%s1217_s5 + $0x74] sm:$0xf] }
  0x2e   : > { %v960_v19 = vor.u32 %v996_v17, %v959_v16  ;;  %v961_v20 = vld [vmem:[%s1217_s5 + $0x78] sm:$0xf0]  ;;  %v951_v21 = vld [vmem:[%s1217_s5 + $0x60] sm:$0xf]  ;;  %v994_v22 = vld [vmem:[%s1217_s5 + $0x64] sm:$0xf0] }
  0x2f   : > { %v964_v23 = vor.u32 %v995_v18, %v961_v20  ;;  %v993_v24 = vld [vmem:[%s1217_s5 + $0x64] sm:$0xf]  ;;  %v953_v25 = vld [vmem:[%s1217_s5 + $0x68] sm:$0xf0]  ;;  %v952_v26 = vor.u32 %v994_v22, %v951_v21  ;;  %v943_v28 = vld [vmem:[%s1217_s5 + $0x50] sm:$0xf] }
  0x30   : > { %475 = vmatpush.bf16.msra.mxu0 %v960_v19  ;;  %998 = vmatpush.bf16.msra.mxu2 %v960_v19  ;;  %v956_v27 = vor.u32 %v993_v24, %v953_v25  ;;  %v992_v29 = vld [vmem:[%s1217_s5 + $0x54] sm:$0xf0]  ;;  %v991_v30 = vld [vmem:[%s1217_s5 + $0x54] sm:$0xf]  ;;  %v945_v31 = vld [vmem:[%s1217_s5 + $0x58] sm:$0xf0] }
  0x31   : > { %494 = vmatpush.bf16.msra.mxu1 %v964_v23  ;;  %1006 = vmatpush.bf16.msra.mxu3 %v964_v23  ;;  %v944_v32 = vor.u32 %v992_v29, %v943_v28  ;;  %v948_v33 = vor.u32 %v991_v30, %v945_v31  ;;  %v935_v34 = vld [vmem:[%s1217_s5 + $0x40] sm:$0xf]  ;;  %v990_v35 = vld [vmem:[%s1217_s5 + $0x44] sm:$0xf0]  ;;  %v989_v36 = vld [vmem:[%s1217_s5 + $0x44] sm:$0xf] }
  0x32   : > { %v937_v37 = vld [vmem:[%s1217_s5 + $0x48] sm:$0xf0]  ;;  %v936_v38 = vor.u32 %v990_v35, %v935_v34  ;;  %v927_v40 = vld [vmem:[%s1217_s5 + $0x30] sm:$0xf]  ;;  %v988_v41 = vld [vmem:[%s1217_s5 + $0x34] sm:$0xf0] }
  0x33   : > { %v940_v39 = vor.u32 %v989_v36, %v937_v37  ;;  %v987_v42 = vld [vmem:[%s1217_s5 + $0x34] sm:$0xf]  ;;  %v929_v43 = vld [vmem:[%s1217_s5 + $0x38] sm:$0xf0]  ;;  %v928_v44 = vor.u32 %v988_v41, %v927_v40  ;;  %v919_v46 = vld [vmem:[%s1217_s5 + $0x20] sm:$0xf] }
  0x34   : > { %476 = vmatpush.bf16.msra.mxu0 %v952_v26  ;;  %999 = vmatpush.bf16.msra.mxu2 %v952_v26  ;;  %v932_v45 = vor.u32 %v987_v42, %v929_v43  ;;  %v986_v47 = vld [vmem:[%s1217_s5 + $0x24] sm:$0xf0]  ;;  %v985_v48 = vld [vmem:[%s1217_s5 + $0x24] sm:$0xf]  ;;  %v921_v49 = vld [vmem:[%s1217_s5 + $0x28] sm:$0xf0] }
  0x35   : > { %495 = vmatpush.bf16.msra.mxu1 %v956_v27  ;;  %1007 = vmatpush.bf16.msra.mxu3 %v956_v27  ;;  %v920_v50 = vor.u32 %v986_v47, %v919_v46  ;;  %v924_v51 = vor.u32 %v985_v48, %v921_v49  ;;  %v911_v52 = vld [vmem:[%s1217_s5 + $0x10] sm:$0xf]  ;;  %v984_v53 = vld [vmem:[%s1217_s5 + $0x14] sm:$0xf0]  ;;  %v983_v54 = vld [vmem:[%s1217_s5 + $0x14] sm:$0xf] }
  0x36   : > { %v913_v55 = vld [vmem:[%s1217_s5 + $0x18] sm:$0xf0]  ;;  %v912_v56 = vor.u32 %v984_v53, %v911_v52  ;;  %v903_v58 = vld [vmem:[%s1217_s5] sm:$0xf]  ;;  %v982_v59 = vld [vmem:[%s1217_s5 + $0x4] sm:$0xf0] }
  0x37   : > { %v916_v57 = vor.u32 %v983_v54, %v913_v55  ;;  %v981_v60 = vld [vmem:[%s1217_s5 + $0x4] sm:$0xf]  ;;  %v905_v61 = vld [vmem:[%s1217_s5 + $0x8] sm:$0xf0]  ;;  %v904_v62 = vor.u32 %v982_v59, %v903_v58  ;;  %s1409_s10 = smov (!%p337_p11, %s892_s10), 9  ;;  %s997_s23 = sshll.u32 (%p1181_p6), %s1116_s14, 3 }
  0x38   : > { %477 = vmatpush.bf16.msra.mxu0 %v944_v32  ;;  %1000 = vmatpush.bf16.msra.mxu2 %v944_v32  ;;  %v908_v63 = vor.u32 %v981_v60, %v905_v61  ;;  %v979_v0 = vld [vmem:[%s1389_s0] sm:$0xff]  ;;  %v980_v1 = vld [vmem:[%s1389_s0 + $0x8] sm:$0xff]  ;;  %s339_s19 = scalar_lea.vmem %s1391_s2, %s1409_s10  ;;  %s734_s26 = scalar_lea.vmem (%p1181_p6), %s1392_s3, %s997_s23 }
  0x39   : > { %496 = vmatpush.bf16.msra.mxu1 %v948_v33  ;;  %1008 = vmatpush.bf16.msra.mxu3 %v948_v33  ;;  %v540_v2 = vld [vmem:[%s339_s19] sm:$0x3] }
  0x3a   : > { %v542_v3 = vperm.slane %v540_v2, 0  ;;  %v543_v4 = vperm.slane %v540_v2, 1 }
  0x3c   : > { %478 = vmatpush.bf16.msra.mxu0 %v936_v38  ;;  %1001 = vmatpush.bf16.msra.mxu2 %v936_v38 }
  0x3d   : > { %497 = vmatpush.bf16.msra.mxu1 %v940_v39  ;;  %1009 = vmatpush.bf16.msra.mxu3 %v940_v39 }
  0x40   : > { %479 = vmatpush.bf16.msra.mxu0 %v928_v44  ;;  %1002 = vmatpush.bf16.msra.mxu2 %v928_v44 }
  0x41   : > { %498 = vmatpush.bf16.msra.mxu1 %v932_v45  ;;  %1010 = vmatpush.bf16.msra.mxu3 %v932_v45 }
  0x44   : > { %480 = vmatpush.bf16.msra.mxu0 %v920_v50  ;;  %1003 = vmatpush.bf16.msra.mxu2 %v920_v50 }
  0x45   : > { %499 = vmatpush.bf16.msra.mxu1 %v924_v51  ;;  %1011 = vmatpush.bf16.msra.mxu3 %v924_v51 }
  0x48   : > { %481 = vmatpush.bf16.msra.mxu0 %v912_v56  ;;  %1004 = vmatpush.bf16.msra.mxu2 %v912_v56 }
  0x49   : > { %500 = vmatpush.bf16.msra.mxu1 %v916_v57  ;;  %1012 = vmatpush.bf16.msra.mxu3 %v916_v57 }
  0x4c   : > { %482 = vmatpush.bf16.msra.mxu0 %v904_v62  ;;  %1005 = vmatpush.bf16.msra.mxu2 %v904_v62 }
  0x4d   : > { %501 = vmatpush.bf16.msra.mxu1 %v908_v63  ;;  %1013 = vmatpush.bf16.msra.mxu3 %v908_v63 }
  0x4f   : > { %483 = vmatmul.bf16.vlgmr.msra.gmra.mxu0 %v979_v0  ;;  %488 = vmatmul.bf16.vlgmr.msra.gmra.mxu2 %v980_v1 }
  0x50   : > { %502 = vmatmul.bf16.vlgmr.msra.gmra.mxu1 %v979_v0  ;;  %507 = vmatmul.bf16.vlgmr.msra.gmra.mxu3 %v980_v1 }
  0xcc   : > { %v484_v5 = vpop.f32.mrf.mxu0 }
  0xcd   : > { %v1261_v6 = vadd.f32 %v542_v3, %v484_v5  ;;  %v503_v7 = vpop.f32.mrf.mxu1 }
  0xce   : > { %v1263_v8 = vadd.f32 %v543_v4, %v503_v7 }
  0xcf   : > { %v965_v9 = vmul.f32 -1.442695, %v1261_v6 }
  0xd0   : > { %v966_v10 = vmul.f32 -1.442695, %v1263_v8 }
  0xd1   : > { %1054 = vpow2.f32 %v965_v9 }
  0xd2   : > { %1056 = vpow2.f32 %v966_v10  ;;  %v489_v11 = vpop.f32.mrf.mxu2 }
  0xd3   : > { %v1267_v12 = vadd.f32 %v542_v3, %v489_v11  ;;  %v508_v13 = vpop.f32.mrf.mxu3 }
  0xd4   : > { %v1269_v14 = vadd.f32 %v543_v4, %v508_v13  ;;  %v486_v15 = vpop.f32.mrf.mxu0 }
  0xd5   : > { %v969_v16 = vmul.f32 -1.442695, %v1267_v12  ;;  %v1272_v17 = vadd.f32 %v542_v3, %v486_v15  ;;  %v505_v18 = vpop.f32.mrf.mxu1 }
  0xd6   : > { %v970_v19 = vmul.f32 -1.442695, %v1269_v14  ;;  %v1275_v20 = vadd.f32 %v543_v4, %v505_v18 }
  0xd7   : > { %v1055_v21 = vpop.eup %1054  ;;  %1058 = vpow2.f32 %v969_v16  ;;  %v967_v22 = vmul.f32 -1.442695, %v1272_v17 }
  0xd8   : > { %v1057_v23 = vpop.eup %1056  ;;  %v578_v24 = vadd.f32 1.0, %v1055_v21  ;;  %1060 = vpow2.f32 %v970_v19  ;;  %v968_v25 = vmul.f32 -1.442695, %v1275_v20 }
  0xd9   : > { %v579_v26 = vadd.f32 1.0, %v1057_v23  ;;  %1062 = vpow2.f32 %v967_v22 }
  0xda   : > { %1064 = vrcp.f32 %v578_v24  ;;  %v491_v27 = vpop.f32.mrf.mxu2  ;;  %v595_v30 = vand.u32 2147483647, %v578_v24  ;;  %v597_v31 = vand.u32 2147483648, %v578_v24  ;;  %vm591_vm0 = vweird.f32 %v578_v24 }
  0xdb   : > { %1066 = vrcp.f32 %v579_v26  ;;  %v1279_v28 = vadd.f32 %v542_v3, %v491_v27  ;;  %v610_v33 = vand.u32 2147483647, %v579_v26  ;;  %v612_v34 = vand.u32 2147483648, %v579_v26  ;;  %v510_v38 = vpop.f32.mrf.mxu3 }
  0xdc   : > { %1068 = vpow2.f32 %v968_v25  ;;  %vm606_vm1 = vweird.f32 %v579_v26  ;;  %vm1287_vm2 = vcmp.eq.f32.partialorder %v595_v30, 8.507059e+37  ;;  %v598_v44 = vor.u32 1.1754944e-38, %v597_v31 }
  0xdd   : > { %v1059_v29 = vpop.eup %1058  ;;  %v971_v40 = vmul.f32 -1.442695, %v1279_v28  ;;  %vm1292_vm3 = vcmp.eq.f32.partialorder %v610_v33, 8.507059e+37  ;;  %v613_v48 = vor.u32 1.1754944e-38, %v612_v34  ;;  %v1296_v49 = vadd.f32 %v543_v4, %v510_v38 }
  0xde   : > { %v1061_v32 = vpop.eup %1060  ;;  %v1281_v35 = vadd.f32 1.0, %v1059_v29 }
  0xdf   : > { %v1063_v36 = vpop.eup %1062  ;;  %v1283_v37 = vadd.f32 1.0, %v1061_v32  ;;  %v972_v61 = vmul.f32 -1.442695, %v1296_v49 }
  0xe0   : > { %v1065_v39 = vpop.eup %1064  ;;  %1070 = vrcp.f32 %v1281_v35  ;;  %v655_v51 = vand.u32 2147483647, %v1281_v35  ;;  %v657_v52 = vand.u32 2147483648, %v1281_v35  ;;  %v1300_v53 = vadd.f32 1.0, %v1063_v36 }
  0xe1   : > { %v1067_v41 = vpop.eup %1066  ;;  %v587_v42 = vmul.f32 %v1065_v39, %v578_v24  ;;  %1072 = vrcp.f32 %v1283_v37  ;;  %vm592_vm4 = vweird.f32 %v1065_v39  ;;  %v670_v57 = vand.u32 2147483647, %v1283_v37 }
  0xe2   : > { %v1069_v45 = vpop.eup %1068  ;;  %v602_v46 = vmul.f32 %v1067_v41, %v579_v26  ;;  %1074 = vpow2.f32 %v971_v40  ;;  %v672_v58 = vand.u32 2147483648, %v1283_v37  ;;  %vm607_vm5 = vweird.f32 %v1067_v41  ;;  %vm593_vm8 = vmor %vm591_vm0, %vm592_vm4 }
  0xe3   : > { %v588_v50 = vsub.f32 1.0, %v587_v42  ;;  %v1302_v55 = vadd.f32 1.0, %v1069_v45  ;;  %1076 = vrcp.f32 %v1300_v53  ;;  %vm651_vm6 = vweird.f32 %v1281_v35  ;;  %vm608_vm10 = vmor %vm606_vm1, %vm607_vm5 }
  0xe4   : > { %v603_v54 = vsub.f32 1.0, %v602_v46  ;;  %vm666_vm7 = vweird.f32 %v1283_v37  ;;  %vm1314_vm9 = vcmp.eq.f32.partialorder %v655_v51, 8.507059e+37  ;;  %v658_v3 = vor.u32 1.1754944e-38, %v657_v52 }
  0xe5   : > { %v589_v56 = vmul.f32 %v1065_v39, %v588_v50  ;;  %1078 = vrcp.f32 %v1302_v55  ;;  %vm1320_vm11 = vcmp.eq.f32.partialorder %v670_v57, 8.507059e+37  ;;  %v673_v10 = vor.u32 1.1754944e-38, %v672_v58 }
  0xe6   : > { %v1071_v59 = vpop.eup %1070  ;;  %v604_v60 = vmul.f32 %v1067_v41, %v603_v54  ;;  %vm621_vm12 = vweird.f32 %v1300_v53  ;;  %v625_v29 = vand.u32 2147483647, %v1300_v53  ;;  %v627_v30 = vand.u32 2147483648, %v1300_v53 }
  0xe7   : > { %v1073_v62 = vpop.eup %1072  ;;  %v590_v63 = vadd.f32 %v1065_v39, %v589_v56  ;;  %v647_v0 = vmul.f32 %v1071_v59, %v1281_v35  ;;  %vm652_vm13 = vweird.f32 %v1071_v59  ;;  %v640_v36 = vand.u32 2147483647, %v1302_v55 }
  0xe8   : > { %v605_v1 = vadd.f32 %v1067_v41, %v604_v60  ;;  %v662_v4 = vmul.f32 %v1073_v62, %v1283_v37  ;;  %v1075_v11 = vpop.eup %1074  ;;  %vm667_vm14 = vweird.f32 %v1073_v62  ;;  %vm653_vm15 = vmor %vm651_vm6, %vm652_vm13  ;;  %v642_v42 = vand.u32 2147483648, %v1302_v55 }
  0xe9   : > { %v594_v5 = vsel %vm593_vm8, %v1065_v39, %v590_v63  ;;  %v648_v7 = vsub.f32 1.0, %v647_v0  ;;  %v1077_v18 = vpop.eup %1076  ;;  %v584_v31 = vadd.f32 1.0, %v1075_v11  ;;  %vm668_vm0 = vmor %vm666_vm7, %vm667_vm14  ;;  %vm626_vm4 = vcmp.eq.f32.partialorder %v625_v29, 8.507059e+37 }
  0xea   : > { %v599_v13 = vsel %vm1287_vm2, %v598_v44, %v594_v5  ;;  %v609_v15 = vsel %vm608_vm10, %v1067_v41, %v605_v1  ;;  %v663_v16 = vsub.f32 1.0, %v662_v4  ;;  %v617_v25 = vmul.f32 %v1077_v18, %v1300_v53 }
  0xeb   : > { %v706_v19 = vmul.f32 %v599_v13, %v1261_v6  ;;  %v614_v21 = vsel %vm1292_vm3, %v613_v48, %v609_v15  ;;  %v649_v22 = vmul.f32 %v1071_v59, %v648_v7  ;;  %v1079_v26 = vpop.eup %1078  ;;  %vm622_vm1 = vweird.f32 %v1077_v18 }
  0xec   : > { %v707_v23 = vmul.f32 %v614_v21, %v1263_v8  ;;  %v664_v24 = vmul.f32 %v1073_v62, %v663_v16  ;;  %v618_v33 = vsub.f32 1.0, %v617_v25  ;;  %v632_v34 = vmul.f32 %v1079_v26, %v1302_v55  ;;  %vm623_vm3 = vmor %vm621_vm12, %vm622_vm1 }
  0xed   : > { %v650_v27 = vadd.f32 %v1071_v59, %v649_v22  ;;  %1080 = vrcp.f32 %v584_v31  ;;  %vm637_vm2 = vweird.f32 %v1079_v26  ;;  %v628_v46 = vor.u32 1.1754944e-38, %v627_v30 }
  0xee   : > { %v714_v32 = vpack.c.bf16 %v707_v23, %v706_v19  ;;  %v665_v6 = vadd.f32 %v1073_v62, %v664_v24  ;;  %v619_v39 = vmul.f32 %v1077_v18, %v618_v33  ;;  %v633_v40 = vsub.f32 1.0, %v632_v34 }
  0xef   : > { %v654_v8 = vsel %vm653_vm15, %v1071_v59, %v650_v27  ;;  %1082 = vpow2.f32 %v972_v61  ;;  %vm636_vm5 = vweird.f32 %v1302_v55  ;;  %vm641_vm7 = vcmp.eq.f32.partialorder %v640_v36, 8.507059e+37 }
  0xf0   : > { %718 = vst [vmem:[%s1342_s12] sm:$0xff] %v714_v32  ;;  %v659_v35 = vsel %vm1314_vm9, %v658_v3, %v654_v8  ;;  %v669_v38 = vsel %vm668_vm0, %v1073_v62, %v665_v6  ;;  %v620_v44 = vadd.f32 %v1077_v18, %v619_v39  ;;  %v634_v45 = vmul.f32 %v1079_v26, %v633_v40  ;;  %vm638_vm6 = vmor %vm636_vm5, %vm637_vm2 }
  0xf1   : > { %v710_v41 = vmul.f32 %v659_v35, %v1267_v12  ;;  %v674_v37 = vsel %vm1320_vm11, %v673_v10, %v669_v38  ;;  %v687_v0 = vand.u32 2147483648, %v584_v31  ;;  %vm681_vm9 = vweird.f32 %v584_v31 }
  0xf2   : > { %v711_v43 = vmul.f32 %v674_v37, %v1269_v14  ;;  %v624_v12 = vsel %vm623_vm3, %v1077_v18, %v620_v44  ;;  %v635_v48 = vadd.f32 %v1079_v26, %v634_v45  ;;  %v643_v14 = vor.u32 1.1754944e-38, %v642_v42 }
  0xf3   : > { %v1081_v50 = vpop.eup %1080  ;;  %v629_v51 = vsel %vm626_vm4, %v628_v46, %v624_v12  ;;  %v685_v1 = vand.u32 2147483647, %v584_v31  ;;  %v688_v4 = vor.u32 1.1754944e-38, %v687_v0 }
  0xf4   : > { %v716_v47 = vpack.c.bf16 %v711_v43, %v710_v41  ;;  %v708_v52 = vmul.f32 %v629_v51, %v1272_v17  ;;  %v639_v54 = vsel %vm638_vm6, %v1079_v26, %v635_v48  ;;  %v677_v53 = vmul.f32 %v1081_v50, %v584_v31 }
  0xf5   : > { %v644_v56 = vsel %vm641_vm7, %v643_v14, %v639_v54  ;;  %v1083_v57 = vpop.eup %1082  ;;  %vm682_vm8 = vweird.f32 %v1081_v50  ;;  %vm686_vm11 = vcmp.eq.f32.partialorder %v685_v1, 8.507059e+37 }
  0xf6   : > { %720 = vst [vmem:[%s1342_s12 + $0x10] sm:$0xff] %v716_v47  ;;  %v709_v58 = vmul.f32 %v644_v56, %v1275_v20  ;;  %v678_v59 = vsub.f32 1.0, %v677_v53  ;;  %v585_v60 = vadd.f32 1.0, %v1083_v57  ;;  %vm683_vm10 = vmor %vm681_vm9, %vm682_vm8 }
  0xf7   : > { %v769_v21 = vld [vmem:[%s1342_s12] sm:$0xff] (%p1181_p6) }
  0xf8   : > { %v715_v61 = vpack.c.bf16 %v709_v58, %v708_v52  ;;  %1084 = vrcp.f32 %v585_v60  ;;  %v679_v55 = vmul.f32 %v1081_v50, %v678_v59  ;;  %v702_v5 = vand.u32 2147483648, %v585_v60  ;;  %770 = vst [vmem:[%s734_s26] sm:$0xff] (%p1181_p6), %v769_v21 }
  0xf9   : > { %v700_v7 = vand.u32 2147483647, %v585_v60  ;;  %vm696_vm13 = vweird.f32 %v585_v60 }
  0xfa   : > { %719 = vst [vmem:[%s1342_s12 + $0x8] sm:$0xff] %v715_v61  ;;  %v680_v62 = vadd.f32 %v1081_v50, %v679_v55  ;;  %v703_v11 = vor.u32 1.1754944e-38, %v702_v5 }
  0xfb   : > { %vm701_vm15 = vcmp.eq.f32.partialorder %v700_v7, 8.507059e+37 }
  0xfc   : > { %v684_v2 = vsel %vm683_vm10, %v1081_v50, %v680_v62 }
  0xfd   : > { %v689_v9 = vsel %vm686_vm11, %v688_v4, %v684_v2 }
  0xfe   : > { %v1085_v63 = vpop.eup %1084  ;;  %v712_v13 = vmul.f32 %v689_v9, %v1279_v28  ;;  %v773_v28 = vld [vmem:[%s1342_s12 + $0x10] sm:$0xff] (%p1181_p6) }
  0xff   : > { %v692_v17 = vmul.f32 %v1085_v63, %v585_v60  ;;  %vm697_vm12 = vweird.f32 %v1085_v63  ;;  %774 = vst [vmem:[%s734_s26 + $0x50] sm:$0xff] (%p1181_p6), %v773_v28 }
 0x100   : > { %vm698_vm14 = vmor %vm696_vm13, %vm697_vm12 }
 0x101   : > { %v693_v3 = vsub.f32 1.0, %v692_v17  ;;  %v771_v22 = vld [vmem:[%s1342_s12 + $0x8] sm:$0xff] (%p1181_p6) }
 0x102   : > { %772 = vst [vmem:[%s734_s26 + $0x28] sm:$0xff] (%p1181_p6), %v771_v22 }
 0x103   : > { %v694_v20 = vmul.f32 %v1085_v63, %v693_v3 }
 0x105   : > { %v695_v10 = vadd.f32 %v1085_v63, %v694_v20 }
 0x107   : > { %v699_v15 = vsel %vm698_vm14, %v1085_v63, %v695_v10 }
 0x108   : > { %v704_v16 = vsel %vm701_vm15, %v703_v11, %v699_v15 }
 0x109   : > { %v713_v18 = vmul.f32 %v704_v16, %v1296_v49  ;;  %728 = sbr.rel (!%p1181_p6) target bundleno = 278 (0x116), region = 82 }
 0x10b   : > { %v717_v19 = vpack.c.bf16 %v713_v18, %v712_v13 }
 0x10d   : > { %721 = vst [vmem:[%s1342_s12 + $0x18] sm:$0xff] %v717_v19 }
 0x114   : > { %v775_v49 = vld [vmem:[%s1342_s12 + $0x18] sm:$0xff] }
 0x115   : > { %776 = vst [vmem:[%s734_s26 + $0x78] sm:$0xff] %v775_v49 }
 0x116 PF: > { %s13_s16 = sadd.s32 1, %s1124_s16   ;;  %s1402_s12 = smov %s1112_s13 }
 0x117   : > { %p10_p12 = scmp.ge.s32.totalorder %s13_s16, 7   ;;  %s1403_s13 = smov %s1186_s22 }
 0x118   : > { %s1404_s14 = smov %s1120_s15  ;;  %s1405_s15 = smov %s1407_s17 }
 0x119   :  { %12 = sbr.rel (!%p10_p12) target bundleno = 3 (0x3), region = 157 }

// kernel: _lambda_.41
= control target key start
LH: loop header
LB: loop body
LE: loop exit
PB: predicated region body
PF: predicated region fallthrough
CT: control target
= control target key end

     0   :  { %v330_v0 = vmov 0.0   ;;  %vm272_vm0 = vcmask 1041408   ;;  %vm274_vm1 = vcmask 1045508   ;;  %vm276_vm2 = vcmask 1043456   ;;  %s442_s1 = inlined_call_operand.vmem [shape: f32[2,1280], index: 1, kind: output, shape index: {}]   ;;  %s443_s0 = inlined_call_operand.vmem [shape: bf16[2,16,1280], index: 0, kind: input, shape index: {}]  }
   0x1   :  { %14 = vst [vmem:[%s442_s1 + $0x10] sm:$0xf] %v330_v0  ;;  %v18_v1 = vld [vmem:[%s443_s0] sm:$0xff]  ;;  %v19_v2 = vld [vmem:[%s443_s0 + $0x8] sm:$0xff]  ;;  %v24_v4 = vld [vmem:[%s443_s0 + $0x30] sm:$0xff]  ;;  %vm294_vm3 = vcmask 1041409  }
   0x2   :  { %v23_v3 = vld [vmem:[%s443_s0 + $0x28] sm:$0xff]  ;;  %v28_v5 = vld [vmem:[%s443_s0 + $0x50] sm:$0xff]  ;;  %v29_v6 = vld [vmem:[%s443_s0 + $0x58] sm:$0xff]  ;;  %v38_v7 = vunpack.c.l.bf16 %v18_v1  ;;  %v39_v8 = vunpack.c.h.bf16 %v18_v1  ;;  %v40_v9 = vunpack.c.l.bf16 %v19_v2  ;;  %v41_v10 = vunpack.c.h.bf16 %v19_v2 }
   0x3   :  { %v33_v11 = vld [vmem:[%s443_s0 + $0x78] sm:$0xff]  ;;  %v34_v12 = vld [vmem:[%s443_s0 + $0x80] sm:$0xff]  ;;  %v48_v13 = vunpack.c.l.bf16 %v23_v3  ;;  %v49_v14 = vunpack.c.h.bf16 %v23_v3  ;;  %v50_v15 = vunpack.c.l.bf16 %v24_v4  ;;  %v51_v16 = vunpack.c.h.bf16 %v24_v4 }
   0x4   :  { %v58_v17 = vunpack.c.l.bf16 %v28_v5  ;;  %v59_v18 = vunpack.c.h.bf16 %v28_v5  ;;  %v60_v19 = vunpack.c.l.bf16 %v29_v6  ;;  %v61_v20 = vunpack.c.h.bf16 %v29_v6 }
   0x5   :  { %v68_v21 = vunpack.c.l.bf16 %v33_v11  ;;  %v69_v22 = vunpack.c.h.bf16 %v33_v11  ;;  %v70_v23 = vunpack.c.l.bf16 %v34_v12  ;;  %v71_v24 = vunpack.c.h.bf16 %v34_v12 }
   0x6   :  { %v78_v25 = vadd.f32 %v48_v13, %v38_v7  ;;  %v85_v26 = vadd.f32 %v49_v14, %v39_v8  ;;  %v92_v27 = vadd.f32 %v50_v15, %v40_v9  ;;  %v99_v28 = vadd.f32 %v51_v16, %v41_v10 }
   0x7   :  { %v148_v29 = vadd.f32 %v68_v21, %v58_v17  ;;  %v155_v30 = vadd.f32 %v69_v22, %v59_v18  ;;  %v162_v31 = vadd.f32 %v70_v23, %v60_v19  ;;  %v169_v32 = vadd.f32 %v71_v24, %v61_v20 }
   0x8   :  { %v79_v33 = vrot.slane %v78_v25, 4  ;;  %v86_v34 = vrot.slane %v85_v26, 4  ;;  %v93_v35 = vrot.slane %v92_v27, 4  ;;  %v100_v36 = vrot.slane %v99_v28, 4 }
   0x9   :  { %v149_v37 = vrot.slane %v148_v29, 4  ;;  %v156_v38 = vrot.slane %v155_v30, 4  ;;  %v163_v39 = vrot.slane %v162_v31, 4  ;;  %v170_v40 = vrot.slane %v169_v32, 4 }
   0xa   :  { %v80_v41 = vadd.f32 %v79_v33, %v78_v25  ;;  %v87_v42 = vadd.f32 %v86_v34, %v85_v26  ;;  %v94_v43 = vadd.f32 %v93_v35, %v92_v27  ;;  %v101_v44 = vadd.f32 %v100_v36, %v99_v28  ;;  %v20_v28 = vld [vmem:[%s443_s0 + $0x10] sm:$0xff]  ;;  %v25_v35 = vld [vmem:[%s443_s0 + $0x38] sm:$0xff]  ;;  %v26_v36 = vld [vmem:[%s443_s0 + $0x40] sm:$0xff] }
   0xb   :  { %v150_v45 = vadd.f32 %v149_v37, %v148_v29  ;;  %v157_v46 = vadd.f32 %v156_v38, %v155_v30  ;;  %v164_v47 = vadd.f32 %v163_v39, %v162_v31  ;;  %v171_v48 = vadd.f32 %v170_v40, %v169_v32  ;;  %v21_v32 = vld [vmem:[%s443_s0 + $0x18] sm:$0xff] }
   0xc   :  { %v81_v49 = vrot.slane %v80_v41, 2  ;;  %v88_v50 = vrot.slane %v87_v42, 2  ;;  %v95_v51 = vrot.slane %v94_v43, 2  ;;  %v102_v52 = vrot.slane %v101_v44, 2 }
   0xd   :  { %v151_v53 = vrot.slane %v150_v45, 2  ;;  %v158_v54 = vrot.slane %v157_v46, 2  ;;  %v165_v55 = vrot.slane %v164_v47, 2  ;;  %v172_v56 = vrot.slane %v171_v48, 2 }
   0xe   :  { %v82_v57 = vadd.f32 %v81_v49, %v80_v41  ;;  %v89_v58 = vadd.f32 %v88_v50, %v87_v42  ;;  %v96_v59 = vadd.f32 %v95_v51, %v94_v43  ;;  %v103_v60 = vadd.f32 %v102_v52, %v101_v44  ;;  %v30_v41 = vld [vmem:[%s443_s0 + $0x60] sm:$0xff]  ;;  %v31_v42 = vld [vmem:[%s443_s0 + $0x68] sm:$0xff] }
   0xf   :  { %v152_v61 = vadd.f32 %v151_v53, %v150_v45  ;;  %v159_v62 = vadd.f32 %v158_v54, %v157_v46  ;;  %v166_v63 = vadd.f32 %v165_v55, %v164_v47  ;;  %v173_v0 = vadd.f32 %v172_v56, %v171_v48  ;;  %v35_v45 = vld [vmem:[%s443_s0 + $0x88] sm:$0xff]  ;;  %v36_v46 = vld [vmem:[%s443_s0 + $0x90] sm:$0xff] }
  0x10   :  { %v83_v1 = vrot.slane %v82_v57, 1  ;;  %v90_v2 = vrot.slane %v89_v58, 1  ;;  %v97_v3 = vrot.slane %v96_v59, 1  ;;  %v104_v4 = vrot.slane %v103_v60, 1 }
  0x11   :  { %v153_v5 = vrot.slane %v152_v61, 1  ;;  %v160_v6 = vrot.slane %v159_v62, 1  ;;  %v167_v7 = vrot.slane %v166_v63, 1  ;;  %v174_v8 = vrot.slane %v173_v0, 1 }
  0x12   :  { %v84_v9 = vadd.f32 %v83_v1, %v82_v57  ;;  %v91_v10 = vadd.f32 %v90_v2, %v89_v58  ;;  %v98_v11 = vadd.f32 %v97_v3, %v96_v59  ;;  %v105_v12 = vadd.f32 %v104_v4, %v103_v60 }
  0x13   :  { %v154_v13 = vadd.f32 %v153_v5, %v152_v61  ;;  %v161_v14 = vadd.f32 %v160_v6, %v159_v62  ;;  %v168_v15 = vadd.f32 %v167_v7, %v166_v63  ;;  %v175_v16 = vadd.f32 %v174_v8, %v173_v0 }
  0x14   :  { %v218_v17 = vmul.f32 0.0625, %v84_v9  ;;  %v219_v18 = vmul.f32 0.0625, %v91_v10  ;;  %v220_v19 = vmul.f32 0.0625, %v98_v11  ;;  %v221_v20 = vmul.f32 0.0625, %v105_v12 }
  0x15   :  { %v228_v21 = vmul.f32 0.0625, %v154_v13  ;;  %v229_v22 = vmul.f32 0.0625, %v161_v14  ;;  %v230_v23 = vmul.f32 0.0625, %v168_v15  ;;  %v231_v24 = vmul.f32 0.0625, %v175_v16 }
  0x16   :  { %v258_v25 = vrot.slane %v219_v18, 6  ;;  %v259_v26 = vrot.slane %v220_v19, 4  ;;  %v260_v27 = vrot.slane %v221_v20, 2  ;;  %vm296_vm4 = vcmask 1043459  }
  0x17   :  { %v265_v29 = vrot.slane %v229_v22, 6  ;;  %v266_v30 = vrot.slane %v230_v23, 4  ;;  %v267_v31 = vrot.slane %v231_v24, 2  ;;  %vm298_vm5 = vcmask 1045509  }
  0x18   :  { %v273_v33 = vsel %vm272_vm0, %v218_v17, %v258_v25  ;;  %v275_v34 = vsel %vm274_vm1, %v259_v26, %v260_v27  ;;  %vm300_vm6 = vcmask 1047559   ;;  %v42_v37 = vunpack.c.l.bf16 %v20_v28 }
  0x19   :  { %v277_v38 = vsel %vm276_vm2, %v273_v33, %v275_v34  ;;  %v282_v39 = vsel %vm272_vm0, %v228_v21, %v265_v29  ;;  %v283_v40 = vsel %vm274_vm1, %v266_v30, %v267_v31  ;;  %v43_v43 = vunpack.c.h.bf16 %v20_v28 }
  0x1a   :  { %v284_v44 = vsel %vm276_vm2, %v282_v39, %v283_v40  ;;  %v44_v47 = vunpack.c.l.bf16 %v21_v32  ;;  %v45_v48 = vunpack.c.h.bf16 %v21_v32  ;;  %v52_v49 = vunpack.c.l.bf16 %v25_v35 }
  0x1b   :  { %v293_v50 = vrot.slane %v284_v44, 7  ;;  %v53_v51 = vunpack.c.h.bf16 %v25_v35  ;;  %v54_v52 = vunpack.c.l.bf16 %v26_v36  ;;  %v55_v53 = vunpack.c.h.bf16 %v26_v36 }
  0x1c   :  { %v62_v54 = vunpack.c.l.bf16 %v30_v41  ;;  %v63_v55 = vunpack.c.h.bf16 %v30_v41  ;;  %v64_v56 = vunpack.c.l.bf16 %v31_v42  ;;  %v65_v57 = vunpack.c.h.bf16 %v31_v42 }
  0x1d   :  { %v295_v58 = vsel %vm294_vm3, %v293_v50, %v277_v38  ;;  %v72_v59 = vunpack.c.l.bf16 %v35_v45  ;;  %v73_v60 = vunpack.c.h.bf16 %v35_v45  ;;  %v74_v61 = vunpack.c.l.bf16 %v36_v46 }
  0x1e   :  { %v297_v62 = vsel %vm296_vm4, %v293_v50, %v295_v58  ;;  %v75_v63 = vunpack.c.h.bf16 %v36_v46  ;;  %v106_v0 = vadd.f32 %v52_v49, %v42_v37  ;;  %v113_v1 = vadd.f32 %v53_v51, %v43_v43 }
  0x1f   :  { %v299_v2 = vsel %vm298_vm5, %v293_v50, %v297_v62  ;;  %v120_v3 = vadd.f32 %v54_v52, %v44_v47  ;;  %v127_v4 = vadd.f32 %v55_v53, %v45_v48  ;;  %v176_v5 = vadd.f32 %v72_v59, %v62_v54 }
  0x20   :  { %v301_v6 = vsel %vm300_vm6, %v293_v50, %v299_v2  ;;  %v107_v7 = vrot.slane %v106_v0, 4  ;;  %v114_v8 = vrot.slane %v113_v1, 4  ;;  %v183_v9 = vadd.f32 %v73_v60, %v63_v55  ;;  %v22_v60 = vld [vmem:[%s443_s0 + $0x20] sm:$0xff] }
  0x21   :  { %v121_v10 = vrot.slane %v120_v3, 4  ;;  %v128_v11 = vrot.slane %v127_v4, 4  ;;  %v177_v12 = vrot.slane %v176_v5, 4  ;;  %v190_v16 = vadd.f32 %v74_v61, %v64_v56  ;;  %322 = vst [vmem:[%s442_s1] sm:$0xff] %v301_v6 }
  0x22   :  { %v108_v13 = vadd.f32 %v107_v7, %v106_v0  ;;  %v115_v14 = vadd.f32 %v114_v8, %v113_v1  ;;  %v184_v15 = vrot.slane %v183_v9, 4  ;;  %v197_v20 = vadd.f32 %v75_v63, %v65_v57  ;;  %v27_v1 = vld [vmem:[%s443_s0 + $0x48] sm:$0xff] }
  0x23   :  { %v122_v17 = vadd.f32 %v121_v10, %v120_v3  ;;  %v129_v18 = vadd.f32 %v128_v11, %v127_v4  ;;  %v178_v19 = vadd.f32 %v177_v12, %v176_v5  ;;  %v191_v24 = vrot.slane %v190_v16, 4  ;;  %v32_v5 = vld [vmem:[%s443_s0 + $0x70] sm:$0xff] }
  0x24   :  { %v109_v21 = vrot.slane %v108_v13, 2  ;;  %v116_v22 = vrot.slane %v115_v14, 2  ;;  %v185_v23 = vadd.f32 %v184_v15, %v183_v9  ;;  %v198_v28 = vrot.slane %v197_v20, 4  ;;  %v37_v9 = vld [vmem:[%s443_s0 + $0x98] sm:$0xff] }
  0x25   :  { %v123_v25 = vrot.slane %v122_v17, 2  ;;  %v130_v26 = vrot.slane %v129_v18, 2  ;;  %v179_v27 = vrot.slane %v178_v19, 2  ;;  %v192_v32 = vadd.f32 %v191_v24, %v190_v16 }
  0x26   :  { %v110_v29 = vadd.f32 %v109_v21, %v108_v13  ;;  %v117_v30 = vadd.f32 %v116_v22, %v115_v14  ;;  %v186_v31 = vrot.slane %v185_v23, 2  ;;  %v199_v36 = vadd.f32 %v198_v28, %v197_v20 }
  0x27   :  { %v124_v33 = vadd.f32 %v123_v25, %v122_v17  ;;  %v131_v34 = vadd.f32 %v130_v26, %v129_v18  ;;  %v180_v35 = vadd.f32 %v179_v27, %v178_v19  ;;  %v193_v40 = vrot.slane %v192_v32, 2 }
  0x28   :  { %v111_v37 = vrot.slane %v110_v29, 1  ;;  %v118_v38 = vrot.slane %v117_v30, 1  ;;  %v187_v39 = vadd.f32 %v186_v31, %v185_v23  ;;  %v200_v44 = vrot.slane %v199_v36, 2 }
  0x29   :  { %v125_v41 = vrot.slane %v124_v33, 1  ;;  %v132_v42 = vrot.slane %v131_v34, 1  ;;  %v181_v43 = vrot.slane %v180_v35, 1  ;;  %v194_v48 = vadd.f32 %v193_v40, %v192_v32 }
  0x2a   :  { %v112_v45 = vadd.f32 %v111_v37, %v110_v29  ;;  %v119_v46 = vadd.f32 %v118_v38, %v117_v30  ;;  %v188_v47 = vrot.slane %v187_v39, 1  ;;  %v201_v52 = vadd.f32 %v200_v44, %v199_v36 }
  0x2b   :  { %v126_v49 = vadd.f32 %v125_v41, %v124_v33  ;;  %v133_v50 = vadd.f32 %v132_v42, %v131_v34  ;;  %v182_v51 = vadd.f32 %v181_v43, %v180_v35  ;;  %v195_v54 = vrot.slane %v194_v48, 1 }
  0x2c   :  { %v189_v53 = vadd.f32 %v188_v47, %v187_v39  ;;  %v223_v55 = vmul.f32 0.0625, %v119_v46  ;;  %v202_v56 = vrot.slane %v201_v52, 1  ;;  %v222_v57 = vmul.f32 0.0625, %v112_v45 }
  0x2d   :  { %v224_v58 = vmul.f32 0.0625, %v126_v49  ;;  %v225_v59 = vmul.f32 0.0625, %v133_v50  ;;  %v196_v61 = vadd.f32 %v195_v54, %v194_v48  ;;  %v232_v62 = vmul.f32 0.0625, %v182_v51 }
  0x2e   :  { %v233_v63 = vmul.f32 0.0625, %v189_v53  ;;  %v261_v0 = vrot.slane %v223_v55, 6  ;;  %v203_v2 = vadd.f32 %v202_v56, %v201_v52  ;;  %v46_v6 = vunpack.c.l.bf16 %v22_v60 }
  0x2f   :  { %v262_v3 = vrot.slane %v224_v58, 4  ;;  %v263_v4 = vrot.slane %v225_v59, 2  ;;  %v234_v7 = vmul.f32 0.0625, %v196_v61  ;;  %v47_v10 = vunpack.c.h.bf16 %v22_v60 }
  0x30   :  { %v268_v8 = vrot.slane %v233_v63, 6  ;;  %v56_v11 = vunpack.c.l.bf16 %v27_v1  ;;  %v235_v12 = vmul.f32 0.0625, %v203_v2  ;;  %v278_v13 = vsel %vm272_vm0, %v222_v57, %v261_v0 }
  0x31   :  { %v57_v14 = vunpack.c.h.bf16 %v27_v1  ;;  %v66_v15 = vunpack.c.l.bf16 %v32_v5  ;;  %v269_v16 = vrot.slane %v234_v7, 4  ;;  %v279_v17 = vsel %vm274_vm1, %v262_v3, %v263_v4 }
  0x32   :  { %v285_v18 = vsel %vm272_vm0, %v232_v62, %v268_v8  ;;  %v67_v19 = vunpack.c.h.bf16 %v32_v5  ;;  %v270_v20 = vrot.slane %v235_v12, 2  ;;  %v76_v21 = vunpack.c.l.bf16 %v37_v9  ;;  %v17_v5 = vld [vmem:[%s442_s1 + $0x10] sm:$0xf] }
  0x33   :  { %v77_v22 = vunpack.c.h.bf16 %v37_v9  ;;  %v134_v23 = vadd.f32 %v56_v11, %v46_v6  ;;  %v141_v24 = vadd.f32 %v57_v14, %v47_v10  ;;  %v280_v29 = vsel %vm276_vm2, %v278_v13, %v279_v17 }
  0x34   :  { %v286_v25 = vsel %vm274_vm1, %v269_v16, %v270_v20  ;;  %v204_v27 = vadd.f32 %v76_v21, %v66_v15 }
  0x35   :  { %v135_v26 = vrot.slane %v134_v23, 4  ;;  %v211_v28 = vadd.f32 %v77_v22, %v67_v19  ;;  %v287_v30 = vsel %vm276_vm2, %v285_v18, %v286_v25  ;;  %v142_v31 = vrot.slane %v141_v24, 4 }
  0x36   :  { %v304_v32 = vrot.slane %v287_v30, 7  ;;  %v205_v34 = vrot.slane %v204_v27, 4 }
  0x37   :  { %v136_v33 = vadd.f32 %v135_v26, %v134_v23  ;;  %v212_v35 = vrot.slane %v211_v28, 4  ;;  %v143_v36 = vadd.f32 %v142_v31, %v141_v24 }
  0x38   :  { %v305_v37 = vsel %vm294_vm3, %v304_v32, %v280_v29  ;;  %v206_v39 = vadd.f32 %v205_v34, %v204_v27 }
  0x39   :  { %v137_v38 = vrot.slane %v136_v33, 2  ;;  %v213_v40 = vadd.f32 %v212_v35, %v211_v28  ;;  %v306_v41 = vsel %vm296_vm4, %v304_v32, %v305_v37  ;;  %v144_v42 = vrot.slane %v143_v36, 2 }
  0x3a   :  { %v307_v43 = vsel %vm298_vm5, %v304_v32, %v306_v41  ;;  %v207_v45 = vrot.slane %v206_v39, 2 }
  0x3b   :  { %v138_v44 = vadd.f32 %v137_v38, %v136_v33  ;;  %v214_v46 = vrot.slane %v213_v40, 2  ;;  %v308_v47 = vsel %vm300_vm6, %v304_v32, %v307_v43  ;;  %v145_v48 = vadd.f32 %v144_v42, %v143_v36 }
  0x3c   :  { %v208_v50 = vadd.f32 %v207_v45, %v206_v39  ;;  %323 = vst [vmem:[%s442_s1 + $0x8] sm:$0xff] %v308_v47 }
  0x3d   :  { %v139_v49 = vrot.slane %v138_v44, 1  ;;  %v215_v51 = vadd.f32 %v214_v46, %v213_v40  ;;  %v146_v52 = vrot.slane %v145_v48, 1 }
  0x3e   :  { %v209_v54 = vrot.slane %v208_v50, 1 }
  0x3f   :  { %v140_v53 = vadd.f32 %v139_v49, %v138_v44  ;;  %v216_v55 = vrot.slane %v215_v51, 1  ;;  %v147_v56 = vadd.f32 %v146_v52, %v145_v48 }
  0x40   :  { %v210_v57 = vadd.f32 %v209_v54, %v208_v50 }
  0x41   :  { %v217_v58 = vadd.f32 %v216_v55, %v215_v51  ;;  %v227_v59 = vmul.f32 0.0625, %v147_v56  ;;  %v226_v60 = vmul.f32 0.0625, %v140_v53 }
  0x42   :  { %v236_v61 = vmul.f32 0.0625, %v210_v57 }
  0x43   :  { %v237_v62 = vmul.f32 0.0625, %v217_v58  ;;  %v264_v63 = vrot.slane %v227_v59, 6 }
  0x45   :  { %v271_v0 = vrot.slane %v237_v62, 6  ;;  %v281_v1 = vsel %vm272_vm0, %v226_v60, %v264_v63 }
  0x47   :  { %v288_v2 = vsel %vm272_vm0, %v236_v61, %v271_v0 }
  0x48   :  { %v311_v3 = vrot.slane %v288_v2, 7 }
  0x4a   :  { %v312_v4 = vsel %vm294_vm3, %v311_v3, %v281_v1 }
  0x4b   :  { %v313_v6 = vsel %vm296_vm4, %v311_v3, %v312_v4 }
  0x4c   :  { %v314_v7 = vsel %vm298_vm5, %v311_v3, %v313_v6 }
  0x4d   :  { %v315_v8 = vsel %vm300_vm6, %v311_v3, %v314_v7 }
  0x4e   :  { %v321_v9 = vadd.f32 %v315_v8, %v17_v5 }
  0x50   :  { %324 = vst [vmem:[%s442_s1 + $0x10] sm:$0xf] %v321_v9 }

// kernel: _lambda_.42
= control target key start
LH: loop header
LB: loop body
LE: loop exit
PB: predicated region body
PF: predicated region fallthrough
CT: control target
= control target key end

     0   :  { %s1681_s12 = smov 0   ;;  %s1683_s13 = smov 0   ;;  %s2073_s0 = inlined_call_operand.vmem [shape: bf16[8,1536], index: 0, kind: input, shape index: {}]   ;;  %s2074_s1 = inlined_call_operand.vmem [shape: bf16[1536,512], index: 1, kind: input, shape index: {}]   ;;  %s2075_s2 = inlined_call_operand.vmem [shape: f32[1,512], index: 2, kind: input, shape index: {}]   ;;  %s2076_s3 = inlined_call_operand.vmem [shape: f32[8,512], index: 3, kind: output, shape index: {}]  }
   0x1   :  { %s1685_s14 = smov 0   ;;  %s1687_s15 = smov 0  }
   0x2   :  { %s1689_s16 = smov 0   ;;  %s1691_s17 = smov 0  }
   0x3   :  { %s1693_s18 = smov 0  }
   0x4 LB: > { %s25_s19 = sadd.s32 1, %s1650_s16  ;;  %s28_s20 = sadd.s32 1, %s1654_s17  ;;  %s1658_s18 = sphi %s1693_s18, %s13_s18   ;;  %s1654_s17 = sphi %s1691_s17, %s2082_s17   ;;  %s1650_s16 = sphi %s1689_s16, %s2081_s16   ;;  %s1646_s15 = sphi %s1687_s15, %s2080_s15   ;;  %s1642_s14 = sphi %s1685_s14, %s2079_s14   ;;  %s1638_s13 = sphi %s1683_s13, %s2078_s13   ;;  %s1634_s12 = sphi %s1681_s12, %s2077_s12  }
   0x5   : > { %p26_p0 = scmp.ge.s32.totalorder %s25_s19, 3  ;;  %p76_p1 = scmp.ne.s32.totalorder %s1638_s13, %s1634_s12 }
   0x6   : > { %p77_p2 = scmp.eq.s32.totalorder %s1658_s18, 0  ;;  %s69_s24 = sadd.s32 1, %s1638_s13 }
   0x7   : > { %s2084_s19 = smov (%p26_p0, %s25_s19), 0  ;;  %s2086_s20 = smov (!%p26_p0, %s28_s20), %s1654_s17 }
   0x8   : > { %p78_p3 = por %p77_p2, %p76_p1  ;;  %p30_p4 = scmp.ge.s32.totalorder %s2086_s20, 2 }
   0x9   : > { %s64_s21 = ssub.s32 %s1650_s16, %s2084_s19  ;;  %p1209_p6 = scmp.ge.s32.totalorder %s1658_s18, 6 }
   0xa   : > { %s2088_s20 = smov (%p30_p4, %s2086_s20), 0 }
   0xb   : > { %s65_s22 = ssub.s32 %s1654_s17, %s2088_s20  ;;  %156 = sbr.rel (%p1209_p6) target bundleno = 87 (0x57), region = 16 }
   0xc   : > { %s66_s23 = sor.u32 %s65_s22, %s64_s21 }
   0xd   : > { %p67_p5 = scmp.eq.s32.totalorder %s66_s23, 0 }
   0xf   : > { %s1732_s25 = scalar_select %p67_p5, %s1638_s13, %s69_s24  }
  0x10   : > { %172 = sbr.rel (!%p78_p3) target bundleno = 87 (0x57), region = 24  ;;  %s174_s26 = sand.u32 (%p78_p3), 1, %s1638_s13  }
  0x11   : > { %s1212_s27 = sshll.u32 (%p78_p3), %s1654_s17, 1  ;;  %s1210_s28 = sshll.u32 (%p78_p3), %s174_s26, 9 }
  0x12   : > { %s1482_s29 = sshll.u32 (%p78_p3), %s1650_s16, 8  ;;  %s1746_s8 = scalar_lea.vmem (%p78_p3), [#allocation3], %s1210_s28 }
  0x13   : > { %s180_s30 = sadd.s32 (%p78_p3), %s1482_s29, %s1212_s27 }
  0x14   : > { %s1214_s4 = sshll.u32 (%p78_p3), %s180_s30, 2 }
  0x15   : > { %s1741_s7 = scalar_lea.vmem %s2074_s1, %s1214_s4 }
  0x16   : > { %v337_v0 = vld [vmem:[%s1741_s7] sm:$0xff]  ;;  %v339_v1 = vld [vmem:[%s1741_s7 + $0x10] sm:$0xff] }
  0x17   : > { %v341_v2 = vld [vmem:[%s1741_s7 + $0x20] sm:$0xff]  ;;  %338 = vst [vmem:[%s1746_s8] sm:$0xff] %v337_v0  ;;  %v343_v3 = vld [vmem:[%s1741_s7 + $0x30] sm:$0xff] }
  0x18   : > { %340 = vst [vmem:[%s1746_s8 + $0x8] sm:$0xff] %v339_v1  ;;  %v345_v4 = vld [vmem:[%s1741_s7 + $0x40] sm:$0xff]  ;;  %v347_v5 = vld [vmem:[%s1741_s7 + $0x50] sm:$0xff] }
  0x19   : > { %342 = vst [vmem:[%s1746_s8 + $0x10] sm:$0xff] %v341_v2  ;;  %v349_v6 = vld [vmem:[%s1741_s7 + $0x60] sm:$0xff]  ;;  %v351_v7 = vld [vmem:[%s1741_s7 + $0x70] sm:$0xff] }
  0x1a   : > { %344 = vst [vmem:[%s1746_s8 + $0x18] sm:$0xff] %v343_v3  ;;  %v353_v8 = vld [vmem:[%s1741_s7 + $0x80] sm:$0xff]  ;;  %v355_v9 = vld [vmem:[%s1741_s7 + $0x90] sm:$0xff] }
  0x1b   : > { %346 = vst [vmem:[%s1746_s8 + $0x20] sm:$0xff] %v345_v4  ;;  %v357_v10 = vld [vmem:[%s1741_s7 + $0xa0] sm:$0xff]  ;;  %v359_v11 = vld [vmem:[%s1741_s7 + $0xb0] sm:$0xff] }
  0x1c   : > { %348 = vst [vmem:[%s1746_s8 + $0x28] sm:$0xff] %v347_v5  ;;  %v361_v12 = vld [vmem:[%s1741_s7 + $0xc0] sm:$0xff]  ;;  %v363_v13 = vld [vmem:[%s1741_s7 + $0xd0] sm:$0xff] }
  0x1d   : > { %350 = vst [vmem:[%s1746_s8 + $0x30] sm:$0xff] %v349_v6  ;;  %v365_v14 = vld [vmem:[%s1741_s7 + $0xe0] sm:$0xff]  ;;  %v367_v15 = vld [vmem:[%s1741_s7 + $0xf0] sm:$0xff] }
  0x1e   : > { %352 = vst [vmem:[%s1746_s8 + $0x38] sm:$0xff] %v351_v7  ;;  %v369_v16 = vld [vmem:[%s1741_s7 + $0x100] sm:$0xff]  ;;  %v371_v17 = vld [vmem:[%s1741_s7 + $0x110] sm:$0xff] }
  0x1f   : > { %354 = vst [vmem:[%s1746_s8 + $0x40] sm:$0xff] %v353_v8  ;;  %v373_v18 = vld [vmem:[%s1741_s7 + $0x120] sm:$0xff]  ;;  %v375_v19 = vld [vmem:[%s1741_s7 + $0x130] sm:$0xff] }
  0x20   : > { %356 = vst [vmem:[%s1746_s8 + $0x48] sm:$0xff] %v355_v9  ;;  %v377_v20 = vld [vmem:[%s1741_s7 + $0x140] sm:$0xff]  ;;  %v379_v21 = vld [vmem:[%s1741_s7 + $0x150] sm:$0xff] }
  0x21   : > { %358 = vst [vmem:[%s1746_s8 + $0x50] sm:$0xff] %v357_v10  ;;  %v381_v22 = vld [vmem:[%s1741_s7 + $0x160] sm:$0xff]  ;;  %v383_v23 = vld [vmem:[%s1741_s7 + $0x170] sm:$0xff] }
  0x22   : > { %360 = vst [vmem:[%s1746_s8 + $0x58] sm:$0xff] %v359_v11  ;;  %v385_v24 = vld [vmem:[%s1741_s7 + $0x180] sm:$0xff]  ;;  %v387_v25 = vld [vmem:[%s1741_s7 + $0x190] sm:$0xff] }
  0x23   : > { %362 = vst [vmem:[%s1746_s8 + $0x60] sm:$0xff] %v361_v12  ;;  %v389_v26 = vld [vmem:[%s1741_s7 + $0x1a0] sm:$0xff]  ;;  %v391_v27 = vld [vmem:[%s1741_s7 + $0x1b0] sm:$0xff] }
  0x24   : > { %364 = vst [vmem:[%s1746_s8 + $0x68] sm:$0xff] %v363_v13  ;;  %v393_v28 = vld [vmem:[%s1741_s7 + $0x1c0] sm:$0xff]  ;;  %v395_v29 = vld [vmem:[%s1741_s7 + $0x1d0] sm:$0xff] }
  0x25   : > { %366 = vst [vmem:[%s1746_s8 + $0x70] sm:$0xff] %v365_v14  ;;  %v397_v30 = vld [vmem:[%s1741_s7 + $0x1e0] sm:$0xff]  ;;  %v399_v31 = vld [vmem:[%s1741_s7 + $0x1f0] sm:$0xff] }
  0x26   : > { %368 = vst [vmem:[%s1746_s8 + $0x78] sm:$0xff] %v367_v15  ;;  %v401_v32 = vld [vmem:[%s1741_s7 + $0x200] sm:$0xff]  ;;  %v403_v33 = vld [vmem:[%s1741_s7 + $0x210] sm:$0xff] }
  0x27   : > { %370 = vst [vmem:[%s1746_s8 + $0x80] sm:$0xff] %v369_v16  ;;  %v405_v34 = vld [vmem:[%s1741_s7 + $0x220] sm:$0xff]  ;;  %v407_v35 = vld [vmem:[%s1741_s7 + $0x230] sm:$0xff] }
  0x28   : > { %372 = vst [vmem:[%s1746_s8 + $0x88] sm:$0xff] %v371_v17  ;;  %v409_v36 = vld [vmem:[%s1741_s7 + $0x240] sm:$0xff]  ;;  %v411_v37 = vld [vmem:[%s1741_s7 + $0x250] sm:$0xff] }
  0x29   : > { %374 = vst [vmem:[%s1746_s8 + $0x90] sm:$0xff] %v373_v18  ;;  %v413_v38 = vld [vmem:[%s1741_s7 + $0x260] sm:$0xff]  ;;  %v415_v39 = vld [vmem:[%s1741_s7 + $0x270] sm:$0xff] }
  0x2a   : > { %376 = vst [vmem:[%s1746_s8 + $0x98] sm:$0xff] %v375_v19  ;;  %v417_v40 = vld [vmem:[%s1741_s7 + $0x280] sm:$0xff]  ;;  %v419_v41 = vld [vmem:[%s1741_s7 + $0x290] sm:$0xff] }
  0x2b   : > { %378 = vst [vmem:[%s1746_s8 + $0xa0] sm:$0xff] %v377_v20  ;;  %v421_v42 = vld [vmem:[%s1741_s7 + $0x2a0] sm:$0xff]  ;;  %v423_v43 = vld [vmem:[%s1741_s7 + $0x2b0] sm:$0xff] }
  0x2c   : > { %380 = vst [vmem:[%s1746_s8 + $0xa8] sm:$0xff] %v379_v21  ;;  %v425_v44 = vld [vmem:[%s1741_s7 + $0x2c0] sm:$0xff]  ;;  %v427_v45 = vld [vmem:[%s1741_s7 + $0x2d0] sm:$0xff] }
  0x2d   : > { %382 = vst [vmem:[%s1746_s8 + $0xb0] sm:$0xff] %v381_v22  ;;  %v429_v46 = vld [vmem:[%s1741_s7 + $0x2e0] sm:$0xff]  ;;  %v431_v47 = vld [vmem:[%s1741_s7 + $0x2f0] sm:$0xff] }
  0x2e   : > { %384 = vst [vmem:[%s1746_s8 + $0xb8] sm:$0xff] %v383_v23  ;;  %v433_v48 = vld [vmem:[%s1741_s7 + $0x300] sm:$0xff]  ;;  %v435_v49 = vld [vmem:[%s1741_s7 + $0x310] sm:$0xff] }
  0x2f   : > { %386 = vst [vmem:[%s1746_s8 + $0xc0] sm:$0xff] %v385_v24  ;;  %v437_v50 = vld [vmem:[%s1741_s7 + $0x320] sm:$0xff]  ;;  %v439_v51 = vld [vmem:[%s1741_s7 + $0x330] sm:$0xff] }
  0x30   : > { %388 = vst [vmem:[%s1746_s8 + $0xc8] sm:$0xff] %v387_v25  ;;  %v441_v52 = vld [vmem:[%s1741_s7 + $0x340] sm:$0xff]  ;;  %v443_v53 = vld [vmem:[%s1741_s7 + $0x350] sm:$0xff] }
  0x31   : > { %390 = vst [vmem:[%s1746_s8 + $0xd0] sm:$0xff] %v389_v26  ;;  %v445_v54 = vld [vmem:[%s1741_s7 + $0x360] sm:$0xff]  ;;  %v447_v55 = vld [vmem:[%s1741_s7 + $0x370] sm:$0xff] }
  0x32   : > { %392 = vst [vmem:[%s1746_s8 + $0xd8] sm:$0xff] %v391_v27  ;;  %v449_v56 = vld [vmem:[%s1741_s7 + $0x380] sm:$0xff]  ;;  %v451_v57 = vld [vmem:[%s1741_s7 + $0x390] sm:$0xff] }
  0x33   : > { %394 = vst [vmem:[%s1746_s8 + $0xe0] sm:$0xff] %v393_v28  ;;  %v453_v58 = vld [vmem:[%s1741_s7 + $0x3a0] sm:$0xff]  ;;  %v455_v59 = vld [vmem:[%s1741_s7 + $0x3b0] sm:$0xff] }
  0x34   : > { %396 = vst [vmem:[%s1746_s8 + $0xe8] sm:$0xff] %v395_v29  ;;  %v457_v60 = vld [vmem:[%s1741_s7 + $0x3c0] sm:$0xff]  ;;  %v459_v61 = vld [vmem:[%s1741_s7 + $0x3d0] sm:$0xff] }
  0x35   : > { %398 = vst [vmem:[%s1746_s8 + $0xf0] sm:$0xff] %v397_v30  ;;  %v461_v62 = vld [vmem:[%s1741_s7 + $0x3e0] sm:$0xff]  ;;  %v463_v63 = vld [vmem:[%s1741_s7 + $0x3f0] sm:$0xff] }
  0x36   : > { %400 = vst [vmem:[%s1746_s8 + $0xf8] sm:$0xff] %v399_v31 }
  0x37   : > { %402 = vst [vmem:[%s1746_s8 + $0x100] sm:$0xff] %v401_v32 }
  0x38   : > { %404 = vst [vmem:[%s1746_s8 + $0x108] sm:$0xff] %v403_v33 }
  0x39   : > { %406 = vst [vmem:[%s1746_s8 + $0x110] sm:$0xff] %v405_v34 }
  0x3a   : > { %408 = vst [vmem:[%s1746_s8 + $0x118] sm:$0xff] %v407_v35 }
  0x3b   : > { %410 = vst [vmem:[%s1746_s8 + $0x120] sm:$0xff] %v409_v36 }
  0x3c   : > { %412 = vst [vmem:[%s1746_s8 + $0x128] sm:$0xff] %v411_v37 }
  0x3d   : > { %414 = vst [vmem:[%s1746_s8 + $0x130] sm:$0xff] %v413_v38 }
  0x3e   : > { %416 = vst [vmem:[%s1746_s8 + $0x138] sm:$0xff] %v415_v39 }
  0x3f   : > { %418 = vst [vmem:[%s1746_s8 + $0x140] sm:$0xff] %v417_v40 }
  0x40   : > { %420 = vst [vmem:[%s1746_s8 + $0x148] sm:$0xff] %v419_v41 }
  0x41   : > { %422 = vst [vmem:[%s1746_s8 + $0x150] sm:$0xff] %v421_v42 }
  0x42   : > { %424 = vst [vmem:[%s1746_s8 + $0x158] sm:$0xff] %v423_v43 }
  0x43   : > { %426 = vst [vmem:[%s1746_s8 + $0x160] sm:$0xff] %v425_v44 }
  0x44   : > { %428 = vst [vmem:[%s1746_s8 + $0x168] sm:$0xff] %v427_v45 }
  0x45   : > { %430 = vst [vmem:[%s1746_s8 + $0x170] sm:$0xff] %v429_v46 }
  0x46   : > { %432 = vst [vmem:[%s1746_s8 + $0x178] sm:$0xff] %v431_v47 }
  0x47   : > { %434 = vst [vmem:[%s1746_s8 + $0x180] sm:$0xff] %v433_v48 }
  0x48   : > { %436 = vst [vmem:[%s1746_s8 + $0x188] sm:$0xff] %v435_v49 }
  0x49   : > { %438 = vst [vmem:[%s1746_s8 + $0x190] sm:$0xff] %v437_v50 }
  0x4a   : > { %440 = vst [vmem:[%s1746_s8 + $0x198] sm:$0xff] %v439_v51 }
  0x4b   : > { %442 = vst [vmem:[%s1746_s8 + $0x1a0] sm:$0xff] %v441_v52 }
  0x4c   : > { %444 = vst [vmem:[%s1746_s8 + $0x1a8] sm:$0xff] %v443_v53 }
  0x4d   : > { %446 = vst [vmem:[%s1746_s8 + $0x1b0] sm:$0xff] %v445_v54 }
  0x4e   : > { %448 = vst [vmem:[%s1746_s8 + $0x1b8] sm:$0xff] %v447_v55 }
  0x4f   : > { %450 = vst [vmem:[%s1746_s8 + $0x1c0] sm:$0xff] %v449_v56 }
  0x50   : > { %452 = vst [vmem:[%s1746_s8 + $0x1c8] sm:$0xff] %v451_v57 }
  0x51   : > { %454 = vst [vmem:[%s1746_s8 + $0x1d0] sm:$0xff] %v453_v58 }
  0x52   : > { %456 = vst [vmem:[%s1746_s8 + $0x1d8] sm:$0xff] %v455_v59 }
  0x53   : > { %458 = vst [vmem:[%s1746_s8 + $0x1e0] sm:$0xff] %v457_v60 }
  0x54   : > { %460 = vst [vmem:[%s1746_s8 + $0x1e8] sm:$0xff] %v459_v61 }
  0x55   : > { %462 = vst [vmem:[%s1746_s8 + $0x1f0] sm:$0xff] %v461_v62 }
  0x56   : > { %464 = vst [vmem:[%s1746_s8 + $0x1f8] sm:$0xff] %v463_v63 }
  0x57 PF: > { %p1215_p7 = scmp.ge.s32.totalorder %s1658_s18, 1  ;;  %p477_p8 = scmp.lt.s32.totalorder %s1658_s18, 7 }
  0x59   : > { %p478_p9 = pnand %p1215_p7, %p477_p8 }
  0x5a   : > { %s484_s9 = sand.u32 (!%p478_p9), 1, %s1634_s12   ;;  %s1217_s10 = sshll.u32 (!%p478_p9), %s1642_s14, 2 }
  0x5b   : > { %481 = sbr.rel (%p478_p9) target bundleno = 324 (0x144), region = 66  ;;  %s1216_s11 = sshll.u32 (!%p478_p9), %s484_s9, 9 }
  0x5c   : > { %p527_p10 = scmp.lt.s32.totalorder (!%p478_p9), %s1217_s10, 11  ;;  %s1219_s21 = sshll.u32 (!%p478_p9), %s1646_s15, 1 }
  0x5d   : > { %p537_p11 = scmp.lt.s32.totalorder (!%p478_p9), %s1219_s21, 3  ;;  %s1895_s5 = scalar_lea.vmem (!%p478_p9), [#allocation3], %s1216_s11 }
  0x5e   : > { %p1222_p12 = scmp.ne.s32.totalorder (!%p478_p9), %s1642_s14, 0 }
  0x60   : > { %s2090_s10 = smov (!%p527_p10, %s1217_s10), 11  ;;  %s2092_s21 = smov (!%p537_p11, %s1219_s21), 3 }
  0x61   : > { %s1218_s22 = sshll.u32 %s2090_s10, 2  ;;  %s539_s12 = scalar_lea.vmem %s2075_s2, %s2092_s21 }
  0x62   : > { %s1881_s26 = scalar_lea.vmem %s2073_s0, %s1218_s22  ;;  %s1221_s29 = sshll.u32 %s2092_s21, 3 }
  0x63   : > { %s1893_s15 = scalar_lea.vmem %s2076_s3, %s1221_s29  ;;  %554 = sbr.rel (%p1222_p12) target bundleno = 107 (0x6b), region = 74 }
  0x68   : > { %v1660_v0 = vmov 0.0  }
  0x69   : > { %555 = vst [vmem:[#allocation2] sm:$0xff] %v1660_v0 }
  0x6a   : > { %556 = vst [vmem:[#allocation2 + $0x8] sm:$0xff] %v1660_v0 }
  0x6b PF: > { %v1281_v1 = vld [vmem:[%s1895_s5 + $0x70] sm:$0xf]  ;;  %v1498_v2 = vld [vmem:[%s1895_s5 + $0x74] sm:$0xf0]  ;;  %v1273_v12 = vld [vmem:[%s1895_s5 + $0x60] sm:$0xf] }
  0x6c   : > { %v1345_v3 = vld [vmem:[%s1895_s5 + $0xf0] sm:$0xf]  ;;  %v1282_v4 = vor.u32 %v1498_v2, %v1281_v1  ;;  %v1514_v5 = vld [vmem:[%s1895_s5 + $0xf4] sm:$0xf0]  ;;  %v1496_v14 = vld [vmem:[%s1895_s5 + $0x64] sm:$0xf0] }
  0x6d   : > { %v1409_v6 = vld [vmem:[%s1895_s5 + $0x170] sm:$0xf]  ;;  %v1530_v7 = vld [vmem:[%s1895_s5 + $0x174] sm:$0xf0]  ;;  %v1346_v8 = vor.u32 %v1514_v5, %v1345_v3  ;;  %v1337_v15 = vld [vmem:[%s1895_s5 + $0xe0] sm:$0xf]  ;;  %v1274_v17 = vor.u32 %v1496_v14, %v1273_v12 }
  0x6e   : > { %v1410_v9 = vor.u32 %v1530_v7, %v1409_v6  ;;  %v1473_v10 = vld [vmem:[%s1895_s5 + $0x1f0] sm:$0xf]  ;;  %v1546_v11 = vld [vmem:[%s1895_s5 + $0x1f4] sm:$0xf0]  ;;  %959 = vmatpush.bf16.msra.mxu0 %v1282_v4  ;;  %v1512_v16 = vld [vmem:[%s1895_s5 + $0xe4] sm:$0xf0] }
  0x6f   : > { %v1474_v13 = vor.u32 %v1546_v11, %v1473_v10  ;;  %972 = vmatpush.bf16.msra.mxu1 %v1346_v8  ;;  %v1338_v18 = vor.u32 %v1512_v16, %v1337_v15  ;;  %v1401_v19 = vld [vmem:[%s1895_s5 + $0x160] sm:$0xf]  ;;  %v1528_v20 = vld [vmem:[%s1895_s5 + $0x164] sm:$0xf0]  ;;  %v1265_v24 = vld [vmem:[%s1895_s5 + $0x50] sm:$0xf] }
  0x70   : > { %985 = vmatpush.bf16.msra.mxu2 %v1410_v9  ;;  %v1465_v21 = vld [vmem:[%s1895_s5 + $0x1e0] sm:$0xf]  ;;  %v1402_v22 = vor.u32 %v1528_v20, %v1401_v19  ;;  %v1544_v23 = vld [vmem:[%s1895_s5 + $0x1e4] sm:$0xf0]  ;;  %v1494_v25 = vld [vmem:[%s1895_s5 + $0x54] sm:$0xf0] }
  0x71   : > { %998 = vmatpush.bf16.msra.mxu3 %v1474_v13  ;;  %v1466_v26 = vor.u32 %v1544_v23, %v1465_v21  ;;  %v1329_v27 = vld [vmem:[%s1895_s5 + $0xd0] sm:$0xf]  ;;  %v1510_v28 = vld [vmem:[%s1895_s5 + $0xd4] sm:$0xf0]  ;;  %v1266_v30 = vor.u32 %v1494_v25, %v1265_v24  ;;  %v1257_v36 = vld [vmem:[%s1895_s5 + $0x40] sm:$0xf] }
  0x72   : > { %v1393_v29 = vld [vmem:[%s1895_s5 + $0x150] sm:$0xf]  ;;  %960 = vmatpush.bf16.msra.mxu0 %v1274_v17  ;;  %v1526_v31 = vld [vmem:[%s1895_s5 + $0x154] sm:$0xf0]  ;;  %v1330_v34 = vor.u32 %v1510_v28, %v1329_v27  ;;  %v1492_v37 = vld [vmem:[%s1895_s5 + $0x44] sm:$0xf0] }
  0x73   : > { %v1457_v32 = vld [vmem:[%s1895_s5 + $0x1d0] sm:$0xf]  ;;  %v1542_v33 = vld [vmem:[%s1895_s5 + $0x1d4] sm:$0xf0]  ;;  %973 = vmatpush.bf16.msra.mxu1 %v1338_v18  ;;  %v1394_v35 = vor.u32 %v1526_v31, %v1393_v29  ;;  %v1321_v38 = vld [vmem:[%s1895_s5 + $0xc0] sm:$0xf]  ;;  %v1258_v45 = vor.u32 %v1492_v37, %v1257_v36 }
  0x74   : > { %986 = vmatpush.bf16.msra.mxu2 %v1402_v22  ;;  %v1458_v39 = vor.u32 %v1542_v33, %v1457_v32  ;;  %v1508_v40 = vld [vmem:[%s1895_s5 + $0xc4] sm:$0xf0]  ;;  %v1385_v41 = vld [vmem:[%s1895_s5 + $0x140] sm:$0xf]  ;;  %v1249_v48 = vld [vmem:[%s1895_s5 + $0x30] sm:$0xf] }
  0x75   : > { %999 = vmatpush.bf16.msra.mxu3 %v1466_v26  ;;  %v1524_v42 = vld [vmem:[%s1895_s5 + $0x144] sm:$0xf0]  ;;  %v1449_v43 = vld [vmem:[%s1895_s5 + $0x1c0] sm:$0xf]  ;;  %v1322_v46 = vor.u32 %v1508_v40, %v1321_v38  ;;  %v1490_v49 = vld [vmem:[%s1895_s5 + $0x34] sm:$0xf0] }
  0x76   : > { %v1540_v44 = vld [vmem:[%s1895_s5 + $0x1c4] sm:$0xf0]  ;;  %961 = vmatpush.bf16.msra.mxu0 %v1266_v30  ;;  %v1386_v47 = vor.u32 %v1524_v42, %v1385_v41  ;;  %v1313_v50 = vld [vmem:[%s1895_s5 + $0xb0] sm:$0xf]  ;;  %v1506_v52 = vld [vmem:[%s1895_s5 + $0xb4] sm:$0xf0]  ;;  %v1250_v57 = vor.u32 %v1490_v49, %v1249_v48 }
  0x77   : > { %974 = vmatpush.bf16.msra.mxu1 %v1330_v34  ;;  %v1450_v51 = vor.u32 %v1540_v44, %v1449_v43  ;;  %v1377_v53 = vld [vmem:[%s1895_s5 + $0x130] sm:$0xf]  ;;  %v1522_v54 = vld [vmem:[%s1895_s5 + $0x134] sm:$0xf0]  ;;  %v1314_v58 = vor.u32 %v1506_v52, %v1313_v50  ;;  %v1241_v60 = vld [vmem:[%s1895_s5 + $0x20] sm:$0xf] }
  0x78   : > { %987 = vmatpush.bf16.msra.mxu2 %v1394_v35  ;;  %v1441_v55 = vld [vmem:[%s1895_s5 + $0x1b0] sm:$0xf]  ;;  %v1538_v56 = vld [vmem:[%s1895_s5 + $0x1b4] sm:$0xf0]  ;;  %v1378_v59 = vor.u32 %v1522_v54, %v1377_v53  ;;  %v1488_v61 = vld [vmem:[%s1895_s5 + $0x24] sm:$0xf0] }
  0x79   : > { %1000 = vmatpush.bf16.msra.mxu3 %v1458_v39  ;;  %v1305_v62 = vld [vmem:[%s1895_s5 + $0xa0] sm:$0xf]  ;;  %v1442_v63 = vor.u32 %v1538_v56, %v1441_v55  ;;  %v1504_v0 = vld [vmem:[%s1895_s5 + $0xa4] sm:$0xf0]  ;;  %v1242_v5 = vor.u32 %v1488_v61, %v1241_v60  ;;  %v1233_v8 = vld [vmem:[%s1895_s5 + $0x10] sm:$0xf] }
  0x7a   : > { %962 = vmatpush.bf16.msra.mxu0 %v1258_v45  ;;  %v1369_v1 = vld [vmem:[%s1895_s5 + $0x120] sm:$0xf]  ;;  %v1520_v2 = vld [vmem:[%s1895_s5 + $0x124] sm:$0xf0]  ;;  %v1306_v6 = vor.u32 %v1504_v0, %v1305_v62  ;;  %v1486_v9 = vld [vmem:[%s1895_s5 + $0x14] sm:$0xf0] }
  0x7b   : > { %975 = vmatpush.bf16.msra.mxu1 %v1322_v46  ;;  %v1433_v3 = vld [vmem:[%s1895_s5 + $0x1a0] sm:$0xf]  ;;  %v1536_v4 = vld [vmem:[%s1895_s5 + $0x1a4] sm:$0xf0]  ;;  %v1370_v7 = vor.u32 %v1520_v2, %v1369_v1  ;;  %v1297_v10 = vld [vmem:[%s1895_s5 + $0x90] sm:$0xf]  ;;  %v1234_v17 = vor.u32 %v1486_v9, %v1233_v8 }
  0x7c   : > { %988 = vmatpush.bf16.msra.mxu2 %v1386_v47  ;;  %v1434_v11 = vor.u32 %v1536_v4, %v1433_v3  ;;  %v1502_v12 = vld [vmem:[%s1895_s5 + $0x94] sm:$0xf0]  ;;  %v1361_v13 = vld [vmem:[%s1895_s5 + $0x110] sm:$0xf]  ;;  %v1225_v18 = vld [vmem:[%s1895_s5] sm:$0xf] }
  0x7d   : > { %1001 = vmatpush.bf16.msra.mxu3 %v1450_v51  ;;  %v1518_v14 = vld [vmem:[%s1895_s5 + $0x114] sm:$0xf0]  ;;  %v1425_v15 = vld [vmem:[%s1895_s5 + $0x190] sm:$0xf]  ;;  %v1484_v19 = vld [vmem:[%s1895_s5 + $0x4] sm:$0xf0]  ;;  %v1298_v21 = vor.u32 %v1502_v12, %v1297_v10 }
  0x7e   : > { %963 = vmatpush.bf16.msra.mxu0 %v1250_v57  ;;  %v1534_v16 = vld [vmem:[%s1895_s5 + $0x194] sm:$0xf0]  ;;  %v1289_v20 = vld [vmem:[%s1895_s5 + $0x80] sm:$0xf]  ;;  %v1362_v22 = vor.u32 %v1518_v14, %v1361_v13  ;;  %v1500_v23 = vld [vmem:[%s1895_s5 + $0x84] sm:$0xf0]  ;;  %v1226_v33 = vor.u32 %v1484_v19, %v1225_v18 }
  0x7f   : > { %976 = vmatpush.bf16.msra.mxu1 %v1314_v58  ;;  %v1353_v24 = vld [vmem:[%s1895_s5 + $0x100] sm:$0xf]  ;;  %v1516_v25 = vld [vmem:[%s1895_s5 + $0x104] sm:$0xf0]  ;;  %v1426_v26 = vor.u32 %v1534_v16, %v1425_v15  ;;  %v1497_v29 = vld [vmem:[%s1895_s5 + $0x74] sm:$0xf]  ;;  %v1290_v38 = vor.u32 %v1500_v23, %v1289_v20 }
  0x80   : > { %989 = vmatpush.bf16.msra.mxu2 %v1378_v59  ;;  %v1417_v27 = vld [vmem:[%s1895_s5 + $0x180] sm:$0xf]  ;;  %v1532_v28 = vld [vmem:[%s1895_s5 + $0x184] sm:$0xf0]  ;;  %v1283_v30 = vld [vmem:[%s1895_s5 + $0x78] sm:$0xf0]  ;;  %v1354_v39 = vor.u32 %v1516_v25, %v1353_v24 }
  0x81   : > { %1002 = vmatpush.bf16.msra.mxu3 %v1442_v63  ;;  %v1513_v31 = vld [vmem:[%s1895_s5 + $0xf4] sm:$0xf]  ;;  %v560_v32 = vld [vmem:[%s1881_s26 + $0x8] sm:$0xff]  ;;  %v1418_v43 = vor.u32 %v1532_v28, %v1417_v27  ;;  %v1286_v44 = vor.u32 %v1497_v29, %v1283_v30  ;;  %v1495_v48 = vld [vmem:[%s1895_s5 + $0x64] sm:$0xf]  ;;  %p1479_p13 = scmp.ne.s32.totalorder %s1642_s14, 2 }
  0x82   : > { %964 = vmatpush.bf16.msra.mxu0 %v1242_v5  ;;  %v1347_v34 = vld [vmem:[%s1895_s5 + $0xf8] sm:$0xf0]  ;;  %v1529_v35 = vld [vmem:[%s1895_s5 + $0x174] sm:$0xf]  ;;  %v629_v37 = vunpack.c.l.b16 %v560_v32  ;;  %v630_v42 = vunpack.c.h.b16 %v560_v32  ;;  %v1275_v49 = vld [vmem:[%s1895_s5 + $0x68] sm:$0xf0] }
  0x83   : > { %977 = vmatpush.bf16.msra.mxu1 %v1306_v6  ;;  %v1411_v36 = vld [vmem:[%s1895_s5 + $0x178] sm:$0xf0]  ;;  %v1545_v40 = vld [vmem:[%s1895_s5 + $0x1f4] sm:$0xf]  ;;  %v1350_v46 = vor.u32 %v1513_v31, %v1347_v34  ;;  %v1511_v50 = vld [vmem:[%s1895_s5 + $0xe4] sm:$0xf]  ;;  %v1278_v62 = vor.u32 %v1495_v48, %v1275_v49 }
  0x84   : > { %990 = vmatpush.bf16.msra.mxu2 %v1370_v7  ;;  %v1475_v41 = vld [vmem:[%s1895_s5 + $0x1f8] sm:$0xf0]  ;;  %v559_v45 = vld [vmem:[%s1881_s26] sm:$0xff]  ;;  %v1414_v47 = vor.u32 %v1529_v35, %v1411_v36  ;;  %v1339_v54 = vld [vmem:[%s1895_s5 + $0xe8] sm:$0xf0]  ;;  %v1978_v57 = vpack.c.b16 %v629_v37, %v629_v37  ;;  %v1982_v60 = vpack.c.b16 %v630_v42, %v630_v42 }
  0x85   : > { %1003 = vmatpush.bf16.msra.mxu3 %v1434_v11  ;;  %v627_v51 = vunpack.c.l.b16 %v559_v45  ;;  %v628_v52 = vunpack.c.h.b16 %v559_v45  ;;  %v1478_v53 = vor.u32 %v1545_v40, %v1475_v41  ;;  %v1527_v55 = vld [vmem:[%s1895_s5 + $0x164] sm:$0xf]  ;;  %v1403_v56 = vld [vmem:[%s1895_s5 + $0x168] sm:$0xf0]  ;;  %v1342_v0 = vor.u32 %v1511_v50, %v1339_v54  ;;  %v1493_v2 = vld [vmem:[%s1895_s5 + $0x54] sm:$0xf] }
  0x86   : > { %965 = vmatpush.bf16.msra.mxu0 %v1234_v17  ;;  %v1543_v58 = vld [vmem:[%s1895_s5 + $0x1e4] sm:$0xf]  ;;  %v1467_v59 = vld [vmem:[%s1895_s5 + $0x1e8] sm:$0xf0]  ;;  %v1406_v1 = vor.u32 %v1527_v55, %v1403_v56  ;;  %v1267_v3 = vld [vmem:[%s1895_s5 + $0x58] sm:$0xf0] }
  0x87   : > { %978 = vmatpush.bf16.msra.mxu1 %v1298_v21  ;;  %v1984_v61 = vpack.c.b16 %v627_v51, %v627_v51  ;;  %v1986_v63 = vpack.c.b16 %v628_v52, %v628_v52  ;;  %v1509_v4 = vld [vmem:[%s1895_s5 + $0xd4] sm:$0xf]  ;;  %v1470_v5 = vor.u32 %v1543_v58, %v1467_v59  ;;  %v1331_v6 = vld [vmem:[%s1895_s5 + $0xd8] sm:$0xf0]  ;;  %v1270_v11 = vor.u32 %v1493_v2, %v1267_v3  ;;  %v1491_v14 = vld [vmem:[%s1895_s5 + $0x44] sm:$0xf] }
  0x88   : > { %991 = vmatpush.bf16.msra.mxu2 %v1362_v22  ;;  %v1525_v7 = vld [vmem:[%s1895_s5 + $0x154] sm:$0xf]  ;;  %v1395_v8 = vld [vmem:[%s1895_s5 + $0x158] sm:$0xf0]  ;;  %v1334_v12 = vor.u32 %v1509_v4, %v1331_v6  ;;  %v1259_v15 = vld [vmem:[%s1895_s5 + $0x48] sm:$0xf0] }
  0x89   : > { %1004 = vmatpush.bf16.msra.mxu3 %v1426_v26  ;;  %v1541_v9 = vld [vmem:[%s1895_s5 + $0x1d4] sm:$0xf]  ;;  %v1459_v10 = vld [vmem:[%s1895_s5 + $0x1d8] sm:$0xf0]  ;;  %v1398_v13 = vor.u32 %v1525_v7, %v1395_v8  ;;  %v1507_v16 = vld [vmem:[%s1895_s5 + $0xc4] sm:$0xf]  ;;  %v1262_v23 = vor.u32 %v1491_v14, %v1259_v15 }
  0x8a   : > { %966 = vmatpush.bf16.msra.mxu0 %v1226_v33  ;;  %v1462_v17 = vor.u32 %v1541_v9, %v1459_v10  ;;  %v1323_v18 = vld [vmem:[%s1895_s5 + $0xc8] sm:$0xf0]  ;;  %v1523_v19 = vld [vmem:[%s1895_s5 + $0x144] sm:$0xf]  ;;  %v1489_v26 = vld [vmem:[%s1895_s5 + $0x34] sm:$0xf] }
  0x8b   : > { %979 = vmatpush.bf16.msra.mxu1 %v1290_v38  ;;  %v1387_v20 = vld [vmem:[%s1895_s5 + $0x148] sm:$0xf0]  ;;  %v1539_v21 = vld [vmem:[%s1895_s5 + $0x1c4] sm:$0xf]  ;;  %v1326_v24 = vor.u32 %v1507_v16, %v1323_v18  ;;  %v1251_v27 = vld [vmem:[%s1895_s5 + $0x38] sm:$0xf0] }
  0x8c   : > { %992 = vmatpush.bf16.msra.mxu2 %v1354_v39  ;;  %v1451_v22 = vld [vmem:[%s1895_s5 + $0x1c8] sm:$0xf0]  ;;  %v1390_v25 = vor.u32 %v1523_v19, %v1387_v20  ;;  %v1505_v28 = vld [vmem:[%s1895_s5 + $0xb4] sm:$0xf]  ;;  %v1315_v30 = vld [vmem:[%s1895_s5 + $0xb8] sm:$0xf0]  ;;  %v1254_v35 = vor.u32 %v1489_v26, %v1251_v27 }
  0x8d   : > { %1005 = vmatpush.bf16.msra.mxu3 %v1418_v43  ;;  %967 = vmatmul.bf16.vlgmr.msra.gmra.mxu0 %v1984_v61  ;;  %v1454_v29 = vor.u32 %v1539_v21, %v1451_v22  ;;  %v1521_v31 = vld [vmem:[%s1895_s5 + $0x134] sm:$0xf]  ;;  %v1379_v32 = vld [vmem:[%s1895_s5 + $0x138] sm:$0xf0]  ;;  %v1318_v36 = vor.u32 %v1505_v28, %v1315_v30  ;;  %v1487_v38 = vld [vmem:[%s1895_s5 + $0x24] sm:$0xf] }
  0x8e   : > { %1011 = vmatpush.bf16.msrb.mxu0 %v1286_v44  ;;  %980 = vmatmul.bf16.vlgmr.msra.gmra.mxu1 %v1986_v63  ;;  %v1537_v33 = vld [vmem:[%s1895_s5 + $0x1b4] sm:$0xf]  ;;  %v1443_v34 = vld [vmem:[%s1895_s5 + $0x1b8] sm:$0xf0]  ;;  %v1382_v37 = vor.u32 %v1521_v31, %v1379_v32  ;;  %v1243_v39 = vld [vmem:[%s1895_s5 + $0x28] sm:$0xf0] }
  0x8f   : > { %1024 = vmatpush.bf16.msrb.mxu1 %v1350_v46  ;;  %993 = vmatmul.bf16.vlgmr.msra.gmra.mxu2 %v1978_v57  ;;  %v1503_v40 = vld [vmem:[%s1895_s5 + $0xa4] sm:$0xf]  ;;  %v1446_v41 = vor.u32 %v1537_v33, %v1443_v34  ;;  %v1307_v42 = vld [vmem:[%s1895_s5 + $0xa8] sm:$0xf0]  ;;  %v1485_v50 = vld [vmem:[%s1895_s5 + $0x14] sm:$0xf] }
  0x90   : > { %1037 = vmatpush.bf16.msrb.mxu2 %v1414_v47  ;;  %1006 = vmatmul.bf16.vlgmr.msra.gmra.mxu3 %v1982_v60  ;;  %v1519_v43 = vld [vmem:[%s1895_s5 + $0x124] sm:$0xf]  ;;  %v1371_v44 = vld [vmem:[%s1895_s5 + $0x128] sm:$0xf0]  ;;  %v1246_v47 = vor.u32 %v1487_v38, %v1243_v39  ;;  %v1310_v48 = vor.u32 %v1503_v40, %v1307_v42  ;;  %v1235_v51 = vld [vmem:[%s1895_s5 + $0x18] sm:$0xf0] }
  0x91   : > { %1050 = vmatpush.bf16.msrb.mxu3 %v1478_v53  ;;  %v1535_v45 = vld [vmem:[%s1895_s5 + $0x1a4] sm:$0xf]  ;;  %v1435_v46 = vld [vmem:[%s1895_s5 + $0x1a8] sm:$0xf0]  ;;  %v1374_v49 = vor.u32 %v1519_v43, %v1371_v44  ;;  %v1501_v52 = vld [vmem:[%s1895_s5 + $0x94] sm:$0xf] }
  0x92   : > { %1012 = vmatpush.bf16.msrb.mxu0 %v1278_v62  ;;  %v1438_v53 = vor.u32 %v1535_v45, %v1435_v46  ;;  %v1299_v54 = vld [vmem:[%s1895_s5 + $0x98] sm:$0xf0]  ;;  %v1517_v55 = vld [vmem:[%s1895_s5 + $0x114] sm:$0xf]  ;;  %v1238_v62 = vor.u32 %v1485_v50, %v1235_v51  ;;  %v1483_v2 = vld [vmem:[%s1895_s5 + $0x4] sm:$0xf] }
  0x93   : > { %1025 = vmatpush.bf16.msrb.mxu1 %v1342_v0  ;;  %v1363_v56 = vld [vmem:[%s1895_s5 + $0x118] sm:$0xf0]  ;;  %v1533_v58 = vld [vmem:[%s1895_s5 + $0x194] sm:$0xf]  ;;  %v1302_v0 = vor.u32 %v1501_v52, %v1299_v54  ;;  %v1227_v3 = vld [vmem:[%s1895_s5 + $0x8] sm:$0xf0] }
  0x94   : > { %1038 = vmatpush.bf16.msrb.mxu2 %v1406_v1  ;;  %v1427_v59 = vld [vmem:[%s1895_s5 + $0x198] sm:$0xf0]  ;;  %v1366_v1 = vor.u32 %v1517_v55, %v1363_v56  ;;  %v1499_v4 = vld [vmem:[%s1895_s5 + $0x84] sm:$0xf]  ;;  %v1291_v6 = vld [vmem:[%s1895_s5 + $0x88] sm:$0xf0] }
  0x95   : > { %1051 = vmatpush.bf16.msrb.mxu3 %v1470_v5  ;;  %v1430_v5 = vor.u32 %v1533_v58, %v1427_v59  ;;  %v1515_v7 = vld [vmem:[%s1895_s5 + $0x104] sm:$0xf]  ;;  %v1355_v8 = vld [vmem:[%s1895_s5 + $0x108] sm:$0xf0]  ;;  %v557_v21 = vld [vmem:[#allocation2] sm:$0xff] }
  0x96   : > { %1013 = vmatpush.bf16.msrb.mxu0 %v1270_v11  ;;  %v1531_v9 = vld [vmem:[%s1895_s5 + $0x184] sm:$0xf]  ;;  %v1419_v10 = vld [vmem:[%s1895_s5 + $0x188] sm:$0xf0]  ;;  %v1230_v11 = vor.u32 %v1483_v2, %v1227_v3  ;;  %v558_v31 = vld [vmem:[#allocation2 + $0x8] sm:$0xff] }
  0x97   : > { %1026 = vmatpush.bf16.msrb.mxu1 %v1334_v12  ;;  %v1294_v12 = vor.u32 %v1499_v4, %v1291_v6  ;;  %v1422_v14 = vor.u32 %v1531_v9, %v1419_v10 }
  0x98   : > { %1039 = vmatpush.bf16.msrb.mxu2 %v1398_v13  ;;  %v1358_v13 = vor.u32 %v1515_v7, %v1355_v8 }
  0x99   : > { %1052 = vmatpush.bf16.msrb.mxu3 %v1462_v17 }
  0x9a   : > { %1014 = vmatpush.bf16.msrb.mxu0 %v1262_v23 }
  0x9b   : > { %1027 = vmatpush.bf16.msrb.mxu1 %v1326_v24 }
  0x9c   : > { %1040 = vmatpush.bf16.msrb.mxu2 %v1390_v25 }
  0x9d   : > { %1053 = vmatpush.bf16.msrb.mxu3 %v1454_v29 }
  0x9e   : > { %1015 = vmatpush.bf16.msrb.mxu0 %v1254_v35 }
  0x9f   : > { %1028 = vmatpush.bf16.msrb.mxu1 %v1318_v36 }
  0xa0   : > { %1041 = vmatpush.bf16.msrb.mxu2 %v1382_v37 }
  0xa1   : > { %1054 = vmatpush.bf16.msrb.mxu3 %v1446_v41 }
  0xa2   : > { %1016 = vmatpush.bf16.msrb.mxu0 %v1246_v47 }
  0xa3   : > { %1029 = vmatpush.bf16.msrb.mxu1 %v1310_v48 }
  0xa4   : > { %1042 = vmatpush.bf16.msrb.mxu2 %v1374_v49 }
  0xa5   : > { %1055 = vmatpush.bf16.msrb.mxu3 %v1438_v53 }
  0xa6   : > { %1017 = vmatpush.bf16.msrb.mxu0 %v1238_v62 }
  0xa7   : > { %1030 = vmatpush.bf16.msrb.mxu1 %v1302_v0 }
  0xa8   : > { %1043 = vmatpush.bf16.msrb.mxu2 %v1366_v1 }
  0xa9   : > { %1056 = vmatpush.bf16.msrb.mxu3 %v1430_v5 }
  0xaa   : > { %1018 = vmatpush.bf16.msrb.mxu0 %v1230_v11 }
  0xab   : > { %1031 = vmatpush.bf16.msrb.mxu1 %v1294_v12 }
  0xac   : > { %1044 = vmatpush.bf16.msrb.mxu2 %v1358_v13 }
  0xad   : > { %1057 = vmatpush.bf16.msrb.mxu3 %v1422_v14  ;;  %1019 = vmatmul.bf16.vlgmr.msrb.gmra.mxu0 %v1984_v61 }
  0xae   : > { %1032 = vmatmul.bf16.vlgmr.msrb.gmra.mxu1 %v1986_v63 }
  0xaf   : > { %1045 = vmatmul.bf16.vlgmr.msrb.gmra.mxu2 %v1978_v57 }
  0xb0   : > { %1058 = vmatmul.bf16.vlgmr.msrb.gmra.mxu3 %v1982_v60 }
 0x10a   : > { %v968_v15 = vpop.f32.mrf.mxu0 }
 0x10b   : > { %v981_v16 = vpop.f32.mrf.mxu1 }
 0x10c   : > { %v982_v17 = vadd.f32 %v981_v16, %v968_v15 }
 0x112   : > { %v994_v18 = vpop.f32.mrf.mxu2  ;;  %v970_v23 = vpop.f32.mrf.mxu0 }
 0x113   : > { %v995_v19 = vadd.f32 %v994_v18, %v982_v17  ;;  %v1007_v20 = vpop.f32.mrf.mxu3  ;;  %v983_v24 = vpop.f32.mrf.mxu1 }
 0x115   : > { %v1008_v22 = vadd.f32 %v1007_v20, %v995_v19 }
 0x117   : > { %v1063_v25 = vadd.f32 %v1008_v22, %v557_v21 }
 0x119   : > { %1065 = vst [vmem:[#allocation2] sm:$0xff] %v1063_v25 }
 0x11a   : > { %v996_v26 = vpop.f32.mrf.mxu2 }
 0x11b   : > { %v1009_v61 = vpop.f32.mrf.mxu3 }
 0x12a   : > { %v1020_v27 = vpop.f32.mrf.mxu0 }
 0x12b   : > { %v1033_v63 = vpop.f32.mrf.mxu1 }
 0x12c   : > { %v1034_v28 = vadd.f32 %v1033_v63, %v1020_v27 }
 0x132   : > { %v1046_v57 = vpop.f32.mrf.mxu2  ;;  %v1022_v30 = vpop.f32.mrf.mxu0 }
 0x133   : > { %v1047_v29 = vadd.f32 %v1046_v57, %v1034_v28  ;;  %v1059_v60 = vpop.f32.mrf.mxu3  ;;  %v1035_v32 = vpop.f32.mrf.mxu1 }
 0x135   : > { %v1060_v33 = vadd.f32 %v1059_v60, %v1047_v29 }
 0x137   : > { %v1064_v34 = vadd.f32 %v1060_v33, %v558_v31  ;;  %1070 = sbr.rel (%p1479_p13) target bundleno = 324 (0x144), region = 78 }
 0x139   : > { %1066 = vst [vmem:[#allocation2 + $0x8] sm:$0xff] %v1064_v34 }
 0x13a   : > { %v1048_v35 = vpop.f32.mrf.mxu2 }
 0x13b   : > { %v1061_v36 = vpop.f32.mrf.mxu3 }
 0x13c   : > { %v1071_v37 = vld [vmem:[#allocation2] sm:$0xff] }
 0x13d   : > { %v1073_v38 = vld [vmem:[%s539_s12] sm:$0x3] }
 0x13e   : > { %v1075_v40 = vperm.slane %v1073_v38, 0  ;;  %v1076_v41 = vperm.slane %v1073_v38, 1 }
 0x140   : > { %v1072_v39 = vld [vmem:[#allocation2 + $0x8] sm:$0xff]  ;;  %v1079_v42 = vadd.f32 %v1075_v40, %v1071_v37 }
 0x141   : > { %v1080_v43 = vadd.f32 %v1076_v41, %v1072_v39 }
 0x142   : > { %1081 = vst [vmem:[%s1893_s15] sm:$0xff] %v1079_v42 }
 0x143   : > { %1082 = vst [vmem:[%s1893_s15 + $0x8] sm:$0xff] %v1080_v43 }
 0x144 PF: > { %s13_s18 = sadd.s32 1, %s1658_s18   ;;  %s2077_s12 = smov %s1638_s13 }
 0x145   : > { %p10_p0 = scmp.ge.s32.totalorder %s13_s18, 8   ;;  %s2078_s13 = smov %s1732_s25 }
 0x146   : > { %s2079_s14 = smov %s1650_s16  ;;  %s2080_s15 = smov %s1654_s17 }
 0x147   : > { %s2081_s16 = smov %s2084_s19  ;;  %s2082_s17 = smov %s2088_s20 }
 0x148   :  { %12 = sbr.rel (!%p10_p0) target bundleno = 4 (0x4), region = 119 }

// kernel: _lambda_.43
= control target key start
LH: loop header
LB: loop body
LE: loop exit
PB: predicated region body
PF: predicated region fallthrough
CT: control target
= control target key end

     0   :  { %s673_s1 = inlined_call_operand.vmem [shape: bf16[512,128], index: 1, kind: input, shape index: {}]   ;;  %s674_s0 = inlined_call_operand.vmem [shape: bf16[8,512], index: 0, kind: input, shape index: {}]   ;;  %s675_s2 = inlined_call_operand.vmem [shape: f32[1,128], index: 2, kind: input, shape index: {}]   ;;  %s676_s3 = inlined_call_operand.vmem [shape: f32[8,128], index: 3, kind: output, shape index: {}]  }
   0x1   :  { %v515_v0 = vld [vmem:[%s673_s1 + $0x38] sm:$0xff]  ;;  %v514_v4 = vld [vmem:[%s673_s1 + $0x30] sm:$0xff]  ;;  %v513_v8 = vld [vmem:[%s673_s1 + $0x28] sm:$0xff] }
   0x2   :  { %v523_v1 = vld [vmem:[%s673_s1 + $0x78] sm:$0xff]  ;;  %292 = vmatpush.bf16.msra.mxu0 %v515_v0  ;;  %v522_v5 = vld [vmem:[%s673_s1 + $0x70] sm:$0xff]  ;;  %v521_v9 = vld [vmem:[%s673_s1 + $0x68] sm:$0xff] }
   0x3   :  { %v531_v2 = vld [vmem:[%s673_s1 + $0xb8] sm:$0xff]  ;;  %305 = vmatpush.bf16.msra.mxu1 %v523_v1  ;;  %v530_v6 = vld [vmem:[%s673_s1 + $0xb0] sm:$0xff]  ;;  %v529_v10 = vld [vmem:[%s673_s1 + $0xa8] sm:$0xff] }
   0x4   :  { %v539_v3 = vld [vmem:[%s673_s1 + $0xf8] sm:$0xff]  ;;  %318 = vmatpush.bf16.msra.mxu2 %v531_v2  ;;  %v538_v7 = vld [vmem:[%s673_s1 + $0xf0] sm:$0xff]  ;;  %v537_v11 = vld [vmem:[%s673_s1 + $0xe8] sm:$0xff] }
   0x5   :  { %331 = vmatpush.bf16.msra.mxu3 %v539_v3  ;;  %v512_v12 = vld [vmem:[%s673_s1 + $0x20] sm:$0xff]  ;;  %v511_v16 = vld [vmem:[%s673_s1 + $0x18] sm:$0xff]  ;;  %v510_v20 = vld [vmem:[%s673_s1 + $0x10] sm:$0xff] }
   0x6   :  { %293 = vmatpush.bf16.msra.mxu0 %v514_v4  ;;  %v520_v13 = vld [vmem:[%s673_s1 + $0x60] sm:$0xff]  ;;  %v519_v17 = vld [vmem:[%s673_s1 + $0x58] sm:$0xff]  ;;  %v518_v21 = vld [vmem:[%s673_s1 + $0x50] sm:$0xff] }
   0x7   :  { %306 = vmatpush.bf16.msra.mxu1 %v522_v5  ;;  %v528_v14 = vld [vmem:[%s673_s1 + $0xa0] sm:$0xff]  ;;  %v527_v18 = vld [vmem:[%s673_s1 + $0x98] sm:$0xff]  ;;  %v526_v22 = vld [vmem:[%s673_s1 + $0x90] sm:$0xff] }
   0x8   :  { %319 = vmatpush.bf16.msra.mxu2 %v530_v6  ;;  %v536_v15 = vld [vmem:[%s673_s1 + $0xe0] sm:$0xff]  ;;  %v535_v19 = vld [vmem:[%s673_s1 + $0xd8] sm:$0xff]  ;;  %v534_v23 = vld [vmem:[%s673_s1 + $0xd0] sm:$0xff] }
   0x9   :  { %332 = vmatpush.bf16.msra.mxu3 %v538_v7  ;;  %v509_v24 = vld [vmem:[%s673_s1 + $0x8] sm:$0xff]  ;;  %v20_v26 = vld [vmem:[%s674_s0] sm:$0xff] }
   0xa   :  { %294 = vmatpush.bf16.msra.mxu0 %v513_v8  ;;  %v517_v25 = vld [vmem:[%s673_s1 + $0x48] sm:$0xff]  ;;  %v88_v30 = vunpack.c.l.b16 %v20_v26  ;;  %v89_v31 = vunpack.c.h.b16 %v20_v26  ;;  %v508_v32 = vld [vmem:[%s673_s1] sm:$0xff] }
   0xb   :  { %307 = vmatpush.bf16.msra.mxu1 %v521_v9  ;;  %v525_v27 = vld [vmem:[%s673_s1 + $0x88] sm:$0xff]  ;;  %v516_v33 = vld [vmem:[%s673_s1 + $0x40] sm:$0xff] }
   0xc   :  { %320 = vmatpush.bf16.msra.mxu2 %v529_v10  ;;  %v533_v28 = vld [vmem:[%s673_s1 + $0xc8] sm:$0xff]  ;;  %v524_v36 = vld [vmem:[%s673_s1 + $0x80] sm:$0xff]  ;;  %v92_v38 = vpack.c.b16 %v88_v30, %v88_v30  ;;  %v93_v39 = vpack.c.b16 %v89_v31, %v89_v31 }
   0xd   :  { %333 = vmatpush.bf16.msra.mxu3 %v537_v11  ;;  %v21_v29 = vld [vmem:[%s674_s0 + $0x8] sm:$0xff]  ;;  %v532_v37 = vld [vmem:[%s673_s1 + $0xc0] sm:$0xff] }
   0xe   :  { %295 = vmatpush.bf16.msra.mxu0 %v512_v12  ;;  %v90_v34 = vunpack.c.l.b16 %v21_v29  ;;  %v91_v35 = vunpack.c.h.b16 %v21_v29  ;;  %v540_v48 = vld [vmem:[%s675_s2] ss:$0 sm:$0xff] }
   0xf   :  { %308 = vmatpush.bf16.msra.mxu1 %v520_v13 }
  0x10   :  { %321 = vmatpush.bf16.msra.mxu2 %v528_v14  ;;  %v94_v40 = vpack.c.b16 %v90_v34, %v90_v34  ;;  %v95_v41 = vpack.c.b16 %v91_v35, %v91_v35 }
  0x11   :  { %334 = vmatpush.bf16.msra.mxu3 %v536_v15 }
  0x12   :  { %296 = vmatpush.bf16.msra.mxu0 %v511_v16 }
  0x13   :  { %309 = vmatpush.bf16.msra.mxu1 %v519_v17 }
  0x14   :  { %322 = vmatpush.bf16.msra.mxu2 %v527_v18 }
  0x15   :  { %335 = vmatpush.bf16.msra.mxu3 %v535_v19 }
  0x16   :  { %297 = vmatpush.bf16.msra.mxu0 %v510_v20 }
  0x17   :  { %310 = vmatpush.bf16.msra.mxu1 %v518_v21 }
  0x18   :  { %323 = vmatpush.bf16.msra.mxu2 %v526_v22 }
  0x19   :  { %336 = vmatpush.bf16.msra.mxu3 %v534_v23 }
  0x1a   :  { %298 = vmatpush.bf16.msra.mxu0 %v509_v24 }
  0x1b   :  { %311 = vmatpush.bf16.msra.mxu1 %v517_v25 }
  0x1c   :  { %324 = vmatpush.bf16.msra.mxu2 %v525_v27 }
  0x1d   :  { %337 = vmatpush.bf16.msra.mxu3 %v533_v28 }
  0x1e   :  { %299 = vmatpush.bf16.msra.mxu0 %v508_v32 }
  0x1f   :  { %312 = vmatpush.bf16.msra.mxu1 %v516_v33 }
  0x20   :  { %325 = vmatpush.bf16.msra.mxu2 %v524_v36 }
  0x21   :  { %338 = vmatpush.bf16.msra.mxu3 %v532_v37  ;;  %300 = vmatmul.bf16.vlgmr.msra.gmra.mxu0 %v92_v38 }
  0x22   :  { %313 = vmatmul.bf16.vlgmr.msra.gmra.mxu1 %v93_v39 }
  0x23   :  { %326 = vmatmul.bf16.vlgmr.msra.gmra.mxu2 %v94_v40 }
  0x24   :  { %339 = vmatmul.bf16.vlgmr.msra.gmra.mxu3 %v95_v41 }
  0x9e   :  { %v301_v42 = vpop.f32.mrf.mxu0 }
  0x9f   :  { %v314_v43 = vpop.f32.mrf.mxu1 }
  0xa0   :  { %v315_v44 = vadd.f32 %v314_v43, %v301_v42 }
  0xa6   :  { %v327_v45 = vpop.f32.mrf.mxu2  ;;  %v303_v49 = vpop.f32.mrf.mxu0 }
  0xa7   :  { %v340_v46 = vpop.f32.mrf.mxu3  ;;  %v328_v47 = vadd.f32 %v327_v45, %v315_v44  ;;  %v316_v50 = vpop.f32.mrf.mxu1 }
  0xa9   :  { %v341_v51 = vadd.f32 %v340_v46, %v328_v47 }
  0xab   :  { %v354_v52 = vadd.f32 %v540_v48, %v341_v51 }
  0xad   :  { %v507_v53 = vmul.f32 -1.442695, %v354_v52 }
  0xae   :  { %v329_v54 = vpop.f32.mrf.mxu2 }
  0xaf   :  { %v342_v55 = vpop.f32.mrf.mxu3  ;;  %541 = vpow2.f32 %v507_v53 }
  0xb5   :  { %v542_v56 = vpop.eup %541 }
  0xb6   :  { %v358_v57 = vadd.f32 1.0, %v542_v56 }
  0xb8   :  { %543 = vrcp.f32 %v358_v57  ;;  %v370_v61 = vand.u32 2147483648, %v358_v57  ;;  %v368_v63 = vand.u32 2147483647, %v358_v57  ;;  %vm364_vm1 = vweird.f32 %v358_v57 }
  0xba   :  { %v371_v1 = vor.u32 1.1754944e-38, %v370_v61  ;;  %vm369_vm3 = vcmp.eq.f32.partialorder %v368_v63, 8.507059e+37 }
  0xbe   :  { %v544_v58 = vpop.eup %543 }
  0xbf   :  { %v360_v59 = vmul.f32 %v544_v58, %v358_v57  ;;  %vm365_vm0 = vweird.f32 %v544_v58 }
  0xc0   :  { %vm366_vm2 = vmor %vm364_vm1, %vm365_vm0 }
  0xc1   :  { %v361_v60 = vsub.f32 1.0, %v360_v59 }
  0xc3   :  { %v362_v62 = vmul.f32 %v544_v58, %v361_v60 }
  0xc5   :  { %v363_v0 = vadd.f32 %v544_v58, %v362_v62 }
  0xc7   :  { %v367_v2 = vsel %vm366_vm2, %v544_v58, %v363_v0 }
  0xc8   :  { %v372_v3 = vsel %vm369_vm3, %v371_v1, %v367_v2 }
  0xc9   :  { %374 = vst [vmem:[%s676_s3] sm:$0xff] %v372_v3 }

</bundles_post_ra>
